<compile_context>
chip_gen: v5e
topology: v5e:2x2
jax: 0.10.0
libtpu: 0.0.40
codegen_flags: <defaults>
</compile_context>

<pallas_src>
import math

import jax
import jax.numpy as jnp
from jax.experimental import pallas as pl
from jax.experimental.pallas import tpu as pltpu


# ----------------------------------------------------------------------------
# Pallas kernel: fused DoubleConv (conv3x3 -> LeakyReLU -> conv3x3 -> LeakyReLU)
# ----------------------------------------------------------------------------
def _double_conv_kernel(x2_ref, x1_ref, w1_ref, w2t_ref, o_ref,
                        p1_ref, hpad_ref, p2_ref):
    # x2_ref  : (1, H+2, W+2, C2)   zero-padded skip input (first channels of the cat)
    # x1_ref  : (1, H+2, W+2, C1)   zero-padded upsampled input
    # w1_ref  : (9*Cin, Cmid)       conv1 weights, rows ordered (tap, cin), tap-major
    # w2t_ref : (Cout, 9*Cmid)      conv2 weights, cols ordered (tap, cmid), tap-major
    # o_ref   : (1, Cout, H*W)      NCHW output, spatial flattened on the lane dim
    # p1_ref  : VMEM (H*W, 9*Cin)   im2col patch for conv1
    # hpad_ref: VMEM (H+2, W+2, Cmid) zero-padded conv1 activation
    # p2_ref  : VMEM (H*W, 9*Cmid)  im2col patch for conv2
    H = x2_ref.shape[1] - 2
    W = x2_ref.shape[2] - 2
    HW = H * W
    C2 = x2_ref.shape[3]
    C1 = x1_ref.shape[3]
    Cin = C2 + C1
    Cmid = w1_ref.shape[1]
    Cout = w2t_ref.shape[0]

    taps = [(dy, dx) for dy in range(3) for dx in range(3)]

    # ---- conv1: im2col; torch.cat([x2, x1], dim=1) realized by channel offsets --
    for t, (dy, dx) in enumerate(taps):
        c0 = t * Cin
        p1_ref[:, c0:c0 + C2] = x2_ref[0, dy:dy + H, dx:dx + W, :].reshape(HW, C2)
        p1_ref[:, c0 + C2:c0 + Cin] = x1_ref[0, dy:dy + H, dx:dx + W, :].reshape(HW, C1)
    a1 = jnp.dot(p1_ref[...], w1_ref[...], preferred_element_type=jnp.float32)
    a1 = jnp.where(a1 >= 0.0, a1, 0.01 * a1)          # LeakyReLU(0.01), (HW, Cmid) f32

    # ---- zero-pad the intermediate: border only, interior fully overwritten ----
    hpad_ref[0:1, :, :] = jnp.zeros((1, W + 2, Cmid), jnp.float32)
    hpad_ref[H + 1:H + 2, :, :] = jnp.zeros((1, W + 2, Cmid), jnp.float32)
    hpad_ref[:, 0:1, :] = jnp.zeros((H + 2, 1, Cmid), jnp.float32)
    hpad_ref[:, W + 1:W + 2, :] = jnp.zeros((H + 2, 1, Cmid), jnp.float32)
    hpad_ref[1:H + 1, 1:W + 1, :] = a1.reshape(H, W, Cmid)

    # ---- conv2: im2col, computed transposed so the result is (Cout, H*W) -------
    for t, (dy, dx) in enumerate(taps):
        p2_ref[:, t * Cmid:(t + 1) * Cmid] = (
            hpad_ref[dy:dy + H, dx:dx + W, :].reshape(HW, Cmid))
    # (Cout, 9*Cmid) @ (HW, 9*Cmid)^T  ->  (Cout, HW)   (A @ B^T dot_general)
    a2t = jax.lax.dot_general(
        w2t_ref[...], p2_ref[...],
        dimension_numbers=(((1,), (1,)), ((), ())),
        preferred_element_type=jnp.float32)
    a2t = jnp.where(a2t >= 0.0, a2t, 0.01 * a2t)      # LeakyReLU(0.01), lane-dense

    o_ref[...] = a2t.reshape(1, Cout, HW).astype(o_ref.dtype)


def double_conv_pallas(x2p, x1p, w1, w2t):
    """x2p/x1p: (N, H+2, W+2, C*) NHWC zero-padded; w1: (9*Cin, Cmid); w2t: (Cout, 9*Cmid)."""
    N, Hp, Wp, C2 = x2p.shape
    C1 = x1p.shape[3]
    H, W = Hp - 2, Wp - 2
    HW = H * W
    Cin = C2 + C1
    Cmid = w1.shape[1]
    Cout = w2t.shape[0]
    # TODO(synk): for production-size images, tile H with a 1-row halo instead of
    # full-image blocks so the kernel also fits v7x's smaller (64 MiB) VMEM.
    out = pl.pallas_call(
        _double_conv_kernel,
        out_shape=jax.ShapeDtypeStruct((N, Cout, HW), x2p.dtype),
        grid_spec=pltpu.PrefetchScalarGridSpec(
            num_scalar_prefetch=0,
            grid=(N,),
            in_specs=[
                pl.BlockSpec((1, Hp, Wp, C2), lambda n: (n, 0, 0, 0)),
                pl.BlockSpec((1, Hp, Wp, C1), lambda n: (n, 0, 0, 0)),
                pl.BlockSpec((9 * Cin, Cmid), lambda n: (0, 0)),
                pl.BlockSpec((Cout, 9 * Cmid), lambda n: (0, 0)),
            ],
            out_specs=pl.BlockSpec((1, Cout, HW), lambda n: (n, 0, 0)),
            scratch_shapes=[
                pltpu.VMEM((HW, 9 * Cin), x2p.dtype),
                pltpu.VMEM((Hp, Wp, Cmid), jnp.float32),
                pltpu.VMEM((HW, 9 * Cmid), jnp.float32),
            ],
        ),
        compiler_params=pltpu.CompilerParams(
            dimension_semantics=("parallel",)),
    )(x2p, x1p, w1, w2t)
    return out.reshape(N, Cout, H, W)


# ----------------------------------------------------------------------------
# Plain-JAX glue: bilinear upsample (align_corners=True) and BlurPool
# ----------------------------------------------------------------------------
def _interp_matrix(n_in, n_out):
    """(n_out, n_in) bilinear align_corners=True interpolation matrix."""
    if n_in == 1:
        return jnp.ones((n_out, 1), jnp.float32)
    pos = jnp.arange(n_out, dtype=jnp.float32) * (n_in - 1) / (n_out - 1)
    lo = jnp.minimum(jnp.floor(pos).astype(jnp.int32), n_in - 2)
    frac = pos - lo.astype(jnp.float32)
    cols = jnp.arange(n_in, dtype=jnp.int32)[None, :]
    onehot_lo = (lo[:, None] == cols).astype(jnp.float32)
    onehot_hi = ((lo + 1)[:, None] == cols).astype(jnp.float32)
    return onehot_lo * (1.0 - frac)[:, None] + onehot_hi * frac[:, None]


def _upsample_bilinear_align_corners(x, scale):
    """x: (N, H, W, C) -> (N, scale*H, scale*W, C); matches torch Upsample(align_corners=True)."""
    N, H, W, C = x.shape
    Ay = _interp_matrix(H, H * scale)          # (Ho, H)
    Ax = _interp_matrix(W, W * scale)          # (Wo, W)
    x = jnp.einsum("oh,nhwc->nowc", Ay, x)
    x = jnp.einsum("pw,nowc->nopc", Ax, x)
    return x


def _blurpool(x):
    """Antialiased-cnns BlurPool(filt_size=4, stride=2): reflect pad (1,2),
    depthwise 4x4 binomial filter, stride 2 — as one lax.conv."""
    N, H, W, C = x.shape
    xp = jnp.pad(x, ((0, 0), (1, 2), (1, 2), (0, 0)), mode="reflect")
    a = jnp.array([1.0, 3.0, 3.0, 1.0], jnp.float32)
    filt = jnp.outer(a, a)
    filt = filt / jnp.sum(filt)
    w = jnp.broadcast_to(filt[:, :, None, None], (4, 4, 1, C)).astype(x.dtype)
    return jax.lax.conv_general_dilated(
        xp, w, window_strides=(2, 2), padding="VALID",
        dimension_numbers=("NHWC", "HWIO", "NHWC"),
        feature_group_count=C)


# ----------------------------------------------------------------------------
# Up.forward
# ----------------------------------------------------------------------------
@jax.jit
def up_forward(x1, x2, w1, w2t):
    """x1: (N, C1, H1, W1) NCHW, x2: (N, C2, H, W) NCHW -> (N, Cout, H, W) NCHW."""
    N, C2, H, W = x2.shape
    x1 = jnp.transpose(x1, (0, 2, 3, 1))     # NHWC for the upsample / blur path
    x2 = jnp.transpose(x2, (0, 2, 3, 1))

    # self.up = Upsample(scale_factor=4, bilinear, align_corners=True) -> BlurPool(stride=2)
    x1 = _upsample_bilinear_align_corners(x1, 4)
    x1 = _blurpool(x1)

    # F.pad to x2's spatial size, folded together with the +1 conv halo.
    diffY = H - x1.shape[1]
    diffX = W - x1.shape[2]
    x1p = jnp.pad(x1, ((0, 0),
                       (1 + diffY // 2, 1 + diffY - diffY // 2),
                       (1 + diffX // 2, 1 + diffX - diffX // 2),
                       (0, 0)))
    x2p = jnp.pad(x2, ((0, 0), (1, 1), (1, 1), (0, 0)))

    # torch.cat([x2, x1], dim=1) + DoubleConv happen inside the Pallas kernel.
    return double_conv_pallas(x2p, x1p, w1, w2t)


# ----------------------------------------------------------------------------
# Pure-XLA reference (lax.conv with the original torch-layout weights)
# ----------------------------------------------------------------------------
def _reference_up(x1, x2, w1_t, w2_t):
    x1n = jnp.transpose(x1, (0, 2, 3, 1))
    x1n = _blurpool(_upsample_bilinear_align_corners(x1n, 4))
    x1 = jnp.transpose(x1n, (0, 3, 1, 2))
    diffY = x2.shape[2] - x1.shape[2]
    diffX = x2.shape[3] - x1.shape[3]
    x1 = jnp.pad(x1, ((0, 0), (0, 0),
                      (diffY // 2, diffY - diffY // 2),
                      (diffX // 2, diffX - diffX // 2)))
    x = jnp.concatenate([x2, x1], axis=1)
    dn = ("NCHW", "OIHW", "NCHW")
    hi = jax.lax.Precision.HIGHEST
    h = jax.lax.conv_general_dilated(x, w1_t, (1, 1), ((1, 1), (1, 1)),
                                     dimension_numbers=dn, precision=hi)
    h = jnp.where(h >= 0.0, h, 0.01 * h)
    o = jax.lax.conv_general_dilated(h, w2_t, (1, 1), ((1, 1), (1, 1)),
                                     dimension_numbers=dn, precision=hi)
    return jnp.where(o >= 0.0, o, 0.01 * o)


if __name__ == "__main__":
    key = jax.random.PRNGKey(0)
    k1, k2, k3, k4 = jax.random.split(key, 4)

    # Up(in_channels=8, out_channels=8, bilinear=True) -> mid_channels = 4
    in_channels, out_channels = 8, 8
    mid_channels = in_channels // 2
    c_half = in_channels // 2           # channels of x1 and x2 (they cat to in_channels)
    N, H1, W1 = 2, 8, 8

    x1 = jax.random.normal(k1, (N, c_half, H1, W1), jnp.float32)
    x2 = jax.random.normal(k2, (N, c_half, 2 * H1, 2 * W1), jnp.float32)

    # DoubleConv weights, torch layout (out, in, kh, kw), bias=False.
    w1_t = jax.random.normal(k3, (mid_channels, in_channels, 3, 3), jnp.float32)
    w1_t = w1_t * (1.0 / math.sqrt(in_channels * 9))
    w2_t = jax.random.normal(k4, (out_channels, mid_channels, 3, 3), jnp.float32)
    w2_t = w2_t * (1.0 / math.sqrt(mid_channels * 9))

    # Repack for the kernel:
    #   w1  : (kh, kw, cin, cmid)  -> (9*cin, cmid)    (im2col rows, tap-major)
    #   w2t : (cout, kh, kw, cmid) -> (cout, 9*cmid)   (transposed conv2, tap-major cols)
    w1 = jnp.transpose(w1_t, (2, 3, 1, 0)).reshape(9 * in_channels, mid_channels)
    w2t = jnp.transpose(w2_t, (0, 2, 3, 1)).reshape(out_channels, 9 * mid_channels)

    y = up_forward(x1, x2, w1, w2t)
    y = jax.block_until_ready(y)
    assert y.shape == (N, out_channels, 2 * H1, 2 * W1), y.shape
    assert bool(jnp.all(jnp.isfinite(y)))

    # Cross-check against the pure-XLA reference (structural bugs give O(1) errors).
    y_ref = jax.jit(_reference_up)(x1, x2, w1_t, w2_t)
    err = float(jnp.max(jnp.abs(y - y_ref)))
    assert err < 1e-1, f"max abs err vs reference: {err}"

    print("KERNEL_OK")
</pallas_src>

<mosaic_0001>
module attributes {stable_mosaic.version = 11 : i64} {
  func.func @_double_conv_kernel(%arg0: i32, %arg1: memref<1x18x18x4xf32, #tpu.memory_space<vmem>>, %arg2: memref<1x18x18x4xf32, #tpu.memory_space<vmem>>, %arg3: memref<72x4xf32, #tpu.memory_space<vmem>>, %arg4: memref<8x36xf32, #tpu.memory_space<vmem>>, %arg5: memref<1x8x256xf32, #tpu.memory_space<vmem>>, %arg6: memref<256x72xf32, #tpu.memory_space<vmem>>, %arg7: memref<18x18x4xf32, #tpu.memory_space<vmem>>, %arg8: memref<256x36xf32, #tpu.memory_space<vmem>>) attributes {dimension_semantics = [#tpu.dimension_semantics<parallel>], iteration_bounds = array<i64: 2>, scalar_prefetch = 0 : i64, scratch_operands = 3 : i64, tpu.core_type = #tpu.core_type<tc>, window_params = [{transform_indices = @transform_0, window_bounds = array<i64: 1, 18, 18, 4>}, {transform_indices = @transform_1, window_bounds = array<i64: 1, 18, 18, 4>}, {pipeline_mode = #tpu.pipeline_mode<synchronous>, transform_indices = @transform_2, window_bounds = array<i64: 72, 4>}, {pipeline_mode = #tpu.pipeline_mode<synchronous>, transform_indices = @transform_3, window_bounds = array<i64: 8, 36>}, {transform_indices = @transform_4, window_bounds = array<i64: 1, 8, 256>}]} {
    %c0 = arith.constant 0 : index
    %c0_0 = arith.constant 0 : index
    %c0_1 = arith.constant 0 : index
    %c0_2 = arith.constant 0 : index
    %0 = vector.load %arg1[%c0, %c0_0, %c0_1, %c0_2] : memref<1x18x18x4xf32, #tpu.memory_space<vmem>>, vector<1x16x16x4xf32>
    %1 = vector.shape_cast %0 : vector<1x16x16x4xf32> to vector<16x16x4xf32>
    %2 = vector.shape_cast %1 : vector<16x16x4xf32> to vector<256x4xf32>
    %c0_3 = arith.constant 0 : index
    %c0_4 = arith.constant 0 : index
    %3 = vector.load %arg6[%c0_3, %c0_4] : memref<256x72xf32, #tpu.memory_space<vmem>>, vector<256x4xf32>
    tpu.vector_store %arg6[%c0_3, %c0_4], %2 {strides = array<i32>} : memref<256x72xf32, #tpu.memory_space<vmem>>, vector<256x4xf32>,
    %c0_5 = arith.constant 0 : index
    %c0_6 = arith.constant 0 : index
    %c0_7 = arith.constant 0 : index
    %c0_8 = arith.constant 0 : index
    %4 = vector.load %arg2[%c0_5, %c0_6, %c0_7, %c0_8] : memref<1x18x18x4xf32, #tpu.memory_space<vmem>>, vector<1x16x16x4xf32>
    %5 = vector.shape_cast %4 : vector<1x16x16x4xf32> to vector<16x16x4xf32>
    %6 = vector.shape_cast %5 : vector<16x16x4xf32> to vector<256x4xf32>
    %c0_9 = arith.constant 0 : index
    %c4 = arith.constant 4 : index
    %7 = vector.load %arg6[%c0_9, %c4] : memref<256x72xf32, #tpu.memory_space<vmem>>, vector<256x4xf32>
    tpu.vector_store %arg6[%c0_9, %c4], %6 {strides = array<i32>} : memref<256x72xf32, #tpu.memory_space<vmem>>, vector<256x4xf32>,
    %c0_10 = arith.constant 0 : index
    %c0_11 = arith.constant 0 : index
    %c1 = arith.constant 1 : index
    %c0_12 = arith.constant 0 : index
    %8 = vector.load %arg1[%c0_10, %c0_11, %c1, %c0_12] : memref<1x18x18x4xf32, #tpu.memory_space<vmem>>, vector<1x16x16x4xf32>
    %9 = vector.shape_cast %8 : vector<1x16x16x4xf32> to vector<16x16x4xf32>
    %10 = vector.shape_cast %9 : vector<16x16x4xf32> to vector<256x4xf32>
    %c0_13 = arith.constant 0 : index
    %c8 = arith.constant 8 : index
    %11 = vector.load %arg6[%c0_13, %c8] : memref<256x72xf32, #tpu.memory_space<vmem>>, vector<256x4xf32>
    tpu.vector_store %arg6[%c0_13, %c8], %10 {strides = array<i32>} : memref<256x72xf32, #tpu.memory_space<vmem>>, vector<256x4xf32>,
    %c0_14 = arith.constant 0 : index
    %c0_15 = arith.constant 0 : index
    %c1_16 = arith.constant 1 : index
    %c0_17 = arith.constant 0 : index
    %12 = vector.load %arg2[%c0_14, %c0_15, %c1_16, %c0_17] : memref<1x18x18x4xf32, #tpu.memory_space<vmem>>, vector<1x16x16x4xf32>
    %13 = vector.shape_cast %12 : vector<1x16x16x4xf32> to vector<16x16x4xf32>
    %14 = vector.shape_cast %13 : vector<16x16x4xf32> to vector<256x4xf32>
    %c0_18 = arith.constant 0 : index
    %c12 = arith.constant 12 : index
    %15 = vector.load %arg6[%c0_18, %c12] : memref<256x72xf32, #tpu.memory_space<vmem>>, vector<256x4xf32>
    tpu.vector_store %arg6[%c0_18, %c12], %14 {strides = array<i32>} : memref<256x72xf32, #tpu.memory_space<vmem>>, vector<256x4xf32>,
    %c0_19 = arith.constant 0 : index
    %c0_20 = arith.constant 0 : index
    %c2 = arith.constant 2 : index
    %c0_21 = arith.constant 0 : index
    %16 = vector.load %arg1[%c0_19, %c0_20, %c2, %c0_21] : memref<1x18x18x4xf32, #tpu.memory_space<vmem>>, vector<1x16x16x4xf32>
    %17 = vector.shape_cast %16 : vector<1x16x16x4xf32> to vector<16x16x4xf32>
    %18 = vector.shape_cast %17 : vector<16x16x4xf32> to vector<256x4xf32>
    %c0_22 = arith.constant 0 : index
    %c16 = arith.constant 16 : index
    %19 = vector.load %arg6[%c0_22, %c16] : memref<256x72xf32, #tpu.memory_space<vmem>>, vector<256x4xf32>
    tpu.vector_store %arg6[%c0_22, %c16], %18 {strides = array<i32>} : memref<256x72xf32, #tpu.memory_space<vmem>>, vector<256x4xf32>,
    %c0_23 = arith.constant 0 : index
    %c0_24 = arith.constant 0 : index
    %c2_25 = arith.constant 2 : index
    %c0_26 = arith.constant 0 : index
    %20 = vector.load %arg2[%c0_23, %c0_24, %c2_25, %c0_26] : memref<1x18x18x4xf32, #tpu.memory_space<vmem>>, vector<1x16x16x4xf32>
    %21 = vector.shape_cast %20 : vector<1x16x16x4xf32> to vector<16x16x4xf32>
    %22 = vector.shape_cast %21 : vector<16x16x4xf32> to vector<256x4xf32>
    %c0_27 = arith.constant 0 : index
    %c20 = arith.constant 20 : index
    %23 = vector.load %arg6[%c0_27, %c20] : memref<256x72xf32, #tpu.memory_space<vmem>>, vector<256x4xf32>
    tpu.vector_store %arg6[%c0_27, %c20], %22 {strides = array<i32>} : memref<256x72xf32, #tpu.memory_space<vmem>>, vector<256x4xf32>,
    %c0_28 = arith.constant 0 : index
    %c1_29 = arith.constant 1 : index
    %c0_30 = arith.constant 0 : index
    %c0_31 = arith.constant 0 : index
    %24 = vector.load %arg1[%c0_28, %c1_29, %c0_30, %c0_31] : memref<1x18x18x4xf32, #tpu.memory_space<vmem>>, vector<1x16x16x4xf32>
    %25 = vector.shape_cast %24 : vector<1x16x16x4xf32> to vector<16x16x4xf32>
    %26 = vector.shape_cast %25 : vector<16x16x4xf32> to vector<256x4xf32>
    %c0_32 = arith.constant 0 : index
    %c24 = arith.constant 24 : index
    %27 = vector.load %arg6[%c0_32, %c24] : memref<256x72xf32, #tpu.memory_space<vmem>>, vector<256x4xf32>
    tpu.vector_store %arg6[%c0_32, %c24], %26 {strides = array<i32>} : memref<256x72xf32, #tpu.memory_space<vmem>>, vector<256x4xf32>,
    %c0_33 = arith.constant 0 : index
    %c1_34 = arith.constant 1 : index
    %c0_35 = arith.constant 0 : index
    %c0_36 = arith.constant 0 : index
    %28 = vector.load %arg2[%c0_33, %c1_34, %c0_35, %c0_36] : memref<1x18x18x4xf32, #tpu.memory_space<vmem>>, vector<1x16x16x4xf32>
    %29 = vector.shape_cast %28 : vector<1x16x16x4xf32> to vector<16x16x4xf32>
    %30 = vector.shape_cast %29 : vector<16x16x4xf32> to vector<256x4xf32>
    %c0_37 = arith.constant 0 : index
    %c28 = arith.constant 28 : index
    %31 = vector.load %arg6[%c0_37, %c28] : memref<256x72xf32, #tpu.memory_space<vmem>>, vector<256x4xf32>
    tpu.vector_store %arg6[%c0_37, %c28], %30 {strides = array<i32>} : memref<256x72xf32, #tpu.memory_space<vmem>>, vector<256x4xf32>,
    %c0_38 = arith.constant 0 : index
    %c1_39 = arith.constant 1 : index
    %c1_40 = arith.constant 1 : index
    %c0_41 = arith.constant 0 : index
    %32 = vector.load %arg1[%c0_38, %c1_39, %c1_40, %c0_41] : memref<1x18x18x4xf32, #tpu.memory_space<vmem>>, vector<1x16x16x4xf32>
    %33 = vector.shape_cast %32 : vector<1x16x16x4xf32> to vector<16x16x4xf32>
    %34 = vector.shape_cast %33 : vector<16x16x4xf32> to vector<256x4xf32>
    %c0_42 = arith.constant 0 : index
    %c32 = arith.constant 32 : index
    %35 = vector.load %arg6[%c0_42, %c32] : memref<256x72xf32, #tpu.memory_space<vmem>>, vector<256x4xf32>
    tpu.vector_store %arg6[%c0_42, %c32], %34 {strides = array<i32>} : memref<256x72xf32, #tpu.memory_space<vmem>>, vector<256x4xf32>,
    %c0_43 = arith.constant 0 : index
    %c1_44 = arith.constant 1 : index
    %c1_45 = arith.constant 1 : index
    %c0_46 = arith.constant 0 : index
    %36 = vector.load %arg2[%c0_43, %c1_44, %c1_45, %c0_46] : memref<1x18x18x4xf32, #tpu.memory_space<vmem>>, vector<1x16x16x4xf32>
    %37 = vector.shape_cast %36 : vector<1x16x16x4xf32> to vector<16x16x4xf32>
    %38 = vector.shape_cast %37 : vector<16x16x4xf32> to vector<256x4xf32>
    %c0_47 = arith.constant 0 : index
    %c36 = arith.constant 36 : index
    %39 = vector.load %arg6[%c0_47, %c36] : memref<256x72xf32, #tpu.memory_space<vmem>>, vector<256x4xf32>
    tpu.vector_store %arg6[%c0_47, %c36], %38 {strides = array<i32>} : memref<256x72xf32, #tpu.memory_space<vmem>>, vector<256x4xf32>,
    %c0_48 = arith.constant 0 : index
    %c1_49 = arith.constant 1 : index
    %c2_50 = arith.constant 2 : index
    %c0_51 = arith.constant 0 : index
    %40 = vector.load %arg1[%c0_48, %c1_49, %c2_50, %c0_51] : memref<1x18x18x4xf32, #tpu.memory_space<vmem>>, vector<1x16x16x4xf32>
    %41 = vector.shape_cast %40 : vector<1x16x16x4xf32> to vector<16x16x4xf32>
    %42 = vector.shape_cast %41 : vector<16x16x4xf32> to vector<256x4xf32>
    %c0_52 = arith.constant 0 : index
    %c40 = arith.constant 40 : index
    %43 = vector.load %arg6[%c0_52, %c40] : memref<256x72xf32, #tpu.memory_space<vmem>>, vector<256x4xf32>
    tpu.vector_store %arg6[%c0_52, %c40], %42 {strides = array<i32>} : memref<256x72xf32, #tpu.memory_space<vmem>>, vector<256x4xf32>,
    %c0_53 = arith.constant 0 : index
    %c1_54 = arith.constant 1 : index
    %c2_55 = arith.constant 2 : index
    %c0_56 = arith.constant 0 : index
    %44 = vector.load %arg2[%c0_53, %c1_54, %c2_55, %c0_56] : memref<1x18x18x4xf32, #tpu.memory_space<vmem>>, vector<1x16x16x4xf32>
    %45 = vector.shape_cast %44 : vector<1x16x16x4xf32> to vector<16x16x4xf32>
    %46 = vector.shape_cast %45 : vector<16x16x4xf32> to vector<256x4xf32>
    %c0_57 = arith.constant 0 : index
    %c44 = arith.constant 44 : index
    %47 = vector.load %arg6[%c0_57, %c44] : memref<256x72xf32, #tpu.memory_space<vmem>>, vector<256x4xf32>
    tpu.vector_store %arg6[%c0_57, %c44], %46 {strides = array<i32>} : memref<256x72xf32, #tpu.memory_space<vmem>>, vector<256x4xf32>,
    %c0_58 = arith.constant 0 : index
    %c2_59 = arith.constant 2 : index
    %c0_60 = arith.constant 0 : index
    %c0_61 = arith.constant 0 : index
    %48 = vector.load %arg1[%c0_58, %c2_59, %c0_60, %c0_61] : memref<1x18x18x4xf32, #tpu.memory_space<vmem>>, vector<1x16x16x4xf32>
    %49 = vector.shape_cast %48 : vector<1x16x16x4xf32> to vector<16x16x4xf32>
    %50 = vector.shape_cast %49 : vector<16x16x4xf32> to vector<256x4xf32>
    %c0_62 = arith.constant 0 : index
    %c48 = arith.constant 48 : index
    %51 = vector.load %arg6[%c0_62, %c48] : memref<256x72xf32, #tpu.memory_space<vmem>>, vector<256x4xf32>
    tpu.vector_store %arg6[%c0_62, %c48], %50 {strides = array<i32>} : memref<256x72xf32, #tpu.memory_space<vmem>>, vector<256x4xf32>,
    %c0_63 = arith.constant 0 : index
    %c2_64 = arith.constant 2 : index
    %c0_65 = arith.constant 0 : index
    %c0_66 = arith.constant 0 : index
    %52 = vector.load %arg2[%c0_63, %c2_64, %c0_65, %c0_66] : memref<1x18x18x4xf32, #tpu.memory_space<vmem>>, vector<1x16x16x4xf32>
    %53 = vector.shape_cast %52 : vector<1x16x16x4xf32> to vector<16x16x4xf32>
    %54 = vector.shape_cast %53 : vector<16x16x4xf32> to vector<256x4xf32>
    %c0_67 = arith.constant 0 : index
    %c52 = arith.constant 52 : index
    %55 = vector.load %arg6[%c0_67, %c52] : memref<256x72xf32, #tpu.memory_space<vmem>>, vector<256x4xf32>
    tpu.vector_store %arg6[%c0_67, %c52], %54 {strides = array<i32>} : memref<256x72xf32, #tpu.memory_space<vmem>>, vector<256x4xf32>,
    %c0_68 = arith.constant 0 : index
    %c2_69 = arith.constant 2 : index
    %c1_70 = arith.constant 1 : index
    %c0_71 = arith.constant 0 : index
    %56 = vector.load %arg1[%c0_68, %c2_69, %c1_70, %c0_71] : memref<1x18x18x4xf32, #tpu.memory_space<vmem>>, vector<1x16x16x4xf32>
    %57 = vector.shape_cast %56 : vector<1x16x16x4xf32> to vector<16x16x4xf32>
    %58 = vector.shape_cast %57 : vector<16x16x4xf32> to vector<256x4xf32>
    %c0_72 = arith.constant 0 : index
    %c56 = arith.constant 56 : index
    %59 = vector.load %arg6[%c0_72, %c56] : memref<256x72xf32, #tpu.memory_space<vmem>>, vector<256x4xf32>
    tpu.vector_store %arg6[%c0_72, %c56], %58 {strides = array<i32>} : memref<256x72xf32, #tpu.memory_space<vmem>>, vector<256x4xf32>,
    %c0_73 = arith.constant 0 : index
    %c2_74 = arith.constant 2 : index
    %c1_75 = arith.constant 1 : index
    %c0_76 = arith.constant 0 : index
    %60 = vector.load %arg2[%c0_73, %c2_74, %c1_75, %c0_76] : memref<1x18x18x4xf32, #tpu.memory_space<vmem>>, vector<1x16x16x4xf32>
    %61 = vector.shape_cast %60 : vector<1x16x16x4xf32> to vector<16x16x4xf32>
    %62 = vector.shape_cast %61 : vector<16x16x4xf32> to vector<256x4xf32>
    %c0_77 = arith.constant 0 : index
    %c60 = arith.constant 60 : index
    %63 = vector.load %arg6[%c0_77, %c60] : memref<256x72xf32, #tpu.memory_space<vmem>>, vector<256x4xf32>
    tpu.vector_store %arg6[%c0_77, %c60], %62 {strides = array<i32>} : memref<256x72xf32, #tpu.memory_space<vmem>>, vector<256x4xf32>,
    %c0_78 = arith.constant 0 : index
    %c2_79 = arith.constant 2 : index
    %c2_80 = arith.constant 2 : index
    %c0_81 = arith.constant 0 : index
    %64 = vector.load %arg1[%c0_78, %c2_79, %c2_80, %c0_81] : memref<1x18x18x4xf32, #tpu.memory_space<vmem>>, vector<1x16x16x4xf32>
    %65 = vector.shape_cast %64 : vector<1x16x16x4xf32> to vector<16x16x4xf32>
    %66 = vector.shape_cast %65 : vector<16x16x4xf32> to vector<256x4xf32>
    %c0_82 = arith.constant 0 : index
    %c64 = arith.constant 64 : index
    %67 = vector.load %arg6[%c0_82, %c64] : memref<256x72xf32, #tpu.memory_space<vmem>>, vector<256x4xf32>
    tpu.vector_store %arg6[%c0_82, %c64], %66 {strides = array<i32>} : memref<256x72xf32, #tpu.memory_space<vmem>>, vector<256x4xf32>,
    %c0_83 = arith.constant 0 : index
    %c2_84 = arith.constant 2 : index
    %c2_85 = arith.constant 2 : index
    %c0_86 = arith.constant 0 : index
    %68 = vector.load %arg2[%c0_83, %c2_84, %c2_85, %c0_86] : memref<1x18x18x4xf32, #tpu.memory_space<vmem>>, vector<1x16x16x4xf32>
    %69 = vector.shape_cast %68 : vector<1x16x16x4xf32> to vector<16x16x4xf32>
    %70 = vector.shape_cast %69 : vector<16x16x4xf32> to vector<256x4xf32>
    %c0_87 = arith.constant 0 : index
    %c68 = arith.constant 68 : index
    %71 = vector.load %arg6[%c0_87, %c68] : memref<256x72xf32, #tpu.memory_space<vmem>>, vector<256x4xf32>
    tpu.vector_store %arg6[%c0_87, %c68], %70 {strides = array<i32>} : memref<256x72xf32, #tpu.memory_space<vmem>>, vector<256x4xf32>,
    %c0_88 = arith.constant 0 : index
    %c0_89 = arith.constant 0 : index
    %72 = vector.load %arg6[%c0_88, %c0_89] : memref<256x72xf32, #tpu.memory_space<vmem>>, vector<256x72xf32>
    %c0_90 = arith.constant 0 : index
    %c0_91 = arith.constant 0 : index
    %73 = vector.load %arg3[%c0_90, %c0_91] : memref<72x4xf32, #tpu.memory_space<vmem>>, vector<72x4xf32>
    %cst = arith.constant dense<0.000000e+00> : vector<256x4xf32>
    %74 = tpu.matmul %72, %73, %cst {dimension_numbers = #tpu.dot_dimension_numbers<[1], [0], [0], [1], [0, 0, 1, 1], [], []>} : vector<256x72xf32>, vector<72x4xf32>, vector<256x4xf32> -> vector<256x4xf32>
    %cst_92 = arith.constant 0.000000e+00 : f32
    %75 = vector.broadcast %cst_92 : f32 to vector<256x4xf32>
    %76 = arith.cmpf oge, %74, %75 : vector<256x4xf32>
    %cst_93 = arith.constant 0.00999999977 : f32
    %77 = vector.broadcast %cst_93 : f32 to vector<256x4xf32>
    %78 = arith.mulf %77, %74 : vector<256x4xf32>
    %79 = arith.select %76, %74, %78 : vector<256x4xi1>, vector<256x4xf32>
    %cst_94 = arith.constant 0.000000e+00 : f32
    %80 = vector.broadcast %cst_94 : f32 to vector<1x18x4xf32>
    %c0_95 = arith.constant 0 : index
    %c0_96 = arith.constant 0 : index
    %c0_97 = arith.constant 0 : index
    %81 = vector.load %arg7[%c0_95, %c0_96, %c0_97] : memref<18x18x4xf32, #tpu.memory_space<vmem>>, vector<1x18x4xf32>
    tpu.vector_store %arg7[%c0_95, %c0_96, %c0_97], %80 {strides = array<i32>} : memref<18x18x4xf32, #tpu.memory_space<vmem>>, vector<1x18x4xf32>,
    %cst_98 = arith.constant 0.000000e+00 : f32
    %82 = vector.broadcast %cst_98 : f32 to vector<1x18x4xf32>
    %c17 = arith.constant 17 : index
    %c0_99 = arith.constant 0 : index
    %c0_100 = arith.constant 0 : index
    %83 = vector.load %arg7[%c17, %c0_99, %c0_100] : memref<18x18x4xf32, #tpu.memory_space<vmem>>, vector<1x18x4xf32>
    tpu.vector_store %arg7[%c17, %c0_99, %c0_100], %82 {strides = array<i32>} : memref<18x18x4xf32, #tpu.memory_space<vmem>>, vector<1x18x4xf32>,
    %cst_101 = arith.constant 0.000000e+00 : f32
    %84 = vector.broadcast %cst_101 : f32 to vector<18x1x4xf32>
    %c0_102 = arith.constant 0 : index
    %c0_103 = arith.constant 0 : index
    %c0_104 = arith.constant 0 : index
    %85 = vector.load %arg7[%c0_102, %c0_103, %c0_104] : memref<18x18x4xf32, #tpu.memory_space<vmem>>, vector<18x1x4xf32>
    tpu.vector_store %arg7[%c0_102, %c0_103, %c0_104], %84 {strides = array<i32>} : memref<18x18x4xf32, #tpu.memory_space<vmem>>, vector<18x1x4xf32>,
    %cst_105 = arith.constant 0.000000e+00 : f32
    %86 = vector.broadcast %cst_105 : f32 to vector<18x1x4xf32>
    %c0_106 = arith.constant 0 : index
    %c17_107 = arith.constant 17 : index
    %c0_108 = arith.constant 0 : index
    %87 = vector.load %arg7[%c0_106, %c17_107, %c0_108] : memref<18x18x4xf32, #tpu.memory_space<vmem>>, vector<18x1x4xf32>
    tpu.vector_store %arg7[%c0_106, %c17_107, %c0_108], %86 {strides = array<i32>} : memref<18x18x4xf32, #tpu.memory_space<vmem>>, vector<18x1x4xf32>,
    %88 = vector.shape_cast %79 : vector<256x4xf32> to vector<16x16x4xf32>
    %c1_109 = arith.constant 1 : index
    %c1_110 = arith.constant 1 : index
    %c0_111 = arith.constant 0 : index
    %89 = vector.load %arg7[%c1_109, %c1_110, %c0_111] : memref<18x18x4xf32, #tpu.memory_space<vmem>>, vector<16x16x4xf32>
    tpu.vector_store %arg7[%c1_109, %c1_110, %c0_111], %88 {strides = array<i32>} : memref<18x18x4xf32, #tpu.memory_space<vmem>>, vector<16x16x4xf32>,
    %c0_112 = arith.constant 0 : index
    %c0_113 = arith.constant 0 : index
    %c0_114 = arith.constant 0 : index
    %90 = vector.load %arg7[%c0_112, %c0_113, %c0_114] : memref<18x18x4xf32, #tpu.memory_space<vmem>>, vector<16x16x4xf32>
    %91 = vector.shape_cast %90 : vector<16x16x4xf32> to vector<256x4xf32>
    %c0_115 = arith.constant 0 : index
    %c0_116 = arith.constant 0 : index
    %92 = vector.load %arg8[%c0_115, %c0_116] : memref<256x36xf32, #tpu.memory_space<vmem>>, vector<256x4xf32>
    tpu.vector_store %arg8[%c0_115, %c0_116], %91 {strides = array<i32>} : memref<256x36xf32, #tpu.memory_space<vmem>>, vector<256x4xf32>,
    %c0_117 = arith.constant 0 : index
    %c1_118 = arith.constant 1 : index
    %c0_119 = arith.constant 0 : index
    %93 = vector.load %arg7[%c0_117, %c1_118, %c0_119] : memref<18x18x4xf32, #tpu.memory_space<vmem>>, vector<16x16x4xf32>
    %94 = vector.shape_cast %93 : vector<16x16x4xf32> to vector<256x4xf32>
    %c0_120 = arith.constant 0 : index
    %c4_121 = arith.constant 4 : index
    %95 = vector.load %arg8[%c0_120, %c4_121] : memref<256x36xf32, #tpu.memory_space<vmem>>, vector<256x4xf32>
    tpu.vector_store %arg8[%c0_120, %c4_121], %94 {strides = array<i32>} : memref<256x36xf32, #tpu.memory_space<vmem>>, vector<256x4xf32>,
    %c0_122 = arith.constant 0 : index
    %c2_123 = arith.constant 2 : index
    %c0_124 = arith.constant 0 : index
    %96 = vector.load %arg7[%c0_122, %c2_123, %c0_124] : memref<18x18x4xf32, #tpu.memory_space<vmem>>, vector<16x16x4xf32>
    %97 = vector.shape_cast %96 : vector<16x16x4xf32> to vector<256x4xf32>
    %c0_125 = arith.constant 0 : index
    %c8_126 = arith.constant 8 : index
    %98 = vector.load %arg8[%c0_125, %c8_126] : memref<256x36xf32, #tpu.memory_space<vmem>>, vector<256x4xf32>
    tpu.vector_store %arg8[%c0_125, %c8_126], %97 {strides = array<i32>} : memref<256x36xf32, #tpu.memory_space<vmem>>, vector<256x4xf32>,
    %c1_127 = arith.constant 1 : index
    %c0_128 = arith.constant 0 : index
    %c0_129 = arith.constant 0 : index
    %99 = vector.load %arg7[%c1_127, %c0_128, %c0_129] : memref<18x18x4xf32, #tpu.memory_space<vmem>>, vector<16x16x4xf32>
    %100 = vector.shape_cast %99 : vector<16x16x4xf32> to vector<256x4xf32>
    %c0_130 = arith.constant 0 : index
    %c12_131 = arith.constant 12 : index
    %101 = vector.load %arg8[%c0_130, %c12_131] : memref<256x36xf32, #tpu.memory_space<vmem>>, vector<256x4xf32>
    tpu.vector_store %arg8[%c0_130, %c12_131], %100 {strides = array<i32>} : memref<256x36xf32, #tpu.memory_space<vmem>>, vector<256x4xf32>,
    %c1_132 = arith.constant 1 : index
    %c1_133 = arith.constant 1 : index
    %c0_134 = arith.constant 0 : index
    %102 = vector.load %arg7[%c1_132, %c1_133, %c0_134] : memref<18x18x4xf32, #tpu.memory_space<vmem>>, vector<16x16x4xf32>
    %103 = vector.shape_cast %102 : vector<16x16x4xf32> to vector<256x4xf32>
    %c0_135 = arith.constant 0 : index
    %c16_136 = arith.constant 16 : index
    %104 = vector.load %arg8[%c0_135, %c16_136] : memref<256x36xf32, #tpu.memory_space<vmem>>, vector<256x4xf32>
    tpu.vector_store %arg8[%c0_135, %c16_136], %103 {strides = array<i32>} : memref<256x36xf32, #tpu.memory_space<vmem>>, vector<256x4xf32>,
    %c1_137 = arith.constant 1 : index
    %c2_138 = arith.constant 2 : index
    %c0_139 = arith.constant 0 : index
    %105 = vector.load %arg7[%c1_137, %c2_138, %c0_139] : memref<18x18x4xf32, #tpu.memory_space<vmem>>, vector<16x16x4xf32>
    %106 = vector.shape_cast %105 : vector<16x16x4xf32> to vector<256x4xf32>
    %c0_140 = arith.constant 0 : index
    %c20_141 = arith.constant 20 : index
    %107 = vector.load %arg8[%c0_140, %c20_141] : memref<256x36xf32, #tpu.memory_space<vmem>>, vector<256x4xf32>
    tpu.vector_store %arg8[%c0_140, %c20_141], %106 {strides = array<i32>} : memref<256x36xf32, #tpu.memory_space<vmem>>, vector<256x4xf32>,
    %c2_142 = arith.constant 2 : index
    %c0_143 = arith.constant 0 : index
    %c0_144 = arith.constant 0 : index
    %108 = vector.load %arg7[%c2_142, %c0_143, %c0_144] : memref<18x18x4xf32, #tpu.memory_space<vmem>>, vector<16x16x4xf32>
    %109 = vector.shape_cast %108 : vector<16x16x4xf32> to vector<256x4xf32>
    %c0_145 = arith.constant 0 : index
    %c24_146 = arith.constant 24 : index
    %110 = vector.load %arg8[%c0_145, %c24_146] : memref<256x36xf32, #tpu.memory_space<vmem>>, vector<256x4xf32>
    tpu.vector_store %arg8[%c0_145, %c24_146], %109 {strides = array<i32>} : memref<256x36xf32, #tpu.memory_space<vmem>>, vector<256x4xf32>,
    %c2_147 = arith.constant 2 : index
    %c1_148 = arith.constant 1 : index
    %c0_149 = arith.constant 0 : index
    %111 = vector.load %arg7[%c2_147, %c1_148, %c0_149] : memref<18x18x4xf32, #tpu.memory_space<vmem>>, vector<16x16x4xf32>
    %112 = vector.shape_cast %111 : vector<16x16x4xf32> to vector<256x4xf32>
    %c0_150 = arith.constant 0 : index
    %c28_151 = arith.constant 28 : index
    %113 = vector.load %arg8[%c0_150, %c28_151] : memref<256x36xf32, #tpu.memory_space<vmem>>, vector<256x4xf32>
    tpu.vector_store %arg8[%c0_150, %c28_151], %112 {strides = array<i32>} : memref<256x36xf32, #tpu.memory_space<vmem>>, vector<256x4xf32>,
    %c2_152 = arith.constant 2 : index
    %c2_153 = arith.constant 2 : index
    %c0_154 = arith.constant 0 : index
    %114 = vector.load %arg7[%c2_152, %c2_153, %c0_154] : memref<18x18x4xf32, #tpu.memory_space<vmem>>, vector<16x16x4xf32>
    %115 = vector.shape_cast %114 : vector<16x16x4xf32> to vector<256x4xf32>
    %c0_155 = arith.constant 0 : index
    %c32_156 = arith.constant 32 : index
    %116 = vector.load %arg8[%c0_155, %c32_156] : memref<256x36xf32, #tpu.memory_space<vmem>>, vector<256x4xf32>
    tpu.vector_store %arg8[%c0_155, %c32_156], %115 {strides = array<i32>} : memref<256x36xf32, #tpu.memory_space<vmem>>, vector<256x4xf32>,
    %c0_157 = arith.constant 0 : index
    %c0_158 = arith.constant 0 : index
    %117 = vector.load %arg4[%c0_157, %c0_158] : memref<8x36xf32, #tpu.memory_space<vmem>>, vector<8x36xf32>
    %c0_159 = arith.constant 0 : index
    %c0_160 = arith.constant 0 : index
    %118 = vector.load %arg8[%c0_159, %c0_160] : memref<256x36xf32, #tpu.memory_space<vmem>>, vector<256x36xf32>
    %cst_161 = arith.constant dense<0.000000e+00> : vector<8x256xf32>
    %119 = tpu.matmul %117, %118, %cst_161 {dimension_numbers = #tpu.dot_dimension_numbers<[1], [1], [0], [0], [0, 0, 1, 0], [], []>} : vector<8x36xf32>, vector<256x36xf32>, vector<8x256xf32> -> vector<8x256xf32>
    %cst_162 = arith.constant 0.000000e+00 : f32
    %120 = vector.broadcast %cst_162 : f32 to vector<8x256xf32>
    %121 = arith.cmpf oge, %119, %120 : vector<8x256xf32>
    %cst_163 = arith.constant 0.00999999977 : f32
    %122 = vector.broadcast %cst_163 : f32 to vector<8x256xf32>
    %123 = arith.mulf %122, %119 : vector<8x256xf32>
    %124 = arith.select %121, %119, %123 : vector<8x256xi1>, vector<8x256xf32>
    %125 = vector.shape_cast %124 : vector<8x256xf32> to vector<1x8x256xf32>
    %c0_164 = arith.constant 0 : index
    %c0_165 = arith.constant 0 : index
    %c0_166 = arith.constant 0 : index
    %126 = vector.load %arg5[%c0_164, %c0_165, %c0_166] : memref<1x8x256xf32, #tpu.memory_space<vmem>>, vector<1x8x256xf32>
    tpu.vector_store %arg5[%c0_164, %c0_165, %c0_166], %125 {strides = array<i32>} : memref<1x8x256xf32, #tpu.memory_space<vmem>>, vector<1x8x256xf32>,
    return
  }
  func.func @transform_0(%arg0: i32) -> (i32, i32, i32, i32) {
    %c0_i32 = arith.constant 0 : i32
    %c0_i32_0 = arith.constant 0 : i32
    %c0_i32_1 = arith.constant 0 : i32
    %c0_i32_2 = arith.constant 0 : i32
    return %arg0, %c0_i32, %c0_i32_0, %c0_i32_1 : i32, i32, i32, i32
  }
  func.func @transform_1(%arg0: i32) -> (i32, i32, i32, i32) {
    %c0_i32 = arith.constant 0 : i32
    %c0_i32_0 = arith.constant 0 : i32
    %c0_i32_1 = arith.constant 0 : i32
    %c0_i32_2 = arith.constant 0 : i32
    return %arg0, %c0_i32, %c0_i32_0, %c0_i32_1 : i32, i32, i32, i32
  }
  func.func @transform_2(%arg0: i32) -> (i32, i32) {
    %c0_i32 = arith.constant 0 : i32
    %c0_i32_0 = arith.constant 0 : i32
    %c0_i32_1 = arith.constant 0 : i32
    return %c0_i32, %c0_i32_0 : i32, i32
  }
  func.func @transform_3(%arg0: i32) -> (i32, i32) {
    %c0_i32 = arith.constant 0 : i32
    %c0_i32_0 = arith.constant 0 : i32
    %c0_i32_1 = arith.constant 0 : i32
    return %c0_i32, %c0_i32_0 : i32, i32
  }
  func.func @transform_4(%arg0: i32) -> (i32, i32, i32) {
    %c0_i32 = arith.constant 0 : i32
    %c0_i32_0 = arith.constant 0 : i32
    %c0_i32_1 = arith.constant 0 : i32
    return %arg0, %c0_i32, %c0_i32_0 : i32, i32, i32
  }
}

</mosaic_0001>

<bundles_post_ra>
// kernel: up_forward.1
= control target key start
LH: loop header
LB: loop body
LE: loop exit
PB: predicated region body
PF: predicated region fallthrough
CT: control target
= control target key end

     0   :  { %s6400_s15 = smov 0   ;;  %s9288_s0 = inlined_call_operand.vmem [shape: f32[2,18,18,4], index: 0, kind: input, shape index: {}]   ;;  %s9289_s1 = inlined_call_operand.vmem [shape: f32[2,18,18,4], index: 1, kind: input, shape index: {}]   ;;  %s9290_s2 = inlined_call_operand.vmem [shape: f32[72,4], index: 2, kind: input, shape index: {}]   ;;  %s9291_s3 = inlined_call_operand.vmem [shape: f32[8,36], index: 3, kind: input, shape index: {}]   ;;  %s9292_s4 = inlined_call_operand.vmem [shape: f32[2,8,256], index: 4, kind: output, shape index: {}]  }
   0x1 LB: > { %s5842_s16 = sadd.s32 4294967295, %s6355_s15   ;;  %p5846_p0 = scmp.ge.s32.totalorder %s6355_s15, 1  ;;  %s6355_s15 = sphi %s6400_s15, %s14_s15  }
   0x2   : > { %p172_p1 = scmp.lt.s32.totalorder %s6355_s15, 3 }
   0x4   : > { %p173_p2 = pnand %p5846_p0, %p172_p1 }
   0x6   : > { %176 = sbr.rel (%p173_p2) target bundleno = 2622 (0xa3e), region = 36 }
   0xb   : > { %p203_p3 = scmp.lt.s32.totalorder %s5842_s16, 1  ;;  %s6357_s21 = smov 4   ;;  %vm250_vm0 = vcmask 31744   ;;  %vm443_vm1 = vcmask 64544   ;;  %vm636_vm2 = vcmask 97344   ;;  %vm829_vm3 = vcmask 130144  }
   0xc   : > { %s6358_s25 = smov 8   ;;  %s6359_s26 = smov 12   ;;  %vm1022_vm4 = vcmask 162944   ;;  %vm1215_vm5 = vcmask 195744   ;;  %vm1409_vm6 = vcmask 228544   ;;  %vm1603_vm7 = vcmask 261344  }
   0xd   : > { %s9363_s16 = smov (!%p203_p3, %s5842_s16), 1  ;;  %s6360_s27 = smov 16   ;;  %vm1796_vm8 = vcmask 294144   ;;  %vm1989_vm9 = vcmask 326944   ;;  %vm2182_vm10 = vcmask 359744   ;;  %vm2375_vm11 = vcmask 392544  }
   0xe   : > { %s6322_s17 = smul.u32 432, %s9363_s16  ;;  %s6361_s28 = smov 20   ;;  %vm2569_vm12 = vcmask 425344   ;;  %vm2763_vm13 = vcmask 458144   ;;  %vm2956_vm14 = vcmask 490944   ;;  %vm3149_vm15 = vcmask 523744  }
   0xf   : > { %s6362_s29 = smov 24   ;;  %s6363_s30 = smov 28  }
  0x10   : > { %s6416_s20 = scalar_lea.vmem %s9289_s1, %s6322_s17  ;;  %s6479_s24 = scalar_lea.vmem %s9288_s0, %s6322_s17 }
  0x11   : > { %v283_v0 = vld [vmem:[%s6416_s20] sm:$0xff]  ;;  %v285_v1 = vld [vmem:[%s6416_s20 + $0x18] sm:$0xff]  ;;  %v287_v2 = vld [vmem:[%s6416_s20 + $0x30] sm:$0xff]  ;;  %s6364_s5 = smov 32   ;;  %s6365_s6 = smov 36  }
  0x12   : > { %347 = vrot.lane.b32.xlu0 %v283_v0, %s6357_s21  ;;  %351 = vrot.lane.b32.xlu1 %v285_v1, %s6357_s21  ;;  %v284_v3 = vld [vmem:[%s6416_s20 + $0x8] sm:$0xff]  ;;  %v286_v4 = vld [vmem:[%s6416_s20 + $0x20] sm:$0xff]  ;;  %s6366_s7 = smov 40   ;;  %s6367_s8 = smov 44  }
  0x13   : > { %355 = vrot.lane.b32.xlu2 %v287_v2, %s6357_s21  ;;  %v288_v5 = vld [vmem:[%s6416_s20 + $0x38] sm:$0xff]  ;;  %v289_v6 = vld [vmem:[%s6416_s20 + $0x48] sm:$0xff]  ;;  %v290_v7 = vld [vmem:[%s6416_s20 + $0x50] sm:$0xff]  ;;  %s6368_s9 = smov 48   ;;  %s6369_s10 = smov 52  }
  0x14   : > { %v291_v8 = vld [vmem:[%s6416_s20 + $0x60] sm:$0xff]  ;;  %v292_v9 = vld [vmem:[%s6416_s20 + $0x68] sm:$0xff]  ;;  %v293_v10 = vld [vmem:[%s6416_s20 + $0x78] sm:$0xff]  ;;  %s6370_s11 = smov 56   ;;  %s6371_s12 = smov 60  }
  0x15   : > { %v294_v11 = vld [vmem:[%s6416_s20 + $0x80] sm:$0xff]  ;;  %v295_v12 = vld [vmem:[%s6416_s20 + $0x90] sm:$0xff]  ;;  %v296_v13 = vld [vmem:[%s6416_s20 + $0x98] sm:$0xff]  ;;  %s6372_s13 = smov 64   ;;  %s6373_s14 = smov 68  }
  0x16   : > { %v297_v14 = vld [vmem:[%s6416_s20 + $0xa8] sm:$0xff]  ;;  %v298_v15 = vld [vmem:[%s6416_s20 + $0xb0] sm:$0xff]  ;;  %v299_v16 = vld [vmem:[%s6416_s20 + $0xc0] sm:$0xff] }
  0x17   : > { %v300_v17 = vld [vmem:[%s6416_s20 + $0xc8] sm:$0xff]  ;;  %v301_v18 = vld [vmem:[%s6416_s20 + $0xd8] sm:$0xff]  ;;  %v302_v19 = vld [vmem:[%s6416_s20 + $0xe0] sm:$0xff] }
  0x18   : > { %v303_v20 = vld [vmem:[%s6416_s20 + $0xf0] sm:$0xff]  ;;  %v304_v21 = vld [vmem:[%s6416_s20 + $0xf8] sm:$0xff]  ;;  %v305_v22 = vld [vmem:[%s6416_s20 + $0x108] sm:$0xff] }
  0x19   : > { %v306_v23 = vld [vmem:[%s6416_s20 + $0x110] sm:$0xff]  ;;  %v307_v24 = vld [vmem:[%s6416_s20 + $0x120] sm:$0xff]  ;;  %v308_v25 = vld [vmem:[%s6416_s20 + $0x128] sm:$0xff] }
  0x1a   : > { %349 = vrot.lane.b32.xlu0 %v284_v3, %s6357_s21  ;;  %353 = vrot.lane.b32.xlu1 %v286_v4, %s6357_s21  ;;  %v309_v26 = vld [vmem:[%s6416_s20 + $0x138] sm:$0xff]  ;;  %v310_v27 = vld [vmem:[%s6416_s20 + $0x140] sm:$0xff] }
  0x1b   : > { %357 = vrot.lane.b32.xlu2 %v288_v5, %s6357_s21  ;;  %v311_v28 = vld [vmem:[%s6416_s20 + $0x150] sm:$0xff]  ;;  %v312_v29 = vld [vmem:[%s6416_s20 + $0x158] sm:$0xff]  ;;  %v313_v31 = vld [vmem:[%s6416_s20 + $0x168] sm:$0xff] }
  0x1c   : > { %v222_v30 = vld [vmem:[%s6479_s24 + $0x30] sm:$0xff]  ;;  %v476_v33 = vld [vmem:[%s6479_s24 + $0x1] sm:$0xff]  ;;  %v223_v35 = vld [vmem:[%s6479_s24 + $0x38] sm:$0xff] }
  0x1d   : > { %255 = vst.msk [vmem:[#allocation2 + $0x20] sm:$0xff] %vm250_vm0, %v222_v30  ;;  %v314_v32 = vld [vmem:[%s6416_s20 + $0x170] sm:$0xff]  ;;  %v218_v34 = vld [vmem:[%s6479_s24] sm:$0xff]  ;;  %v220_v39 = vld [vmem:[%s6479_s24 + $0x18] sm:$0xff] }
  0x1e   : > { %251 = vst.msk [vmem:[#allocation2] sm:$0xff] %vm250_vm0, %v218_v34  ;;  %v477_v36 = vld [vmem:[%s6479_s24 + $0x9] sm:$0xff]  ;;  %v478_v37 = vld [vmem:[%s6479_s24 + $0x19] sm:$0xff]  ;;  %v479_v38 = vld [vmem:[%s6479_s24 + $0x21] sm:$0xff] }
  0x1f   : > { %256 = vst.msk [vmem:[#allocation2 + $0x28] sm:$0xff] %vm250_vm0, %v223_v35  ;;  %v219_v40 = vld [vmem:[%s6479_s24 + $0x8] sm:$0xff]  ;;  %v226_v41 = vld [vmem:[%s6479_s24 + $0x60] sm:$0xff]  ;;  %v480_v43 = vld [vmem:[%s6479_s24 + $0x31] sm:$0xff] }
  0x20   : > { %253 = vst.msk [vmem:[#allocation2 + $0x10] sm:$0xff] %vm250_vm0, %v220_v39  ;;  %v481_v44 = vld [vmem:[%s6479_s24 + $0x39] sm:$0xff]  ;;  %v482_v45 = vld [vmem:[%s6479_s24 + $0x49] sm:$0xff]  ;;  %v483_v50 = vld [vmem:[%s6479_s24 + $0x51] sm:$0xff] }
  0x21   : > { %252 = vst.msk [vmem:[#allocation2 + $0x8] sm:$0xff] %vm250_vm0, %v219_v40  ;;  %v221_v46 = vld [vmem:[%s6479_s24 + $0x20] sm:$0xff]  ;;  %v224_v47 = vld [vmem:[%s6479_s24 + $0x48] sm:$0xff]  ;;  %v6529_v53 = vld [vmem:[%s6479_s24 + $0x50] sm:$0xff] }
  0x22   : > { %359 = vrot.lane.b32.xlu0 %v289_v6, %s6357_s21  ;;  %361 = vrot.lane.b32.xlu1 %v290_v7, %s6357_s21  ;;  %259 = vst.msk [vmem:[#allocation2 + $0x40] sm:$0xff] %vm250_vm0, %v226_v41  ;;  %v229_v48 = vld [vmem:[%s6479_s24 + $0x80] sm:$0xff]  ;;  %v485_v52 = vld [vmem:[%s6479_s24 + $0x69] sm:$0xff] }
  0x23   : > { %363 = vrot.lane.b32.xlu2 %v291_v8, %s6357_s21  ;;  %254 = vst.msk [vmem:[#allocation2 + $0x18] sm:$0xff] %vm250_vm0, %v221_v46  ;;  %v484_v51 = vld [vmem:[%s6479_s24 + $0x61] sm:$0xff]  ;;  %v486_v57 = vld [vmem:[%s6479_s24 + $0x79] sm:$0xff]  ;;  %v488_v59 = vld [vmem:[%s6479_s24 + $0x91] sm:$0xff] }
  0x24   : > { %257 = vst.msk [vmem:[#allocation2 + $0x30] sm:$0xff] %vm250_vm0, %v224_v47  ;;  %v227_v54 = vld [vmem:[%s6479_s24 + $0x68] sm:$0xff]  ;;  %v6545_v60 = vld [vmem:[%s6479_s24 + $0x78] sm:$0xff]  ;;  %v230_v61 = vld [vmem:[%s6479_s24 + $0x90] sm:$0xff] }
  0x25   : > { %262 = vst.msk [vmem:[#allocation2 + $0x58] sm:$0xff] %vm250_vm0, %v229_v48  ;;  %v232_v55 = vld [vmem:[%s6479_s24 + $0xa8] sm:$0xff]  ;;  %v489_v2 = vld [vmem:[%s6479_s24 + $0x99] sm:$0xff]  ;;  %v491_v4 = vld [vmem:[%s6479_s24 + $0xb1] sm:$0xff] }
  0x26   : > { %258 = vst.msk [vmem:[#allocation2 + $0x38] sm:$0xff] %vm250_vm0, %v6529_v53  ;;  %v487_v58 = vld [vmem:[%s6479_s24 + $0x81] sm:$0xff]  ;;  %v490_v3 = vld [vmem:[%s6479_s24 + $0xa9] sm:$0xff]  ;;  %v6563_v5 = vld [vmem:[%s6479_s24 + $0x98] sm:$0xff] }
  0x27   : > { %260 = vst.msk [vmem:[#allocation2 + $0x48] sm:$0xff] %vm250_vm0, %v227_v54  ;;  %v235_v0 = vld [vmem:[%s6479_s24 + $0xc8] sm:$0xff]  ;;  %v233_v6 = vld [vmem:[%s6479_s24 + $0xb0] sm:$0xff]  ;;  %v502_v39 = vld [vmem:[%s6479_s24 + $0x139] sm:$0xff] }
  0x28   : > { %265 = vst.msk [vmem:[#allocation2 + $0x70] sm:$0xff] %vm250_vm0, %v232_v55  ;;  %v499_v30 = vld [vmem:[%s6479_s24 + $0x111] sm:$0xff]  ;;  %v503_v40 = vld [vmem:[%s6479_s24 + $0x141] sm:$0xff]  ;;  %v505_v47 = vld [vmem:[%s6479_s24 + $0x159] sm:$0xff] }
  0x29   : > { %261 = vst.msk [vmem:[#allocation2 + $0x50] sm:$0xff] %vm250_vm0, %v6545_v60  ;;  %v6650_v41 = vld [vmem:[%s6479_s24 + $0x128] sm:$0xff]  ;;  %v504_v46 = vld [vmem:[%s6479_s24 + $0x151] sm:$0xff] }
  0x2a   : > { %365 = vrot.lane.b32.xlu0 %v292_v9, %s6357_s21  ;;  %367 = vrot.lane.b32.xlu1 %v293_v10, %s6357_s21  ;;  %263 = vst.msk [vmem:[#allocation2 + $0x60] sm:$0xff] %vm250_vm0, %v230_v61  ;;  %v238_v9 = vld [vmem:[%s6479_s24 + $0xf0] sm:$0xff] }
  0x2b   : > { %369 = vrot.lane.b32.xlu2 %v294_v11, %s6357_s21  ;;  %268 = vst.msk [vmem:[#allocation2 + $0x88] sm:$0xff] %vm250_vm0, %v235_v0  ;;  %v492_v11 = vld [vmem:[%s6479_s24 + $0xc1] sm:$0xff]  ;;  %v506_v48 = vld [vmem:[%s6479_s24 + $0x169] sm:$0xff]  ;;  %v507_v55 = vld [vmem:[%s6479_s24 + $0x171] sm:$0xff] }
  0x2c   : > { %264 = vst.msk [vmem:[#allocation2 + $0x68] sm:$0xff] %vm250_vm0, %v6563_v5  ;;  %v672_v0 = vld [vmem:[%s6416_s20 + $0x21] sm:$0xff] }
  0x2d   : > { %266 = vst.msk [vmem:[#allocation2 + $0x78] sm:$0xff] %vm250_vm0, %v233_v6  ;;  %v674_v6 = vld [vmem:[%s6416_s20 + $0x39] sm:$0xff] }
  0x2e   : > { %271 = vst.msk [vmem:[#allocation2 + $0xa0] sm:$0xff] %vm250_vm0, %v238_v9 }
  0x2f   : > { %276 = vst.msk [vmem:[#allocation2 + $0xc8] sm:$0xff] %vm250_vm0, %v6650_v41 }
  0x32   : > { %371 = vrot.lane.b32.xlu0 %v295_v12, %s6357_s21  ;;  %373 = vrot.lane.b32.xlu1 %v296_v13, %s6357_s21  ;;  %v493_v12 = vld [vmem:[%s6479_s24 + $0xc9] sm:$0xff]  ;;  %v494_v13 = vld [vmem:[%s6479_s24 + $0xd9] sm:$0xff] }
  0x33   : > { %375 = vrot.lane.b32.xlu2 %v297_v14, %s6357_s21  ;;  %v6581_v14 = vld [vmem:[%s6479_s24 + $0xc0] sm:$0xff] }
  0x34   : > { %267 = vst.msk [vmem:[#allocation2 + $0x80] sm:$0xff] %vm250_vm0, %v6581_v14 }
  0x3a   : > { %377 = vrot.lane.b32.xlu0 %v298_v15, %s6357_s21  ;;  %379 = vrot.lane.b32.xlu1 %v299_v16, %s6357_s21  ;;  %v236_v15 = vld [vmem:[%s6479_s24 + $0xd8] sm:$0xff] }
  0x3b   : > { %381 = vrot.lane.b32.xlu2 %v300_v17, %s6357_s21  ;;  %269 = vst.msk [vmem:[#allocation2 + $0x90] sm:$0xff] %vm250_vm0, %v236_v15  ;;  %v679_v15 = vld [vmem:[%s6416_s20 + $0x79] sm:$0xff] }
  0x42   : > { %383 = vrot.lane.b32.xlu0 %v301_v18, %s6357_s21  ;;  %385 = vrot.lane.b32.xlu1 %v302_v19, %s6357_s21  ;;  %v6590_v18 = vld [vmem:[%s6479_s24 + $0x110] sm:$0xff] }
  0x43   : > { %387 = vrot.lane.b32.xlu2 %v303_v20, %s6357_s21  ;;  %v495_v20 = vld [vmem:[%s6479_s24 + $0xe1] sm:$0xff]  ;;  %274 = vst.msk [vmem:[#allocation2 + $0xb8] sm:$0xff] %vm250_vm0, %v6590_v18 }
  0x4a   : > { %389 = vrot.lane.b32.xlu0 %v304_v21, %s6357_s21  ;;  %391 = vrot.lane.b32.xlu1 %v305_v22, %s6357_s21  ;;  %v496_v21 = vld [vmem:[%s6479_s24 + $0xf1] sm:$0xff]  ;;  %v497_v22 = vld [vmem:[%s6479_s24 + $0xf9] sm:$0xff] }
  0x4b   : > { %393 = vrot.lane.b32.xlu2 %v306_v23, %s6357_s21  ;;  %v6602_v23 = vld [vmem:[%s6479_s24 + $0xe0] sm:$0xff] }
  0x4c   : > { %270 = vst.msk [vmem:[#allocation2 + $0x98] sm:$0xff] %vm250_vm0, %v6602_v23 }
  0x52   : > { %395 = vrot.lane.b32.xlu0 %v307_v24, %s6357_s21  ;;  %397 = vrot.lane.b32.xlu1 %v308_v25, %s6357_s21  ;;  %v6607_v24 = vld [vmem:[%s6479_s24 + $0xf8] sm:$0xff] }
  0x53   : > { %399 = vrot.lane.b32.xlu2 %v309_v26, %s6357_s21  ;;  %272 = vst.msk [vmem:[#allocation2 + $0xa8] sm:$0xff] %vm250_vm0, %v6607_v24 }
  0x5a   : > { %401 = vrot.lane.b32.xlu0 %v310_v27, %s6357_s21  ;;  %403 = vrot.lane.b32.xlu1 %v311_v28, %s6357_s21  ;;  %v6614_v27 = vld [vmem:[%s6479_s24 + $0x138] sm:$0xff] }
  0x5b   : > { %405 = vrot.lane.b32.xlu2 %v312_v29, %s6357_s21  ;;  %v498_v29 = vld [vmem:[%s6479_s24 + $0x109] sm:$0xff]  ;;  %277 = vst.msk [vmem:[#allocation2 + $0xd0] sm:$0xff] %vm250_vm0, %v6614_v27 }
  0x62   : > { %407 = vrot.lane.b32.xlu0 %v313_v31, %s6357_s21  ;;  %409 = vrot.lane.b32.xlu1 %v314_v32, %s6357_s21  ;;  %v500_v31 = vld [vmem:[%s6479_s24 + $0x121] sm:$0xff] }
  0x63   : > { %540 = vrot.lane.b32.xlu2 %v476_v33, %s6358_s25  ;;  %v6626_v32 = vld [vmem:[%s6479_s24 + $0x108] sm:$0xff]  ;;  %v6631_v33 = vld [vmem:[%s6479_s24 + $0x120] sm:$0xff] }
  0x64   : > { %273 = vst.msk [vmem:[#allocation2 + $0xb0] sm:$0xff] %vm250_vm0, %v6626_v32 }
  0x65   : > { %275 = vst.msk [vmem:[#allocation2 + $0xc0] sm:$0xff] %vm250_vm0, %v6631_v33 }
  0x6a   : > { %542 = vrot.lane.b32.xlu0 %v477_v36, %s6358_s25  ;;  %544 = vrot.lane.b32.xlu1 %v478_v37, %s6358_s25  ;;  %v6638_v36 = vld [vmem:[%s6479_s24 + $0x158] sm:$0xff] }
  0x6b   : > { %546 = vrot.lane.b32.xlu2 %v479_v38, %s6358_s25  ;;  %v501_v38 = vld [vmem:[%s6479_s24 + $0x129] sm:$0xff]  ;;  %280 = vst.msk [vmem:[#allocation2 + $0xe8] sm:$0xff] %vm250_vm0, %v6638_v36 }
  0x6d   : > { %v356_v42 = vpop.permute.xlu2 %355 }
  0x6e   : > { %448 = vst.msk [vmem:[#allocation2 + $0x20] sm:$0xff] %vm443_vm1, %v356_v42  ;;  %v6655_v42 = vld [vmem:[%s6479_s24 + $0x140] sm:$0xff] }
  0x6f   : > { %278 = vst.msk [vmem:[#allocation2 + $0xd8] sm:$0xff] %vm250_vm0, %v6655_v42 }
  0x72   : > { %548 = vrot.lane.b32.xlu0 %v480_v43, %s6358_s25  ;;  %550 = vrot.lane.b32.xlu1 %v481_v44, %s6358_s25 }
  0x73   : > { %552 = vrot.lane.b32.xlu2 %v482_v45, %s6358_s25 }
  0x75   : > { %v358_v49 = vpop.permute.xlu2 %357 }
  0x76   : > { %449 = vst.msk [vmem:[#allocation2 + $0x28] sm:$0xff] %vm443_vm1, %v358_v49  ;;  %v6669_v49 = vld [vmem:[%s6479_s24 + $0x150] sm:$0xff] }
  0x77   : > { %279 = vst.msk [vmem:[#allocation2 + $0xe0] sm:$0xff] %vm250_vm0, %v6669_v49 }
  0x7a   : > { %554 = vrot.lane.b32.xlu0 %v483_v50, %s6358_s25  ;;  %556 = vrot.lane.b32.xlu1 %v484_v51, %s6358_s25  ;;  %v6674_v50 = vld [vmem:[%s6479_s24 + $0x168] sm:$0xff] }
  0x7b   : > { %558 = vrot.lane.b32.xlu2 %v485_v52, %s6358_s25  ;;  %281 = vst.msk [vmem:[#allocation2 + $0xf0] sm:$0xff] %vm250_vm0, %v6674_v50 }
  0x7d   : > { %v364_v56 = vpop.permute.xlu2 %363 }
  0x7e   : > { %452 = vst.msk [vmem:[#allocation2 + $0x40] sm:$0xff] %vm443_vm1, %v364_v56  ;;  %v669_v56 = vld [vmem:[%s6416_s20 + $0x1] sm:$0xff] }
  0x82   : > { %560 = vrot.lane.b32.xlu0 %v486_v57, %s6358_s25  ;;  %562 = vrot.lane.b32.xlu1 %v487_v58, %s6358_s25  ;;  %v670_v57 = vld [vmem:[%s6416_s20 + $0x9] sm:$0xff] }
  0x83   : > { %564 = vrot.lane.b32.xlu2 %v488_v59, %s6358_s25  ;;  %v6688_v58 = vld [vmem:[%s6479_s24 + $0x170] sm:$0xff] }
  0x84   : > { %v348_v62 = vpop.permute.xlu0 %347  ;;  %v352_v63 = vpop.permute.xlu1 %351  ;;  %282 = vst.msk [vmem:[#allocation2 + $0xf8] sm:$0xff] %vm250_vm0, %v6688_v58 }
  0x85   : > { %444 = vst.msk [vmem:[#allocation2] sm:$0xff] %vm443_vm1, %v348_v62  ;;  %v370_v1 = vpop.permute.xlu2 %369 }
  0x86   : > { %446 = vst.msk [vmem:[#allocation2 + $0x10] sm:$0xff] %vm443_vm1, %v352_v63  ;;  %v671_v63 = vld [vmem:[%s6416_s20 + $0x19] sm:$0xff] }
  0x87   : > { %455 = vst.msk [vmem:[#allocation2 + $0x58] sm:$0xff] %vm443_vm1, %v370_v1  ;;  %v673_v1 = vld [vmem:[%s6416_s20 + $0x31] sm:$0xff] }
  0x8a   : > { %566 = vrot.lane.b32.xlu0 %v489_v2, %s6358_s25  ;;  %568 = vrot.lane.b32.xlu1 %v490_v3, %s6358_s25 }
  0x8b   : > { %570 = vrot.lane.b32.xlu2 %v491_v4, %s6358_s25 }
  0x8c   : > { %v350_v7 = vpop.permute.xlu0 %349  ;;  %v354_v8 = vpop.permute.xlu1 %353 }
  0x8d   : > { %445 = vst.msk [vmem:[#allocation2 + $0x8] sm:$0xff] %vm443_vm1, %v350_v7  ;;  %v376_v10 = vpop.permute.xlu2 %375  ;;  %v675_v7 = vld [vmem:[%s6416_s20 + $0x49] sm:$0xff] }
  0x8e   : > { %447 = vst.msk [vmem:[#allocation2 + $0x18] sm:$0xff] %vm443_vm1, %v354_v8  ;;  %v676_v8 = vld [vmem:[%s6416_s20 + $0x51] sm:$0xff] }
  0x8f   : > { %458 = vst.msk [vmem:[#allocation2 + $0x70] sm:$0xff] %vm443_vm1, %v376_v10 }
  0x92   : > { %572 = vrot.lane.b32.xlu0 %v492_v11, %s6358_s25  ;;  %574 = vrot.lane.b32.xlu1 %v493_v12, %s6358_s25  ;;  %v677_v12 = vld [vmem:[%s6416_s20 + $0x61] sm:$0xff] }
  0x93   : > { %576 = vrot.lane.b32.xlu2 %v494_v13, %s6358_s25  ;;  %v678_v13 = vld [vmem:[%s6416_s20 + $0x69] sm:$0xff] }
  0x94   : > { %v360_v16 = vpop.permute.xlu0 %359  ;;  %v362_v17 = vpop.permute.xlu1 %361 }
  0x95   : > { %450 = vst.msk [vmem:[#allocation2 + $0x30] sm:$0xff] %vm443_vm1, %v360_v16  ;;  %v382_v19 = vpop.permute.xlu2 %381 }
  0x96   : > { %451 = vst.msk [vmem:[#allocation2 + $0x38] sm:$0xff] %vm443_vm1, %v362_v17 }
  0x97   : > { %461 = vst.msk [vmem:[#allocation2 + $0x88] sm:$0xff] %vm443_vm1, %v382_v19 }
  0x9a   : > { %578 = vrot.lane.b32.xlu0 %v495_v20, %s6358_s25  ;;  %580 = vrot.lane.b32.xlu1 %v496_v21, %s6358_s25  ;;  %v680_v20 = vld [vmem:[%s6416_s20 + $0x81] sm:$0xff]  ;;  %v681_v21 = vld [vmem:[%s6416_s20 + $0x91] sm:$0xff] }
  0x9b   : > { %582 = vrot.lane.b32.xlu2 %v497_v22, %s6358_s25  ;;  %v682_v22 = vld [vmem:[%s6416_s20 + $0x99] sm:$0xff] }
  0x9c   : > { %v366_v25 = vpop.permute.xlu0 %365  ;;  %v368_v26 = vpop.permute.xlu1 %367 }
  0x9d   : > { %453 = vst.msk [vmem:[#allocation2 + $0x48] sm:$0xff] %vm443_vm1, %v366_v25  ;;  %v388_v28 = vpop.permute.xlu2 %387 }
  0x9e   : > { %454 = vst.msk [vmem:[#allocation2 + $0x50] sm:$0xff] %vm443_vm1, %v368_v26 }
  0x9f   : > { %464 = vst.msk [vmem:[#allocation2 + $0xa0] sm:$0xff] %vm443_vm1, %v388_v28 }
  0xa2   : > { %584 = vrot.lane.b32.xlu0 %v498_v29, %s6358_s25  ;;  %586 = vrot.lane.b32.xlu1 %v499_v30, %s6358_s25  ;;  %v683_v29 = vld [vmem:[%s6416_s20 + $0xa9] sm:$0xff]  ;;  %v684_v30 = vld [vmem:[%s6416_s20 + $0xb1] sm:$0xff] }
  0xa3   : > { %588 = vrot.lane.b32.xlu2 %v500_v31, %s6358_s25  ;;  %v685_v31 = vld [vmem:[%s6416_s20 + $0xc1] sm:$0xff] }
  0xa4   : > { %v372_v34 = vpop.permute.xlu0 %371  ;;  %v374_v35 = vpop.permute.xlu1 %373 }
  0xa5   : > { %456 = vst.msk [vmem:[#allocation2 + $0x60] sm:$0xff] %vm443_vm1, %v372_v34  ;;  %v394_v37 = vpop.permute.xlu2 %393 }
  0xa6   : > { %457 = vst.msk [vmem:[#allocation2 + $0x68] sm:$0xff] %vm443_vm1, %v374_v35 }
  0xa7   : > { %467 = vst.msk [vmem:[#allocation2 + $0xb8] sm:$0xff] %vm443_vm1, %v394_v37 }
  0xaa   : > { %590 = vrot.lane.b32.xlu0 %v501_v38, %s6358_s25  ;;  %592 = vrot.lane.b32.xlu1 %v502_v39, %s6358_s25  ;;  %v686_v38 = vld [vmem:[%s6416_s20 + $0xc9] sm:$0xff]  ;;  %v687_v39 = vld [vmem:[%s6416_s20 + $0xd9] sm:$0xff] }
  0xab   : > { %594 = vrot.lane.b32.xlu2 %v503_v40, %s6358_s25  ;;  %v688_v40 = vld [vmem:[%s6416_s20 + $0xe1] sm:$0xff] }
  0xac   : > { %v378_v43 = vpop.permute.xlu0 %377  ;;  %v380_v44 = vpop.permute.xlu1 %379 }
  0xad   : > { %459 = vst.msk [vmem:[#allocation2 + $0x78] sm:$0xff] %vm443_vm1, %v378_v43  ;;  %v400_v45 = vpop.permute.xlu2 %399 }
  0xae   : > { %460 = vst.msk [vmem:[#allocation2 + $0x80] sm:$0xff] %vm443_vm1, %v380_v44 }
  0xaf   : > { %470 = vst.msk [vmem:[#allocation2 + $0xd0] sm:$0xff] %vm443_vm1, %v400_v45 }
  0xb2   : > { %596 = vrot.lane.b32.xlu0 %v504_v46, %s6358_s25  ;;  %598 = vrot.lane.b32.xlu1 %v505_v47, %s6358_s25  ;;  %v689_v46 = vld [vmem:[%s6416_s20 + $0xf1] sm:$0xff]  ;;  %v690_v47 = vld [vmem:[%s6416_s20 + $0xf9] sm:$0xff] }
  0xb3   : > { %600 = vrot.lane.b32.xlu2 %v506_v48, %s6358_s25  ;;  %v691_v48 = vld [vmem:[%s6416_s20 + $0x109] sm:$0xff] }
  0xb4   : > { %v384_v51 = vpop.permute.xlu0 %383  ;;  %v386_v52 = vpop.permute.xlu1 %385 }
  0xb5   : > { %462 = vst.msk [vmem:[#allocation2 + $0x90] sm:$0xff] %vm443_vm1, %v384_v51  ;;  %v406_v54 = vpop.permute.xlu2 %405 }
  0xb6   : > { %463 = vst.msk [vmem:[#allocation2 + $0x98] sm:$0xff] %vm443_vm1, %v386_v52 }
  0xb7   : > { %473 = vst.msk [vmem:[#allocation2 + $0xe8] sm:$0xff] %vm443_vm1, %v406_v54 }
  0xba   : > { %602 = vrot.lane.b32.xlu0 %v507_v55, %s6358_s25  ;;  %733 = vrot.lane.b32.xlu1 %v669_v56, %s6359_s26  ;;  %v692_v55 = vld [vmem:[%s6416_s20 + $0x111] sm:$0xff]  ;;  %v693_v56 = vld [vmem:[%s6416_s20 + $0x121] sm:$0xff] }
  0xbb   : > { %735 = vrot.lane.b32.xlu2 %v670_v57, %s6359_s26  ;;  %v694_v57 = vld [vmem:[%s6416_s20 + $0x129] sm:$0xff] }
  0xbc   : > { %v390_v59 = vpop.permute.xlu0 %389  ;;  %v392_v61 = vpop.permute.xlu1 %391 }
  0xbd   : > { %465 = vst.msk [vmem:[#allocation2 + $0xa8] sm:$0xff] %vm443_vm1, %v390_v59  ;;  %v541_v62 = vpop.permute.xlu2 %540 }
  0xbe   : > { %466 = vst.msk [vmem:[#allocation2 + $0xb0] sm:$0xff] %vm443_vm1, %v392_v61 }
  0xbf   : > { %637 = vst.msk [vmem:[#allocation2] sm:$0xff] %vm636_vm2, %v541_v62 }
  0xc2   : > { %737 = vrot.lane.b32.xlu0 %v671_v63, %s6359_s26  ;;  %739 = vrot.lane.b32.xlu1 %v672_v0, %s6359_s26  ;;  %v695_v63 = vld [vmem:[%s6416_s20 + $0x139] sm:$0xff]  ;;  %v696_v0 = vld [vmem:[%s6416_s20 + $0x141] sm:$0xff] }
  0xc3   : > { %741 = vrot.lane.b32.xlu2 %v673_v1, %s6359_s26  ;;  %v697_v1 = vld [vmem:[%s6416_s20 + $0x151] sm:$0xff] }
  0xc4   : > { %v396_v2 = vpop.permute.xlu0 %395  ;;  %v398_v3 = vpop.permute.xlu1 %397 }
  0xc5   : > { %468 = vst.msk [vmem:[#allocation2 + $0xc0] sm:$0xff] %vm443_vm1, %v396_v2  ;;  %v547_v4 = vpop.permute.xlu2 %546 }
  0xc6   : > { %469 = vst.msk [vmem:[#allocation2 + $0xc8] sm:$0xff] %vm443_vm1, %v398_v3 }
  0xc7   : > { %640 = vst.msk [vmem:[#allocation2 + $0x18] sm:$0xff] %vm636_vm2, %v547_v4 }
  0xca   : > { %743 = vrot.lane.b32.xlu0 %v674_v6, %s6359_s26  ;;  %745 = vrot.lane.b32.xlu1 %v675_v7, %s6359_s26  ;;  %v698_v6 = vld [vmem:[%s6416_s20 + $0x159] sm:$0xff]  ;;  %v699_v7 = vld [vmem:[%s6416_s20 + $0x169] sm:$0xff] }
  0xcb   : > { %747 = vrot.lane.b32.xlu2 %v676_v8, %s6359_s26  ;;  %v700_v8 = vld [vmem:[%s6416_s20 + $0x171] sm:$0xff] }
  0xcc   : > { %v402_v9 = vpop.permute.xlu0 %401  ;;  %v404_v10 = vpop.permute.xlu1 %403 }
  0xcd   : > { %471 = vst.msk [vmem:[#allocation2 + $0xd8] sm:$0xff] %vm443_vm1, %v402_v9  ;;  %v553_v11 = vpop.permute.xlu2 %552 }
  0xce   : > { %472 = vst.msk [vmem:[#allocation2 + $0xe0] sm:$0xff] %vm443_vm1, %v404_v10 }
  0xcf   : > { %643 = vst.msk [vmem:[#allocation2 + $0x30] sm:$0xff] %vm636_vm2, %v553_v11 }
  0xd2   : > { %749 = vrot.lane.b32.xlu0 %v677_v12, %s6359_s26  ;;  %751 = vrot.lane.b32.xlu1 %v678_v13, %s6359_s26  ;;  %v862_v12 = vld [vmem:[%s6479_s24 + $0x2] sm:$0xff]  ;;  %v863_v13 = vld [vmem:[%s6479_s24 + $0xa] sm:$0xff] }
  0xd3   : > { %753 = vrot.lane.b32.xlu2 %v679_v15, %s6359_s26  ;;  %v864_v15 = vld [vmem:[%s6479_s24 + $0x1a] sm:$0xff] }
  0xd4   : > { %v408_v16 = vpop.permute.xlu0 %407  ;;  %v410_v17 = vpop.permute.xlu1 %409 }
  0xd5   : > { %474 = vst.msk [vmem:[#allocation2 + $0xf0] sm:$0xff] %vm443_vm1, %v408_v16  ;;  %v559_v19 = vpop.permute.xlu2 %558 }
  0xd6   : > { %475 = vst.msk [vmem:[#allocation2 + $0xf8] sm:$0xff] %vm443_vm1, %v410_v17 }
  0xd7   : > { %646 = vst.msk [vmem:[#allocation2 + $0x48] sm:$0xff] %vm636_vm2, %v559_v19 }
  0xda   : > { %755 = vrot.lane.b32.xlu0 %v680_v20, %s6359_s26  ;;  %757 = vrot.lane.b32.xlu1 %v681_v21, %s6359_s26  ;;  %v865_v20 = vld [vmem:[%s6479_s24 + $0x22] sm:$0xff]  ;;  %v866_v21 = vld [vmem:[%s6479_s24 + $0x32] sm:$0xff] }
  0xdb   : > { %759 = vrot.lane.b32.xlu2 %v682_v22, %s6359_s26  ;;  %v867_v22 = vld [vmem:[%s6479_s24 + $0x3a] sm:$0xff] }
  0xdc   : > { %v543_v25 = vpop.permute.xlu0 %542  ;;  %v545_v26 = vpop.permute.xlu1 %544 }
  0xdd   : > { %638 = vst.msk [vmem:[#allocation2 + $0x8] sm:$0xff] %vm636_vm2, %v543_v25  ;;  %v565_v28 = vpop.permute.xlu2 %564 }
  0xde   : > { %639 = vst.msk [vmem:[#allocation2 + $0x10] sm:$0xff] %vm636_vm2, %v545_v26 }
  0xdf   : > { %649 = vst.msk [vmem:[#allocation2 + $0x60] sm:$0xff] %vm636_vm2, %v565_v28 }
  0xe2   : > { %761 = vrot.lane.b32.xlu0 %v683_v29, %s6359_s26  ;;  %763 = vrot.lane.b32.xlu1 %v684_v30, %s6359_s26  ;;  %v868_v29 = vld [vmem:[%s6479_s24 + $0x4a] sm:$0xff]  ;;  %v869_v30 = vld [vmem:[%s6479_s24 + $0x52] sm:$0xff] }
  0xe3   : > { %765 = vrot.lane.b32.xlu2 %v685_v31, %s6359_s26  ;;  %v870_v31 = vld [vmem:[%s6479_s24 + $0x62] sm:$0xff] }
  0xe4   : > { %v549_v34 = vpop.permute.xlu0 %548  ;;  %v551_v35 = vpop.permute.xlu1 %550 }
  0xe5   : > { %641 = vst.msk [vmem:[#allocation2 + $0x20] sm:$0xff] %vm636_vm2, %v549_v34  ;;  %v571_v37 = vpop.permute.xlu2 %570 }
  0xe6   : > { %642 = vst.msk [vmem:[#allocation2 + $0x28] sm:$0xff] %vm636_vm2, %v551_v35 }
  0xe7   : > { %652 = vst.msk [vmem:[#allocation2 + $0x78] sm:$0xff] %vm636_vm2, %v571_v37 }
  0xea   : > { %767 = vrot.lane.b32.xlu0 %v686_v38, %s6359_s26  ;;  %769 = vrot.lane.b32.xlu1 %v687_v39, %s6359_s26  ;;  %v871_v38 = vld [vmem:[%s6479_s24 + $0x6a] sm:$0xff]  ;;  %v872_v39 = vld [vmem:[%s6479_s24 + $0x7a] sm:$0xff] }
  0xeb   : > { %771 = vrot.lane.b32.xlu2 %v688_v40, %s6359_s26  ;;  %v873_v40 = vld [vmem:[%s6479_s24 + $0x82] sm:$0xff] }
  0xec   : > { %v555_v43 = vpop.permute.xlu0 %554  ;;  %v557_v44 = vpop.permute.xlu1 %556 }
  0xed   : > { %644 = vst.msk [vmem:[#allocation2 + $0x38] sm:$0xff] %vm636_vm2, %v555_v43  ;;  %v577_v45 = vpop.permute.xlu2 %576 }
  0xee   : > { %645 = vst.msk [vmem:[#allocation2 + $0x40] sm:$0xff] %vm636_vm2, %v557_v44 }
  0xef   : > { %655 = vst.msk [vmem:[#allocation2 + $0x90] sm:$0xff] %vm636_vm2, %v577_v45 }
  0xf2   : > { %773 = vrot.lane.b32.xlu0 %v689_v46, %s6359_s26  ;;  %775 = vrot.lane.b32.xlu1 %v690_v47, %s6359_s26  ;;  %v874_v46 = vld [vmem:[%s6479_s24 + $0x92] sm:$0xff]  ;;  %v875_v47 = vld [vmem:[%s6479_s24 + $0x9a] sm:$0xff] }
  0xf3   : > { %777 = vrot.lane.b32.xlu2 %v691_v48, %s6359_s26  ;;  %v876_v48 = vld [vmem:[%s6479_s24 + $0xaa] sm:$0xff] }
  0xf4   : > { %v561_v51 = vpop.permute.xlu0 %560  ;;  %v563_v52 = vpop.permute.xlu1 %562 }
  0xf5   : > { %647 = vst.msk [vmem:[#allocation2 + $0x50] sm:$0xff] %vm636_vm2, %v561_v51  ;;  %v583_v54 = vpop.permute.xlu2 %582 }
  0xf6   : > { %648 = vst.msk [vmem:[#allocation2 + $0x58] sm:$0xff] %vm636_vm2, %v563_v52 }
  0xf7   : > { %658 = vst.msk [vmem:[#allocation2 + $0xa8] sm:$0xff] %vm636_vm2, %v583_v54 }
  0xfa   : > { %779 = vrot.lane.b32.xlu0 %v692_v55, %s6359_s26  ;;  %781 = vrot.lane.b32.xlu1 %v693_v56, %s6359_s26  ;;  %v877_v55 = vld [vmem:[%s6479_s24 + $0xb2] sm:$0xff]  ;;  %v878_v56 = vld [vmem:[%s6479_s24 + $0xc2] sm:$0xff] }
  0xfb   : > { %783 = vrot.lane.b32.xlu2 %v694_v57, %s6359_s26  ;;  %v879_v57 = vld [vmem:[%s6479_s24 + $0xca] sm:$0xff] }
  0xfc   : > { %v567_v59 = vpop.permute.xlu0 %566  ;;  %v569_v61 = vpop.permute.xlu1 %568 }
  0xfd   : > { %650 = vst.msk [vmem:[#allocation2 + $0x68] sm:$0xff] %vm636_vm2, %v567_v59  ;;  %v589_v62 = vpop.permute.xlu2 %588 }
  0xfe   : > { %651 = vst.msk [vmem:[#allocation2 + $0x70] sm:$0xff] %vm636_vm2, %v569_v61 }
  0xff   : > { %661 = vst.msk [vmem:[#allocation2 + $0xc0] sm:$0xff] %vm636_vm2, %v589_v62 }
 0x102   : > { %785 = vrot.lane.b32.xlu0 %v695_v63, %s6359_s26  ;;  %787 = vrot.lane.b32.xlu1 %v696_v0, %s6359_s26  ;;  %v880_v63 = vld [vmem:[%s6479_s24 + $0xda] sm:$0xff]  ;;  %v881_v0 = vld [vmem:[%s6479_s24 + $0xe2] sm:$0xff] }
 0x103   : > { %789 = vrot.lane.b32.xlu2 %v697_v1, %s6359_s26  ;;  %v882_v1 = vld [vmem:[%s6479_s24 + $0xf2] sm:$0xff] }
 0x104   : > { %v573_v2 = vpop.permute.xlu0 %572  ;;  %v575_v3 = vpop.permute.xlu1 %574 }
 0x105   : > { %653 = vst.msk [vmem:[#allocation2 + $0x80] sm:$0xff] %vm636_vm2, %v573_v2  ;;  %v595_v4 = vpop.permute.xlu2 %594 }
 0x106   : > { %654 = vst.msk [vmem:[#allocation2 + $0x88] sm:$0xff] %vm636_vm2, %v575_v3 }
 0x107   : > { %664 = vst.msk [vmem:[#allocation2 + $0xd8] sm:$0xff] %vm636_vm2, %v595_v4 }
 0x10a   : > { %791 = vrot.lane.b32.xlu0 %v698_v6, %s6359_s26  ;;  %793 = vrot.lane.b32.xlu1 %v699_v7, %s6359_s26  ;;  %v883_v6 = vld [vmem:[%s6479_s24 + $0xfa] sm:$0xff]  ;;  %v884_v7 = vld [vmem:[%s6479_s24 + $0x10a] sm:$0xff] }
 0x10b   : > { %795 = vrot.lane.b32.xlu2 %v700_v8, %s6359_s26  ;;  %v885_v8 = vld [vmem:[%s6479_s24 + $0x112] sm:$0xff] }
 0x10c   : > { %v579_v9 = vpop.permute.xlu0 %578  ;;  %v581_v10 = vpop.permute.xlu1 %580 }
 0x10d   : > { %656 = vst.msk [vmem:[#allocation2 + $0x98] sm:$0xff] %vm636_vm2, %v579_v9  ;;  %v601_v11 = vpop.permute.xlu2 %600 }
 0x10e   : > { %657 = vst.msk [vmem:[#allocation2 + $0xa0] sm:$0xff] %vm636_vm2, %v581_v10 }
 0x10f   : > { %667 = vst.msk [vmem:[#allocation2 + $0xf0] sm:$0xff] %vm636_vm2, %v601_v11 }
 0x112   : > { %926 = vrot.lane.b32.xlu0 %v862_v12, %s6360_s27  ;;  %928 = vrot.lane.b32.xlu1 %v863_v13, %s6360_s27  ;;  %v886_v12 = vld [vmem:[%s6479_s24 + $0x122] sm:$0xff]  ;;  %v887_v13 = vld [vmem:[%s6479_s24 + $0x12a] sm:$0xff] }
 0x113   : > { %930 = vrot.lane.b32.xlu2 %v864_v15, %s6360_s27  ;;  %v888_v15 = vld [vmem:[%s6479_s24 + $0x13a] sm:$0xff] }
 0x114   : > { %v585_v16 = vpop.permute.xlu0 %584  ;;  %v587_v17 = vpop.permute.xlu1 %586 }
 0x115   : > { %659 = vst.msk [vmem:[#allocation2 + $0xb0] sm:$0xff] %vm636_vm2, %v585_v16  ;;  %v736_v19 = vpop.permute.xlu2 %735 }
 0x116   : > { %660 = vst.msk [vmem:[#allocation2 + $0xb8] sm:$0xff] %vm636_vm2, %v587_v17 }
 0x117   : > { %831 = vst.msk [vmem:[#allocation2 + $0x8] sm:$0xff] %vm829_vm3, %v736_v19 }
 0x11a   : > { %932 = vrot.lane.b32.xlu0 %v865_v20, %s6360_s27  ;;  %934 = vrot.lane.b32.xlu1 %v866_v21, %s6360_s27  ;;  %v889_v20 = vld [vmem:[%s6479_s24 + $0x142] sm:$0xff]  ;;  %v890_v21 = vld [vmem:[%s6479_s24 + $0x152] sm:$0xff] }
 0x11b   : > { %936 = vrot.lane.b32.xlu2 %v867_v22, %s6360_s27  ;;  %v891_v22 = vld [vmem:[%s6479_s24 + $0x15a] sm:$0xff] }
 0x11c   : > { %v591_v25 = vpop.permute.xlu0 %590  ;;  %v593_v26 = vpop.permute.xlu1 %592 }
 0x11d   : > { %662 = vst.msk [vmem:[#allocation2 + $0xc8] sm:$0xff] %vm636_vm2, %v591_v25  ;;  %v742_v28 = vpop.permute.xlu2 %741 }
 0x11e   : > { %663 = vst.msk [vmem:[#allocation2 + $0xd0] sm:$0xff] %vm636_vm2, %v593_v26 }
 0x11f   : > { %834 = vst.msk [vmem:[#allocation2 + $0x20] sm:$0xff] %vm829_vm3, %v742_v28 }
 0x122   : > { %938 = vrot.lane.b32.xlu0 %v868_v29, %s6360_s27  ;;  %940 = vrot.lane.b32.xlu1 %v869_v30, %s6360_s27  ;;  %v892_v29 = vld [vmem:[%s6479_s24 + $0x16a] sm:$0xff]  ;;  %v893_v30 = vld [vmem:[%s6479_s24 + $0x172] sm:$0xff] }
 0x123   : > { %942 = vrot.lane.b32.xlu2 %v870_v31, %s6360_s27  ;;  %v1055_v31 = vld [vmem:[%s6416_s20 + $0x2] sm:$0xff] }
 0x124   : > { %v597_v34 = vpop.permute.xlu0 %596  ;;  %v599_v35 = vpop.permute.xlu1 %598 }
 0x125   : > { %665 = vst.msk [vmem:[#allocation2 + $0xe0] sm:$0xff] %vm636_vm2, %v597_v34  ;;  %v748_v37 = vpop.permute.xlu2 %747 }
 0x126   : > { %666 = vst.msk [vmem:[#allocation2 + $0xe8] sm:$0xff] %vm636_vm2, %v599_v35 }
 0x127   : > { %837 = vst.msk [vmem:[#allocation2 + $0x38] sm:$0xff] %vm829_vm3, %v748_v37 }
 0x12a   : > { %944 = vrot.lane.b32.xlu0 %v871_v38, %s6360_s27  ;;  %946 = vrot.lane.b32.xlu1 %v872_v39, %s6360_s27  ;;  %v1056_v38 = vld [vmem:[%s6416_s20 + $0xa] sm:$0xff]  ;;  %v1057_v39 = vld [vmem:[%s6416_s20 + $0x1a] sm:$0xff] }
 0x12b   : > { %948 = vrot.lane.b32.xlu2 %v873_v40, %s6360_s27  ;;  %v1058_v40 = vld [vmem:[%s6416_s20 + $0x22] sm:$0xff] }
 0x12c   : > { %v603_v43 = vpop.permute.xlu0 %602  ;;  %v734_v44 = vpop.permute.xlu1 %733 }
 0x12d   : > { %668 = vst.msk [vmem:[#allocation2 + $0xf8] sm:$0xff] %vm636_vm2, %v603_v43  ;;  %v754_v45 = vpop.permute.xlu2 %753 }
 0x12e   : > { %830 = vst.msk [vmem:[#allocation2] sm:$0xff] %vm829_vm3, %v734_v44 }
 0x12f   : > { %840 = vst.msk [vmem:[#allocation2 + $0x50] sm:$0xff] %vm829_vm3, %v754_v45 }
 0x132   : > { %950 = vrot.lane.b32.xlu0 %v874_v46, %s6360_s27  ;;  %952 = vrot.lane.b32.xlu1 %v875_v47, %s6360_s27  ;;  %v1059_v46 = vld [vmem:[%s6416_s20 + $0x32] sm:$0xff]  ;;  %v1060_v47 = vld [vmem:[%s6416_s20 + $0x3a] sm:$0xff] }
 0x133   : > { %954 = vrot.lane.b32.xlu2 %v876_v48, %s6360_s27  ;;  %v1061_v48 = vld [vmem:[%s6416_s20 + $0x4a] sm:$0xff] }
 0x134   : > { %v738_v51 = vpop.permute.xlu0 %737  ;;  %v740_v52 = vpop.permute.xlu1 %739 }
 0x135   : > { %832 = vst.msk [vmem:[#allocation2 + $0x10] sm:$0xff] %vm829_vm3, %v738_v51  ;;  %v760_v54 = vpop.permute.xlu2 %759 }
 0x136   : > { %833 = vst.msk [vmem:[#allocation2 + $0x18] sm:$0xff] %vm829_vm3, %v740_v52 }
 0x137   : > { %843 = vst.msk [vmem:[#allocation2 + $0x68] sm:$0xff] %vm829_vm3, %v760_v54 }
 0x13a   : > { %956 = vrot.lane.b32.xlu0 %v877_v55, %s6360_s27  ;;  %958 = vrot.lane.b32.xlu1 %v878_v56, %s6360_s27  ;;  %v1062_v55 = vld [vmem:[%s6416_s20 + $0x52] sm:$0xff]  ;;  %v1063_v56 = vld [vmem:[%s6416_s20 + $0x62] sm:$0xff] }
 0x13b   : > { %960 = vrot.lane.b32.xlu2 %v879_v57, %s6360_s27  ;;  %v1064_v57 = vld [vmem:[%s6416_s20 + $0x6a] sm:$0xff] }
 0x13c   : > { %v744_v59 = vpop.permute.xlu0 %743  ;;  %v746_v61 = vpop.permute.xlu1 %745 }
 0x13d   : > { %835 = vst.msk [vmem:[#allocation2 + $0x28] sm:$0xff] %vm829_vm3, %v744_v59  ;;  %v766_v62 = vpop.permute.xlu2 %765 }
 0x13e   : > { %836 = vst.msk [vmem:[#allocation2 + $0x30] sm:$0xff] %vm829_vm3, %v746_v61 }
 0x13f   : > { %846 = vst.msk [vmem:[#allocation2 + $0x80] sm:$0xff] %vm829_vm3, %v766_v62 }
 0x142   : > { %962 = vrot.lane.b32.xlu0 %v880_v63, %s6360_s27  ;;  %964 = vrot.lane.b32.xlu1 %v881_v0, %s6360_s27  ;;  %v1065_v63 = vld [vmem:[%s6416_s20 + $0x7a] sm:$0xff]  ;;  %v1066_v0 = vld [vmem:[%s6416_s20 + $0x82] sm:$0xff] }
 0x143   : > { %966 = vrot.lane.b32.xlu2 %v882_v1, %s6360_s27  ;;  %v1067_v1 = vld [vmem:[%s6416_s20 + $0x92] sm:$0xff] }
 0x144   : > { %v750_v2 = vpop.permute.xlu0 %749  ;;  %v752_v3 = vpop.permute.xlu1 %751 }
 0x145   : > { %838 = vst.msk [vmem:[#allocation2 + $0x40] sm:$0xff] %vm829_vm3, %v750_v2  ;;  %v772_v4 = vpop.permute.xlu2 %771 }
 0x146   : > { %839 = vst.msk [vmem:[#allocation2 + $0x48] sm:$0xff] %vm829_vm3, %v752_v3 }
 0x147   : > { %849 = vst.msk [vmem:[#allocation2 + $0x98] sm:$0xff] %vm829_vm3, %v772_v4 }
 0x14a   : > { %968 = vrot.lane.b32.xlu0 %v883_v6, %s6360_s27  ;;  %970 = vrot.lane.b32.xlu1 %v884_v7, %s6360_s27  ;;  %v1068_v6 = vld [vmem:[%s6416_s20 + $0x9a] sm:$0xff]  ;;  %v1069_v7 = vld [vmem:[%s6416_s20 + $0xaa] sm:$0xff] }
 0x14b   : > { %972 = vrot.lane.b32.xlu2 %v885_v8, %s6360_s27  ;;  %v1070_v8 = vld [vmem:[%s6416_s20 + $0xb2] sm:$0xff] }
 0x14c   : > { %v756_v9 = vpop.permute.xlu0 %755  ;;  %v758_v10 = vpop.permute.xlu1 %757 }
 0x14d   : > { %841 = vst.msk [vmem:[#allocation2 + $0x58] sm:$0xff] %vm829_vm3, %v756_v9  ;;  %v778_v11 = vpop.permute.xlu2 %777 }
 0x14e   : > { %842 = vst.msk [vmem:[#allocation2 + $0x60] sm:$0xff] %vm829_vm3, %v758_v10 }
 0x14f   : > { %852 = vst.msk [vmem:[#allocation2 + $0xb0] sm:$0xff] %vm829_vm3, %v778_v11 }
 0x152   : > { %974 = vrot.lane.b32.xlu0 %v886_v12, %s6360_s27  ;;  %976 = vrot.lane.b32.xlu1 %v887_v13, %s6360_s27  ;;  %v1071_v12 = vld [vmem:[%s6416_s20 + $0xc2] sm:$0xff]  ;;  %v1072_v13 = vld [vmem:[%s6416_s20 + $0xca] sm:$0xff] }
 0x153   : > { %978 = vrot.lane.b32.xlu2 %v888_v15, %s6360_s27  ;;  %v1073_v15 = vld [vmem:[%s6416_s20 + $0xda] sm:$0xff] }
 0x154   : > { %v762_v16 = vpop.permute.xlu0 %761  ;;  %v764_v17 = vpop.permute.xlu1 %763 }
 0x155   : > { %844 = vst.msk [vmem:[#allocation2 + $0x70] sm:$0xff] %vm829_vm3, %v762_v16  ;;  %v784_v19 = vpop.permute.xlu2 %783 }
 0x156   : > { %845 = vst.msk [vmem:[#allocation2 + $0x78] sm:$0xff] %vm829_vm3, %v764_v17 }
 0x157   : > { %855 = vst.msk [vmem:[#allocation2 + $0xc8] sm:$0xff] %vm829_vm3, %v784_v19 }
 0x15a   : > { %980 = vrot.lane.b32.xlu0 %v889_v20, %s6360_s27  ;;  %982 = vrot.lane.b32.xlu1 %v890_v21, %s6360_s27  ;;  %v1074_v20 = vld [vmem:[%s6416_s20 + $0xe2] sm:$0xff]  ;;  %v1075_v21 = vld [vmem:[%s6416_s20 + $0xf2] sm:$0xff] }
 0x15b   : > { %984 = vrot.lane.b32.xlu2 %v891_v22, %s6360_s27  ;;  %v1076_v22 = vld [vmem:[%s6416_s20 + $0xfa] sm:$0xff] }
 0x15c   : > { %v768_v25 = vpop.permute.xlu0 %767  ;;  %v770_v26 = vpop.permute.xlu1 %769 }
 0x15d   : > { %847 = vst.msk [vmem:[#allocation2 + $0x88] sm:$0xff] %vm829_vm3, %v768_v25  ;;  %v790_v28 = vpop.permute.xlu2 %789 }
 0x15e   : > { %848 = vst.msk [vmem:[#allocation2 + $0x90] sm:$0xff] %vm829_vm3, %v770_v26 }
 0x15f   : > { %858 = vst.msk [vmem:[#allocation2 + $0xe0] sm:$0xff] %vm829_vm3, %v790_v28 }
 0x162   : > { %986 = vrot.lane.b32.xlu0 %v892_v29, %s6360_s27  ;;  %988 = vrot.lane.b32.xlu1 %v893_v30, %s6360_s27  ;;  %v1077_v29 = vld [vmem:[%s6416_s20 + $0x10a] sm:$0xff]  ;;  %v1078_v30 = vld [vmem:[%s6416_s20 + $0x112] sm:$0xff] }
 0x163   : > { %1119 = vrot.lane.b32.xlu2 %v1055_v31, %s6361_s28  ;;  %v1079_v31 = vld [vmem:[%s6416_s20 + $0x122] sm:$0xff] }
 0x164   : > { %v774_v34 = vpop.permute.xlu0 %773  ;;  %v776_v35 = vpop.permute.xlu1 %775 }
 0x165   : > { %850 = vst.msk [vmem:[#allocation2 + $0xa0] sm:$0xff] %vm829_vm3, %v774_v34  ;;  %v796_v37 = vpop.permute.xlu2 %795 }
 0x166   : > { %851 = vst.msk [vmem:[#allocation2 + $0xa8] sm:$0xff] %vm829_vm3, %v776_v35 }
 0x167   : > { %861 = vst.msk [vmem:[#allocation2 + $0xf8] sm:$0xff] %vm829_vm3, %v796_v37 }
 0x16a   : > { %1121 = vrot.lane.b32.xlu0 %v1056_v38, %s6361_s28  ;;  %1123 = vrot.lane.b32.xlu1 %v1057_v39, %s6361_s28  ;;  %v1080_v38 = vld [vmem:[%s6416_s20 + $0x12a] sm:$0xff]  ;;  %v1081_v39 = vld [vmem:[%s6416_s20 + $0x13a] sm:$0xff] }
 0x16b   : > { %1125 = vrot.lane.b32.xlu2 %v1058_v40, %s6361_s28  ;;  %v1082_v40 = vld [vmem:[%s6416_s20 + $0x142] sm:$0xff] }
 0x16c   : > { %v780_v43 = vpop.permute.xlu0 %779  ;;  %v782_v44 = vpop.permute.xlu1 %781 }
 0x16d   : > { %853 = vst.msk [vmem:[#allocation2 + $0xb8] sm:$0xff] %vm829_vm3, %v780_v43  ;;  %v931_v45 = vpop.permute.xlu2 %930 }
 0x16e   : > { %854 = vst.msk [vmem:[#allocation2 + $0xc0] sm:$0xff] %vm829_vm3, %v782_v44 }
 0x16f   : > { %1025 = vst.msk [vmem:[#allocation2 + $0x10] sm:$0xff] %vm1022_vm4, %v931_v45 }
 0x172   : > { %1127 = vrot.lane.b32.xlu0 %v1059_v46, %s6361_s28  ;;  %1129 = vrot.lane.b32.xlu1 %v1060_v47, %s6361_s28  ;;  %v1083_v46 = vld [vmem:[%s6416_s20 + $0x152] sm:$0xff]  ;;  %v1084_v47 = vld [vmem:[%s6416_s20 + $0x15a] sm:$0xff] }
 0x173   : > { %1131 = vrot.lane.b32.xlu2 %v1061_v48, %s6361_s28  ;;  %v1085_v48 = vld [vmem:[%s6416_s20 + $0x16a] sm:$0xff] }
 0x174   : > { %v786_v51 = vpop.permute.xlu0 %785  ;;  %v788_v52 = vpop.permute.xlu1 %787 }
 0x175   : > { %856 = vst.msk [vmem:[#allocation2 + $0xd0] sm:$0xff] %vm829_vm3, %v786_v51  ;;  %v937_v54 = vpop.permute.xlu2 %936 }
 0x176   : > { %857 = vst.msk [vmem:[#allocation2 + $0xd8] sm:$0xff] %vm829_vm3, %v788_v52 }
 0x177   : > { %1028 = vst.msk [vmem:[#allocation2 + $0x28] sm:$0xff] %vm1022_vm4, %v937_v54 }
 0x17a   : > { %1133 = vrot.lane.b32.xlu0 %v1062_v55, %s6361_s28  ;;  %1135 = vrot.lane.b32.xlu1 %v1063_v56, %s6361_s28  ;;  %v1086_v55 = vld [vmem:[%s6416_s20 + $0x172] sm:$0xff] }
 0x17b   : > { %1137 = vrot.lane.b32.xlu2 %v1064_v57, %s6361_s28  ;;  %v5851_v56 = vld [vmem:[%s6479_s24 + $0x18] sm:$0xff]  ;;  %v5852_v57 = vld [vmem:[%s6479_s24 + $0x20] sm:$0xff] }
 0x17c   : > { %v792_v59 = vpop.permute.xlu0 %791  ;;  %v794_v61 = vpop.permute.xlu1 %793 }
 0x17d   : > { %859 = vst.msk [vmem:[#allocation2 + $0xe8] sm:$0xff] %vm829_vm3, %v792_v59  ;;  %v943_v62 = vpop.permute.xlu2 %942 }
 0x17e   : > { %860 = vst.msk [vmem:[#allocation2 + $0xf0] sm:$0xff] %vm829_vm3, %v794_v61 }
 0x17f   : > { %1031 = vst.msk [vmem:[#allocation2 + $0x40] sm:$0xff] %vm1022_vm4, %v943_v62 }
 0x182   : > { %1139 = vrot.lane.b32.xlu0 %v1065_v63, %s6361_s28  ;;  %1141 = vrot.lane.b32.xlu1 %v1066_v0, %s6361_s28  ;;  %v5853_v63 = vld [vmem:[%s6479_s24 + $0x30] sm:$0xff]  ;;  %v5854_v0 = vld [vmem:[%s6479_s24 + $0x38] sm:$0xff] }
 0x183   : > { %1143 = vrot.lane.b32.xlu2 %v1067_v1, %s6361_s28  ;;  %v5855_v1 = vld [vmem:[%s6479_s24 + $0x48] sm:$0xff] }
 0x184   : > { %v927_v2 = vpop.permute.xlu0 %926  ;;  %v929_v3 = vpop.permute.xlu1 %928 }
 0x185   : > { %1023 = vst.msk [vmem:[#allocation2] sm:$0xff] %vm1022_vm4, %v927_v2  ;;  %v949_v4 = vpop.permute.xlu2 %948 }
 0x186   : > { %1024 = vst.msk [vmem:[#allocation2 + $0x8] sm:$0xff] %vm1022_vm4, %v929_v3 }
 0x187   : > { %1034 = vst.msk [vmem:[#allocation2 + $0x58] sm:$0xff] %vm1022_vm4, %v949_v4 }
 0x18a   : > { %1145 = vrot.lane.b32.xlu0 %v1068_v6, %s6361_s28  ;;  %1147 = vrot.lane.b32.xlu1 %v1069_v7, %s6361_s28  ;;  %v5857_v6 = vld [vmem:[%s6479_s24 + $0x60] sm:$0xff]  ;;  %v5858_v7 = vld [vmem:[%s6479_s24 + $0x68] sm:$0xff] }
 0x18b   : > { %1149 = vrot.lane.b32.xlu2 %v1070_v8, %s6361_s28 }
 0x18c   : > { %v933_v9 = vpop.permute.xlu0 %932  ;;  %v935_v10 = vpop.permute.xlu1 %934 }
 0x18d   : > { %1026 = vst.msk [vmem:[#allocation2 + $0x18] sm:$0xff] %vm1022_vm4, %v933_v9  ;;  %v955_v11 = vpop.permute.xlu2 %954 }
 0x18e   : > { %1027 = vst.msk [vmem:[#allocation2 + $0x20] sm:$0xff] %vm1022_vm4, %v935_v10 }
 0x18f   : > { %1037 = vst.msk [vmem:[#allocation2 + $0x70] sm:$0xff] %vm1022_vm4, %v955_v11  ;;  %v5860_v11 = vld [vmem:[%s6479_s24 + $0x80] sm:$0xff] }
 0x192   : > { %1151 = vrot.lane.b32.xlu0 %v1071_v12, %s6361_s28  ;;  %1153 = vrot.lane.b32.xlu1 %v1072_v13, %s6361_s28  ;;  %v5861_v12 = vld [vmem:[%s6479_s24 + $0x90] sm:$0xff] }
 0x193   : > { %1155 = vrot.lane.b32.xlu2 %v1073_v15, %s6361_s28 }
 0x194   : > { %v939_v16 = vpop.permute.xlu0 %938  ;;  %v941_v17 = vpop.permute.xlu1 %940 }
 0x195   : > { %1029 = vst.msk [vmem:[#allocation2 + $0x30] sm:$0xff] %vm1022_vm4, %v939_v16  ;;  %v961_v19 = vpop.permute.xlu2 %960  ;;  %v5863_v16 = vld [vmem:[%s6479_s24 + $0xa8] sm:$0xff] }
 0x196   : > { %1030 = vst.msk [vmem:[#allocation2 + $0x38] sm:$0xff] %vm1022_vm4, %v941_v17  ;;  %v5864_v17 = vld [vmem:[%s6479_s24 + $0xb0] sm:$0xff] }
 0x197   : > { %1040 = vst.msk [vmem:[#allocation2 + $0x88] sm:$0xff] %vm1022_vm4, %v961_v19 }
 0x19a   : > { %1157 = vrot.lane.b32.xlu0 %v1074_v20, %s6361_s28  ;;  %1159 = vrot.lane.b32.xlu1 %v1075_v21, %s6361_s28  ;;  %v5866_v21 = vld [vmem:[%s6479_s24 + $0xc8] sm:$0xff] }
 0x19b   : > { %1161 = vrot.lane.b32.xlu2 %v1076_v22, %s6361_s28  ;;  %v5867_v22 = vld [vmem:[%s6479_s24 + $0xd8] sm:$0xff] }
 0x19c   : > { %v945_v25 = vpop.permute.xlu0 %944  ;;  %v947_v26 = vpop.permute.xlu1 %946 }
 0x19d   : > { %1032 = vst.msk [vmem:[#allocation2 + $0x48] sm:$0xff] %vm1022_vm4, %v945_v25  ;;  %v967_v28 = vpop.permute.xlu2 %966 }
 0x19e   : > { %1033 = vst.msk [vmem:[#allocation2 + $0x50] sm:$0xff] %vm1022_vm4, %v947_v26 }
 0x19f   : > { %1043 = vst.msk [vmem:[#allocation2 + $0xa0] sm:$0xff] %vm1022_vm4, %v967_v28  ;;  %v5869_v28 = vld [vmem:[%s6479_s24 + $0xf0] sm:$0xff] }
 0x1a2   : > { %1163 = vrot.lane.b32.xlu0 %v1077_v29, %s6361_s28  ;;  %1165 = vrot.lane.b32.xlu1 %v1078_v30, %s6361_s28 }
 0x1a3   : > { %1167 = vrot.lane.b32.xlu2 %v1079_v31, %s6361_s28 }
 0x1a4   : > { %v951_v34 = vpop.permute.xlu0 %950  ;;  %v953_v35 = vpop.permute.xlu1 %952 }
 0x1a5   : > { %1035 = vst.msk [vmem:[#allocation2 + $0x60] sm:$0xff] %vm1022_vm4, %v951_v34  ;;  %v973_v37 = vpop.permute.xlu2 %972  ;;  %v5881_v34 = vld [vmem:[%s6479_s24 + $0x180] sm:$0xff] }
 0x1a6   : > { %1036 = vst.msk [vmem:[#allocation2 + $0x68] sm:$0xff] %vm1022_vm4, %v953_v35 }
 0x1a7   : > { %1046 = vst.msk [vmem:[#allocation2 + $0xb8] sm:$0xff] %vm1022_vm4, %v973_v37  ;;  %v5883_v37 = vld [vmem:[%s6416_s20 + $0x18] sm:$0xff] }
 0x1aa   : > { %1169 = vrot.lane.b32.xlu0 %v1080_v38, %s6361_s28  ;;  %1171 = vrot.lane.b32.xlu1 %v1081_v39, %s6361_s28  ;;  %v5884_v38 = vld [vmem:[%s6416_s20 + $0x20] sm:$0xff]  ;;  %v5885_v39 = vld [vmem:[%s6416_s20 + $0x30] sm:$0xff] }
 0x1ab   : > { %1173 = vrot.lane.b32.xlu2 %v1082_v40, %s6361_s28 }
 0x1ac   : > { %v957_v43 = vpop.permute.xlu0 %956  ;;  %v959_v44 = vpop.permute.xlu1 %958 }
 0x1ad   : > { %1038 = vst.msk [vmem:[#allocation2 + $0x78] sm:$0xff] %vm1022_vm4, %v957_v43  ;;  %v979_v45 = vpop.permute.xlu2 %978 }
 0x1ae   : > { %1039 = vst.msk [vmem:[#allocation2 + $0x80] sm:$0xff] %vm1022_vm4, %v959_v44  ;;  %v5886_v44 = vld [vmem:[%s6416_s20 + $0x38] sm:$0xff] }
 0x1af   : > { %1049 = vst.msk [vmem:[#allocation2 + $0xd0] sm:$0xff] %vm1022_vm4, %v979_v45  ;;  %v5887_v45 = vld [vmem:[%s6416_s20 + $0x48] sm:$0xff] }
 0x1b2   : > { %1175 = vrot.lane.b32.xlu0 %v1083_v46, %s6361_s28  ;;  %1177 = vrot.lane.b32.xlu1 %v1084_v47, %s6361_s28  ;;  %v5888_v46 = vld [vmem:[%s6416_s20 + $0x50] sm:$0xff] }
 0x1b3   : > { %1179 = vrot.lane.b32.xlu2 %v1085_v48, %s6361_s28 }
 0x1b4   : > { %v963_v51 = vpop.permute.xlu0 %962  ;;  %v965_v52 = vpop.permute.xlu1 %964 }
 0x1b5   : > { %1041 = vst.msk [vmem:[#allocation2 + $0x90] sm:$0xff] %vm1022_vm4, %v963_v51  ;;  %v985_v54 = vpop.permute.xlu2 %984 }
 0x1b6   : > { %1042 = vst.msk [vmem:[#allocation2 + $0x98] sm:$0xff] %vm1022_vm4, %v965_v52  ;;  %v5889_v52 = vld [vmem:[%s6416_s20 + $0x60] sm:$0xff] }
 0x1b7   : > { %1052 = vst.msk [vmem:[#allocation2 + $0xe8] sm:$0xff] %vm1022_vm4, %v985_v54  ;;  %v5890_v54 = vld [vmem:[%s6416_s20 + $0x68] sm:$0xff] }
 0x1ba   : > { %1181 = vrot.lane.b32.xlu0 %v1086_v55, %s6361_s28  ;;  %1313 = vrot.lane.b32.xlu1 %v5851_v56, %s6362_s29  ;;  %v5891_v55 = vld [vmem:[%s6416_s20 + $0x78] sm:$0xff] }
 0x1bb   : > { %1315 = vrot.lane.b32.xlu2 %v5852_v57, %s6362_s29 }
 0x1bc   : > { %v969_v59 = vpop.permute.xlu0 %968  ;;  %v971_v61 = vpop.permute.xlu1 %970 }
 0x1bd   : > { %1044 = vst.msk [vmem:[#allocation2 + $0xa8] sm:$0xff] %vm1022_vm4, %v969_v59  ;;  %v1120_v62 = vpop.permute.xlu2 %1119 }
 0x1be   : > { %1045 = vst.msk [vmem:[#allocation2 + $0xb0] sm:$0xff] %vm1022_vm4, %v971_v61  ;;  %v5892_v61 = vld [vmem:[%s6416_s20 + $0x80] sm:$0xff] }
 0x1bf   : > { %1216 = vst.msk [vmem:[#allocation2] sm:$0xff] %vm1215_vm5, %v1120_v62  ;;  %v5893_v62 = vld [vmem:[%s6416_s20 + $0x90] sm:$0xff] }
 0x1c2   : > { %1317 = vrot.lane.b32.xlu0 %v5853_v63, %s6362_s29  ;;  %1319 = vrot.lane.b32.xlu1 %v5854_v0, %s6362_s29  ;;  %v5894_v63 = vld [vmem:[%s6416_s20 + $0x98] sm:$0xff] }
 0x1c3   : > { %1321 = vrot.lane.b32.xlu2 %v5855_v1, %s6362_s29 }
 0x1c4   : > { %v975_v2 = vpop.permute.xlu0 %974  ;;  %v977_v3 = vpop.permute.xlu1 %976 }
 0x1c5   : > { %1047 = vst.msk [vmem:[#allocation2 + $0xc0] sm:$0xff] %vm1022_vm4, %v975_v2  ;;  %v1126_v4 = vpop.permute.xlu2 %1125 }
 0x1c6   : > { %1048 = vst.msk [vmem:[#allocation2 + $0xc8] sm:$0xff] %vm1022_vm4, %v977_v3  ;;  %v5895_v3 = vld [vmem:[%s6416_s20 + $0xa8] sm:$0xff] }
 0x1c7   : > { %1219 = vst.msk [vmem:[#allocation2 + $0x18] sm:$0xff] %vm1215_vm5, %v1126_v4  ;;  %v5896_v4 = vld [vmem:[%s6416_s20 + $0xb0] sm:$0xff] }
 0x1ca   : > { %1323 = vrot.lane.b32.xlu0 %v6529_v53, %s6362_s29  ;;  %1325 = vrot.lane.b32.xlu1 %v5857_v6, %s6362_s29  ;;  %v5897_v6 = vld [vmem:[%s6416_s20 + $0xc0] sm:$0xff] }
 0x1cb   : > { %1327 = vrot.lane.b32.xlu2 %v5858_v7, %s6362_s29 }
 0x1cc   : > { %v981_v8 = vpop.permute.xlu0 %980  ;;  %v983_v9 = vpop.permute.xlu1 %982 }
 0x1cd   : > { %1050 = vst.msk [vmem:[#allocation2 + $0xd8] sm:$0xff] %vm1022_vm4, %v981_v8  ;;  %v1132_v10 = vpop.permute.xlu2 %1131 }
 0x1ce   : > { %1051 = vst.msk [vmem:[#allocation2 + $0xe0] sm:$0xff] %vm1022_vm4, %v983_v9 }
 0x1cf   : > { %1222 = vst.msk [vmem:[#allocation2 + $0x30] sm:$0xff] %vm1215_vm5, %v1132_v10  ;;  %v5898_v10 = vld [vmem:[%s6416_s20 + $0xc8] sm:$0xff] }
 0x1d2   : > { %1329 = vrot.lane.b32.xlu0 %v6545_v60, %s6362_s29  ;;  %1331 = vrot.lane.b32.xlu1 %v5860_v11, %s6362_s29  ;;  %v5899_v11 = vld [vmem:[%s6416_s20 + $0xd8] sm:$0xff] }
 0x1d3   : > { %1333 = vrot.lane.b32.xlu2 %v5861_v12, %s6362_s29  ;;  %v5900_v12 = vld [vmem:[%s6416_s20 + $0xe0] sm:$0xff] }
 0x1d4   : > { %v987_v53 = vpop.permute.xlu0 %986  ;;  %v989_v13 = vpop.permute.xlu1 %988 }
 0x1d5   : > { %1053 = vst.msk [vmem:[#allocation2 + $0xf0] sm:$0xff] %vm1022_vm4, %v987_v53  ;;  %v1138_v15 = vpop.permute.xlu2 %1137 }
 0x1d6   : > { %1054 = vst.msk [vmem:[#allocation2 + $0xf8] sm:$0xff] %vm1022_vm4, %v989_v13 }
 0x1d7   : > { %1225 = vst.msk [vmem:[#allocation2 + $0x48] sm:$0xff] %vm1215_vm5, %v1138_v15 }
 0x1da   : > { %1335 = vrot.lane.b32.xlu0 %v6563_v5, %s6362_s29  ;;  %1337 = vrot.lane.b32.xlu1 %v5863_v16, %s6362_s29  ;;  %v5901_v16 = vld [vmem:[%s6416_s20 + $0xf0] sm:$0xff] }
 0x1db   : > { %1339 = vrot.lane.b32.xlu2 %v5864_v17, %s6362_s29  ;;  %v5902_v17 = vld [vmem:[%s6416_s20 + $0xf8] sm:$0xff] }
 0x1dc   : > { %v1122_v60 = vpop.permute.xlu0 %1121  ;;  %v1124_v19 = vpop.permute.xlu1 %1123 }
 0x1dd   : > { %1217 = vst.msk [vmem:[#allocation2 + $0x8] sm:$0xff] %vm1215_vm5, %v1122_v60  ;;  %v1144_v20 = vpop.permute.xlu2 %1143  ;;  %v5903_v60 = vld [vmem:[%s6416_s20 + $0x108] sm:$0xff] }
 0x1de   : > { %1218 = vst.msk [vmem:[#allocation2 + $0x10] sm:$0xff] %vm1215_vm5, %v1124_v19 }
 0x1df   : > { %1228 = vst.msk [vmem:[#allocation2 + $0x60] sm:$0xff] %vm1215_vm5, %v1144_v20 }
 0x1e2   : > { %1341 = vrot.lane.b32.xlu0 %v6581_v14, %s6362_s29  ;;  %1343 = vrot.lane.b32.xlu1 %v5866_v21, %s6362_s29 }
 0x1e3   : > { %1345 = vrot.lane.b32.xlu2 %v5867_v22, %s6362_s29  ;;  %v5904_v22 = vld [vmem:[%s6416_s20 + $0x110] sm:$0xff] }
 0x1e4   : > { %v1128_v5 = vpop.permute.xlu0 %1127  ;;  %v1130_v25 = vpop.permute.xlu1 %1129 }
 0x1e5   : > { %1220 = vst.msk [vmem:[#allocation2 + $0x20] sm:$0xff] %vm1215_vm5, %v1128_v5  ;;  %v1150_v26 = vpop.permute.xlu2 %1149  ;;  %v5905_v5 = vld [vmem:[%s6416_s20 + $0x120] sm:$0xff] }
 0x1e6   : > { %1221 = vst.msk [vmem:[#allocation2 + $0x28] sm:$0xff] %vm1215_vm5, %v1130_v25  ;;  %v5906_v25 = vld [vmem:[%s6416_s20 + $0x128] sm:$0xff] }
 0x1e7   : > { %1231 = vst.msk [vmem:[#allocation2 + $0x78] sm:$0xff] %vm1215_vm5, %v1150_v26 }
 0x1ea   : > { %1347 = vrot.lane.b32.xlu0 %v6602_v23, %s6362_s29  ;;  %1349 = vrot.lane.b32.xlu1 %v5869_v28, %s6362_s29 }
 0x1eb   : > { %1351 = vrot.lane.b32.xlu2 %v6607_v24, %s6362_s29 }
 0x1ec   : > { %v1134_v14 = vpop.permute.xlu0 %1133  ;;  %v1136_v29 = vpop.permute.xlu1 %1135 }
 0x1ed   : > { %1223 = vst.msk [vmem:[#allocation2 + $0x38] sm:$0xff] %vm1215_vm5, %v1134_v14  ;;  %v1156_v30 = vpop.permute.xlu2 %1155 }
 0x1ee   : > { %1224 = vst.msk [vmem:[#allocation2 + $0x40] sm:$0xff] %vm1215_vm5, %v1136_v29  ;;  %v5907_v29 = vld [vmem:[%s6416_s20 + $0x138] sm:$0xff] }
 0x1ef   : > { %1234 = vst.msk [vmem:[#allocation2 + $0x90] sm:$0xff] %vm1215_vm5, %v1156_v30  ;;  %v5908_v30 = vld [vmem:[%s6416_s20 + $0x140] sm:$0xff] }
 0x1f2   : > { %1353 = vrot.lane.b32.xlu0 %v6626_v32, %s6362_s29  ;;  %1355 = vrot.lane.b32.xlu1 %v6590_v18, %s6362_s29 }
 0x1f3   : > { %1357 = vrot.lane.b32.xlu2 %v6631_v33, %s6362_s29 }
 0x1f4   : > { %v1140_v23 = vpop.permute.xlu0 %1139  ;;  %v1142_v31 = vpop.permute.xlu1 %1141 }
 0x1f5   : > { %1226 = vst.msk [vmem:[#allocation2 + $0x50] sm:$0xff] %vm1215_vm5, %v1140_v23  ;;  %v1162_v24 = vpop.permute.xlu2 %1161  ;;  %v5909_v23 = vld [vmem:[%s6416_s20 + $0x150] sm:$0xff] }
 0x1f6   : > { %1227 = vst.msk [vmem:[#allocation2 + $0x58] sm:$0xff] %vm1215_vm5, %v1142_v31 }
 0x1f7   : > { %1237 = vst.msk [vmem:[#allocation2 + $0xa8] sm:$0xff] %vm1215_vm5, %v1162_v24 }
 0x1fa   : > { %1359 = vrot.lane.b32.xlu0 %v6650_v41, %s6362_s29  ;;  %1361 = vrot.lane.b32.xlu1 %v6614_v27, %s6362_s29 }
 0x1fb   : > { %1363 = vrot.lane.b32.xlu2 %v6655_v42, %s6362_s29 }
 0x1fc   : > { %v1146_v18 = vpop.permute.xlu0 %1145  ;;  %v1148_v32 = vpop.permute.xlu1 %1147 }
 0x1fd   : > { %1229 = vst.msk [vmem:[#allocation2 + $0x68] sm:$0xff] %vm1215_vm5, %v1146_v18  ;;  %v1168_v33 = vpop.permute.xlu2 %1167 }
 0x1fe   : > { %1230 = vst.msk [vmem:[#allocation2 + $0x70] sm:$0xff] %vm1215_vm5, %v1148_v32  ;;  %v5910_v32 = vld [vmem:[%s6416_s20 + $0x158] sm:$0xff] }
 0x1ff   : > { %1240 = vst.msk [vmem:[#allocation2 + $0xc0] sm:$0xff] %vm1215_vm5, %v1168_v33  ;;  %v5911_v33 = vld [vmem:[%s6416_s20 + $0x168] sm:$0xff] }
 0x202   : > { %1365 = vrot.lane.b32.xlu0 %v6669_v49, %s6362_s29  ;;  %1367 = vrot.lane.b32.xlu1 %v6638_v36, %s6362_s29  ;;  %v5882_v49 = vld [vmem:[%s6479_s24 + $0x188] sm:$0xff] }
 0x203   : > { %1369 = vrot.lane.b32.xlu2 %v6674_v50, %s6362_s29 }
 0x204   : > { %v1152_v27 = vpop.permute.xlu0 %1151  ;;  %v1154_v41 = vpop.permute.xlu1 %1153 }
 0x205   : > { %1232 = vst.msk [vmem:[#allocation2 + $0x80] sm:$0xff] %vm1215_vm5, %v1152_v27  ;;  %v1174_v42 = vpop.permute.xlu2 %1173  ;;  %v5912_v27 = vld [vmem:[%s6416_s20 + $0x170] sm:$0xff] }
 0x206   : > { %1233 = vst.msk [vmem:[#allocation2 + $0x88] sm:$0xff] %vm1215_vm5, %v1154_v41 }
 0x207   : > { %1243 = vst.msk [vmem:[#allocation2 + $0xd8] sm:$0xff] %vm1215_vm5, %v1174_v42 }
 0x20a   : > { %1371 = vrot.lane.b32.xlu0 %v6688_v58, %s6362_s29  ;;  %1373 = vrot.lane.b32.xlu1 %v5881_v34, %s6362_s29 }
 0x20b   : > { %1375 = vrot.lane.b32.xlu2 %v5882_v49, %s6362_s29  ;;  %v5913_v49 = vld [vmem:[%s6416_s20 + $0x180] sm:$0xff] }
 0x20c   : > { %v1158_v36 = vpop.permute.xlu0 %1157  ;;  %v1160_v35 = vpop.permute.xlu1 %1159 }
 0x20d   : > { %1235 = vst.msk [vmem:[#allocation2 + $0x98] sm:$0xff] %vm1215_vm5, %v1158_v36  ;;  %v1180_v50 = vpop.permute.xlu2 %1179  ;;  %v5914_v36 = vld [vmem:[%s6416_s20 + $0x188] sm:$0xff] }
 0x20e   : > { %1236 = vst.msk [vmem:[#allocation2 + $0xa0] sm:$0xff] %vm1215_vm5, %v1160_v35  ;;  %v5915_v35 = vld [vmem:[%s6479_s24 + $0x19] sm:$0xff] }
 0x20f   : > { %1246 = vst.msk [vmem:[#allocation2 + $0xf0] sm:$0xff] %vm1215_vm5, %v1180_v50 }
 0x212   : > { %1507 = vrot.lane.b32.xlu0 %v5883_v37, %s6363_s30  ;;  %1509 = vrot.lane.b32.xlu1 %v5884_v38, %s6363_s30 }
 0x213   : > { %1511 = vrot.lane.b32.xlu2 %v5885_v39, %s6363_s30  ;;  %v5916_v39 = vld [vmem:[%s6479_s24 + $0x21] sm:$0xff] }
 0x214   : > { %v1164_v58 = vpop.permute.xlu0 %1163  ;;  %v1166_v40 = vpop.permute.xlu1 %1165 }
 0x215   : > { %1238 = vst.msk [vmem:[#allocation2 + $0xb0] sm:$0xff] %vm1215_vm5, %v1164_v58  ;;  %v1316_v43 = vpop.permute.xlu2 %1315  ;;  %v5917_v58 = vld [vmem:[%s6479_s24 + $0x31] sm:$0xff] }
 0x216   : > { %1239 = vst.msk [vmem:[#allocation2 + $0xb8] sm:$0xff] %vm1215_vm5, %v1166_v40  ;;  %v5918_v40 = vld [vmem:[%s6479_s24 + $0x39] sm:$0xff] }
 0x217   : > { %1411 = vst.msk [vmem:[#allocation2 + $0x8] sm:$0xff] %vm1409_vm6, %v1316_v43 }
 0x21a   : > { %1513 = vrot.lane.b32.xlu0 %v5886_v44, %s6363_s30  ;;  %1515 = vrot.lane.b32.xlu1 %v5887_v45, %s6363_s30 }
 0x21b   : > { %1517 = vrot.lane.b32.xlu2 %v5888_v46, %s6363_s30  ;;  %v5919_v46 = vld [vmem:[%s6479_s24 + $0x49] sm:$0xff] }
 0x21c   : > { %v1170_v47 = vpop.permute.xlu0 %1169  ;;  %v1172_v48 = vpop.permute.xlu1 %1171 }
 0x21d   : > { %1241 = vst.msk [vmem:[#allocation2 + $0xc8] sm:$0xff] %vm1215_vm5, %v1170_v47  ;;  %v1322_v51 = vpop.permute.xlu2 %1321  ;;  %v5920_v47 = vld [vmem:[%s6479_s24 + $0x51] sm:$0xff] }
 0x21e   : > { %1242 = vst.msk [vmem:[#allocation2 + $0xd0] sm:$0xff] %vm1215_vm5, %v1172_v48  ;;  %v5921_v48 = vld [vmem:[%s6479_s24 + $0x61] sm:$0xff] }
 0x21f   : > { %1414 = vst.msk [vmem:[#allocation2 + $0x20] sm:$0xff] %vm1409_vm6, %v1322_v51 }
 0x222   : > { %1519 = vrot.lane.b32.xlu0 %v5889_v52, %s6363_s30  ;;  %1521 = vrot.lane.b32.xlu1 %v5890_v54, %s6363_s30 }
 0x223   : > { %1523 = vrot.lane.b32.xlu2 %v5891_v55, %s6363_s30  ;;  %v5922_v55 = vld [vmem:[%s6479_s24 + $0x69] sm:$0xff] }
 0x224   : > { %v1176_v56 = vpop.permute.xlu0 %1175  ;;  %v1178_v57 = vpop.permute.xlu1 %1177 }
 0x225   : > { %1244 = vst.msk [vmem:[#allocation2 + $0xe0] sm:$0xff] %vm1215_vm5, %v1176_v56  ;;  %v1328_v59 = vpop.permute.xlu2 %1327  ;;  %v5923_v56 = vld [vmem:[%s6479_s24 + $0x79] sm:$0xff] }
 0x226   : > { %1245 = vst.msk [vmem:[#allocation2 + $0xe8] sm:$0xff] %vm1215_vm5, %v1178_v57  ;;  %v5924_v57 = vld [vmem:[%s6479_s24 + $0x81] sm:$0xff] }
 0x227   : > { %1417 = vst.msk [vmem:[#allocation2 + $0x38] sm:$0xff] %vm1409_vm6, %v1328_v59 }
 0x22a   : > { %1525 = vrot.lane.b32.xlu0 %v5892_v61, %s6363_s30  ;;  %1527 = vrot.lane.b32.xlu1 %v5893_v62, %s6363_s30 }
 0x22b   : > { %1529 = vrot.lane.b32.xlu2 %v5894_v63, %s6363_s30  ;;  %v5925_v63 = vld [vmem:[%s6479_s24 + $0x91] sm:$0xff] }
 0x22c   : > { %v1182_v0 = vpop.permute.xlu0 %1181  ;;  %v1314_v1 = vpop.permute.xlu1 %1313 }
 0x22d   : > { %1247 = vst.msk [vmem:[#allocation2 + $0xf8] sm:$0xff] %vm1215_vm5, %v1182_v0  ;;  %v1334_v2 = vpop.permute.xlu2 %1333  ;;  %v5926_v0 = vld [vmem:[%s6479_s24 + $0x99] sm:$0xff] }
 0x22e   : > { %1410 = vst.msk [vmem:[#allocation2] sm:$0xff] %vm1409_vm6, %v1314_v1  ;;  %v5927_v1 = vld [vmem:[%s6479_s24 + $0xa9] sm:$0xff] }
 0x22f   : > { %1420 = vst.msk [vmem:[#allocation2 + $0x50] sm:$0xff] %vm1409_vm6, %v1334_v2 }
 0x232   : > { %1531 = vrot.lane.b32.xlu0 %v5895_v3, %s6363_s30  ;;  %1533 = vrot.lane.b32.xlu1 %v5896_v4, %s6363_s30 }
 0x233   : > { %1535 = vrot.lane.b32.xlu2 %v5897_v6, %s6363_s30  ;;  %v5928_v6 = vld [vmem:[%s6479_s24 + $0xb1] sm:$0xff] }
 0x234   : > { %v1318_v7 = vpop.permute.xlu0 %1317  ;;  %v1320_v8 = vpop.permute.xlu1 %1319 }
 0x235   : > { %1412 = vst.msk [vmem:[#allocation2 + $0x10] sm:$0xff] %vm1409_vm6, %v1318_v7  ;;  %v1340_v9 = vpop.permute.xlu2 %1339  ;;  %v5929_v7 = vld [vmem:[%s6479_s24 + $0xc1] sm:$0xff] }
 0x236   : > { %1413 = vst.msk [vmem:[#allocation2 + $0x18] sm:$0xff] %vm1409_vm6, %v1320_v8  ;;  %v5930_v8 = vld [vmem:[%s6479_s24 + $0xc9] sm:$0xff] }
 0x237   : > { %1423 = vst.msk [vmem:[#allocation2 + $0x68] sm:$0xff] %vm1409_vm6, %v1340_v9 }
 0x23a   : > { %1537 = vrot.lane.b32.xlu0 %v5898_v10, %s6363_s30  ;;  %1539 = vrot.lane.b32.xlu1 %v5899_v11, %s6363_s30 }
 0x23b   : > { %1541 = vrot.lane.b32.xlu2 %v5900_v12, %s6363_s30  ;;  %v5931_v12 = vld [vmem:[%s6479_s24 + $0xd9] sm:$0xff] }
 0x23c   : > { %v1324_v53 = vpop.permute.xlu0 %1323  ;;  %v1326_v13 = vpop.permute.xlu1 %1325 }
 0x23d   : > { %1415 = vst.msk [vmem:[#allocation2 + $0x28] sm:$0xff] %vm1409_vm6, %v1324_v53  ;;  %v1346_v15 = vpop.permute.xlu2 %1345  ;;  %v5932_v53 = vld [vmem:[%s6479_s24 + $0xe1] sm:$0xff] }
 0x23e   : > { %1416 = vst.msk [vmem:[#allocation2 + $0x30] sm:$0xff] %vm1409_vm6, %v1326_v13  ;;  %v5933_v13 = vld [vmem:[%s6479_s24 + $0xf1] sm:$0xff] }
 0x23f   : > { %1426 = vst.msk [vmem:[#allocation2 + $0x80] sm:$0xff] %vm1409_vm6, %v1346_v15 }
 0x242   : > { %1543 = vrot.lane.b32.xlu0 %v5901_v16, %s6363_s30  ;;  %1545 = vrot.lane.b32.xlu1 %v5902_v17, %s6363_s30 }
 0x243   : > { %1547 = vrot.lane.b32.xlu2 %v5903_v60, %s6363_s30  ;;  %v5934_v60 = vld [vmem:[%s6479_s24 + $0xf9] sm:$0xff] }
 0x244   : > { %v1330_v19 = vpop.permute.xlu0 %1329  ;;  %v1332_v20 = vpop.permute.xlu1 %1331 }
 0x245   : > { %1418 = vst.msk [vmem:[#allocation2 + $0x40] sm:$0xff] %vm1409_vm6, %v1330_v19  ;;  %v1352_v21 = vpop.permute.xlu2 %1351  ;;  %v5935_v19 = vld [vmem:[%s6479_s24 + $0x109] sm:$0xff] }
 0x246   : > { %1419 = vst.msk [vmem:[#allocation2 + $0x48] sm:$0xff] %vm1409_vm6, %v1332_v20  ;;  %v5936_v20 = vld [vmem:[%s6479_s24 + $0x111] sm:$0xff] }
 0x247   : > { %1429 = vst.msk [vmem:[#allocation2 + $0x98] sm:$0xff] %vm1409_vm6, %v1352_v21 }
 0x24a   : > { %1549 = vrot.lane.b32.xlu0 %v5904_v22, %s6363_s30  ;;  %1551 = vrot.lane.b32.xlu1 %v5905_v5, %s6363_s30 }
 0x24b   : > { %1553 = vrot.lane.b32.xlu2 %v5906_v25, %s6363_s30  ;;  %v5937_v25 = vld [vmem:[%s6479_s24 + $0x121] sm:$0xff] }
 0x24c   : > { %v1336_v26 = vpop.permute.xlu0 %1335  ;;  %v1338_v28 = vpop.permute.xlu1 %1337 }
 0x24d   : > { %1421 = vst.msk [vmem:[#allocation2 + $0x58] sm:$0xff] %vm1409_vm6, %v1336_v26  ;;  %v1358_v14 = vpop.permute.xlu2 %1357  ;;  %v5938_v26 = vld [vmem:[%s6479_s24 + $0x129] sm:$0xff] }
 0x24e   : > { %1422 = vst.msk [vmem:[#allocation2 + $0x60] sm:$0xff] %vm1409_vm6, %v1338_v28  ;;  %v5939_v28 = vld [vmem:[%s6479_s24 + $0x139] sm:$0xff] }
 0x24f   : > { %1432 = vst.msk [vmem:[#allocation2 + $0xb0] sm:$0xff] %vm1409_vm6, %v1358_v14 }
 0x252   : > { %1555 = vrot.lane.b32.xlu0 %v5907_v29, %s6363_s30  ;;  %1557 = vrot.lane.b32.xlu1 %v5908_v30, %s6363_s30 }
 0x253   : > { %1559 = vrot.lane.b32.xlu2 %v5909_v23, %s6363_s30  ;;  %v5940_v23 = vld [vmem:[%s6479_s24 + $0x141] sm:$0xff] }
 0x254   : > { %v1342_v31 = vpop.permute.xlu0 %1341  ;;  %v1344_v24 = vpop.permute.xlu1 %1343 }
 0x255   : > { %1424 = vst.msk [vmem:[#allocation2 + $0x70] sm:$0xff] %vm1409_vm6, %v1342_v31  ;;  %v1364_v18 = vpop.permute.xlu2 %1363  ;;  %v5941_v31 = vld [vmem:[%s6479_s24 + $0x151] sm:$0xff] }
 0x256   : > { %1425 = vst.msk [vmem:[#allocation2 + $0x78] sm:$0xff] %vm1409_vm6, %v1344_v24  ;;  %v5942_v24 = vld [vmem:[%s6479_s24 + $0x159] sm:$0xff] }
 0x257   : > { %1435 = vst.msk [vmem:[#allocation2 + $0xc8] sm:$0xff] %vm1409_vm6, %v1364_v18 }
 0x25a   : > { %1561 = vrot.lane.b32.xlu0 %v5910_v32, %s6363_s30  ;;  %1563 = vrot.lane.b32.xlu1 %v5911_v33, %s6363_s30 }
 0x25b   : > { %1565 = vrot.lane.b32.xlu2 %v5912_v27, %s6363_s30  ;;  %v5943_v27 = vld [vmem:[%s6479_s24 + $0x169] sm:$0xff] }
 0x25c   : > { %v1348_v41 = vpop.permute.xlu0 %1347  ;;  %v1350_v42 = vpop.permute.xlu1 %1349 }
 0x25d   : > { %1427 = vst.msk [vmem:[#allocation2 + $0x88] sm:$0xff] %vm1409_vm6, %v1348_v41  ;;  %v1370_v34 = vpop.permute.xlu2 %1369  ;;  %v5944_v41 = vld [vmem:[%s6479_s24 + $0x171] sm:$0xff] }
 0x25e   : > { %1428 = vst.msk [vmem:[#allocation2 + $0x90] sm:$0xff] %vm1409_vm6, %v1350_v42  ;;  %v5945_v42 = vld [vmem:[%s6479_s24 + $0x181] sm:$0xff] }
 0x25f   : > { %1438 = vst.msk [vmem:[#allocation2 + $0xe0] sm:$0xff] %vm1409_vm6, %v1370_v34 }
 0x262   : > { %1567 = vrot.lane.b32.xlu0 %v5913_v49, %s6363_s30  ;;  %1569 = vrot.lane.b32.xlu1 %v5914_v36, %s6363_s30 }
 0x263   : > { %1700 = vrot.lane.b32.xlu2 %v5915_v35, %s6364_s5  ;;  %v5946_v35 = vld [vmem:[%s6479_s24 + $0x189] sm:$0xff] }
 0x264   : > { %v1354_v50 = vpop.permute.xlu0 %1353  ;;  %v1356_v37 = vpop.permute.xlu1 %1355 }
 0x265   : > { %1430 = vst.msk [vmem:[#allocation2 + $0xa0] sm:$0xff] %vm1409_vm6, %v1354_v50  ;;  %v1376_v38 = vpop.permute.xlu2 %1375  ;;  %v5947_v50 = vld [vmem:[%s6416_s20 + $0x19] sm:$0xff] }
 0x266   : > { %1431 = vst.msk [vmem:[#allocation2 + $0xa8] sm:$0xff] %vm1409_vm6, %v1356_v37  ;;  %v5948_v37 = vld [vmem:[%s6416_s20 + $0x21] sm:$0xff] }
 0x267   : > { %1441 = vst.msk [vmem:[#allocation2 + $0xf8] sm:$0xff] %vm1409_vm6, %v1376_v38 }
 0x26a   : > { %1702 = vrot.lane.b32.xlu0 %v5916_v39, %s6364_s5  ;;  %1704 = vrot.lane.b32.xlu1 %v5917_v58, %s6364_s5 }
 0x26b   : > { %1706 = vrot.lane.b32.xlu2 %v5918_v40, %s6364_s5  ;;  %v5949_v40 = vld [vmem:[%s6416_s20 + $0x31] sm:$0xff] }
 0x26c   : > { %v1360_v43 = vpop.permute.xlu0 %1359  ;;  %v1362_v44 = vpop.permute.xlu1 %1361 }
 0x26d   : > { %1433 = vst.msk [vmem:[#allocation2 + $0xb8] sm:$0xff] %vm1409_vm6, %v1360_v43  ;;  %v1512_v45 = vpop.permute.xlu2 %1511  ;;  %v5950_v43 = vld [vmem:[%s6416_s20 + $0x39] sm:$0xff] }
 0x26e   : > { %1434 = vst.msk [vmem:[#allocation2 + $0xc0] sm:$0xff] %vm1409_vm6, %v1362_v44  ;;  %v5951_v44 = vld [vmem:[%s6416_s20 + $0x49] sm:$0xff] }
 0x26f   : > { %1606 = vst.msk [vmem:[#allocation2 + $0x10] sm:$0xff] %vm1603_vm7, %v1512_v45 }
 0x272   : > { %1708 = vrot.lane.b32.xlu0 %v5919_v46, %s6364_s5  ;;  %1710 = vrot.lane.b32.xlu1 %v5920_v47, %s6364_s5 }
 0x273   : > { %1712 = vrot.lane.b32.xlu2 %v5921_v48, %s6364_s5  ;;  %v5952_v48 = vld [vmem:[%s6416_s20 + $0x51] sm:$0xff] }
 0x274   : > { %v1366_v51 = vpop.permute.xlu0 %1365  ;;  %v1368_v52 = vpop.permute.xlu1 %1367 }
 0x275   : > { %1436 = vst.msk [vmem:[#allocation2 + $0xd0] sm:$0xff] %vm1409_vm6, %v1366_v51  ;;  %v1518_v54 = vpop.permute.xlu2 %1517  ;;  %v5953_v51 = vld [vmem:[%s6416_s20 + $0x61] sm:$0xff] }
 0x276   : > { %1437 = vst.msk [vmem:[#allocation2 + $0xd8] sm:$0xff] %vm1409_vm6, %v1368_v52  ;;  %v5954_v52 = vld [vmem:[%s6416_s20 + $0x69] sm:$0xff] }
 0x277   : > { %1609 = vst.msk [vmem:[#allocation2 + $0x28] sm:$0xff] %vm1603_vm7, %v1518_v54 }
 0x27a   : > { %1714 = vrot.lane.b32.xlu0 %v5922_v55, %s6364_s5  ;;  %1716 = vrot.lane.b32.xlu1 %v5923_v56, %s6364_s5 }
 0x27b   : > { %1718 = vrot.lane.b32.xlu2 %v5924_v57, %s6364_s5  ;;  %v5955_v57 = vld [vmem:[%s6416_s20 + $0x79] sm:$0xff] }
 0x27c   : > { %v1372_v59 = vpop.permute.xlu0 %1371  ;;  %v1374_v61 = vpop.permute.xlu1 %1373 }
 0x27d   : > { %1439 = vst.msk [vmem:[#allocation2 + $0xe8] sm:$0xff] %vm1409_vm6, %v1372_v59  ;;  %v1524_v62 = vpop.permute.xlu2 %1523  ;;  %v5956_v59 = vld [vmem:[%s6416_s20 + $0x81] sm:$0xff] }
 0x27e   : > { %1440 = vst.msk [vmem:[#allocation2 + $0xf0] sm:$0xff] %vm1409_vm6, %v1374_v61  ;;  %v5957_v61 = vld [vmem:[%s6416_s20 + $0x91] sm:$0xff] }
 0x27f   : > { %1612 = vst.msk [vmem:[#allocation2 + $0x40] sm:$0xff] %vm1603_vm7, %v1524_v62 }
 0x282   : > { %1720 = vrot.lane.b32.xlu0 %v5925_v63, %s6364_s5  ;;  %1722 = vrot.lane.b32.xlu1 %v5926_v0, %s6364_s5 }
 0x283   : > { %1724 = vrot.lane.b32.xlu2 %v5927_v1, %s6364_s5  ;;  %v5958_v1 = vld [vmem:[%s6416_s20 + $0x99] sm:$0xff] }
 0x284   : > { %v1508_v2 = vpop.permute.xlu0 %1507  ;;  %v1510_v3 = vpop.permute.xlu1 %1509 }
 0x285   : > { %1604 = vst.msk [vmem:[#allocation2] sm:$0xff] %vm1603_vm7, %v1508_v2  ;;  %v1530_v4 = vpop.permute.xlu2 %1529  ;;  %v5959_v2 = vld [vmem:[%s6416_s20 + $0xa9] sm:$0xff] }
 0x286   : > { %1605 = vst.msk [vmem:[#allocation2 + $0x8] sm:$0xff] %vm1603_vm7, %v1510_v3  ;;  %v5960_v3 = vld [vmem:[%s6416_s20 + $0xb1] sm:$0xff] }
 0x287   : > { %1615 = vst.msk [vmem:[#allocation2 + $0x58] sm:$0xff] %vm1603_vm7, %v1530_v4 }
 0x28a   : > { %1726 = vrot.lane.b32.xlu0 %v5928_v6, %s6364_s5  ;;  %1728 = vrot.lane.b32.xlu1 %v5929_v7, %s6364_s5 }
 0x28b   : > { %1730 = vrot.lane.b32.xlu2 %v5930_v8, %s6364_s5  ;;  %v5961_v8 = vld [vmem:[%s6416_s20 + $0xc1] sm:$0xff] }
 0x28c   : > { %v1514_v9 = vpop.permute.xlu0 %1513  ;;  %v1516_v10 = vpop.permute.xlu1 %1515 }
 0x28d   : > { %1607 = vst.msk [vmem:[#allocation2 + $0x18] sm:$0xff] %vm1603_vm7, %v1514_v9  ;;  %v1536_v11 = vpop.permute.xlu2 %1535  ;;  %v5962_v9 = vld [vmem:[%s6416_s20 + $0xc9] sm:$0xff] }
 0x28e   : > { %1608 = vst.msk [vmem:[#allocation2 + $0x20] sm:$0xff] %vm1603_vm7, %v1516_v10  ;;  %v5963_v10 = vld [vmem:[%s6416_s20 + $0xd9] sm:$0xff] }
 0x28f   : > { %1618 = vst.msk [vmem:[#allocation2 + $0x70] sm:$0xff] %vm1603_vm7, %v1536_v11 }
 0x292   : > { %1732 = vrot.lane.b32.xlu0 %v5931_v12, %s6364_s5  ;;  %1734 = vrot.lane.b32.xlu1 %v5932_v53, %s6364_s5 }
 0x293   : > { %1736 = vrot.lane.b32.xlu2 %v5933_v13, %s6364_s5  ;;  %v5964_v13 = vld [vmem:[%s6416_s20 + $0xe1] sm:$0xff] }
 0x294   : > { %v1520_v15 = vpop.permute.xlu0 %1519  ;;  %v1522_v16 = vpop.permute.xlu1 %1521 }
 0x295   : > { %1610 = vst.msk [vmem:[#allocation2 + $0x30] sm:$0xff] %vm1603_vm7, %v1520_v15  ;;  %v1542_v17 = vpop.permute.xlu2 %1541  ;;  %v5965_v15 = vld [vmem:[%s6416_s20 + $0xf1] sm:$0xff] }
 0x296   : > { %1611 = vst.msk [vmem:[#allocation2 + $0x38] sm:$0xff] %vm1603_vm7, %v1522_v16  ;;  %v5966_v16 = vld [vmem:[%s6416_s20 + $0xf9] sm:$0xff] }
 0x297   : > { %1621 = vst.msk [vmem:[#allocation2 + $0x88] sm:$0xff] %vm1603_vm7, %v1542_v17 }
 0x29a   : > { %1738 = vrot.lane.b32.xlu0 %v5934_v60, %s6364_s5  ;;  %1740 = vrot.lane.b32.xlu1 %v5935_v19, %s6364_s5 }
 0x29b   : > { %1742 = vrot.lane.b32.xlu2 %v5936_v20, %s6364_s5  ;;  %v5967_v20 = vld [vmem:[%s6416_s20 + $0x109] sm:$0xff] }
 0x29c   : > { %v1526_v21 = vpop.permute.xlu0 %1525  ;;  %v1528_v22 = vpop.permute.xlu1 %1527 }
 0x29d   : > { %1613 = vst.msk [vmem:[#allocation2 + $0x48] sm:$0xff] %vm1603_vm7, %v1526_v21  ;;  %v1548_v5 = vpop.permute.xlu2 %1547  ;;  %v5968_v21 = vld [vmem:[%s6416_s20 + $0x111] sm:$0xff] }
 0x29e   : > { %1614 = vst.msk [vmem:[#allocation2 + $0x50] sm:$0xff] %vm1603_vm7, %v1528_v22  ;;  %v5969_v22 = vld [vmem:[%s6416_s20 + $0x121] sm:$0xff] }
 0x29f   : > { %1624 = vst.msk [vmem:[#allocation2 + $0xa0] sm:$0xff] %vm1603_vm7, %v1548_v5 }
 0x2a2   : > { %1744 = vrot.lane.b32.xlu0 %v5937_v25, %s6364_s5  ;;  %1746 = vrot.lane.b32.xlu1 %v5938_v26, %s6364_s5 }
 0x2a3   : > { %1748 = vrot.lane.b32.xlu2 %v5939_v28, %s6364_s5  ;;  %v5970_v28 = vld [vmem:[%s6416_s20 + $0x129] sm:$0xff] }
 0x2a4   : > { %v1532_v14 = vpop.permute.xlu0 %1531  ;;  %v1534_v29 = vpop.permute.xlu1 %1533 }
 0x2a5   : > { %1616 = vst.msk [vmem:[#allocation2 + $0x60] sm:$0xff] %vm1603_vm7, %v1532_v14  ;;  %v1554_v30 = vpop.permute.xlu2 %1553  ;;  %v5971_v14 = vld [vmem:[%s6416_s20 + $0x139] sm:$0xff] }
 0x2a6   : > { %1617 = vst.msk [vmem:[#allocation2 + $0x68] sm:$0xff] %vm1603_vm7, %v1534_v29  ;;  %v5972_v29 = vld [vmem:[%s6416_s20 + $0x141] sm:$0xff] }
 0x2a7   : > { %1627 = vst.msk [vmem:[#allocation2 + $0xb8] sm:$0xff] %vm1603_vm7, %v1554_v30 }
 0x2aa   : > { %1750 = vrot.lane.b32.xlu0 %v5940_v23, %s6364_s5  ;;  %1752 = vrot.lane.b32.xlu1 %v5941_v31, %s6364_s5 }
 0x2ab   : > { %1754 = vrot.lane.b32.xlu2 %v5942_v24, %s6364_s5  ;;  %v5973_v24 = vld [vmem:[%s6416_s20 + $0x151] sm:$0xff] }
 0x2ac   : > { %v1538_v18 = vpop.permute.xlu0 %1537  ;;  %v1540_v32 = vpop.permute.xlu1 %1539 }
 0x2ad   : > { %1619 = vst.msk [vmem:[#allocation2 + $0x78] sm:$0xff] %vm1603_vm7, %v1538_v18  ;;  %v1560_v33 = vpop.permute.xlu2 %1559  ;;  %v5974_v18 = vld [vmem:[%s6416_s20 + $0x159] sm:$0xff] }
 0x2ae   : > { %1620 = vst.msk [vmem:[#allocation2 + $0x80] sm:$0xff] %vm1603_vm7, %v1540_v32  ;;  %v5975_v32 = vld [vmem:[%s6416_s20 + $0x169] sm:$0xff] }
 0x2af   : > { %1630 = vst.msk [vmem:[#allocation2 + $0xd0] sm:$0xff] %vm1603_vm7, %v1560_v33 }
 0x2b2   : > { %1756 = vrot.lane.b32.xlu0 %v5943_v27, %s6364_s5  ;;  %1758 = vrot.lane.b32.xlu1 %v5944_v41, %s6364_s5 }
 0x2b3   : > { %1760 = vrot.lane.b32.xlu2 %v5945_v42, %s6364_s5  ;;  %v5976_v42 = vld [vmem:[%s6416_s20 + $0x171] sm:$0xff] }
 0x2b4   : > { %v1544_v34 = vpop.permute.xlu0 %1543  ;;  %v1546_v49 = vpop.permute.xlu1 %1545 }
 0x2b5   : > { %1622 = vst.msk [vmem:[#allocation2 + $0x90] sm:$0xff] %vm1603_vm7, %v1544_v34  ;;  %v1566_v36 = vpop.permute.xlu2 %1565  ;;  %v5977_v34 = vld [vmem:[%s6416_s20 + $0x181] sm:$0xff] }
 0x2b6   : > { %1623 = vst.msk [vmem:[#allocation2 + $0x98] sm:$0xff] %vm1603_vm7, %v1546_v49  ;;  %v5978_v49 = vld [vmem:[%s6416_s20 + $0x189] sm:$0xff] }
 0x2b7   : > { %1633 = vst.msk [vmem:[#allocation2 + $0xe8] sm:$0xff] %vm1603_vm7, %v1566_v36 }
 0x2ba   : > { %1762 = vrot.lane.b32.xlu0 %v5946_v35, %s6364_s5  ;;  %1893 = vrot.lane.b32.xlu1 %v5947_v50, %s6365_s6 }
 0x2bb   : > { %1895 = vrot.lane.b32.xlu2 %v5948_v37, %s6365_s6  ;;  %v5979_v37 = vld [vmem:[%s6479_s24 + $0x1a] sm:$0xff] }
 0x2bc   : > { %v1550_v38 = vpop.permute.xlu0 %1549  ;;  %v1552_v39 = vpop.permute.xlu1 %1551 }
 0x2bd   : > { %1625 = vst.msk [vmem:[#allocation2 + $0xa8] sm:$0xff] %vm1603_vm7, %v1550_v38  ;;  %v1701_v58 = vpop.permute.xlu2 %1700  ;;  %v5980_v38 = vld [vmem:[%s6479_s24 + $0x22] sm:$0xff] }
 0x2be   : > { %1626 = vst.msk [vmem:[#allocation2 + $0xb0] sm:$0xff] %vm1603_vm7, %v1552_v39  ;;  %v5981_v39 = vld [vmem:[%s6479_s24 + $0x32] sm:$0xff] }
 0x2bf   : > { %1797 = vst.msk [vmem:[#allocation2] sm:$0xff] %vm1796_vm8, %v1701_v58 }
 0x2c2   : > { %1897 = vrot.lane.b32.xlu0 %v5949_v40, %s6365_s6  ;;  %1899 = vrot.lane.b32.xlu1 %v5950_v43, %s6365_s6 }
 0x2c3   : > { %1901 = vrot.lane.b32.xlu2 %v5951_v44, %s6365_s6  ;;  %v5982_v44 = vld [vmem:[%s6479_s24 + $0x3a] sm:$0xff] }
 0x2c4   : > { %v1556_v45 = vpop.permute.xlu0 %1555  ;;  %v1558_v46 = vpop.permute.xlu1 %1557 }
 0x2c5   : > { %1628 = vst.msk [vmem:[#allocation2 + $0xc0] sm:$0xff] %vm1603_vm7, %v1556_v45  ;;  %v1707_v47 = vpop.permute.xlu2 %1706  ;;  %v5983_v45 = vld [vmem:[%s6479_s24 + $0x4a] sm:$0xff] }
 0x2c6   : > { %1629 = vst.msk [vmem:[#allocation2 + $0xc8] sm:$0xff] %vm1603_vm7, %v1558_v46  ;;  %v5984_v46 = vld [vmem:[%s6479_s24 + $0x52] sm:$0xff] }
 0x2c7   : > { %1800 = vst.msk [vmem:[#allocation2 + $0x18] sm:$0xff] %vm1796_vm8, %v1707_v47 }
 0x2ca   : > { %1903 = vrot.lane.b32.xlu0 %v5952_v48, %s6365_s6  ;;  %1905 = vrot.lane.b32.xlu1 %v5953_v51, %s6365_s6 }
 0x2cb   : > { %1907 = vrot.lane.b32.xlu2 %v5954_v52, %s6365_s6  ;;  %v5985_v52 = vld [vmem:[%s6479_s24 + $0x62] sm:$0xff] }
 0x2cc   : > { %v1562_v54 = vpop.permute.xlu0 %1561  ;;  %v1564_v55 = vpop.permute.xlu1 %1563 }
 0x2cd   : > { %1631 = vst.msk [vmem:[#allocation2 + $0xd8] sm:$0xff] %vm1603_vm7, %v1562_v54  ;;  %v1713_v56 = vpop.permute.xlu2 %1712  ;;  %v5986_v54 = vld [vmem:[%s6479_s24 + $0x6a] sm:$0xff] }
 0x2ce   : > { %1632 = vst.msk [vmem:[#allocation2 + $0xe0] sm:$0xff] %vm1603_vm7, %v1564_v55  ;;  %v5987_v55 = vld [vmem:[%s6479_s24 + $0x7a] sm:$0xff] }
 0x2cf   : > { %1803 = vst.msk [vmem:[#allocation2 + $0x30] sm:$0xff] %vm1796_vm8, %v1713_v56 }
 0x2d2   : > { %1909 = vrot.lane.b32.xlu0 %v5955_v57, %s6365_s6  ;;  %1911 = vrot.lane.b32.xlu1 %v5956_v59, %s6365_s6 }
 0x2d3   : > { %1913 = vrot.lane.b32.xlu2 %v5957_v61, %s6365_s6  ;;  %v5988_v61 = vld [vmem:[%s6479_s24 + $0x82] sm:$0xff] }
 0x2d4   : > { %v1568_v62 = vpop.permute.xlu0 %1567  ;;  %v1570_v63 = vpop.permute.xlu1 %1569 }
 0x2d5   : > { %1634 = vst.msk [vmem:[#allocation2 + $0xf0] sm:$0xff] %vm1603_vm7, %v1568_v62  ;;  %v1719_v0 = vpop.permute.xlu2 %1718  ;;  %v5989_v62 = vld [vmem:[%s6479_s24 + $0x92] sm:$0xff] }
 0x2d6   : > { %1635 = vst.msk [vmem:[#allocation2 + $0xf8] sm:$0xff] %vm1603_vm7, %v1570_v63  ;;  %v5990_v63 = vld [vmem:[%s6479_s24 + $0x9a] sm:$0xff] }
 0x2d7   : > { %1806 = vst.msk [vmem:[#allocation2 + $0x48] sm:$0xff] %vm1796_vm8, %v1719_v0 }
 0x2da   : > { %1915 = vrot.lane.b32.xlu0 %v5958_v1, %s6365_s6  ;;  %1917 = vrot.lane.b32.xlu1 %v5959_v2, %s6365_s6 }
 0x2db   : > { %1919 = vrot.lane.b32.xlu2 %v5960_v3, %s6365_s6  ;;  %v5991_v3 = vld [vmem:[%s6479_s24 + $0xaa] sm:$0xff] }
 0x2dc   : > { %v1703_v4 = vpop.permute.xlu0 %1702  ;;  %v1705_v6 = vpop.permute.xlu1 %1704 }
 0x2dd   : > { %1798 = vst.msk [vmem:[#allocation2 + $0x8] sm:$0xff] %vm1796_vm8, %v1703_v4  ;;  %v1725_v7 = vpop.permute.xlu2 %1724  ;;  %v5992_v4 = vld [vmem:[%s6479_s24 + $0xb2] sm:$0xff] }
 0x2de   : > { %1799 = vst.msk [vmem:[#allocation2 + $0x10] sm:$0xff] %vm1796_vm8, %v1705_v6  ;;  %v5993_v6 = vld [vmem:[%s6479_s24 + $0xc2] sm:$0xff] }
 0x2df   : > { %1809 = vst.msk [vmem:[#allocation2 + $0x60] sm:$0xff] %vm1796_vm8, %v1725_v7 }
 0x2e2   : > { %1921 = vrot.lane.b32.xlu0 %v5961_v8, %s6365_s6  ;;  %1923 = vrot.lane.b32.xlu1 %v5962_v9, %s6365_s6 }
 0x2e3   : > { %1925 = vrot.lane.b32.xlu2 %v5963_v10, %s6365_s6  ;;  %v5994_v10 = vld [vmem:[%s6479_s24 + $0xca] sm:$0xff] }
 0x2e4   : > { %v1709_v11 = vpop.permute.xlu0 %1708  ;;  %v1711_v12 = vpop.permute.xlu1 %1710 }
 0x2e5   : > { %1801 = vst.msk [vmem:[#allocation2 + $0x20] sm:$0xff] %vm1796_vm8, %v1709_v11  ;;  %v1731_v53 = vpop.permute.xlu2 %1730  ;;  %v5995_v11 = vld [vmem:[%s6479_s24 + $0xda] sm:$0xff] }
 0x2e6   : > { %1802 = vst.msk [vmem:[#allocation2 + $0x28] sm:$0xff] %vm1796_vm8, %v1711_v12  ;;  %v5996_v12 = vld [vmem:[%s6479_s24 + $0xe2] sm:$0xff] }
 0x2e7   : > { %1812 = vst.msk [vmem:[#allocation2 + $0x78] sm:$0xff] %vm1796_vm8, %v1731_v53 }
 0x2ea   : > { %1927 = vrot.lane.b32.xlu0 %v5964_v13, %s6365_s6  ;;  %1929 = vrot.lane.b32.xlu1 %v5965_v15, %s6365_s6 }
 0x2eb   : > { %1931 = vrot.lane.b32.xlu2 %v5966_v16, %s6365_s6  ;;  %v5997_v16 = vld [vmem:[%s6479_s24 + $0xf2] sm:$0xff] }
 0x2ec   : > { %v1715_v17 = vpop.permute.xlu0 %1714  ;;  %v1717_v60 = vpop.permute.xlu1 %1716 }
 0x2ed   : > { %1804 = vst.msk [vmem:[#allocation2 + $0x38] sm:$0xff] %vm1796_vm8, %v1715_v17  ;;  %v1737_v19 = vpop.permute.xlu2 %1736  ;;  %v5998_v17 = vld [vmem:[%s6479_s24 + $0xfa] sm:$0xff] }
 0x2ee   : > { %1805 = vst.msk [vmem:[#allocation2 + $0x40] sm:$0xff] %vm1796_vm8, %v1717_v60  ;;  %v5999_v60 = vld [vmem:[%s6479_s24 + $0x10a] sm:$0xff] }
 0x2ef   : > { %1815 = vst.msk [vmem:[#allocation2 + $0x90] sm:$0xff] %vm1796_vm8, %v1737_v19 }
 0x2f2   : > { %1933 = vrot.lane.b32.xlu0 %v5967_v20, %s6365_s6  ;;  %1935 = vrot.lane.b32.xlu1 %v5968_v21, %s6365_s6 }
 0x2f3   : > { %1937 = vrot.lane.b32.xlu2 %v5969_v22, %s6365_s6  ;;  %v6000_v22 = vld [vmem:[%s6479_s24 + $0x112] sm:$0xff] }
 0x2f4   : > { %v1721_v5 = vpop.permute.xlu0 %1720  ;;  %v1723_v25 = vpop.permute.xlu1 %1722 }
 0x2f5   : > { %1807 = vst.msk [vmem:[#allocation2 + $0x50] sm:$0xff] %vm1796_vm8, %v1721_v5  ;;  %v1743_v26 = vpop.permute.xlu2 %1742  ;;  %v6001_v5 = vld [vmem:[%s6479_s24 + $0x122] sm:$0xff] }
 0x2f6   : > { %1808 = vst.msk [vmem:[#allocation2 + $0x58] sm:$0xff] %vm1796_vm8, %v1723_v25  ;;  %v6002_v25 = vld [vmem:[%s6479_s24 + $0x12a] sm:$0xff] }
 0x2f7   : > { %1818 = vst.msk [vmem:[#allocation2 + $0xa8] sm:$0xff] %vm1796_vm8, %v1743_v26 }
 0x2fa   : > { %1939 = vrot.lane.b32.xlu0 %v5970_v28, %s6365_s6  ;;  %1941 = vrot.lane.b32.xlu1 %v5971_v14, %s6365_s6 }
 0x2fb   : > { %1943 = vrot.lane.b32.xlu2 %v5972_v29, %s6365_s6  ;;  %v6003_v29 = vld [vmem:[%s6479_s24 + $0x13a] sm:$0xff] }
 0x2fc   : > { %v1727_v30 = vpop.permute.xlu0 %1726  ;;  %v1729_v23 = vpop.permute.xlu1 %1728 }
 0x2fd   : > { %1810 = vst.msk [vmem:[#allocation2 + $0x68] sm:$0xff] %vm1796_vm8, %v1727_v30  ;;  %v1749_v31 = vpop.permute.xlu2 %1748  ;;  %v6004_v30 = vld [vmem:[%s6479_s24 + $0x142] sm:$0xff] }
 0x2fe   : > { %1811 = vst.msk [vmem:[#allocation2 + $0x70] sm:$0xff] %vm1796_vm8, %v1729_v23  ;;  %v6005_v23 = vld [vmem:[%s6479_s24 + $0x152] sm:$0xff] }
 0x2ff   : > { %1821 = vst.msk [vmem:[#allocation2 + $0xc0] sm:$0xff] %vm1796_vm8, %v1749_v31 }
 0x302   : > { %1945 = vrot.lane.b32.xlu0 %v5973_v24, %s6365_s6  ;;  %1947 = vrot.lane.b32.xlu1 %v5974_v18, %s6365_s6 }
 0x303   : > { %1949 = vrot.lane.b32.xlu2 %v5975_v32, %s6365_s6  ;;  %v6006_v32 = vld [vmem:[%s6479_s24 + $0x15a] sm:$0xff] }
 0x304   : > { %v1733_v33 = vpop.permute.xlu0 %1732  ;;  %v1735_v27 = vpop.permute.xlu1 %1734 }
 0x305   : > { %1813 = vst.msk [vmem:[#allocation2 + $0x80] sm:$0xff] %vm1796_vm8, %v1733_v33  ;;  %v1755_v41 = vpop.permute.xlu2 %1754  ;;  %v6007_v33 = vld [vmem:[%s6479_s24 + $0x16a] sm:$0xff] }
 0x306   : > { %1814 = vst.msk [vmem:[#allocation2 + $0x88] sm:$0xff] %vm1796_vm8, %v1735_v27  ;;  %v6008_v27 = vld [vmem:[%s6479_s24 + $0x172] sm:$0xff] }
 0x307   : > { %1824 = vst.msk [vmem:[#allocation2 + $0xd8] sm:$0xff] %vm1796_vm8, %v1755_v41 }
 0x30a   : > { %1951 = vrot.lane.b32.xlu0 %v5976_v42, %s6365_s6  ;;  %1953 = vrot.lane.b32.xlu1 %v5977_v34, %s6365_s6 }
 0x30b   : > { %1955 = vrot.lane.b32.xlu2 %v5978_v49, %s6365_s6  ;;  %v6009_v49 = vld [vmem:[%s6479_s24 + $0x182] sm:$0xff] }
 0x30c   : > { %v1739_v36 = vpop.permute.xlu0 %1738  ;;  %v1741_v35 = vpop.permute.xlu1 %1740 }
 0x30d   : > { %1816 = vst.msk [vmem:[#allocation2 + $0x98] sm:$0xff] %vm1796_vm8, %v1739_v36  ;;  %v1761_v50 = vpop.permute.xlu2 %1760  ;;  %v6010_v36 = vld [vmem:[%s6479_s24 + $0x18a] sm:$0xff] }
 0x30e   : > { %1817 = vst.msk [vmem:[#allocation2 + $0xa0] sm:$0xff] %vm1796_vm8, %v1741_v35  ;;  %v6011_v35 = vld [vmem:[%s6416_s20 + $0x1a] sm:$0xff] }
 0x30f   : > { %1827 = vst.msk [vmem:[#allocation2 + $0xf0] sm:$0xff] %vm1796_vm8, %v1761_v50 }
 0x312   : > { %2086 = vrot.lane.b32.xlu0 %v5979_v37, %s6366_s7  ;;  %2088 = vrot.lane.b32.xlu1 %v5980_v38, %s6366_s7 }
 0x313   : > { %2090 = vrot.lane.b32.xlu2 %v5981_v39, %s6366_s7  ;;  %v6012_v39 = vld [vmem:[%s6416_s20 + $0x22] sm:$0xff] }
 0x314   : > { %v1745_v58 = vpop.permute.xlu0 %1744  ;;  %v1747_v40 = vpop.permute.xlu1 %1746 }
 0x315   : > { %1819 = vst.msk [vmem:[#allocation2 + $0xb0] sm:$0xff] %vm1796_vm8, %v1745_v58  ;;  %v1896_v43 = vpop.permute.xlu2 %1895  ;;  %v6013_v58 = vld [vmem:[%s6416_s20 + $0x32] sm:$0xff] }
 0x316   : > { %1820 = vst.msk [vmem:[#allocation2 + $0xb8] sm:$0xff] %vm1796_vm8, %v1747_v40  ;;  %v6014_v40 = vld [vmem:[%s6416_s20 + $0x3a] sm:$0xff] }
 0x317   : > { %1991 = vst.msk [vmem:[#allocation2 + $0x8] sm:$0xff] %vm1989_vm9, %v1896_v43 }
 0x31a   : > { %2092 = vrot.lane.b32.xlu0 %v5982_v44, %s6366_s7  ;;  %2094 = vrot.lane.b32.xlu1 %v5983_v45, %s6366_s7 }
 0x31b   : > { %2096 = vrot.lane.b32.xlu2 %v5984_v46, %s6366_s7  ;;  %v6015_v46 = vld [vmem:[%s6416_s20 + $0x4a] sm:$0xff] }
 0x31c   : > { %v1751_v47 = vpop.permute.xlu0 %1750  ;;  %v1753_v48 = vpop.permute.xlu1 %1752 }
 0x31d   : > { %1822 = vst.msk [vmem:[#allocation2 + $0xc8] sm:$0xff] %vm1796_vm8, %v1751_v47  ;;  %v1902_v51 = vpop.permute.xlu2 %1901  ;;  %v6016_v47 = vld [vmem:[%s6416_s20 + $0x52] sm:$0xff] }
 0x31e   : > { %1823 = vst.msk [vmem:[#allocation2 + $0xd0] sm:$0xff] %vm1796_vm8, %v1753_v48  ;;  %v6017_v48 = vld [vmem:[%s6416_s20 + $0x62] sm:$0xff] }
 0x31f   : > { %1994 = vst.msk [vmem:[#allocation2 + $0x20] sm:$0xff] %vm1989_vm9, %v1902_v51 }
 0x322   : > { %2098 = vrot.lane.b32.xlu0 %v5985_v52, %s6366_s7  ;;  %2100 = vrot.lane.b32.xlu1 %v5986_v54, %s6366_s7 }
 0x323   : > { %2102 = vrot.lane.b32.xlu2 %v5987_v55, %s6366_s7  ;;  %v6018_v55 = vld [vmem:[%s6416_s20 + $0x6a] sm:$0xff] }
 0x324   : > { %v1757_v56 = vpop.permute.xlu0 %1756  ;;  %v1759_v57 = vpop.permute.xlu1 %1758 }
 0x325   : > { %1825 = vst.msk [vmem:[#allocation2 + $0xe0] sm:$0xff] %vm1796_vm8, %v1757_v56  ;;  %v1908_v59 = vpop.permute.xlu2 %1907  ;;  %v6019_v56 = vld [vmem:[%s6416_s20 + $0x7a] sm:$0xff] }
 0x326   : > { %1826 = vst.msk [vmem:[#allocation2 + $0xe8] sm:$0xff] %vm1796_vm8, %v1759_v57  ;;  %v6020_v57 = vld [vmem:[%s6416_s20 + $0x82] sm:$0xff] }
 0x327   : > { %1997 = vst.msk [vmem:[#allocation2 + $0x38] sm:$0xff] %vm1989_vm9, %v1908_v59 }
 0x32a   : > { %2104 = vrot.lane.b32.xlu0 %v5988_v61, %s6366_s7  ;;  %2106 = vrot.lane.b32.xlu1 %v5989_v62, %s6366_s7 }
 0x32b   : > { %2108 = vrot.lane.b32.xlu2 %v5990_v63, %s6366_s7  ;;  %v6021_v63 = vld [vmem:[%s6416_s20 + $0x92] sm:$0xff] }
 0x32c   : > { %v1763_v0 = vpop.permute.xlu0 %1762  ;;  %v1894_v1 = vpop.permute.xlu1 %1893 }
 0x32d   : > { %1828 = vst.msk [vmem:[#allocation2 + $0xf8] sm:$0xff] %vm1796_vm8, %v1763_v0  ;;  %v1914_v2 = vpop.permute.xlu2 %1913  ;;  %v6022_v0 = vld [vmem:[%s6416_s20 + $0x9a] sm:$0xff] }
 0x32e   : > { %1990 = vst.msk [vmem:[#allocation2] sm:$0xff] %vm1989_vm9, %v1894_v1  ;;  %v6023_v1 = vld [vmem:[%s6416_s20 + $0xaa] sm:$0xff] }
 0x32f   : > { %2000 = vst.msk [vmem:[#allocation2 + $0x50] sm:$0xff] %vm1989_vm9, %v1914_v2 }
 0x332   : > { %2110 = vrot.lane.b32.xlu0 %v5991_v3, %s6366_s7  ;;  %2112 = vrot.lane.b32.xlu1 %v5992_v4, %s6366_s7 }
 0x333   : > { %2114 = vrot.lane.b32.xlu2 %v5993_v6, %s6366_s7  ;;  %v6024_v6 = vld [vmem:[%s6416_s20 + $0xb2] sm:$0xff] }
 0x334   : > { %v1898_v7 = vpop.permute.xlu0 %1897  ;;  %v1900_v8 = vpop.permute.xlu1 %1899 }
 0x335   : > { %1992 = vst.msk [vmem:[#allocation2 + $0x10] sm:$0xff] %vm1989_vm9, %v1898_v7  ;;  %v1920_v9 = vpop.permute.xlu2 %1919  ;;  %v6025_v7 = vld [vmem:[%s6416_s20 + $0xc2] sm:$0xff] }
 0x336   : > { %1993 = vst.msk [vmem:[#allocation2 + $0x18] sm:$0xff] %vm1989_vm9, %v1900_v8  ;;  %v6026_v8 = vld [vmem:[%s6416_s20 + $0xca] sm:$0xff] }
 0x337   : > { %2003 = vst.msk [vmem:[#allocation2 + $0x68] sm:$0xff] %vm1989_vm9, %v1920_v9 }
 0x33a   : > { %2116 = vrot.lane.b32.xlu0 %v5994_v10, %s6366_s7  ;;  %2118 = vrot.lane.b32.xlu1 %v5995_v11, %s6366_s7 }
 0x33b   : > { %2120 = vrot.lane.b32.xlu2 %v5996_v12, %s6366_s7  ;;  %v6027_v12 = vld [vmem:[%s6416_s20 + $0xda] sm:$0xff] }
 0x33c   : > { %v1904_v53 = vpop.permute.xlu0 %1903  ;;  %v1906_v13 = vpop.permute.xlu1 %1905 }
 0x33d   : > { %1995 = vst.msk [vmem:[#allocation2 + $0x28] sm:$0xff] %vm1989_vm9, %v1904_v53  ;;  %v1926_v15 = vpop.permute.xlu2 %1925  ;;  %v6028_v53 = vld [vmem:[%s6416_s20 + $0xe2] sm:$0xff] }
 0x33e   : > { %1996 = vst.msk [vmem:[#allocation2 + $0x30] sm:$0xff] %vm1989_vm9, %v1906_v13  ;;  %v6029_v13 = vld [vmem:[%s6416_s20 + $0xf2] sm:$0xff] }
 0x33f   : > { %2006 = vst.msk [vmem:[#allocation2 + $0x80] sm:$0xff] %vm1989_vm9, %v1926_v15 }
 0x342   : > { %2122 = vrot.lane.b32.xlu0 %v5997_v16, %s6366_s7  ;;  %2124 = vrot.lane.b32.xlu1 %v5998_v17, %s6366_s7 }
 0x343   : > { %2126 = vrot.lane.b32.xlu2 %v5999_v60, %s6366_s7  ;;  %v6030_v60 = vld [vmem:[%s6416_s20 + $0xfa] sm:$0xff] }
 0x344   : > { %v1910_v19 = vpop.permute.xlu0 %1909  ;;  %v1912_v20 = vpop.permute.xlu1 %1911 }
 0x345   : > { %1998 = vst.msk [vmem:[#allocation2 + $0x40] sm:$0xff] %vm1989_vm9, %v1910_v19  ;;  %v1932_v21 = vpop.permute.xlu2 %1931  ;;  %v6031_v19 = vld [vmem:[%s6416_s20 + $0x10a] sm:$0xff] }
 0x346   : > { %1999 = vst.msk [vmem:[#allocation2 + $0x48] sm:$0xff] %vm1989_vm9, %v1912_v20  ;;  %v6032_v20 = vld [vmem:[%s6416_s20 + $0x112] sm:$0xff] }
 0x347   : > { %2009 = vst.msk [vmem:[#allocation2 + $0x98] sm:$0xff] %vm1989_vm9, %v1932_v21 }
 0x34a   : > { %2128 = vrot.lane.b32.xlu0 %v6000_v22, %s6366_s7  ;;  %2130 = vrot.lane.b32.xlu1 %v6001_v5, %s6366_s7 }
 0x34b   : > { %2132 = vrot.lane.b32.xlu2 %v6002_v25, %s6366_s7  ;;  %v6033_v25 = vld [vmem:[%s6416_s20 + $0x122] sm:$0xff] }
 0x34c   : > { %v1916_v26 = vpop.permute.xlu0 %1915  ;;  %v1918_v28 = vpop.permute.xlu1 %1917 }
 0x34d   : > { %2001 = vst.msk [vmem:[#allocation2 + $0x58] sm:$0xff] %vm1989_vm9, %v1916_v26  ;;  %v1938_v14 = vpop.permute.xlu2 %1937  ;;  %v6034_v26 = vld [vmem:[%s6416_s20 + $0x12a] sm:$0xff] }
 0x34e   : > { %2002 = vst.msk [vmem:[#allocation2 + $0x60] sm:$0xff] %vm1989_vm9, %v1918_v28  ;;  %v6035_v28 = vld [vmem:[%s6416_s20 + $0x13a] sm:$0xff] }
 0x34f   : > { %2012 = vst.msk [vmem:[#allocation2 + $0xb0] sm:$0xff] %vm1989_vm9, %v1938_v14 }
 0x352   : > { %2134 = vrot.lane.b32.xlu0 %v6003_v29, %s6366_s7  ;;  %2136 = vrot.lane.b32.xlu1 %v6004_v30, %s6366_s7 }
 0x353   : > { %2138 = vrot.lane.b32.xlu2 %v6005_v23, %s6366_s7  ;;  %v6036_v23 = vld [vmem:[%s6416_s20 + $0x142] sm:$0xff] }
 0x354   : > { %v1922_v31 = vpop.permute.xlu0 %1921  ;;  %v1924_v24 = vpop.permute.xlu1 %1923 }
 0x355   : > { %2004 = vst.msk [vmem:[#allocation2 + $0x70] sm:$0xff] %vm1989_vm9, %v1922_v31  ;;  %v1944_v18 = vpop.permute.xlu2 %1943  ;;  %v6037_v31 = vld [vmem:[%s6416_s20 + $0x152] sm:$0xff] }
 0x356   : > { %2005 = vst.msk [vmem:[#allocation2 + $0x78] sm:$0xff] %vm1989_vm9, %v1924_v24  ;;  %v6038_v24 = vld [vmem:[%s6416_s20 + $0x15a] sm:$0xff] }
 0x357   : > { %2015 = vst.msk [vmem:[#allocation2 + $0xc8] sm:$0xff] %vm1989_vm9, %v1944_v18 }
 0x35a   : > { %2140 = vrot.lane.b32.xlu0 %v6006_v32, %s6366_s7  ;;  %2142 = vrot.lane.b32.xlu1 %v6007_v33, %s6366_s7 }
 0x35b   : > { %2144 = vrot.lane.b32.xlu2 %v6008_v27, %s6366_s7  ;;  %v6039_v27 = vld [vmem:[%s6416_s20 + $0x16a] sm:$0xff] }
 0x35c   : > { %v1928_v41 = vpop.permute.xlu0 %1927  ;;  %v1930_v42 = vpop.permute.xlu1 %1929 }
 0x35d   : > { %2007 = vst.msk [vmem:[#allocation2 + $0x88] sm:$0xff] %vm1989_vm9, %v1928_v41  ;;  %v1950_v34 = vpop.permute.xlu2 %1949  ;;  %v6040_v41 = vld [vmem:[%s6416_s20 + $0x172] sm:$0xff] }
 0x35e   : > { %2008 = vst.msk [vmem:[#allocation2 + $0x90] sm:$0xff] %vm1989_vm9, %v1930_v42  ;;  %v6041_v42 = vld [vmem:[%s6416_s20 + $0x182] sm:$0xff] }
 0x35f   : > { %2018 = vst.msk [vmem:[#allocation2 + $0xe0] sm:$0xff] %vm1989_vm9, %v1950_v34 }
 0x362   : > { %2146 = vrot.lane.b32.xlu0 %v6009_v49, %s6366_s7  ;;  %2148 = vrot.lane.b32.xlu1 %v6010_v36, %s6366_s7 }
 0x363   : > { %2279 = vrot.lane.b32.xlu2 %v6011_v35, %s6367_s8  ;;  %v6042_v35 = vld [vmem:[%s6416_s20 + $0x18a] sm:$0xff] }
 0x364   : > { %v1934_v50 = vpop.permute.xlu0 %1933  ;;  %v1936_v37 = vpop.permute.xlu1 %1935 }
 0x365   : > { %2010 = vst.msk [vmem:[#allocation2 + $0xa0] sm:$0xff] %vm1989_vm9, %v1934_v50  ;;  %v1956_v38 = vpop.permute.xlu2 %1955  ;;  %v6043_v50 = vld [vmem:[%s6479_s24 + $0x30] sm:$0xff] }
 0x366   : > { %2011 = vst.msk [vmem:[#allocation2 + $0xa8] sm:$0xff] %vm1989_vm9, %v1936_v37  ;;  %v6044_v37 = vld [vmem:[%s6479_s24 + $0x38] sm:$0xff] }
 0x367   : > { %2021 = vst.msk [vmem:[#allocation2 + $0xf8] sm:$0xff] %vm1989_vm9, %v1956_v38 }
 0x36a   : > { %2281 = vrot.lane.b32.xlu0 %v6012_v39, %s6367_s8  ;;  %2283 = vrot.lane.b32.xlu1 %v6013_v58, %s6367_s8 }
 0x36b   : > { %2285 = vrot.lane.b32.xlu2 %v6014_v40, %s6367_s8  ;;  %v6045_v40 = vld [vmem:[%s6479_s24 + $0x48] sm:$0xff] }
 0x36c   : > { %v1940_v43 = vpop.permute.xlu0 %1939  ;;  %v1942_v44 = vpop.permute.xlu1 %1941 }
 0x36d   : > { %2013 = vst.msk [vmem:[#allocation2 + $0xb8] sm:$0xff] %vm1989_vm9, %v1940_v43  ;;  %v2091_v45 = vpop.permute.xlu2 %2090  ;;  %v6046_v43 = vld [vmem:[%s6479_s24 + $0x50] sm:$0xff] }
 0x36e   : > { %2014 = vst.msk [vmem:[#allocation2 + $0xc0] sm:$0xff] %vm1989_vm9, %v1942_v44  ;;  %v6047_v44 = vld [vmem:[%s6479_s24 + $0x60] sm:$0xff] }
 0x36f   : > { %2185 = vst.msk [vmem:[#allocation2 + $0x10] sm:$0xff] %vm2182_vm10, %v2091_v45 }
 0x372   : > { %2287 = vrot.lane.b32.xlu0 %v6015_v46, %s6367_s8  ;;  %2289 = vrot.lane.b32.xlu1 %v6016_v47, %s6367_s8 }
 0x373   : > { %2291 = vrot.lane.b32.xlu2 %v6017_v48, %s6367_s8  ;;  %v6048_v48 = vld [vmem:[%s6479_s24 + $0x68] sm:$0xff] }
 0x374   : > { %v1946_v51 = vpop.permute.xlu0 %1945  ;;  %v1948_v52 = vpop.permute.xlu1 %1947 }
 0x375   : > { %2016 = vst.msk [vmem:[#allocation2 + $0xd0] sm:$0xff] %vm1989_vm9, %v1946_v51  ;;  %v2097_v54 = vpop.permute.xlu2 %2096  ;;  %v6049_v51 = vld [vmem:[%s6479_s24 + $0x78] sm:$0xff] }
 0x376   : > { %2017 = vst.msk [vmem:[#allocation2 + $0xd8] sm:$0xff] %vm1989_vm9, %v1948_v52  ;;  %v6050_v52 = vld [vmem:[%s6479_s24 + $0x80] sm:$0xff] }
 0x377   : > { %2188 = vst.msk [vmem:[#allocation2 + $0x28] sm:$0xff] %vm2182_vm10, %v2097_v54 }
 0x37a   : > { %2293 = vrot.lane.b32.xlu0 %v6018_v55, %s6367_s8  ;;  %2295 = vrot.lane.b32.xlu1 %v6019_v56, %s6367_s8 }
 0x37b   : > { %2297 = vrot.lane.b32.xlu2 %v6020_v57, %s6367_s8  ;;  %v6051_v57 = vld [vmem:[%s6479_s24 + $0x90] sm:$0xff] }
 0x37c   : > { %v1952_v59 = vpop.permute.xlu0 %1951  ;;  %v1954_v61 = vpop.permute.xlu1 %1953 }
 0x37d   : > { %2019 = vst.msk [vmem:[#allocation2 + $0xe8] sm:$0xff] %vm1989_vm9, %v1952_v59  ;;  %v2103_v62 = vpop.permute.xlu2 %2102  ;;  %v6052_v59 = vld [vmem:[%s6479_s24 + $0x98] sm:$0xff] }
 0x37e   : > { %2020 = vst.msk [vmem:[#allocation2 + $0xf0] sm:$0xff] %vm1989_vm9, %v1954_v61  ;;  %v6053_v61 = vld [vmem:[%s6479_s24 + $0xa8] sm:$0xff]  ;;  %vm3342_vm9 = vcmask 556544  }
 0x37f   : > { %2191 = vst.msk [vmem:[#allocation2 + $0x40] sm:$0xff] %vm2182_vm10, %v2103_v62 }
 0x382   : > { %2299 = vrot.lane.b32.xlu0 %v6021_v63, %s6367_s8  ;;  %2301 = vrot.lane.b32.xlu1 %v6022_v0, %s6367_s8 }
 0x383   : > { %2303 = vrot.lane.b32.xlu2 %v6023_v1, %s6367_s8  ;;  %v6054_v1 = vld [vmem:[%s6479_s24 + $0xb0] sm:$0xff] }
 0x384   : > { %v2087_v2 = vpop.permute.xlu0 %2086  ;;  %v2089_v3 = vpop.permute.xlu1 %2088 }
 0x385   : > { %2183 = vst.msk [vmem:[#allocation2] sm:$0xff] %vm2182_vm10, %v2087_v2  ;;  %v2109_v4 = vpop.permute.xlu2 %2108  ;;  %v6055_v2 = vld [vmem:[%s6479_s24 + $0xc0] sm:$0xff] }
 0x386   : > { %2184 = vst.msk [vmem:[#allocation2 + $0x8] sm:$0xff] %vm2182_vm10, %v2089_v3  ;;  %v6056_v3 = vld [vmem:[%s6479_s24 + $0xc8] sm:$0xff] }
 0x387   : > { %2194 = vst.msk [vmem:[#allocation2 + $0x58] sm:$0xff] %vm2182_vm10, %v2109_v4 }
 0x38a   : > { %2305 = vrot.lane.b32.xlu0 %v6024_v6, %s6367_s8  ;;  %2307 = vrot.lane.b32.xlu1 %v6025_v7, %s6367_s8 }
 0x38b   : > { %2309 = vrot.lane.b32.xlu2 %v6026_v8, %s6367_s8  ;;  %v6057_v8 = vld [vmem:[%s6479_s24 + $0xd8] sm:$0xff] }
 0x38c   : > { %v2093_v9 = vpop.permute.xlu0 %2092  ;;  %v2095_v10 = vpop.permute.xlu1 %2094 }
 0x38d   : > { %2186 = vst.msk [vmem:[#allocation2 + $0x18] sm:$0xff] %vm2182_vm10, %v2093_v9  ;;  %v2115_v11 = vpop.permute.xlu2 %2114  ;;  %v6058_v9 = vld [vmem:[%s6479_s24 + $0xe0] sm:$0xff] }
 0x38e   : > { %2187 = vst.msk [vmem:[#allocation2 + $0x20] sm:$0xff] %vm2182_vm10, %v2095_v10  ;;  %v6059_v10 = vld [vmem:[%s6479_s24 + $0xf0] sm:$0xff] }
 0x38f   : > { %2197 = vst.msk [vmem:[#allocation2 + $0x70] sm:$0xff] %vm2182_vm10, %v2115_v11 }
 0x392   : > { %2311 = vrot.lane.b32.xlu0 %v6027_v12, %s6367_s8  ;;  %2313 = vrot.lane.b32.xlu1 %v6028_v53, %s6367_s8 }
 0x393   : > { %2315 = vrot.lane.b32.xlu2 %v6029_v13, %s6367_s8  ;;  %v6060_v13 = vld [vmem:[%s6479_s24 + $0xf8] sm:$0xff] }
 0x394   : > { %v2099_v15 = vpop.permute.xlu0 %2098  ;;  %v2101_v16 = vpop.permute.xlu1 %2100 }
 0x395   : > { %2189 = vst.msk [vmem:[#allocation2 + $0x30] sm:$0xff] %vm2182_vm10, %v2099_v15  ;;  %v2121_v17 = vpop.permute.xlu2 %2120  ;;  %v6061_v15 = vld [vmem:[%s6479_s24 + $0x108] sm:$0xff] }
 0x396   : > { %2190 = vst.msk [vmem:[#allocation2 + $0x38] sm:$0xff] %vm2182_vm10, %v2101_v16  ;;  %v6062_v16 = vld [vmem:[%s6479_s24 + $0x110] sm:$0xff] }
 0x397   : > { %2200 = vst.msk [vmem:[#allocation2 + $0x88] sm:$0xff] %vm2182_vm10, %v2121_v17 }
 0x39a   : > { %2317 = vrot.lane.b32.xlu0 %v6030_v60, %s6367_s8  ;;  %2319 = vrot.lane.b32.xlu1 %v6031_v19, %s6367_s8 }
 0x39b   : > { %2321 = vrot.lane.b32.xlu2 %v6032_v20, %s6367_s8  ;;  %v6063_v20 = vld [vmem:[%s6479_s24 + $0x120] sm:$0xff] }
 0x39c   : > { %v2105_v21 = vpop.permute.xlu0 %2104  ;;  %v2107_v22 = vpop.permute.xlu1 %2106 }
 0x39d   : > { %2192 = vst.msk [vmem:[#allocation2 + $0x48] sm:$0xff] %vm2182_vm10, %v2105_v21  ;;  %v2127_v5 = vpop.permute.xlu2 %2126  ;;  %v6064_v21 = vld [vmem:[%s6479_s24 + $0x128] sm:$0xff] }
 0x39e   : > { %2193 = vst.msk [vmem:[#allocation2 + $0x50] sm:$0xff] %vm2182_vm10, %v2107_v22  ;;  %v6065_v22 = vld [vmem:[%s6479_s24 + $0x138] sm:$0xff] }
 0x39f   : > { %2203 = vst.msk [vmem:[#allocation2 + $0xa0] sm:$0xff] %vm2182_vm10, %v2127_v5 }
 0x3a2   : > { %2323 = vrot.lane.b32.xlu0 %v6033_v25, %s6367_s8  ;;  %2325 = vrot.lane.b32.xlu1 %v6034_v26, %s6367_s8 }
 0x3a3   : > { %2327 = vrot.lane.b32.xlu2 %v6035_v28, %s6367_s8  ;;  %v6066_v28 = vld [vmem:[%s6479_s24 + $0x140] sm:$0xff] }
 0x3a4   : > { %v2111_v14 = vpop.permute.xlu0 %2110  ;;  %v2113_v29 = vpop.permute.xlu1 %2112 }
 0x3a5   : > { %2195 = vst.msk [vmem:[#allocation2 + $0x60] sm:$0xff] %vm2182_vm10, %v2111_v14  ;;  %v2133_v30 = vpop.permute.xlu2 %2132  ;;  %v6067_v14 = vld [vmem:[%s6479_s24 + $0x150] sm:$0xff] }
 0x3a6   : > { %2196 = vst.msk [vmem:[#allocation2 + $0x68] sm:$0xff] %vm2182_vm10, %v2113_v29  ;;  %v6068_v29 = vld [vmem:[%s6479_s24 + $0x158] sm:$0xff] }
 0x3a7   : > { %2206 = vst.msk [vmem:[#allocation2 + $0xb8] sm:$0xff] %vm2182_vm10, %v2133_v30 }
 0x3aa   : > { %2329 = vrot.lane.b32.xlu0 %v6036_v23, %s6367_s8  ;;  %2331 = vrot.lane.b32.xlu1 %v6037_v31, %s6367_s8 }
 0x3ab   : > { %2333 = vrot.lane.b32.xlu2 %v6038_v24, %s6367_s8  ;;  %v6069_v24 = vld [vmem:[%s6479_s24 + $0x168] sm:$0xff] }
 0x3ac   : > { %v2117_v18 = vpop.permute.xlu0 %2116  ;;  %v2119_v32 = vpop.permute.xlu1 %2118 }
 0x3ad   : > { %2198 = vst.msk [vmem:[#allocation2 + $0x78] sm:$0xff] %vm2182_vm10, %v2117_v18  ;;  %v2139_v33 = vpop.permute.xlu2 %2138  ;;  %v6070_v18 = vld [vmem:[%s6479_s24 + $0x170] sm:$0xff] }
 0x3ae   : > { %2199 = vst.msk [vmem:[#allocation2 + $0x80] sm:$0xff] %vm2182_vm10, %v2119_v32  ;;  %v6071_v32 = vld [vmem:[%s6479_s24 + $0x180] sm:$0xff] }
 0x3af   : > { %2209 = vst.msk [vmem:[#allocation2 + $0xd0] sm:$0xff] %vm2182_vm10, %v2139_v33 }
 0x3b2   : > { %2335 = vrot.lane.b32.xlu0 %v6039_v27, %s6367_s8  ;;  %2337 = vrot.lane.b32.xlu1 %v6040_v41, %s6367_s8 }
 0x3b3   : > { %2339 = vrot.lane.b32.xlu2 %v6041_v42, %s6367_s8  ;;  %v6072_v42 = vld [vmem:[%s6479_s24 + $0x188] sm:$0xff] }
 0x3b4   : > { %v2123_v34 = vpop.permute.xlu0 %2122  ;;  %v2125_v49 = vpop.permute.xlu1 %2124 }
 0x3b5   : > { %2201 = vst.msk [vmem:[#allocation2 + $0x90] sm:$0xff] %vm2182_vm10, %v2123_v34  ;;  %v2145_v36 = vpop.permute.xlu2 %2144  ;;  %v6073_v34 = vld [vmem:[%s6479_s24 + $0x198] sm:$0xff] }
 0x3b6   : > { %2202 = vst.msk [vmem:[#allocation2 + $0x98] sm:$0xff] %vm2182_vm10, %v2125_v49  ;;  %v6074_v49 = vld [vmem:[%s6479_s24 + $0x1a0] sm:$0xff] }
 0x3b7   : > { %2212 = vst.msk [vmem:[#allocation2 + $0xe8] sm:$0xff] %vm2182_vm10, %v2145_v36 }
 0x3ba   : > { %2341 = vrot.lane.b32.xlu0 %v6042_v35, %s6367_s8  ;;  %2473 = vrot.lane.b32.xlu1 %v6043_v50, %s6368_s9 }
 0x3bb   : > { %2475 = vrot.lane.b32.xlu2 %v6044_v37, %s6368_s9  ;;  %v6075_v37 = vld [vmem:[%s6416_s20 + $0x30] sm:$0xff] }
 0x3bc   : > { %v2129_v38 = vpop.permute.xlu0 %2128  ;;  %v2131_v39 = vpop.permute.xlu1 %2130 }
 0x3bd   : > { %2204 = vst.msk [vmem:[#allocation2 + $0xa8] sm:$0xff] %vm2182_vm10, %v2129_v38  ;;  %v2280_v58 = vpop.permute.xlu2 %2279  ;;  %v6076_v38 = vld [vmem:[%s6416_s20 + $0x38] sm:$0xff] }
 0x3be   : > { %2205 = vst.msk [vmem:[#allocation2 + $0xb0] sm:$0xff] %vm2182_vm10, %v2131_v39  ;;  %v6077_v39 = vld [vmem:[%s6416_s20 + $0x48] sm:$0xff] }
 0x3bf   : > { %2376 = vst.msk [vmem:[#allocation2] sm:$0xff] %vm2375_vm11, %v2280_v58 }
 0x3c2   : > { %2477 = vrot.lane.b32.xlu0 %v6045_v40, %s6368_s9  ;;  %2479 = vrot.lane.b32.xlu1 %v6046_v43, %s6368_s9 }
 0x3c3   : > { %2481 = vrot.lane.b32.xlu2 %v6047_v44, %s6368_s9  ;;  %v6078_v44 = vld [vmem:[%s6416_s20 + $0x50] sm:$0xff] }
 0x3c4   : > { %v2135_v45 = vpop.permute.xlu0 %2134  ;;  %v2137_v46 = vpop.permute.xlu1 %2136 }
 0x3c5   : > { %2207 = vst.msk [vmem:[#allocation2 + $0xc0] sm:$0xff] %vm2182_vm10, %v2135_v45  ;;  %v2286_v47 = vpop.permute.xlu2 %2285  ;;  %v6079_v45 = vld [vmem:[%s6416_s20 + $0x60] sm:$0xff] }
 0x3c6   : > { %2208 = vst.msk [vmem:[#allocation2 + $0xc8] sm:$0xff] %vm2182_vm10, %v2137_v46  ;;  %v6080_v46 = vld [vmem:[%s6416_s20 + $0x68] sm:$0xff] }
 0x3c7   : > { %2379 = vst.msk [vmem:[#allocation2 + $0x18] sm:$0xff] %vm2375_vm11, %v2286_v47 }
 0x3ca   : > { %2483 = vrot.lane.b32.xlu0 %v6048_v48, %s6368_s9  ;;  %2485 = vrot.lane.b32.xlu1 %v6049_v51, %s6368_s9 }
 0x3cb   : > { %2487 = vrot.lane.b32.xlu2 %v6050_v52, %s6368_s9  ;;  %v6081_v52 = vld [vmem:[%s6416_s20 + $0x78] sm:$0xff] }
 0x3cc   : > { %v2141_v54 = vpop.permute.xlu0 %2140  ;;  %v2143_v55 = vpop.permute.xlu1 %2142 }
 0x3cd   : > { %2210 = vst.msk [vmem:[#allocation2 + $0xd8] sm:$0xff] %vm2182_vm10, %v2141_v54  ;;  %v2292_v56 = vpop.permute.xlu2 %2291  ;;  %v6082_v54 = vld [vmem:[%s6416_s20 + $0x80] sm:$0xff] }
 0x3ce   : > { %2211 = vst.msk [vmem:[#allocation2 + $0xe0] sm:$0xff] %vm2182_vm10, %v2143_v55  ;;  %v6083_v55 = vld [vmem:[%s6416_s20 + $0x90] sm:$0xff] }
 0x3cf   : > { %2382 = vst.msk [vmem:[#allocation2 + $0x30] sm:$0xff] %vm2375_vm11, %v2292_v56 }
 0x3d2   : > { %2489 = vrot.lane.b32.xlu0 %v6051_v57, %s6368_s9  ;;  %2491 = vrot.lane.b32.xlu1 %v6052_v59, %s6368_s9 }
 0x3d3   : > { %2493 = vrot.lane.b32.xlu2 %v6053_v61, %s6368_s9  ;;  %v6084_v61 = vld [vmem:[%s6416_s20 + $0x98] sm:$0xff] }
 0x3d4   : > { %v2147_v62 = vpop.permute.xlu0 %2146  ;;  %v2149_v63 = vpop.permute.xlu1 %2148 }
 0x3d5   : > { %2213 = vst.msk [vmem:[#allocation2 + $0xf0] sm:$0xff] %vm2182_vm10, %v2147_v62  ;;  %v2298_v0 = vpop.permute.xlu2 %2297  ;;  %v6085_v62 = vld [vmem:[%s6416_s20 + $0xa8] sm:$0xff] }
 0x3d6   : > { %2214 = vst.msk [vmem:[#allocation2 + $0xf8] sm:$0xff] %vm2182_vm10, %v2149_v63  ;;  %v6086_v63 = vld [vmem:[%s6416_s20 + $0xb0] sm:$0xff]  ;;  %vm3535_vm10 = vcmask 589344  }
 0x3d7   : > { %2385 = vst.msk [vmem:[#allocation2 + $0x48] sm:$0xff] %vm2375_vm11, %v2298_v0 }
 0x3da   : > { %2495 = vrot.lane.b32.xlu0 %v6054_v1, %s6368_s9  ;;  %2497 = vrot.lane.b32.xlu1 %v6055_v2, %s6368_s9 }
 0x3db   : > { %2499 = vrot.lane.b32.xlu2 %v6056_v3, %s6368_s9  ;;  %v6087_v3 = vld [vmem:[%s6416_s20 + $0xc0] sm:$0xff] }
 0x3dc   : > { %v2282_v4 = vpop.permute.xlu0 %2281  ;;  %v2284_v6 = vpop.permute.xlu1 %2283 }
 0x3dd   : > { %2377 = vst.msk [vmem:[#allocation2 + $0x8] sm:$0xff] %vm2375_vm11, %v2282_v4  ;;  %v2304_v7 = vpop.permute.xlu2 %2303  ;;  %v6088_v4 = vld [vmem:[%s6416_s20 + $0xc8] sm:$0xff] }
 0x3de   : > { %2378 = vst.msk [vmem:[#allocation2 + $0x10] sm:$0xff] %vm2375_vm11, %v2284_v6  ;;  %v6089_v6 = vld [vmem:[%s6416_s20 + $0xd8] sm:$0xff] }
 0x3df   : > { %2388 = vst.msk [vmem:[#allocation2 + $0x60] sm:$0xff] %vm2375_vm11, %v2304_v7 }
 0x3e2   : > { %2501 = vrot.lane.b32.xlu0 %v6057_v8, %s6368_s9  ;;  %2503 = vrot.lane.b32.xlu1 %v6058_v9, %s6368_s9 }
 0x3e3   : > { %2505 = vrot.lane.b32.xlu2 %v6059_v10, %s6368_s9  ;;  %v6090_v10 = vld [vmem:[%s6416_s20 + $0xe0] sm:$0xff] }
 0x3e4   : > { %v2288_v11 = vpop.permute.xlu0 %2287  ;;  %v2290_v12 = vpop.permute.xlu1 %2289 }
 0x3e5   : > { %2380 = vst.msk [vmem:[#allocation2 + $0x20] sm:$0xff] %vm2375_vm11, %v2288_v11  ;;  %v2310_v53 = vpop.permute.xlu2 %2309  ;;  %v6091_v11 = vld [vmem:[%s6416_s20 + $0xf0] sm:$0xff] }
 0x3e6   : > { %2381 = vst.msk [vmem:[#allocation2 + $0x28] sm:$0xff] %vm2375_vm11, %v2290_v12  ;;  %v6092_v12 = vld [vmem:[%s6416_s20 + $0xf8] sm:$0xff] }
 0x3e7   : > { %2391 = vst.msk [vmem:[#allocation2 + $0x78] sm:$0xff] %vm2375_vm11, %v2310_v53 }
 0x3ea   : > { %2507 = vrot.lane.b32.xlu0 %v6060_v13, %s6368_s9  ;;  %2509 = vrot.lane.b32.xlu1 %v6061_v15, %s6368_s9 }
 0x3eb   : > { %2511 = vrot.lane.b32.xlu2 %v6062_v16, %s6368_s9  ;;  %v6093_v16 = vld [vmem:[%s6416_s20 + $0x108] sm:$0xff] }
 0x3ec   : > { %v2294_v17 = vpop.permute.xlu0 %2293  ;;  %v2296_v60 = vpop.permute.xlu1 %2295 }
 0x3ed   : > { %2383 = vst.msk [vmem:[#allocation2 + $0x38] sm:$0xff] %vm2375_vm11, %v2294_v17  ;;  %v2316_v19 = vpop.permute.xlu2 %2315  ;;  %v6094_v17 = vld [vmem:[%s6416_s20 + $0x110] sm:$0xff] }
 0x3ee   : > { %2384 = vst.msk [vmem:[#allocation2 + $0x40] sm:$0xff] %vm2375_vm11, %v2296_v60  ;;  %v6095_v60 = vld [vmem:[%s6416_s20 + $0x120] sm:$0xff] }
 0x3ef   : > { %2394 = vst.msk [vmem:[#allocation2 + $0x90] sm:$0xff] %vm2375_vm11, %v2316_v19 }
 0x3f2   : > { %2513 = vrot.lane.b32.xlu0 %v6063_v20, %s6368_s9  ;;  %2515 = vrot.lane.b32.xlu1 %v6064_v21, %s6368_s9 }
 0x3f3   : > { %2517 = vrot.lane.b32.xlu2 %v6065_v22, %s6368_s9  ;;  %v6096_v22 = vld [vmem:[%s6416_s20 + $0x128] sm:$0xff] }
 0x3f4   : > { %v2300_v5 = vpop.permute.xlu0 %2299  ;;  %v2302_v25 = vpop.permute.xlu1 %2301 }
 0x3f5   : > { %2386 = vst.msk [vmem:[#allocation2 + $0x50] sm:$0xff] %vm2375_vm11, %v2300_v5  ;;  %v2322_v26 = vpop.permute.xlu2 %2321  ;;  %v6097_v5 = vld [vmem:[%s6416_s20 + $0x138] sm:$0xff] }
 0x3f6   : > { %2387 = vst.msk [vmem:[#allocation2 + $0x58] sm:$0xff] %vm2375_vm11, %v2302_v25  ;;  %v6098_v25 = vld [vmem:[%s6416_s20 + $0x140] sm:$0xff] }
 0x3f7   : > { %2397 = vst.msk [vmem:[#allocation2 + $0xa8] sm:$0xff] %vm2375_vm11, %v2322_v26 }
 0x3fa   : > { %2519 = vrot.lane.b32.xlu0 %v6066_v28, %s6368_s9  ;;  %2521 = vrot.lane.b32.xlu1 %v6067_v14, %s6368_s9 }
 0x3fb   : > { %2523 = vrot.lane.b32.xlu2 %v6068_v29, %s6368_s9  ;;  %v6099_v29 = vld [vmem:[%s6416_s20 + $0x150] sm:$0xff] }
 0x3fc   : > { %v2306_v30 = vpop.permute.xlu0 %2305  ;;  %v2308_v23 = vpop.permute.xlu1 %2307 }
 0x3fd   : > { %2389 = vst.msk [vmem:[#allocation2 + $0x68] sm:$0xff] %vm2375_vm11, %v2306_v30  ;;  %v2328_v31 = vpop.permute.xlu2 %2327  ;;  %v6100_v30 = vld [vmem:[%s6416_s20 + $0x158] sm:$0xff] }
 0x3fe   : > { %2390 = vst.msk [vmem:[#allocation2 + $0x70] sm:$0xff] %vm2375_vm11, %v2308_v23  ;;  %v6101_v23 = vld [vmem:[%s6416_s20 + $0x168] sm:$0xff] }
 0x3ff   : > { %2400 = vst.msk [vmem:[#allocation2 + $0xc0] sm:$0xff] %vm2375_vm11, %v2328_v31 }
 0x402   : > { %2525 = vrot.lane.b32.xlu0 %v6069_v24, %s6368_s9  ;;  %2527 = vrot.lane.b32.xlu1 %v6070_v18, %s6368_s9 }
 0x403   : > { %2529 = vrot.lane.b32.xlu2 %v6071_v32, %s6368_s9  ;;  %v6102_v32 = vld [vmem:[%s6416_s20 + $0x170] sm:$0xff] }
 0x404   : > { %v2312_v33 = vpop.permute.xlu0 %2311  ;;  %v2314_v27 = vpop.permute.xlu1 %2313 }
 0x405   : > { %2392 = vst.msk [vmem:[#allocation2 + $0x80] sm:$0xff] %vm2375_vm11, %v2312_v33  ;;  %v2334_v41 = vpop.permute.xlu2 %2333  ;;  %v6103_v33 = vld [vmem:[%s6416_s20 + $0x180] sm:$0xff] }
 0x406   : > { %2393 = vst.msk [vmem:[#allocation2 + $0x88] sm:$0xff] %vm2375_vm11, %v2314_v27  ;;  %v6104_v27 = vld [vmem:[%s6416_s20 + $0x188] sm:$0xff] }
 0x407   : > { %2403 = vst.msk [vmem:[#allocation2 + $0xd8] sm:$0xff] %vm2375_vm11, %v2334_v41 }
 0x40a   : > { %2531 = vrot.lane.b32.xlu0 %v6072_v42, %s6368_s9  ;;  %2533 = vrot.lane.b32.xlu1 %v6073_v34, %s6368_s9 }
 0x40b   : > { %2535 = vrot.lane.b32.xlu2 %v6074_v49, %s6368_s9  ;;  %v6105_v49 = vld [vmem:[%s6416_s20 + $0x198] sm:$0xff] }
 0x40c   : > { %v2318_v36 = vpop.permute.xlu0 %2317  ;;  %v2320_v35 = vpop.permute.xlu1 %2319 }
 0x40d   : > { %2395 = vst.msk [vmem:[#allocation2 + $0x98] sm:$0xff] %vm2375_vm11, %v2318_v36  ;;  %v2340_v50 = vpop.permute.xlu2 %2339  ;;  %v6106_v36 = vld [vmem:[%s6416_s20 + $0x1a0] sm:$0xff] }
 0x40e   : > { %2396 = vst.msk [vmem:[#allocation2 + $0xa0] sm:$0xff] %vm2375_vm11, %v2320_v35  ;;  %v6107_v35 = vld [vmem:[%s6479_s24 + $0x31] sm:$0xff] }
 0x40f   : > { %2406 = vst.msk [vmem:[#allocation2 + $0xf0] sm:$0xff] %vm2375_vm11, %v2340_v50 }
 0x412   : > { %2667 = vrot.lane.b32.xlu0 %v6075_v37, %s6369_s10  ;;  %2669 = vrot.lane.b32.xlu1 %v6076_v38, %s6369_s10 }
 0x413   : > { %2671 = vrot.lane.b32.xlu2 %v6077_v39, %s6369_s10  ;;  %v6108_v39 = vld [vmem:[%s6479_s24 + $0x39] sm:$0xff] }
 0x414   : > { %v2324_v58 = vpop.permute.xlu0 %2323  ;;  %v2326_v40 = vpop.permute.xlu1 %2325 }
 0x415   : > { %2398 = vst.msk [vmem:[#allocation2 + $0xb0] sm:$0xff] %vm2375_vm11, %v2324_v58  ;;  %v2476_v43 = vpop.permute.xlu2 %2475  ;;  %v6109_v58 = vld [vmem:[%s6479_s24 + $0x49] sm:$0xff] }
 0x416   : > { %2399 = vst.msk [vmem:[#allocation2 + $0xb8] sm:$0xff] %vm2375_vm11, %v2326_v40  ;;  %v6110_v40 = vld [vmem:[%s6479_s24 + $0x51] sm:$0xff] }
 0x417   : > { %2571 = vst.msk [vmem:[#allocation2 + $0x8] sm:$0xff] %vm2569_vm12, %v2476_v43 }
 0x41a   : > { %2673 = vrot.lane.b32.xlu0 %v6078_v44, %s6369_s10  ;;  %2675 = vrot.lane.b32.xlu1 %v6079_v45, %s6369_s10 }
 0x41b   : > { %2677 = vrot.lane.b32.xlu2 %v6080_v46, %s6369_s10  ;;  %v6111_v46 = vld [vmem:[%s6479_s24 + $0x61] sm:$0xff] }
 0x41c   : > { %v2330_v47 = vpop.permute.xlu0 %2329  ;;  %v2332_v48 = vpop.permute.xlu1 %2331 }
 0x41d   : > { %2401 = vst.msk [vmem:[#allocation2 + $0xc8] sm:$0xff] %vm2375_vm11, %v2330_v47  ;;  %v2482_v51 = vpop.permute.xlu2 %2481  ;;  %v6112_v47 = vld [vmem:[%s6479_s24 + $0x69] sm:$0xff] }
 0x41e   : > { %2402 = vst.msk [vmem:[#allocation2 + $0xd0] sm:$0xff] %vm2375_vm11, %v2332_v48  ;;  %v6113_v48 = vld [vmem:[%s6479_s24 + $0x79] sm:$0xff] }
 0x41f   : > { %2574 = vst.msk [vmem:[#allocation2 + $0x20] sm:$0xff] %vm2569_vm12, %v2482_v51 }
 0x422   : > { %2679 = vrot.lane.b32.xlu0 %v6081_v52, %s6369_s10  ;;  %2681 = vrot.lane.b32.xlu1 %v6082_v54, %s6369_s10 }
 0x423   : > { %2683 = vrot.lane.b32.xlu2 %v6083_v55, %s6369_s10  ;;  %v6114_v55 = vld [vmem:[%s6479_s24 + $0x81] sm:$0xff] }
 0x424   : > { %v2336_v56 = vpop.permute.xlu0 %2335  ;;  %v2338_v57 = vpop.permute.xlu1 %2337 }
 0x425   : > { %2404 = vst.msk [vmem:[#allocation2 + $0xe0] sm:$0xff] %vm2375_vm11, %v2336_v56  ;;  %v2488_v59 = vpop.permute.xlu2 %2487  ;;  %v6115_v56 = vld [vmem:[%s6479_s24 + $0x91] sm:$0xff] }
 0x426   : > { %2405 = vst.msk [vmem:[#allocation2 + $0xe8] sm:$0xff] %vm2375_vm11, %v2338_v57  ;;  %v6116_v57 = vld [vmem:[%s6479_s24 + $0x99] sm:$0xff] }
 0x427   : > { %2577 = vst.msk [vmem:[#allocation2 + $0x38] sm:$0xff] %vm2569_vm12, %v2488_v59 }
 0x42a   : > { %2685 = vrot.lane.b32.xlu0 %v6084_v61, %s6369_s10  ;;  %2687 = vrot.lane.b32.xlu1 %v6085_v62, %s6369_s10 }
 0x42b   : > { %2689 = vrot.lane.b32.xlu2 %v6086_v63, %s6369_s10  ;;  %v6117_v63 = vld [vmem:[%s6479_s24 + $0xa9] sm:$0xff] }
 0x42c   : > { %v2342_v0 = vpop.permute.xlu0 %2341  ;;  %v2474_v1 = vpop.permute.xlu1 %2473 }
 0x42d   : > { %2407 = vst.msk [vmem:[#allocation2 + $0xf8] sm:$0xff] %vm2375_vm11, %v2342_v0  ;;  %v2494_v2 = vpop.permute.xlu2 %2493  ;;  %v6118_v0 = vld [vmem:[%s6479_s24 + $0xb1] sm:$0xff]  ;;  %vm3609_vm11 = vcmask 588800  }
 0x42e   : > { %2570 = vst.msk [vmem:[#allocation2] sm:$0xff] %vm2569_vm12, %v2474_v1  ;;  %v6119_v1 = vld [vmem:[%s6479_s24 + $0xc1] sm:$0xff] }
 0x42f   : > { %2580 = vst.msk [vmem:[#allocation2 + $0x50] sm:$0xff] %vm2569_vm12, %v2494_v2 }
 0x432   : > { %2691 = vrot.lane.b32.xlu0 %v6087_v3, %s6369_s10  ;;  %2693 = vrot.lane.b32.xlu1 %v6088_v4, %s6369_s10 }
 0x433   : > { %2695 = vrot.lane.b32.xlu2 %v6089_v6, %s6369_s10  ;;  %v6120_v6 = vld [vmem:[%s6479_s24 + $0xc9] sm:$0xff] }
 0x434   : > { %v2478_v7 = vpop.permute.xlu0 %2477  ;;  %v2480_v8 = vpop.permute.xlu1 %2479 }
 0x435   : > { %2572 = vst.msk [vmem:[#allocation2 + $0x10] sm:$0xff] %vm2569_vm12, %v2478_v7  ;;  %v2500_v9 = vpop.permute.xlu2 %2499  ;;  %v6121_v7 = vld [vmem:[%s6479_s24 + $0xd9] sm:$0xff] }
 0x436   : > { %2573 = vst.msk [vmem:[#allocation2 + $0x18] sm:$0xff] %vm2569_vm12, %v2480_v8  ;;  %v6122_v8 = vld [vmem:[%s6479_s24 + $0xe1] sm:$0xff] }
 0x437   : > { %2583 = vst.msk [vmem:[#allocation2 + $0x68] sm:$0xff] %vm2569_vm12, %v2500_v9 }
 0x43a   : > { %2697 = vrot.lane.b32.xlu0 %v6090_v10, %s6369_s10  ;;  %2699 = vrot.lane.b32.xlu1 %v6091_v11, %s6369_s10 }
 0x43b   : > { %2701 = vrot.lane.b32.xlu2 %v6092_v12, %s6369_s10  ;;  %v6123_v12 = vld [vmem:[%s6479_s24 + $0xf1] sm:$0xff] }
 0x43c   : > { %v2484_v53 = vpop.permute.xlu0 %2483  ;;  %v2486_v13 = vpop.permute.xlu1 %2485 }
 0x43d   : > { %2575 = vst.msk [vmem:[#allocation2 + $0x28] sm:$0xff] %vm2569_vm12, %v2484_v53  ;;  %v2506_v15 = vpop.permute.xlu2 %2505  ;;  %v6124_v53 = vld [vmem:[%s6479_s24 + $0xf9] sm:$0xff] }
 0x43e   : > { %2576 = vst.msk [vmem:[#allocation2 + $0x30] sm:$0xff] %vm2569_vm12, %v2486_v13  ;;  %v6125_v13 = vld [vmem:[%s6479_s24 + $0x109] sm:$0xff] }
 0x43f   : > { %2586 = vst.msk [vmem:[#allocation2 + $0x80] sm:$0xff] %vm2569_vm12, %v2506_v15 }
 0x442   : > { %2703 = vrot.lane.b32.xlu0 %v6093_v16, %s6369_s10  ;;  %2705 = vrot.lane.b32.xlu1 %v6094_v17, %s6369_s10 }
 0x443   : > { %2707 = vrot.lane.b32.xlu2 %v6095_v60, %s6369_s10  ;;  %v6126_v60 = vld [vmem:[%s6479_s24 + $0x111] sm:$0xff] }
 0x444   : > { %v2490_v19 = vpop.permute.xlu0 %2489  ;;  %v2492_v20 = vpop.permute.xlu1 %2491 }
 0x445   : > { %2578 = vst.msk [vmem:[#allocation2 + $0x40] sm:$0xff] %vm2569_vm12, %v2490_v19  ;;  %v2512_v21 = vpop.permute.xlu2 %2511  ;;  %v6127_v19 = vld [vmem:[%s6479_s24 + $0x121] sm:$0xff] }
 0x446   : > { %2579 = vst.msk [vmem:[#allocation2 + $0x48] sm:$0xff] %vm2569_vm12, %v2492_v20  ;;  %v6128_v20 = vld [vmem:[%s6479_s24 + $0x129] sm:$0xff] }
 0x447   : > { %2589 = vst.msk [vmem:[#allocation2 + $0x98] sm:$0xff] %vm2569_vm12, %v2512_v21 }
 0x44a   : > { %2709 = vrot.lane.b32.xlu0 %v6096_v22, %s6369_s10  ;;  %2711 = vrot.lane.b32.xlu1 %v6097_v5, %s6369_s10 }
 0x44b   : > { %2713 = vrot.lane.b32.xlu2 %v6098_v25, %s6369_s10  ;;  %v6129_v25 = vld [vmem:[%s6479_s24 + $0x139] sm:$0xff] }
 0x44c   : > { %v2496_v26 = vpop.permute.xlu0 %2495  ;;  %v2498_v28 = vpop.permute.xlu1 %2497 }
 0x44d   : > { %2581 = vst.msk [vmem:[#allocation2 + $0x58] sm:$0xff] %vm2569_vm12, %v2496_v26  ;;  %v2518_v14 = vpop.permute.xlu2 %2517  ;;  %v6130_v26 = vld [vmem:[%s6479_s24 + $0x141] sm:$0xff] }
 0x44e   : > { %2582 = vst.msk [vmem:[#allocation2 + $0x60] sm:$0xff] %vm2569_vm12, %v2498_v28  ;;  %v6131_v28 = vld [vmem:[%s6479_s24 + $0x151] sm:$0xff] }
 0x44f   : > { %2592 = vst.msk [vmem:[#allocation2 + $0xb0] sm:$0xff] %vm2569_vm12, %v2518_v14 }
 0x452   : > { %2715 = vrot.lane.b32.xlu0 %v6099_v29, %s6369_s10  ;;  %2717 = vrot.lane.b32.xlu1 %v6100_v30, %s6369_s10 }
 0x453   : > { %2719 = vrot.lane.b32.xlu2 %v6101_v23, %s6369_s10  ;;  %v6132_v23 = vld [vmem:[%s6479_s24 + $0x159] sm:$0xff] }
 0x454   : > { %v2502_v31 = vpop.permute.xlu0 %2501  ;;  %v2504_v24 = vpop.permute.xlu1 %2503 }
 0x455   : > { %2584 = vst.msk [vmem:[#allocation2 + $0x70] sm:$0xff] %vm2569_vm12, %v2502_v31  ;;  %v2524_v18 = vpop.permute.xlu2 %2523  ;;  %v6133_v31 = vld [vmem:[%s6479_s24 + $0x169] sm:$0xff] }
 0x456   : > { %2585 = vst.msk [vmem:[#allocation2 + $0x78] sm:$0xff] %vm2569_vm12, %v2504_v24  ;;  %v6134_v24 = vld [vmem:[%s6479_s24 + $0x171] sm:$0xff] }
 0x457   : > { %2595 = vst.msk [vmem:[#allocation2 + $0xc8] sm:$0xff] %vm2569_vm12, %v2524_v18 }
 0x45a   : > { %2721 = vrot.lane.b32.xlu0 %v6102_v32, %s6369_s10  ;;  %2723 = vrot.lane.b32.xlu1 %v6103_v33, %s6369_s10 }
 0x45b   : > { %2725 = vrot.lane.b32.xlu2 %v6104_v27, %s6369_s10  ;;  %v6135_v27 = vld [vmem:[%s6479_s24 + $0x181] sm:$0xff] }
 0x45c   : > { %v2508_v41 = vpop.permute.xlu0 %2507  ;;  %v2510_v42 = vpop.permute.xlu1 %2509 }
 0x45d   : > { %2587 = vst.msk [vmem:[#allocation2 + $0x88] sm:$0xff] %vm2569_vm12, %v2508_v41  ;;  %v2530_v34 = vpop.permute.xlu2 %2529  ;;  %v6136_v41 = vld [vmem:[%s6479_s24 + $0x189] sm:$0xff] }
 0x45e   : > { %2588 = vst.msk [vmem:[#allocation2 + $0x90] sm:$0xff] %vm2569_vm12, %v2510_v42  ;;  %v6137_v42 = vld [vmem:[%s6479_s24 + $0x199] sm:$0xff] }
 0x45f   : > { %2598 = vst.msk [vmem:[#allocation2 + $0xe0] sm:$0xff] %vm2569_vm12, %v2530_v34 }
 0x462   : > { %2727 = vrot.lane.b32.xlu0 %v6105_v49, %s6369_s10  ;;  %2729 = vrot.lane.b32.xlu1 %v6106_v36, %s6369_s10 }
 0x463   : > { %2860 = vrot.lane.b32.xlu2 %v6107_v35, %s6370_s11  ;;  %v6138_v35 = vld [vmem:[%s6479_s24 + $0x1a1] sm:$0xff] }
 0x464   : > { %v2514_v50 = vpop.permute.xlu0 %2513  ;;  %v2516_v37 = vpop.permute.xlu1 %2515 }
 0x465   : > { %2590 = vst.msk [vmem:[#allocation2 + $0xa0] sm:$0xff] %vm2569_vm12, %v2514_v50  ;;  %v2536_v38 = vpop.permute.xlu2 %2535  ;;  %v6139_v50 = vld [vmem:[%s6416_s20 + $0x31] sm:$0xff] }
 0x466   : > { %2591 = vst.msk [vmem:[#allocation2 + $0xa8] sm:$0xff] %vm2569_vm12, %v2516_v37  ;;  %v6140_v37 = vld [vmem:[%s6416_s20 + $0x39] sm:$0xff] }
 0x467   : > { %2601 = vst.msk [vmem:[#allocation2 + $0xf8] sm:$0xff] %vm2569_vm12, %v2536_v38 }
 0x46a   : > { %2862 = vrot.lane.b32.xlu0 %v6108_v39, %s6370_s11  ;;  %2864 = vrot.lane.b32.xlu1 %v6109_v58, %s6370_s11 }
 0x46b   : > { %2866 = vrot.lane.b32.xlu2 %v6110_v40, %s6370_s11  ;;  %v6141_v40 = vld [vmem:[%s6416_s20 + $0x49] sm:$0xff] }
 0x46c   : > { %v2520_v43 = vpop.permute.xlu0 %2519  ;;  %v2522_v44 = vpop.permute.xlu1 %2521 }
 0x46d   : > { %2593 = vst.msk [vmem:[#allocation2 + $0xb8] sm:$0xff] %vm2569_vm12, %v2520_v43  ;;  %v2672_v45 = vpop.permute.xlu2 %2671  ;;  %v6142_v43 = vld [vmem:[%s6416_s20 + $0x51] sm:$0xff] }
 0x46e   : > { %2594 = vst.msk [vmem:[#allocation2 + $0xc0] sm:$0xff] %vm2569_vm12, %v2522_v44  ;;  %v6143_v44 = vld [vmem:[%s6416_s20 + $0x61] sm:$0xff] }
 0x46f   : > { %2766 = vst.msk [vmem:[#allocation2 + $0x10] sm:$0xff] %vm2763_vm13, %v2672_v45 }
 0x472   : > { %2868 = vrot.lane.b32.xlu0 %v6111_v46, %s6370_s11  ;;  %2870 = vrot.lane.b32.xlu1 %v6112_v47, %s6370_s11 }
 0x473   : > { %2872 = vrot.lane.b32.xlu2 %v6113_v48, %s6370_s11  ;;  %v6144_v48 = vld [vmem:[%s6416_s20 + $0x69] sm:$0xff] }
 0x474   : > { %v2526_v51 = vpop.permute.xlu0 %2525  ;;  %v2528_v52 = vpop.permute.xlu1 %2527 }
 0x475   : > { %2596 = vst.msk [vmem:[#allocation2 + $0xd0] sm:$0xff] %vm2569_vm12, %v2526_v51  ;;  %v2678_v54 = vpop.permute.xlu2 %2677  ;;  %v6145_v51 = vld [vmem:[%s6416_s20 + $0x79] sm:$0xff] }
 0x476   : > { %2597 = vst.msk [vmem:[#allocation2 + $0xd8] sm:$0xff] %vm2569_vm12, %v2528_v52  ;;  %v6146_v52 = vld [vmem:[%s6416_s20 + $0x81] sm:$0xff] }
 0x477   : > { %2769 = vst.msk [vmem:[#allocation2 + $0x28] sm:$0xff] %vm2763_vm13, %v2678_v54 }
 0x47a   : > { %2874 = vrot.lane.b32.xlu0 %v6114_v55, %s6370_s11  ;;  %2876 = vrot.lane.b32.xlu1 %v6115_v56, %s6370_s11 }
 0x47b   : > { %2878 = vrot.lane.b32.xlu2 %v6116_v57, %s6370_s11  ;;  %v6147_v57 = vld [vmem:[%s6416_s20 + $0x91] sm:$0xff] }
 0x47c   : > { %v2532_v59 = vpop.permute.xlu0 %2531  ;;  %v2534_v61 = vpop.permute.xlu1 %2533 }
 0x47d   : > { %2599 = vst.msk [vmem:[#allocation2 + $0xe8] sm:$0xff] %vm2569_vm12, %v2532_v59  ;;  %v2684_v62 = vpop.permute.xlu2 %2683  ;;  %v6148_v59 = vld [vmem:[%s6416_s20 + $0x99] sm:$0xff] }
 0x47e   : > { %2600 = vst.msk [vmem:[#allocation2 + $0xf0] sm:$0xff] %vm2569_vm12, %v2534_v61  ;;  %v6149_v61 = vld [vmem:[%s6416_s20 + $0xa9] sm:$0xff]  ;;  %vm3923_vm12 = vcmask 24576  }
 0x47f   : > { %2772 = vst.msk [vmem:[#allocation2 + $0x40] sm:$0xff] %vm2763_vm13, %v2684_v62 }
 0x482   : > { %2880 = vrot.lane.b32.xlu0 %v6117_v63, %s6370_s11  ;;  %2882 = vrot.lane.b32.xlu1 %v6118_v0, %s6370_s11 }
 0x483   : > { %2884 = vrot.lane.b32.xlu2 %v6119_v1, %s6370_s11  ;;  %v6150_v1 = vld [vmem:[%s6416_s20 + $0xb1] sm:$0xff] }
 0x484   : > { %v2668_v2 = vpop.permute.xlu0 %2667  ;;  %v2670_v3 = vpop.permute.xlu1 %2669 }
 0x485   : > { %2764 = vst.msk [vmem:[#allocation2] sm:$0xff] %vm2763_vm13, %v2668_v2  ;;  %v2690_v4 = vpop.permute.xlu2 %2689  ;;  %v6151_v2 = vld [vmem:[%s6416_s20 + $0xc1] sm:$0xff] }
 0x486   : > { %2765 = vst.msk [vmem:[#allocation2 + $0x8] sm:$0xff] %vm2763_vm13, %v2670_v3  ;;  %v6152_v3 = vld [vmem:[%s6416_s20 + $0xc9] sm:$0xff] }
 0x487   : > { %2775 = vst.msk [vmem:[#allocation2 + $0x58] sm:$0xff] %vm2763_vm13, %v2690_v4 }
 0x48a   : > { %2886 = vrot.lane.b32.xlu0 %v6120_v6, %s6370_s11  ;;  %2888 = vrot.lane.b32.xlu1 %v6121_v7, %s6370_s11 }
 0x48b   : > { %2890 = vrot.lane.b32.xlu2 %v6122_v8, %s6370_s11  ;;  %v6153_v8 = vld [vmem:[%s6416_s20 + $0xd9] sm:$0xff] }
 0x48c   : > { %v2674_v9 = vpop.permute.xlu0 %2673  ;;  %v2676_v10 = vpop.permute.xlu1 %2675 }
 0x48d   : > { %2767 = vst.msk [vmem:[#allocation2 + $0x18] sm:$0xff] %vm2763_vm13, %v2674_v9  ;;  %v2696_v11 = vpop.permute.xlu2 %2695  ;;  %v6154_v9 = vld [vmem:[%s6416_s20 + $0xe1] sm:$0xff] }
 0x48e   : > { %2768 = vst.msk [vmem:[#allocation2 + $0x20] sm:$0xff] %vm2763_vm13, %v2676_v10  ;;  %v6155_v10 = vld [vmem:[%s6416_s20 + $0xf1] sm:$0xff] }
 0x48f   : > { %2778 = vst.msk [vmem:[#allocation2 + $0x70] sm:$0xff] %vm2763_vm13, %v2696_v11 }
 0x492   : > { %2892 = vrot.lane.b32.xlu0 %v6123_v12, %s6370_s11  ;;  %2894 = vrot.lane.b32.xlu1 %v6124_v53, %s6370_s11 }
 0x493   : > { %2896 = vrot.lane.b32.xlu2 %v6125_v13, %s6370_s11  ;;  %v6156_v13 = vld [vmem:[%s6416_s20 + $0xf9] sm:$0xff] }
 0x494   : > { %v2680_v15 = vpop.permute.xlu0 %2679  ;;  %v2682_v16 = vpop.permute.xlu1 %2681 }
 0x495   : > { %2770 = vst.msk [vmem:[#allocation2 + $0x30] sm:$0xff] %vm2763_vm13, %v2680_v15  ;;  %v2702_v17 = vpop.permute.xlu2 %2701  ;;  %v6157_v15 = vld [vmem:[%s6416_s20 + $0x109] sm:$0xff] }
 0x496   : > { %2771 = vst.msk [vmem:[#allocation2 + $0x38] sm:$0xff] %vm2763_vm13, %v2682_v16  ;;  %v6158_v16 = vld [vmem:[%s6416_s20 + $0x111] sm:$0xff] }
 0x497   : > { %2781 = vst.msk [vmem:[#allocation2 + $0x88] sm:$0xff] %vm2763_vm13, %v2702_v17 }
 0x49a   : > { %2898 = vrot.lane.b32.xlu0 %v6126_v60, %s6370_s11  ;;  %2900 = vrot.lane.b32.xlu1 %v6127_v19, %s6370_s11 }
 0x49b   : > { %2902 = vrot.lane.b32.xlu2 %v6128_v20, %s6370_s11  ;;  %v6159_v20 = vld [vmem:[%s6416_s20 + $0x121] sm:$0xff] }
 0x49c   : > { %v2686_v21 = vpop.permute.xlu0 %2685  ;;  %v2688_v22 = vpop.permute.xlu1 %2687 }
 0x49d   : > { %2773 = vst.msk [vmem:[#allocation2 + $0x48] sm:$0xff] %vm2763_vm13, %v2686_v21  ;;  %v2708_v5 = vpop.permute.xlu2 %2707  ;;  %v6160_v21 = vld [vmem:[%s6416_s20 + $0x129] sm:$0xff] }
 0x49e   : > { %2774 = vst.msk [vmem:[#allocation2 + $0x50] sm:$0xff] %vm2763_vm13, %v2688_v22  ;;  %v6161_v22 = vld [vmem:[%s6416_s20 + $0x139] sm:$0xff] }
 0x49f   : > { %2784 = vst.msk [vmem:[#allocation2 + $0xa0] sm:$0xff] %vm2763_vm13, %v2708_v5 }
 0x4a2   : > { %2904 = vrot.lane.b32.xlu0 %v6129_v25, %s6370_s11  ;;  %2906 = vrot.lane.b32.xlu1 %v6130_v26, %s6370_s11 }
 0x4a3   : > { %2908 = vrot.lane.b32.xlu2 %v6131_v28, %s6370_s11  ;;  %v6162_v28 = vld [vmem:[%s6416_s20 + $0x141] sm:$0xff] }
 0x4a4   : > { %v2692_v14 = vpop.permute.xlu0 %2691  ;;  %v2694_v29 = vpop.permute.xlu1 %2693 }
 0x4a5   : > { %2776 = vst.msk [vmem:[#allocation2 + $0x60] sm:$0xff] %vm2763_vm13, %v2692_v14  ;;  %v2714_v30 = vpop.permute.xlu2 %2713  ;;  %v6163_v14 = vld [vmem:[%s6416_s20 + $0x151] sm:$0xff] }
 0x4a6   : > { %2777 = vst.msk [vmem:[#allocation2 + $0x68] sm:$0xff] %vm2763_vm13, %v2694_v29  ;;  %v6164_v29 = vld [vmem:[%s6416_s20 + $0x159] sm:$0xff] }
 0x4a7   : > { %2787 = vst.msk [vmem:[#allocation2 + $0xb8] sm:$0xff] %vm2763_vm13, %v2714_v30 }
 0x4aa   : > { %2910 = vrot.lane.b32.xlu0 %v6132_v23, %s6370_s11  ;;  %2912 = vrot.lane.b32.xlu1 %v6133_v31, %s6370_s11 }
 0x4ab   : > { %2914 = vrot.lane.b32.xlu2 %v6134_v24, %s6370_s11  ;;  %v6165_v24 = vld [vmem:[%s6416_s20 + $0x169] sm:$0xff] }
 0x4ac   : > { %v2698_v18 = vpop.permute.xlu0 %2697  ;;  %v2700_v32 = vpop.permute.xlu1 %2699 }
 0x4ad   : > { %2779 = vst.msk [vmem:[#allocation2 + $0x78] sm:$0xff] %vm2763_vm13, %v2698_v18  ;;  %v2720_v33 = vpop.permute.xlu2 %2719  ;;  %v6166_v18 = vld [vmem:[%s6416_s20 + $0x171] sm:$0xff] }
 0x4ae   : > { %2780 = vst.msk [vmem:[#allocation2 + $0x80] sm:$0xff] %vm2763_vm13, %v2700_v32  ;;  %v6167_v32 = vld [vmem:[%s6416_s20 + $0x181] sm:$0xff] }
 0x4af   : > { %2790 = vst.msk [vmem:[#allocation2 + $0xd0] sm:$0xff] %vm2763_vm13, %v2720_v33 }
 0x4b2   : > { %2916 = vrot.lane.b32.xlu0 %v6135_v27, %s6370_s11  ;;  %2918 = vrot.lane.b32.xlu1 %v6136_v41, %s6370_s11 }
 0x4b3   : > { %2920 = vrot.lane.b32.xlu2 %v6137_v42, %s6370_s11  ;;  %v6168_v42 = vld [vmem:[%s6416_s20 + $0x189] sm:$0xff] }
 0x4b4   : > { %v2704_v34 = vpop.permute.xlu0 %2703  ;;  %v2706_v49 = vpop.permute.xlu1 %2705 }
 0x4b5   : > { %2782 = vst.msk [vmem:[#allocation2 + $0x90] sm:$0xff] %vm2763_vm13, %v2704_v34  ;;  %v2726_v36 = vpop.permute.xlu2 %2725  ;;  %v6169_v34 = vld [vmem:[%s6416_s20 + $0x199] sm:$0xff] }
 0x4b6   : > { %2783 = vst.msk [vmem:[#allocation2 + $0x98] sm:$0xff] %vm2763_vm13, %v2706_v49  ;;  %v6170_v49 = vld [vmem:[%s6416_s20 + $0x1a1] sm:$0xff] }
 0x4b7   : > { %2793 = vst.msk [vmem:[#allocation2 + $0xe8] sm:$0xff] %vm2763_vm13, %v2726_v36 }
 0x4ba   : > { %2922 = vrot.lane.b32.xlu0 %v6138_v35, %s6370_s11  ;;  %3053 = vrot.lane.b32.xlu1 %v6139_v50, %s6371_s12 }
 0x4bb   : > { %3055 = vrot.lane.b32.xlu2 %v6140_v37, %s6371_s12  ;;  %v6171_v37 = vld [vmem:[%s6479_s24 + $0x32] sm:$0xff] }
 0x4bc   : > { %v2710_v38 = vpop.permute.xlu0 %2709  ;;  %v2712_v39 = vpop.permute.xlu1 %2711 }
 0x4bd   : > { %2785 = vst.msk [vmem:[#allocation2 + $0xa8] sm:$0xff] %vm2763_vm13, %v2710_v38  ;;  %v2861_v58 = vpop.permute.xlu2 %2860  ;;  %v6172_v38 = vld [vmem:[%s6479_s24 + $0x3a] sm:$0xff] }
 0x4be   : > { %2786 = vst.msk [vmem:[#allocation2 + $0xb0] sm:$0xff] %vm2763_vm13, %v2712_v39  ;;  %v6173_v39 = vld [vmem:[%s6479_s24 + $0x4a] sm:$0xff] }
 0x4bf   : > { %2957 = vst.msk [vmem:[#allocation2] sm:$0xff] %vm2956_vm14, %v2861_v58 }
 0x4c2   : > { %3057 = vrot.lane.b32.xlu0 %v6141_v40, %s6371_s12  ;;  %3059 = vrot.lane.b32.xlu1 %v6142_v43, %s6371_s12 }
 0x4c3   : > { %3061 = vrot.lane.b32.xlu2 %v6143_v44, %s6371_s12  ;;  %v6174_v44 = vld [vmem:[%s6479_s24 + $0x52] sm:$0xff] }
 0x4c4   : > { %v2716_v45 = vpop.permute.xlu0 %2715  ;;  %v2718_v46 = vpop.permute.xlu1 %2717 }
 0x4c5   : > { %2788 = vst.msk [vmem:[#allocation2 + $0xc0] sm:$0xff] %vm2763_vm13, %v2716_v45  ;;  %v2867_v47 = vpop.permute.xlu2 %2866  ;;  %v6175_v45 = vld [vmem:[%s6479_s24 + $0x62] sm:$0xff] }
 0x4c6   : > { %2789 = vst.msk [vmem:[#allocation2 + $0xc8] sm:$0xff] %vm2763_vm13, %v2718_v46  ;;  %v6176_v46 = vld [vmem:[%s6479_s24 + $0x6a] sm:$0xff] }
 0x4c7   : > { %2960 = vst.msk [vmem:[#allocation2 + $0x18] sm:$0xff] %vm2956_vm14, %v2867_v47 }
 0x4ca   : > { %3063 = vrot.lane.b32.xlu0 %v6144_v48, %s6371_s12  ;;  %3065 = vrot.lane.b32.xlu1 %v6145_v51, %s6371_s12 }
 0x4cb   : > { %3067 = vrot.lane.b32.xlu2 %v6146_v52, %s6371_s12  ;;  %v6177_v52 = vld [vmem:[%s6479_s24 + $0x7a] sm:$0xff] }
 0x4cc   : > { %v2722_v54 = vpop.permute.xlu0 %2721  ;;  %v2724_v55 = vpop.permute.xlu1 %2723 }
 0x4cd   : > { %2791 = vst.msk [vmem:[#allocation2 + $0xd8] sm:$0xff] %vm2763_vm13, %v2722_v54  ;;  %v2873_v56 = vpop.permute.xlu2 %2872  ;;  %v6178_v54 = vld [vmem:[%s6479_s24 + $0x82] sm:$0xff] }
 0x4ce   : > { %2792 = vst.msk [vmem:[#allocation2 + $0xe0] sm:$0xff] %vm2763_vm13, %v2724_v55  ;;  %v6179_v55 = vld [vmem:[%s6479_s24 + $0x92] sm:$0xff] }
 0x4cf   : > { %2963 = vst.msk [vmem:[#allocation2 + $0x30] sm:$0xff] %vm2956_vm14, %v2873_v56 }
 0x4d2   : > { %3069 = vrot.lane.b32.xlu0 %v6147_v57, %s6371_s12  ;;  %3071 = vrot.lane.b32.xlu1 %v6148_v59, %s6371_s12 }
 0x4d3   : > { %3073 = vrot.lane.b32.xlu2 %v6149_v61, %s6371_s12  ;;  %v6180_v61 = vld [vmem:[%s6479_s24 + $0x9a] sm:$0xff] }
 0x4d4   : > { %v2728_v62 = vpop.permute.xlu0 %2727  ;;  %v2730_v63 = vpop.permute.xlu1 %2729 }
 0x4d5   : > { %2794 = vst.msk [vmem:[#allocation2 + $0xf0] sm:$0xff] %vm2763_vm13, %v2728_v62  ;;  %v2879_v0 = vpop.permute.xlu2 %2878  ;;  %v6181_v62 = vld [vmem:[%s6479_s24 + $0xaa] sm:$0xff] }
 0x4d6   : > { %2795 = vst.msk [vmem:[#allocation2 + $0xf8] sm:$0xff] %vm2763_vm13, %v2730_v63  ;;  %v6182_v63 = vld [vmem:[%s6479_s24 + $0xb2] sm:$0xff] }
 0x4d7   : > { %2966 = vst.msk [vmem:[#allocation2 + $0x48] sm:$0xff] %vm2956_vm14, %v2879_v0 }
 0x4da   : > { %3075 = vrot.lane.b32.xlu0 %v6150_v1, %s6371_s12  ;;  %3077 = vrot.lane.b32.xlu1 %v6151_v2, %s6371_s12 }
 0x4db   : > { %3079 = vrot.lane.b32.xlu2 %v6152_v3, %s6371_s12  ;;  %v6183_v3 = vld [vmem:[%s6479_s24 + $0xc2] sm:$0xff] }
 0x4dc   : > { %v2863_v4 = vpop.permute.xlu0 %2862  ;;  %v2865_v6 = vpop.permute.xlu1 %2864 }
 0x4dd   : > { %2958 = vst.msk [vmem:[#allocation2 + $0x8] sm:$0xff] %vm2956_vm14, %v2863_v4  ;;  %v2885_v7 = vpop.permute.xlu2 %2884  ;;  %v6184_v4 = vld [vmem:[%s6479_s24 + $0xca] sm:$0xff] }
 0x4de   : > { %2959 = vst.msk [vmem:[#allocation2 + $0x10] sm:$0xff] %vm2956_vm14, %v2865_v6  ;;  %v6185_v6 = vld [vmem:[%s6479_s24 + $0xda] sm:$0xff] }
 0x4df   : > { %2969 = vst.msk [vmem:[#allocation2 + $0x60] sm:$0xff] %vm2956_vm14, %v2885_v7 }
 0x4e2   : > { %3081 = vrot.lane.b32.xlu0 %v6153_v8, %s6371_s12  ;;  %3083 = vrot.lane.b32.xlu1 %v6154_v9, %s6371_s12 }
 0x4e3   : > { %3085 = vrot.lane.b32.xlu2 %v6155_v10, %s6371_s12  ;;  %v6186_v10 = vld [vmem:[%s6479_s24 + $0xe2] sm:$0xff] }
 0x4e4   : > { %v2869_v11 = vpop.permute.xlu0 %2868  ;;  %v2871_v12 = vpop.permute.xlu1 %2870 }
 0x4e5   : > { %2961 = vst.msk [vmem:[#allocation2 + $0x20] sm:$0xff] %vm2956_vm14, %v2869_v11  ;;  %v2891_v53 = vpop.permute.xlu2 %2890  ;;  %v6187_v11 = vld [vmem:[%s6479_s24 + $0xf2] sm:$0xff] }
 0x4e6   : > { %2962 = vst.msk [vmem:[#allocation2 + $0x28] sm:$0xff] %vm2956_vm14, %v2871_v12  ;;  %v6188_v12 = vld [vmem:[%s6479_s24 + $0xfa] sm:$0xff] }
 0x4e7   : > { %2972 = vst.msk [vmem:[#allocation2 + $0x78] sm:$0xff] %vm2956_vm14, %v2891_v53 }
 0x4ea   : > { %3087 = vrot.lane.b32.xlu0 %v6156_v13, %s6371_s12  ;;  %3089 = vrot.lane.b32.xlu1 %v6157_v15, %s6371_s12 }
 0x4eb   : > { %3091 = vrot.lane.b32.xlu2 %v6158_v16, %s6371_s12  ;;  %v6189_v16 = vld [vmem:[%s6479_s24 + $0x10a] sm:$0xff] }
 0x4ec   : > { %v2875_v17 = vpop.permute.xlu0 %2874  ;;  %v2877_v60 = vpop.permute.xlu1 %2876 }
 0x4ed   : > { %2964 = vst.msk [vmem:[#allocation2 + $0x38] sm:$0xff] %vm2956_vm14, %v2875_v17  ;;  %v2897_v19 = vpop.permute.xlu2 %2896  ;;  %v6190_v17 = vld [vmem:[%s6479_s24 + $0x112] sm:$0xff] }
 0x4ee   : > { %2965 = vst.msk [vmem:[#allocation2 + $0x40] sm:$0xff] %vm2956_vm14, %v2877_v60  ;;  %v6191_v60 = vld [vmem:[%s6479_s24 + $0x122] sm:$0xff] }
 0x4ef   : > { %2975 = vst.msk [vmem:[#allocation2 + $0x90] sm:$0xff] %vm2956_vm14, %v2897_v19 }
 0x4f2   : > { %3093 = vrot.lane.b32.xlu0 %v6159_v20, %s6371_s12  ;;  %3095 = vrot.lane.b32.xlu1 %v6160_v21, %s6371_s12 }
 0x4f3   : > { %3097 = vrot.lane.b32.xlu2 %v6161_v22, %s6371_s12  ;;  %v6192_v22 = vld [vmem:[%s6479_s24 + $0x12a] sm:$0xff] }
 0x4f4   : > { %v2881_v5 = vpop.permute.xlu0 %2880  ;;  %v2883_v25 = vpop.permute.xlu1 %2882 }
 0x4f5   : > { %2967 = vst.msk [vmem:[#allocation2 + $0x50] sm:$0xff] %vm2956_vm14, %v2881_v5  ;;  %v2903_v26 = vpop.permute.xlu2 %2902  ;;  %v6193_v5 = vld [vmem:[%s6479_s24 + $0x13a] sm:$0xff] }
 0x4f6   : > { %2968 = vst.msk [vmem:[#allocation2 + $0x58] sm:$0xff] %vm2956_vm14, %v2883_v25  ;;  %v6194_v25 = vld [vmem:[%s6479_s24 + $0x142] sm:$0xff] }
 0x4f7   : > { %2978 = vst.msk [vmem:[#allocation2 + $0xa8] sm:$0xff] %vm2956_vm14, %v2903_v26 }
 0x4fa   : > { %3099 = vrot.lane.b32.xlu0 %v6162_v28, %s6371_s12  ;;  %3101 = vrot.lane.b32.xlu1 %v6163_v14, %s6371_s12 }
 0x4fb   : > { %3103 = vrot.lane.b32.xlu2 %v6164_v29, %s6371_s12  ;;  %v6195_v29 = vld [vmem:[%s6479_s24 + $0x152] sm:$0xff] }
 0x4fc   : > { %v2887_v30 = vpop.permute.xlu0 %2886  ;;  %v2889_v23 = vpop.permute.xlu1 %2888 }
 0x4fd   : > { %2970 = vst.msk [vmem:[#allocation2 + $0x68] sm:$0xff] %vm2956_vm14, %v2887_v30  ;;  %v2909_v31 = vpop.permute.xlu2 %2908  ;;  %v6196_v30 = vld [vmem:[%s6479_s24 + $0x15a] sm:$0xff] }
 0x4fe   : > { %2971 = vst.msk [vmem:[#allocation2 + $0x70] sm:$0xff] %vm2956_vm14, %v2889_v23  ;;  %v6197_v23 = vld [vmem:[%s6479_s24 + $0x16a] sm:$0xff] }
 0x4ff   : > { %2981 = vst.msk [vmem:[#allocation2 + $0xc0] sm:$0xff] %vm2956_vm14, %v2909_v31 }
 0x502   : > { %3105 = vrot.lane.b32.xlu0 %v6165_v24, %s6371_s12  ;;  %3107 = vrot.lane.b32.xlu1 %v6166_v18, %s6371_s12 }
 0x503   : > { %3109 = vrot.lane.b32.xlu2 %v6167_v32, %s6371_s12  ;;  %v6198_v32 = vld [vmem:[%s6479_s24 + $0x172] sm:$0xff] }
 0x504   : > { %v2893_v33 = vpop.permute.xlu0 %2892  ;;  %v2895_v27 = vpop.permute.xlu1 %2894 }
 0x505   : > { %2973 = vst.msk [vmem:[#allocation2 + $0x80] sm:$0xff] %vm2956_vm14, %v2893_v33  ;;  %v2915_v41 = vpop.permute.xlu2 %2914  ;;  %v6199_v33 = vld [vmem:[%s6479_s24 + $0x182] sm:$0xff] }
 0x506   : > { %2974 = vst.msk [vmem:[#allocation2 + $0x88] sm:$0xff] %vm2956_vm14, %v2895_v27  ;;  %v6200_v27 = vld [vmem:[%s6479_s24 + $0x18a] sm:$0xff] }
 0x507   : > { %2984 = vst.msk [vmem:[#allocation2 + $0xd8] sm:$0xff] %vm2956_vm14, %v2915_v41 }
 0x50a   : > { %3111 = vrot.lane.b32.xlu0 %v6168_v42, %s6371_s12  ;;  %3113 = vrot.lane.b32.xlu1 %v6169_v34, %s6371_s12 }
 0x50b   : > { %3115 = vrot.lane.b32.xlu2 %v6170_v49, %s6371_s12  ;;  %v6201_v49 = vld [vmem:[%s6479_s24 + $0x19a] sm:$0xff] }
 0x50c   : > { %v2899_v36 = vpop.permute.xlu0 %2898  ;;  %v2901_v35 = vpop.permute.xlu1 %2900 }
 0x50d   : > { %2976 = vst.msk [vmem:[#allocation2 + $0x98] sm:$0xff] %vm2956_vm14, %v2899_v36  ;;  %v2921_v50 = vpop.permute.xlu2 %2920  ;;  %v6202_v36 = vld [vmem:[%s6479_s24 + $0x1a2] sm:$0xff] }
 0x50e   : > { %2977 = vst.msk [vmem:[#allocation2 + $0xa0] sm:$0xff] %vm2956_vm14, %v2901_v35  ;;  %v6203_v35 = vld [vmem:[%s6416_s20 + $0x32] sm:$0xff] }
 0x50f   : > { %2987 = vst.msk [vmem:[#allocation2 + $0xf0] sm:$0xff] %vm2956_vm14, %v2921_v50 }
 0x512   : > { %3246 = vrot.lane.b32.xlu0 %v6171_v37, %s6372_s13  ;;  %3248 = vrot.lane.b32.xlu1 %v6172_v38, %s6372_s13 }
 0x513   : > { %3250 = vrot.lane.b32.xlu2 %v6173_v39, %s6372_s13  ;;  %v6204_v39 = vld [vmem:[%s6416_s20 + $0x3a] sm:$0xff] }
 0x514   : > { %v2905_v58 = vpop.permute.xlu0 %2904  ;;  %v2907_v40 = vpop.permute.xlu1 %2906 }
 0x515   : > { %2979 = vst.msk [vmem:[#allocation2 + $0xb0] sm:$0xff] %vm2956_vm14, %v2905_v58  ;;  %v3056_v43 = vpop.permute.xlu2 %3055  ;;  %v6205_v58 = vld [vmem:[%s6416_s20 + $0x4a] sm:$0xff] }
 0x516   : > { %2980 = vst.msk [vmem:[#allocation2 + $0xb8] sm:$0xff] %vm2956_vm14, %v2907_v40  ;;  %v6206_v40 = vld [vmem:[%s6416_s20 + $0x52] sm:$0xff] }
 0x517   : > { %3151 = vst.msk [vmem:[#allocation2 + $0x8] sm:$0xff] %vm3149_vm15, %v3056_v43 }
 0x51a   : > { %3252 = vrot.lane.b32.xlu0 %v6174_v44, %s6372_s13  ;;  %3254 = vrot.lane.b32.xlu1 %v6175_v45, %s6372_s13 }
 0x51b   : > { %3256 = vrot.lane.b32.xlu2 %v6176_v46, %s6372_s13  ;;  %v6207_v46 = vld [vmem:[%s6416_s20 + $0x62] sm:$0xff] }
 0x51c   : > { %v2911_v47 = vpop.permute.xlu0 %2910  ;;  %v2913_v48 = vpop.permute.xlu1 %2912 }
 0x51d   : > { %2982 = vst.msk [vmem:[#allocation2 + $0xc8] sm:$0xff] %vm2956_vm14, %v2911_v47  ;;  %v3062_v51 = vpop.permute.xlu2 %3061  ;;  %v6208_v47 = vld [vmem:[%s6416_s20 + $0x6a] sm:$0xff] }
 0x51e   : > { %2983 = vst.msk [vmem:[#allocation2 + $0xd0] sm:$0xff] %vm2956_vm14, %v2913_v48  ;;  %v6209_v48 = vld [vmem:[%s6416_s20 + $0x7a] sm:$0xff] }
 0x51f   : > { %3154 = vst.msk [vmem:[#allocation2 + $0x20] sm:$0xff] %vm3149_vm15, %v3062_v51 }
 0x522   : > { %3258 = vrot.lane.b32.xlu0 %v6177_v52, %s6372_s13  ;;  %3260 = vrot.lane.b32.xlu1 %v6178_v54, %s6372_s13 }
 0x523   : > { %3262 = vrot.lane.b32.xlu2 %v6179_v55, %s6372_s13  ;;  %v6210_v55 = vld [vmem:[%s6416_s20 + $0x82] sm:$0xff] }
 0x524   : > { %v2917_v56 = vpop.permute.xlu0 %2916  ;;  %v2919_v57 = vpop.permute.xlu1 %2918 }
 0x525   : > { %2985 = vst.msk [vmem:[#allocation2 + $0xe0] sm:$0xff] %vm2956_vm14, %v2917_v56  ;;  %v3068_v59 = vpop.permute.xlu2 %3067  ;;  %v6211_v56 = vld [vmem:[%s6416_s20 + $0x92] sm:$0xff] }
 0x526   : > { %2986 = vst.msk [vmem:[#allocation2 + $0xe8] sm:$0xff] %vm2956_vm14, %v2919_v57  ;;  %v6212_v57 = vld [vmem:[%s6416_s20 + $0x9a] sm:$0xff] }
 0x527   : > { %3157 = vst.msk [vmem:[#allocation2 + $0x38] sm:$0xff] %vm3149_vm15, %v3068_v59 }
 0x52a   : > { %3264 = vrot.lane.b32.xlu0 %v6180_v61, %s6372_s13  ;;  %3266 = vrot.lane.b32.xlu1 %v6181_v62, %s6372_s13 }
 0x52b   : > { %3268 = vrot.lane.b32.xlu2 %v6182_v63, %s6372_s13  ;;  %v6213_v63 = vld [vmem:[%s6416_s20 + $0xaa] sm:$0xff] }
 0x52c   : > { %v2923_v0 = vpop.permute.xlu0 %2922  ;;  %v3054_v1 = vpop.permute.xlu1 %3053 }
 0x52d   : > { %2988 = vst.msk [vmem:[#allocation2 + $0xf8] sm:$0xff] %vm2956_vm14, %v2923_v0  ;;  %v3074_v2 = vpop.permute.xlu2 %3073  ;;  %v6214_v0 = vld [vmem:[%s6416_s20 + $0xb2] sm:$0xff]  ;;  %vm3917_vm14 = vcmask 25600  }
 0x52e   : > { %3150 = vst.msk [vmem:[#allocation2] sm:$0xff] %vm3149_vm15, %v3054_v1  ;;  %v6215_v1 = vld [vmem:[%s6416_s20 + $0xc2] sm:$0xff] }
 0x52f   : > { %3160 = vst.msk [vmem:[#allocation2 + $0x50] sm:$0xff] %vm3149_vm15, %v3074_v2 }
 0x532   : > { %3270 = vrot.lane.b32.xlu0 %v6183_v3, %s6372_s13  ;;  %3272 = vrot.lane.b32.xlu1 %v6184_v4, %s6372_s13 }
 0x533   : > { %3274 = vrot.lane.b32.xlu2 %v6185_v6, %s6372_s13  ;;  %v6216_v6 = vld [vmem:[%s6416_s20 + $0xca] sm:$0xff] }
 0x534   : > { %v3058_v7 = vpop.permute.xlu0 %3057  ;;  %v3060_v8 = vpop.permute.xlu1 %3059 }
 0x535   : > { %3152 = vst.msk [vmem:[#allocation2 + $0x10] sm:$0xff] %vm3149_vm15, %v3058_v7  ;;  %v3080_v9 = vpop.permute.xlu2 %3079  ;;  %v6217_v7 = vld [vmem:[%s6416_s20 + $0xda] sm:$0xff] }
 0x536   : > { %3153 = vst.msk [vmem:[#allocation2 + $0x18] sm:$0xff] %vm3149_vm15, %v3060_v8 }
 0x537   : > { %3163 = vst.msk [vmem:[#allocation2 + $0x68] sm:$0xff] %vm3149_vm15, %v3080_v9 }
 0x53a   : > { %3276 = vrot.lane.b32.xlu0 %v6186_v10, %s6372_s13  ;;  %3278 = vrot.lane.b32.xlu1 %v6187_v11, %s6372_s13  ;;  %v6218_v10 = vld [vmem:[%s6416_s20 + $0xe2] sm:$0xff] }
 0x53b   : > { %3280 = vrot.lane.b32.xlu2 %v6188_v12, %s6372_s13  ;;  %v6219_v12 = vld [vmem:[%s6416_s20 + $0xf2] sm:$0xff] }
 0x53c   : > { %v3064_v53 = vpop.permute.xlu0 %3063  ;;  %v3066_v13 = vpop.permute.xlu1 %3065 }
 0x53d   : > { %3155 = vst.msk [vmem:[#allocation2 + $0x28] sm:$0xff] %vm3149_vm15, %v3064_v53  ;;  %v3086_v15 = vpop.permute.xlu2 %3085  ;;  %v6220_v53 = vld [vmem:[%s6416_s20 + $0xfa] sm:$0xff] }
 0x53e   : > { %3156 = vst.msk [vmem:[#allocation2 + $0x30] sm:$0xff] %vm3149_vm15, %v3066_v13 }
 0x53f   : > { %3166 = vst.msk [vmem:[#allocation2 + $0x80] sm:$0xff] %vm3149_vm15, %v3086_v15 }
 0x542   : > { %3282 = vrot.lane.b32.xlu0 %v6189_v16, %s6372_s13  ;;  %3284 = vrot.lane.b32.xlu1 %v6190_v17, %s6372_s13  ;;  %v6221_v16 = vld [vmem:[%s6416_s20 + $0x10a] sm:$0xff] }
 0x543   : > { %3286 = vrot.lane.b32.xlu2 %v6191_v60, %s6372_s13  ;;  %v6222_v60 = vld [vmem:[%s6416_s20 + $0x112] sm:$0xff] }
 0x544   : > { %v3070_v19 = vpop.permute.xlu0 %3069  ;;  %v3072_v20 = vpop.permute.xlu1 %3071 }
 0x545   : > { %3158 = vst.msk [vmem:[#allocation2 + $0x40] sm:$0xff] %vm3149_vm15, %v3070_v19  ;;  %v3092_v21 = vpop.permute.xlu2 %3091  ;;  %v6223_v19 = vld [vmem:[%s6416_s20 + $0x122] sm:$0xff] }
 0x546   : > { %3159 = vst.msk [vmem:[#allocation2 + $0x48] sm:$0xff] %vm3149_vm15, %v3072_v20 }
 0x547   : > { %3169 = vst.msk [vmem:[#allocation2 + $0x98] sm:$0xff] %vm3149_vm15, %v3092_v21 }
 0x54a   : > { %3288 = vrot.lane.b32.xlu0 %v6192_v22, %s6372_s13  ;;  %3290 = vrot.lane.b32.xlu1 %v6193_v5, %s6372_s13  ;;  %v6224_v22 = vld [vmem:[%s6416_s20 + $0x12a] sm:$0xff] }
 0x54b   : > { %3292 = vrot.lane.b32.xlu2 %v6194_v25, %s6372_s13  ;;  %v6225_v25 = vld [vmem:[%s6416_s20 + $0x13a] sm:$0xff] }
 0x54c   : > { %v3076_v26 = vpop.permute.xlu0 %3075  ;;  %v3078_v28 = vpop.permute.xlu1 %3077 }
 0x54d   : > { %3161 = vst.msk [vmem:[#allocation2 + $0x58] sm:$0xff] %vm3149_vm15, %v3076_v26  ;;  %v3098_v14 = vpop.permute.xlu2 %3097  ;;  %v6226_v26 = vld [vmem:[%s6416_s20 + $0x142] sm:$0xff] }
 0x54e   : > { %3162 = vst.msk [vmem:[#allocation2 + $0x60] sm:$0xff] %vm3149_vm15, %v3078_v28 }
 0x54f   : > { %3172 = vst.msk [vmem:[#allocation2 + $0xb0] sm:$0xff] %vm3149_vm15, %v3098_v14 }
 0x552   : > { %3294 = vrot.lane.b32.xlu0 %v6195_v29, %s6372_s13  ;;  %3296 = vrot.lane.b32.xlu1 %v6196_v30, %s6372_s13  ;;  %v3608_v29 = vld [vmem:[%s9290_s2 + $0x40] sm:$0xff]  ;;  %v6227_v30 = vld [vmem:[%s6416_s20 + $0x152] sm:$0xff] }
 0x553   : > { %3298 = vrot.lane.b32.xlu2 %v6197_v23, %s6372_s13  ;;  %v3607_v23 = vld [vmem:[%s9290_s2 + $0x38] sm:$0xff]  ;;  %3713 = vmatpush.msra.mxu0 %v3608_v29 }
 0x554   : > { %v3082_v31 = vpop.permute.xlu0 %3081  ;;  %v3084_v24 = vpop.permute.xlu1 %3083  ;;  %6304 = vmatpush.msra.mxu1 %v3608_v29  ;;  %6305 = vmatpush.msra.mxu3 %v3608_v29 }
 0x555   : > { %3164 = vst.msk [vmem:[#allocation2 + $0x70] sm:$0xff] %vm3149_vm15, %v3082_v31  ;;  %v3104_v18 = vpop.permute.xlu2 %3103  ;;  %3714 = vmatpush.msra.mxu0 %v3607_v23 }
 0x556   : > { %3165 = vst.msk [vmem:[#allocation2 + $0x78] sm:$0xff] %vm3149_vm15, %v3084_v24  ;;  %v6228_v24 = vld [vmem:[%s6416_s20 + $0x15a] sm:$0xff]  ;;  %6306 = vmatpush.msra.mxu1 %v3607_v23  ;;  %6307 = vmatpush.msra.mxu3 %v3607_v23 }
 0x557   : > { %3175 = vst.msk [vmem:[#allocation2 + $0xc8] sm:$0xff] %vm3149_vm15, %v3104_v18  ;;  %v6229_v18 = vld [vmem:[%s6416_s20 + $0x16a] sm:$0xff] }
 0x55a   : > { %3300 = vrot.lane.b32.xlu0 %v6198_v32, %s6372_s13  ;;  %3302 = vrot.lane.b32.xlu1 %v6199_v33, %s6372_s13 }
 0x55b   : > { %3304 = vrot.lane.b32.xlu2 %v6200_v27, %s6372_s13  ;;  %v3606_v27 = vld [vmem:[%s9290_s2 + $0x30] sm:$0xff] }
 0x55c   : > { %v3088_v41 = vpop.permute.xlu0 %3087  ;;  %v3090_v42 = vpop.permute.xlu1 %3089  ;;  %3715 = vmatpush.msra.mxu0 %v3606_v27  ;;  %6308 = vmatpush.msra.mxu1 %v3606_v27 }
 0x55d   : > { %3167 = vst.msk [vmem:[#allocation2 + $0x88] sm:$0xff] %vm3149_vm15, %v3088_v41  ;;  %v3110_v34 = vpop.permute.xlu2 %3109  ;;  %v3605_v41 = vld [vmem:[%s9290_s2 + $0x28] sm:$0xff]  ;;  %6309 = vmatpush.msra.mxu3 %v3606_v27 }
 0x55e   : > { %3168 = vst.msk [vmem:[#allocation2 + $0x90] sm:$0xff] %vm3149_vm15, %v3090_v42  ;;  %3716 = vmatpush.msra.mxu0 %v3605_v41  ;;  %6310 = vmatpush.msra.mxu1 %v3605_v41 }
 0x55f   : > { %3178 = vst.msk [vmem:[#allocation2 + $0xe0] sm:$0xff] %vm3149_vm15, %v3110_v34  ;;  %v3604_v34 = vld [vmem:[%s9290_s2 + $0x20] sm:$0xff]  ;;  %6311 = vmatpush.msra.mxu3 %v3605_v41 }
 0x560   : > { %3717 = vmatpush.msra.mxu0 %v3604_v34  ;;  %6312 = vmatpush.msra.mxu1 %v3604_v34 }
 0x561   : > { %6313 = vmatpush.msra.mxu3 %v3604_v34 }
 0x562   : > { %3306 = vrot.lane.b32.xlu0 %v6201_v49, %s6372_s13  ;;  %3308 = vrot.lane.b32.xlu1 %v6202_v36, %s6372_s13  ;;  %v6231_v49 = vld [vmem:[%s6416_s20 + $0x182] sm:$0xff]  ;;  %v3603_v36 = vld [vmem:[%s9290_s2 + $0x18] sm:$0xff] }
 0x563   : > { %3439 = vrot.lane.b32.xlu2 %v6203_v35, %s6373_s14  ;;  %3718 = vmatpush.msra.mxu0 %v3603_v36 }
 0x564   : > { %v3094_v50 = vpop.permute.xlu0 %3093  ;;  %v3096_v37 = vpop.permute.xlu1 %3095  ;;  %6314 = vmatpush.msra.mxu1 %v3603_v36  ;;  %6315 = vmatpush.msra.mxu3 %v3603_v36 }
 0x565   : > { %3170 = vst.msk [vmem:[#allocation2 + $0xa0] sm:$0xff] %vm3149_vm15, %v3094_v50  ;;  %v3116_v38 = vpop.permute.xlu2 %3115 }
 0x566   : > { %3171 = vst.msk [vmem:[#allocation2 + $0xa8] sm:$0xff] %vm3149_vm15, %v3096_v37  ;;  %v3602_v37 = vld [vmem:[%s9290_s2 + $0x10] sm:$0xff] }
 0x567   : > { %3181 = vst.msk [vmem:[#allocation2 + $0xf8] sm:$0xff] %vm3149_vm15, %v3116_v38  ;;  %v3601_v38 = vld [vmem:[%s9290_s2 + $0x8] sm:$0xff]  ;;  %3719 = vmatpush.msra.mxu0 %v3602_v37  ;;  %6316 = vmatpush.msra.mxu1 %v3602_v37 }
 0x568   : > { %6317 = vmatpush.msra.mxu3 %v3602_v37 }
 0x569   : > { %3720 = vmatpush.msra.mxu0 %v3601_v38  ;;  %6318 = vmatpush.msra.mxu1 %v3601_v38 }
 0x56a   : > { %3441 = vrot.lane.b32.xlu0 %v6204_v39, %s6373_s14  ;;  %3443 = vrot.lane.b32.xlu1 %v6205_v58, %s6373_s14  ;;  %v6232_v58 = vld [vmem:[%s6416_s20 + $0x18a] sm:$0xff] }
 0x56b   : > { %3445 = vrot.lane.b32.xlu2 %v6206_v40, %s6373_s14  ;;  %v3600_v40 = vld [vmem:[%s9290_s2] sm:$0xff]  ;;  %6319 = vmatpush.msra.mxu3 %v3601_v38 }
 0x56c   : > { %v3100_v43 = vpop.permute.xlu0 %3099  ;;  %v3102_v44 = vpop.permute.xlu1 %3101  ;;  %3721 = vmatpush.msra.mxu0 %v3600_v40  ;;  %6320 = vmatpush.msra.mxu1 %v3600_v40 }
 0x56d   : > { %3173 = vst.msk [vmem:[#allocation2 + $0xb8] sm:$0xff] %vm3149_vm15, %v3100_v43  ;;  %v3251_v45 = vpop.permute.xlu2 %3250  ;;  %6321 = vmatpush.msra.mxu3 %v3600_v40  ;;  %v6234_v40 = vld [vmem:[%s6416_s20 + $0x1a2] sm:$0xff] }
 0x56e   : > { %3174 = vst.msk [vmem:[#allocation2 + $0xc0] sm:$0xff] %vm3149_vm15, %v3102_v44 }
 0x56f   : > { %3345 = vst.msk [vmem:[#allocation2 + $0x10] sm:$0xff] %vm3342_vm9, %v3251_v45  ;;  %v6230_v45 = vld [vmem:[%s6416_s20 + $0x172] sm:$0xff] }
 0x572   : > { %3447 = vrot.lane.b32.xlu0 %v6207_v46, %s6373_s14  ;;  %3449 = vrot.lane.b32.xlu1 %v6208_v47, %s6373_s14 }
 0x573   : > { %3451 = vrot.lane.b32.xlu2 %v6209_v48, %s6373_s14 }
 0x574   : > { %v3106_v51 = vpop.permute.xlu0 %3105  ;;  %v3108_v52 = vpop.permute.xlu1 %3107 }
 0x575   : > { %3176 = vst.msk [vmem:[#allocation2 + $0xd0] sm:$0xff] %vm3149_vm15, %v3106_v51  ;;  %v3257_v54 = vpop.permute.xlu2 %3256 }
 0x576   : > { %3177 = vst.msk [vmem:[#allocation2 + $0xd8] sm:$0xff] %vm3149_vm15, %v3108_v52 }
 0x577   : > { %3348 = vst.msk [vmem:[#allocation2 + $0x28] sm:$0xff] %vm3342_vm9, %v3257_v54 }
 0x57a   : > { %3453 = vrot.lane.b32.xlu0 %v6210_v55, %s6373_s14  ;;  %3455 = vrot.lane.b32.xlu1 %v6211_v56, %s6373_s14 }
 0x57b   : > { %3457 = vrot.lane.b32.xlu2 %v6212_v57, %s6373_s14 }
 0x57c   : > { %v3112_v59 = vpop.permute.xlu0 %3111  ;;  %v3114_v61 = vpop.permute.xlu1 %3113 }
 0x57d   : > { %3179 = vst.msk [vmem:[#allocation2 + $0xe8] sm:$0xff] %vm3149_vm15, %v3112_v59  ;;  %v3263_v62 = vpop.permute.xlu2 %3262 }
 0x57e   : > { %3180 = vst.msk [vmem:[#allocation2 + $0xf0] sm:$0xff] %vm3149_vm15, %v3114_v61 }
 0x57f   : > { %3351 = vst.msk [vmem:[#allocation2 + $0x40] sm:$0xff] %vm3342_vm9, %v3263_v62 }
 0x582   : > { %3459 = vrot.lane.b32.xlu0 %v6213_v63, %s6373_s14  ;;  %3461 = vrot.lane.b32.xlu1 %v6214_v0, %s6373_s14 }
 0x583   : > { %3463 = vrot.lane.b32.xlu2 %v6215_v1, %s6373_s14 }
 0x584   : > { %v3247_v2 = vpop.permute.xlu0 %3246  ;;  %v3249_v3 = vpop.permute.xlu1 %3248 }
 0x585   : > { %3343 = vst.msk [vmem:[#allocation2] sm:$0xff] %vm3342_vm9, %v3247_v2  ;;  %v3269_v4 = vpop.permute.xlu2 %3268 }
 0x586   : > { %3344 = vst.msk [vmem:[#allocation2 + $0x8] sm:$0xff] %vm3342_vm9, %v3249_v3 }
 0x587   : > { %3354 = vst.msk [vmem:[#allocation2 + $0x58] sm:$0xff] %vm3342_vm9, %v3269_v4 }
 0x58a   : > { %3465 = vrot.lane.b32.xlu0 %v6216_v6, %s6373_s14  ;;  %3467 = vrot.lane.b32.xlu1 %v6217_v7, %s6373_s14 }
 0x58b   : > { %3469 = vrot.lane.b32.xlu2 %v6218_v10, %s6373_s14 }
 0x58c   : > { %v3253_v8 = vpop.permute.xlu0 %3252  ;;  %v3255_v9 = vpop.permute.xlu1 %3254 }
 0x58d   : > { %3346 = vst.msk [vmem:[#allocation2 + $0x18] sm:$0xff] %vm3342_vm9, %v3253_v8  ;;  %v3275_v11 = vpop.permute.xlu2 %3274 }
 0x58e   : > { %3347 = vst.msk [vmem:[#allocation2 + $0x20] sm:$0xff] %vm3342_vm9, %v3255_v9 }
 0x58f   : > { %3357 = vst.msk [vmem:[#allocation2 + $0x70] sm:$0xff] %vm3342_vm9, %v3275_v11 }
 0x592   : > { %3471 = vrot.lane.b32.xlu0 %v6219_v12, %s6373_s14  ;;  %3473 = vrot.lane.b32.xlu1 %v6220_v53, %s6373_s14 }
 0x593   : > { %3475 = vrot.lane.b32.xlu2 %v6221_v16, %s6373_s14 }
 0x594   : > { %v3259_v13 = vpop.permute.xlu0 %3258  ;;  %v3261_v15 = vpop.permute.xlu1 %3260 }
 0x595   : > { %3349 = vst.msk [vmem:[#allocation2 + $0x30] sm:$0xff] %vm3342_vm9, %v3259_v13  ;;  %v3281_v17 = vpop.permute.xlu2 %3280 }
 0x596   : > { %3350 = vst.msk [vmem:[#allocation2 + $0x38] sm:$0xff] %vm3342_vm9, %v3261_v15 }
 0x597   : > { %3360 = vst.msk [vmem:[#allocation2 + $0x88] sm:$0xff] %vm3342_vm9, %v3281_v17 }
 0x59a   : > { %3477 = vrot.lane.b32.xlu0 %v6222_v60, %s6373_s14  ;;  %3479 = vrot.lane.b32.xlu1 %v6223_v19, %s6373_s14 }
 0x59b   : > { %3481 = vrot.lane.b32.xlu2 %v6224_v22, %s6373_s14 }
 0x59c   : > { %v3265_v20 = vpop.permute.xlu0 %3264  ;;  %v3267_v21 = vpop.permute.xlu1 %3266 }
 0x59d   : > { %3352 = vst.msk [vmem:[#allocation2 + $0x48] sm:$0xff] %vm3342_vm9, %v3265_v20  ;;  %v3287_v5 = vpop.permute.xlu2 %3286 }
 0x59e   : > { %3353 = vst.msk [vmem:[#allocation2 + $0x50] sm:$0xff] %vm3342_vm9, %v3267_v21 }
 0x59f   : > { %3363 = vst.msk [vmem:[#allocation2 + $0xa0] sm:$0xff] %vm3342_vm9, %v3287_v5 }
 0x5a2   : > { %3483 = vrot.lane.b32.xlu0 %v6225_v25, %s6373_s14  ;;  %3485 = vrot.lane.b32.xlu1 %v6226_v26, %s6373_s14 }
 0x5a3   : > { %3487 = vrot.lane.b32.xlu2 %v6227_v30, %s6373_s14 }
 0x5a4   : > { %v3271_v28 = vpop.permute.xlu0 %3270  ;;  %v3273_v14 = vpop.permute.xlu1 %3272 }
 0x5a5   : > { %3355 = vst.msk [vmem:[#allocation2 + $0x60] sm:$0xff] %vm3342_vm9, %v3271_v28  ;;  %v3293_v31 = vpop.permute.xlu2 %3292 }
 0x5a6   : > { %3356 = vst.msk [vmem:[#allocation2 + $0x68] sm:$0xff] %vm3342_vm9, %v3273_v14 }
 0x5a7   : > { %3366 = vst.msk [vmem:[#allocation2 + $0xb8] sm:$0xff] %vm3342_vm9, %v3293_v31 }
 0x5aa   : > { %3489 = vrot.lane.b32.xlu0 %v6228_v24, %s6373_s14  ;;  %3491 = vrot.lane.b32.xlu1 %v6229_v18, %s6373_s14 }
 0x5ab   : > { %3493 = vrot.lane.b32.xlu2 %v6230_v45, %s6373_s14  ;;  %v6374_v45 = vmov 0.0  }
 0x5ac   : > { %v3277_v32 = vpop.permute.xlu0 %3276  ;;  %v3279_v33 = vpop.permute.xlu1 %3278  ;;  %3915 = vst.msk [vmem:[#allocation3] sm:$0xff] %vm250_vm0, %v6374_v45 }
 0x5ad   : > { %3358 = vst.msk [vmem:[#allocation2 + $0x78] sm:$0xff] %vm3342_vm9, %v3277_v32  ;;  %v3299_v42 = vpop.permute.xlu2 %3298 }
 0x5ae   : > { %3359 = vst.msk [vmem:[#allocation2 + $0x80] sm:$0xff] %vm3342_vm9, %v3279_v33 }
 0x5af   : > { %3369 = vst.msk [vmem:[#allocation2 + $0xd0] sm:$0xff] %vm3342_vm9, %v3299_v42 }
 0x5b0   : > { %3916 = vst.msk [vmem:[#allocation3 + $0x8] sm:$0xff] %vm250_vm0, %v6374_v45 }
 0x5b1   : > { %3920 = vst.msk [vmem:[#allocation3 + $0x198] sm:$0xff] %vm250_vm0, %v6374_v45 }
 0x5b2   : > { %3495 = vrot.lane.b32.xlu0 %v6231_v49, %s6373_s14  ;;  %3497 = vrot.lane.b32.xlu1 %v6232_v58, %s6373_s14  ;;  %3921 = vst.msk [vmem:[#allocation3 + $0x1a0] sm:$0xff] %vm250_vm0, %v6374_v45 }
 0x5b3   : > { %3926 = vst.msk [vmem:[#allocation3 + $0x30] sm:$0x1] %vm3923_vm12, %v6374_v45 }
 0x5b4   : > { %v3283_v35 = vpop.permute.xlu0 %3282  ;;  %v3285_v50 = vpop.permute.xlu1 %3284  ;;  %3924 = vst.msk [vmem:[#allocation3] sm:$0x1] %vm3923_vm12, %v6374_v45 }
 0x5b5   : > { %3361 = vst.msk [vmem:[#allocation2 + $0x90] sm:$0xff] %vm3342_vm9, %v3283_v35  ;;  %v3305_v39 = vpop.permute.xlu2 %3304 }
 0x5b6   : > { %3362 = vst.msk [vmem:[#allocation2 + $0x98] sm:$0xff] %vm3342_vm9, %v3285_v50 }
 0x5b7   : > { %3372 = vst.msk [vmem:[#allocation2 + $0xe8] sm:$0xff] %vm3342_vm9, %v3305_v39 }
 0x5b8   : > { %3925 = vst.msk [vmem:[#allocation3 + $0x18] sm:$0x1] %vm3923_vm12, %v6374_v45 }
 0x5b9   : > { %3927 = vst.msk [vmem:[#allocation3 + $0x48] sm:$0x1] %vm3923_vm12, %v6374_v45 }
 0x5ba   : > { %3501 = vrot.lane.b32.xlu0 %v6234_v40, %s6373_s14  ;;  %3928 = vst.msk [vmem:[#allocation3 + $0x60] sm:$0x1] %vm3923_vm12, %v6374_v45 }
 0x5bb   : > { %3929 = vst.msk [vmem:[#allocation3 + $0x78] sm:$0x1] %vm3923_vm12, %v6374_v45 }
 0x5bc   : > { %v3289_v43 = vpop.permute.xlu0 %3288  ;;  %v3291_v44 = vpop.permute.xlu1 %3290  ;;  %3918 = vst.msk [vmem:[#allocation3 + $0x10] sm:$0x3] %vm3917_vm14, %v6374_v45 }
 0x5bd   : > { %3364 = vst.msk [vmem:[#allocation2 + $0xa8] sm:$0xff] %vm3342_vm9, %v3289_v43  ;;  %v3440_v46 = vpop.permute.xlu2 %3439 }
 0x5be   : > { %3365 = vst.msk [vmem:[#allocation2 + $0xb0] sm:$0xff] %vm3342_vm9, %v3291_v44 }
 0x5bf   : > { %3536 = vst.msk [vmem:[#allocation2] sm:$0xff] %vm3535_vm10, %v3440_v46 }
 0x5c0   : > { %3922 = vst.msk [vmem:[#allocation3 + $0x1a8] sm:$0x3] %vm3917_vm14, %v6374_v45 }
 0x5c1   : > { %3930 = vst.msk [vmem:[#allocation3 + $0x90] sm:$0x1] %vm3923_vm12, %v6374_v45 }
 0x5c2   : > { %3931 = vst.msk [vmem:[#allocation3 + $0xa8] sm:$0x1] %vm3923_vm12, %v6374_v45 }
 0x5c3   : > { %3932 = vst.msk [vmem:[#allocation3 + $0xc0] sm:$0x1] %vm3923_vm12, %v6374_v45 }
 0x5c4   : > { %v3295_v47 = vpop.permute.xlu0 %3294  ;;  %v3297_v48 = vpop.permute.xlu1 %3296  ;;  %3933 = vst.msk [vmem:[#allocation3 + $0xd8] sm:$0x1] %vm3923_vm12, %v6374_v45 }
 0x5c5   : > { %3367 = vst.msk [vmem:[#allocation2 + $0xc0] sm:$0xff] %vm3342_vm9, %v3295_v47  ;;  %v3446_v52 = vpop.permute.xlu2 %3445 }
 0x5c6   : > { %3368 = vst.msk [vmem:[#allocation2 + $0xc8] sm:$0xff] %vm3342_vm9, %v3297_v48  ;;  %v3568_v51 = vld [vmem:[#allocation2] sm:$0xff] }
 0x5c7   : > { %6235 = vmatmul.msk.f32.vlgmr.msra.gmra.mxu0 %vm3609_vm11, %v3568_v51  ;;  %3539 = vst.msk [vmem:[#allocation2 + $0x18] sm:$0xff] %vm3535_vm10, %v3446_v52  ;;  %v4057_v52 = vld [vmem:[#allocation3 + $0x1] sm:$0xff] }
 0x5c8   : > { %4121 = vrot.lane.b32.xlu1 %v4057_v52, %s6357_s21  ;;  %3934 = vst.msk [vmem:[#allocation3 + $0xf0] sm:$0x1] %vm3923_vm12, %v6374_v45 }
 0x5c9   : > { %3935 = vst.msk [vmem:[#allocation3 + $0x108] sm:$0x1] %vm3923_vm12, %v6374_v45 }
 0x5ca   : > { %3936 = vst.msk [vmem:[#allocation3 + $0x120] sm:$0x1] %vm3923_vm12, %v6374_v45 }
 0x5cb   : > { %3937 = vst.msk [vmem:[#allocation3 + $0x138] sm:$0x1] %vm3923_vm12, %v6374_v45 }
 0x5cc   : > { %v3301_v54 = vpop.permute.xlu0 %3300  ;;  %v3303_v55 = vpop.permute.xlu1 %3302  ;;  %3938 = vst.msk [vmem:[#allocation3 + $0x150] sm:$0x1] %vm3923_vm12, %v6374_v45 }
 0x5cd   : > { %3370 = vst.msk [vmem:[#allocation2 + $0xd8] sm:$0xff] %vm3342_vm9, %v3301_v54  ;;  %v3452_v56 = vpop.permute.xlu2 %3451  ;;  %v6233_v54 = vld [vmem:[%s6416_s20 + $0x19a] sm:$0xff] }
 0x5ce   : > { %3371 = vst.msk [vmem:[#allocation2 + $0xe0] sm:$0xff] %vm3342_vm9, %v3303_v55  ;;  %v3571_v11 = vld [vmem:[#allocation2 + $0x18] sm:$0xff]  ;;  %3499 = vrot.lane.b32.xlu2 %v6233_v54, %s6373_s14 }
 0x5cf   : > { %3542 = vst.msk [vmem:[#allocation2 + $0x30] sm:$0xff] %vm3535_vm10, %v3452_v56 }
 0x5d0   : > { %3939 = vst.msk [vmem:[#allocation3 + $0x168] sm:$0x1] %vm3923_vm12, %v6374_v45 }
 0x5d1   : > { %3940 = vst.msk [vmem:[#allocation3 + $0x180] sm:$0x1] %vm3923_vm12, %v6374_v45 }
 0x5d2   : > { %3941 = vst.msk [vmem:[#allocation3 + $0x198] sm:$0x1] %vm3923_vm12, %v6374_v45 }
 0x5d3   : > { %3942 = vst.msk [vmem:[#allocation3 + $0x11] sm:$0x1] %vm3923_vm12, %v6374_v45 }
 0x5d4   : > { %v3307_v57 = vpop.permute.xlu0 %3306  ;;  %v3309_v59 = vpop.permute.xlu1 %3308  ;;  %3943 = vst.msk [vmem:[#allocation3 + $0x29] sm:$0x1] %vm3923_vm12, %v6374_v45 }
 0x5d5   : > { %3373 = vst.msk [vmem:[#allocation2 + $0xf0] sm:$0xff] %vm3342_vm9, %v3307_v57  ;;  %v3458_v61 = vpop.permute.xlu2 %3457  ;;  %v4058_v57 = vld [vmem:[#allocation3 + $0x9] sm:$0xff] }
 0x5d6   : > { %3374 = vst.msk [vmem:[#allocation2 + $0xf8] sm:$0xff] %vm3342_vm9, %v3309_v59  ;;  %v3574_v26 = vld [vmem:[#allocation2 + $0x30] sm:$0xff]  ;;  %4123 = vrot.lane.b32.xlu2 %v4058_v57, %s6357_s21 }
 0x5d7   : > { %3545 = vst.msk [vmem:[#allocation2 + $0x48] sm:$0xff] %vm3535_vm10, %v3458_v61 }
 0x5d8   : > { %3944 = vst.msk [vmem:[#allocation3 + $0x41] sm:$0x1] %vm3923_vm12, %v6374_v45 }
 0x5d9   : > { %3945 = vst.msk [vmem:[#allocation3 + $0x59] sm:$0x1] %vm3923_vm12, %v6374_v45 }
 0x5da   : > { %3946 = vst.msk [vmem:[#allocation3 + $0x71] sm:$0x1] %vm3923_vm12, %v6374_v45 }
 0x5db   : > { %3947 = vst.msk [vmem:[#allocation3 + $0x89] sm:$0x1] %vm3923_vm12, %v6374_v45 }
 0x5dc   : > { %v3442_v62 = vpop.permute.xlu0 %3441  ;;  %v3444_v63 = vpop.permute.xlu1 %3443  ;;  %3948 = vst.msk [vmem:[#allocation3 + $0xa1] sm:$0x1] %vm3923_vm12, %v6374_v45 }
 0x5dd   : > { %3537 = vst.msk [vmem:[#allocation2 + $0x8] sm:$0xff] %vm3535_vm10, %v3442_v62  ;;  %v3464_v0 = vpop.permute.xlu2 %3463 }
 0x5de   : > { %3538 = vst.msk [vmem:[#allocation2 + $0x10] sm:$0xff] %vm3535_vm10, %v3444_v63  ;;  %v3577_v42 = vld [vmem:[#allocation2 + $0x48] sm:$0xff] }
 0x5df   : > { %3548 = vst.msk [vmem:[#allocation2 + $0x60] sm:$0xff] %vm3535_vm10, %v3464_v0 }
 0x5e0   : > { %3949 = vst.msk [vmem:[#allocation3 + $0xb9] sm:$0x1] %vm3923_vm12, %v6374_v45 }
 0x5e1   : > { %3950 = vst.msk [vmem:[#allocation3 + $0xd1] sm:$0x1] %vm3923_vm12, %v6374_v45 }
 0x5e2   : > { %3951 = vst.msk [vmem:[#allocation3 + $0xe9] sm:$0x1] %vm3923_vm12, %v6374_v45 }
 0x5e3   : > { %3952 = vst.msk [vmem:[#allocation3 + $0x101] sm:$0x1] %vm3923_vm12, %v6374_v45 }
 0x5e4   : > { %v3448_v1 = vpop.permute.xlu0 %3447  ;;  %v3569_v2 = vld [vmem:[#allocation2 + $0x8] sm:$0xff]  ;;  %v3450_v3 = vpop.permute.xlu1 %3449  ;;  %3953 = vst.msk [vmem:[#allocation3 + $0x119] sm:$0x1] %vm3923_vm12, %v6374_v45 }
 0x5e5   : > { %3540 = vst.msk [vmem:[#allocation2 + $0x20] sm:$0xff] %vm3535_vm10, %v3448_v1  ;;  %6236 = vmatmul.msk.f32.gmra.mxu0 %vm3609_vm11, %v3569_v2  ;;  %v3570_v6 = vld [vmem:[#allocation2 + $0x10] sm:$0xff]  ;;  %v3470_v9 = vpop.permute.xlu2 %3469 }
 0x5e6   : > { %3541 = vst.msk [vmem:[#allocation2 + $0x28] sm:$0xff] %vm3535_vm10, %v3450_v3  ;;  %v3580_v4 = vld [vmem:[#allocation2 + $0x60] sm:$0xff] }
 0x5e7   : > { %6247 = vmatmul.msk.f32.vlgmr.msra.gmra.mxu1 %vm3609_vm11, %v3580_v4  ;;  %3551 = vst.msk [vmem:[#allocation2 + $0x78] sm:$0xff] %vm3535_vm10, %v3470_v9 }
 0x5e8   : > { %3954 = vst.msk [vmem:[#allocation3 + $0x131] sm:$0x1] %vm3923_vm12, %v6374_v45 }
 0x5e9   : > { %3955 = vst.msk [vmem:[#allocation3 + $0x149] sm:$0x1] %vm3923_vm12, %v6374_v45 }
 0x5ea   : > { %3956 = vst.msk [vmem:[#allocation3 + $0x161] sm:$0x1] %vm3923_vm12, %v6374_v45 }
 0x5eb   : > { %3957 = vst.msk [vmem:[#allocation3 + $0x179] sm:$0x1] %vm3923_vm12, %v6374_v45 }
 0x5ec   : > { %v3454_v7 = vpop.permute.xlu0 %3453  ;;  %v3456_v8 = vpop.permute.xlu1 %3455  ;;  %v3572_v15 = vld [vmem:[#allocation2 + $0x20] sm:$0xff]  ;;  %3958 = vst.msk [vmem:[#allocation3 + $0x191] sm:$0x1] %vm3923_vm12, %v6374_v45 }
 0x5ed   : > { %3543 = vst.msk [vmem:[#allocation2 + $0x38] sm:$0xff] %vm3535_vm10, %v3454_v7  ;;  %6237 = vmatmul.msk.f32.gmra.mxu0 %vm3609_vm11, %v3570_v6  ;;  %v3476_v53 = vpop.permute.xlu2 %3475  ;;  %v3573_v19 = vld [vmem:[#allocation2 + $0x28] sm:$0xff] }
 0x5ee   : > { %3544 = vst.msk [vmem:[#allocation2 + $0x40] sm:$0xff] %vm3535_vm10, %v3456_v8  ;;  %v3583_v14 = vld [vmem:[#allocation2 + $0x78] sm:$0xff] }
 0x5ef   : > { %3554 = vst.msk [vmem:[#allocation2 + $0x90] sm:$0xff] %vm3535_vm10, %v3476_v53 }
 0x5f0   : > { %3959 = vst.msk [vmem:[#allocation3 + $0x1a9] sm:$0x1] %vm3923_vm12, %v6374_v45 }
 0x5f4   : > { %v3460_v10 = vpop.permute.xlu0 %3459  ;;  %v3462_v12 = vpop.permute.xlu1 %3461  ;;  %v3575_v30 = vld [vmem:[#allocation2 + $0x38] sm:$0xff] }
 0x5f5   : > { %3546 = vst.msk [vmem:[#allocation2 + $0x50] sm:$0xff] %vm3535_vm10, %v3460_v10  ;;  %6238 = vmatmul.msk.f32.gmra.mxu0 %vm3609_vm11, %v3571_v11  ;;  %v3482_v17 = vpop.permute.xlu2 %3481  ;;  %v3576_v24 = vld [vmem:[#allocation2 + $0x40] sm:$0xff] }
 0x5f6   : > { %3547 = vst.msk [vmem:[#allocation2 + $0x58] sm:$0xff] %vm3535_vm10, %v3462_v12  ;;  %v3586_v37 = vld [vmem:[#allocation2 + $0x90] sm:$0xff] }
 0x5f7   : > { %3557 = vst.msk [vmem:[#allocation2 + $0xa8] sm:$0xff] %vm3535_vm10, %v3482_v17 }
 0x5fc   : > { %v3466_v13 = vpop.permute.xlu0 %3465  ;;  %v3468_v16 = vpop.permute.xlu1 %3467  ;;  %v3578_v50 = vld [vmem:[#allocation2 + $0x50] sm:$0xff] }
 0x5fd   : > { %3549 = vst.msk [vmem:[#allocation2 + $0x68] sm:$0xff] %vm3535_vm10, %v3466_v13  ;;  %6239 = vmatmul.msk.f32.gmra.mxu0 %vm3609_vm11, %v3572_v15  ;;  %v3488_v22 = vpop.permute.xlu2 %3487  ;;  %v3579_v39 = vld [vmem:[#allocation2 + $0x58] sm:$0xff] }
 0x5fe   : > { %3550 = vst.msk [vmem:[#allocation2 + $0x70] sm:$0xff] %vm3535_vm10, %v3468_v16  ;;  %v3589_v47 = vld [vmem:[#allocation2 + $0xa8] sm:$0xff] }
 0x5ff   : > { %3560 = vst.msk [vmem:[#allocation2 + $0xc0] sm:$0xff] %vm3535_vm10, %v3488_v22 }
 0x604   : > { %v3472_v60 = vpop.permute.xlu0 %3471  ;;  %v3581_v20 = vld [vmem:[#allocation2 + $0x68] sm:$0xff]  ;;  %v3474_v21 = vpop.permute.xlu1 %3473 }
 0x605   : > { %3552 = vst.msk [vmem:[#allocation2 + $0x80] sm:$0xff] %vm3535_vm10, %v3472_v60  ;;  %6240 = vmatmul.msk.f32.gmra.mxu0 %vm3609_vm11, %v3573_v19  ;;  %6248 = vmatmul.msk.f32.gmra.mxu1 %vm3609_vm11, %v3581_v20  ;;  %v3582_v5 = vld [vmem:[#allocation2 + $0x70] sm:$0xff]  ;;  %v3494_v31 = vpop.permute.xlu2 %3493 }
 0x606   : > { %3553 = vst.msk [vmem:[#allocation2 + $0x88] sm:$0xff] %vm3535_vm10, %v3474_v21  ;;  %v3592_v35 = vld [vmem:[#allocation2 + $0xc0] sm:$0xff] }
 0x607   : > { %3563 = vst.msk [vmem:[#allocation2 + $0xd8] sm:$0xff] %vm3535_vm10, %v3494_v31 }
 0x60c   : > { %v3478_v25 = vpop.permute.xlu0 %3477  ;;  %v3480_v28 = vpop.permute.xlu1 %3479  ;;  %v3584_v18 = vld [vmem:[#allocation2 + $0x80] sm:$0xff] }
 0x60d   : > { %3555 = vst.msk [vmem:[#allocation2 + $0x98] sm:$0xff] %vm3535_vm10, %v3478_v25  ;;  %6241 = vmatmul.msk.f32.gmra.mxu0 %vm3609_vm11, %v3574_v26  ;;  %6249 = vmatmul.msk.f32.gmra.mxu1 %vm3609_vm11, %v3582_v5  ;;  %v3585_v34 = vld [vmem:[#allocation2 + $0x88] sm:$0xff] }
 0x60e   : > { %3556 = vst.msk [vmem:[#allocation2 + $0xa0] sm:$0xff] %vm3535_vm10, %v3480_v28  ;;  %v3595_v46 = vld [vmem:[#allocation2 + $0xd8] sm:$0xff] }
 0x614   : > { %v3484_v29 = vpop.permute.xlu0 %3483  ;;  %v3486_v23 = vpop.permute.xlu1 %3485  ;;  %v3587_v58 = vld [vmem:[#allocation2 + $0x98] sm:$0xff] }
 0x615   : > { %3558 = vst.msk [vmem:[#allocation2 + $0xb0] sm:$0xff] %vm3535_vm10, %v3484_v29  ;;  %6242 = vmatmul.msk.f32.gmra.mxu0 %vm3609_vm11, %v3575_v30  ;;  %6250 = vmatmul.msk.f32.gmra.mxu1 %vm3609_vm11, %v3583_v14  ;;  %v3588_v44 = vld [vmem:[#allocation2 + $0xa0] sm:$0xff] }
 0x616   : > { %3559 = vst.msk [vmem:[#allocation2 + $0xb8] sm:$0xff] %vm3535_vm10, %v3486_v23 }
 0x61c   : > { %v3590_v32 = vld [vmem:[#allocation2 + $0xb0] sm:$0xff]  ;;  %v3490_v33 = vpop.permute.xlu0 %3489  ;;  %v3492_v27 = vpop.permute.xlu1 %3491 }
 0x61d   : > { %6243 = vmatmul.msk.f32.gmra.mxu0 %vm3609_vm11, %v3576_v24  ;;  %6251 = vmatmul.msk.f32.gmra.mxu1 %vm3609_vm11, %v3584_v18  ;;  %3561 = vst.msk [vmem:[#allocation2 + $0xc8] sm:$0xff] %vm3535_vm10, %v3490_v33  ;;  %v3591_v41 = vld [vmem:[#allocation2 + $0xb8] sm:$0xff] }
 0x61e   : > { %6257 = vmatmul.msk.f32.vlgmr.msra.gmra.mxu3 %vm3609_vm11, %v3590_v32  ;;  %3562 = vst.msk [vmem:[#allocation2 + $0xd0] sm:$0xff] %vm3535_vm10, %v3492_v27 }
 0x624   : > { %v3496_v49 = vpop.permute.xlu0 %3495  ;;  %v3498_v36 = vpop.permute.xlu1 %3497  ;;  %v3593_v38 = vld [vmem:[#allocation2 + $0xc8] sm:$0xff] }
 0x625   : > { %6244 = vmatmul.msk.f32.gmra.mxu0 %vm3609_vm11, %v3577_v42  ;;  %6252 = vmatmul.msk.f32.gmra.mxu1 %vm3609_vm11, %v3585_v34  ;;  %3564 = vst.msk [vmem:[#allocation2 + $0xe0] sm:$0xff] %vm3535_vm10, %v3496_v49  ;;  %v3594_v43 = vld [vmem:[#allocation2 + $0xd0] sm:$0xff] }
 0x626   : > { %6258 = vmatmul.msk.f32.gmra.mxu3 %vm3609_vm11, %v3591_v41  ;;  %3565 = vst.msk [vmem:[#allocation2 + $0xe8] sm:$0xff] %vm3535_vm10, %v3498_v36 }
 0x62c   : > { %v3596_v56 = vld [vmem:[#allocation2 + $0xe0] sm:$0xff] }
 0x62d   : > { %6245 = vmatmul.msk.f32.gmra.mxu0 %vm3609_vm11, %v3578_v50  ;;  %6253 = vmatmul.msk.f32.gmra.mxu1 %vm3609_vm11, %v3586_v37  ;;  %v3597_v61 = vld [vmem:[#allocation2 + $0xe8] sm:$0xff] }
 0x62e   : > { %6259 = vmatmul.msk.f32.gmra.mxu3 %vm3609_vm11, %v3592_v35 }
 0x635   : > { %6246 = vmatmul.msk.f32.gmra.mxu0 %vm3609_vm11, %v3579_v39  ;;  %6254 = vmatmul.msk.f32.gmra.mxu1 %vm3609_vm11, %v3587_v58 }
 0x636   : > { %6260 = vmatmul.msk.f32.gmra.mxu3 %vm3609_vm11, %v3593_v38 }
 0x63d   : > { %6255 = vmatmul.msk.f32.gmra.mxu1 %vm3609_vm11, %v3588_v44 }
 0x63e   : > { %6261 = vmatmul.msk.f32.gmra.mxu3 %vm3609_vm11, %v3594_v43 }
 0x644   : > { %v3723_v48 = vpop.f32.mrf.mxu0 }
 0x645   : > { %6256 = vmatmul.msk.f32.gmra.mxu1 %vm3609_vm11, %v3589_v47  ;;  %vm3819_vm13 = vcmp.ge.f32.partialorder %v3723_v48, 0.0  ;;  %v3851_v51 = vmul.f32 0.01, %v3723_v48 }
 0x646   : > { %6262 = vmatmul.msk.f32.gmra.mxu3 %vm3609_vm11, %v3595_v46 }
 0x647   : > { %v3883_v55 = vsel %vm3819_vm13, %v3723_v48, %v3851_v51 }
 0x648   : > { %3961 = vst.msk [vmem:[#allocation3 + $0x19] sm:$0xff] %vm250_vm0, %v3883_v55  ;;  %v3500_v55 = vpop.permute.xlu2 %3499 }
 0x649   : > { %3566 = vst.msk [vmem:[#allocation2 + $0xf0] sm:$0xff] %vm3535_vm10, %v3500_v55 }
 0x64e   : > { %6263 = vmatmul.msk.f32.gmra.mxu3 %vm3609_vm11, %v3596_v56 }
 0x64f   : > { %v4059_v59 = vld [vmem:[#allocation3 + $0x19] sm:$0xff] }
 0x650   : > { %4125 = vrot.lane.b32.xlu0 %v4059_v59, %s6357_s21  ;;  %v8309_v4 = vld [vmem:[#allocation3 + $0x18] sm:$0xff] }
 0x651   : > { %4027 = vst.msk [vmem:[#allocation4 + $0x10] sm:$0xff] %vm250_vm0, %v8309_v4 }
 0x656   : > { %6264 = vmatmul.msk.f32.gmra.mxu3 %vm3609_vm11, %v3597_v61 }
 0x662   : > { %v3726_v62 = vpop.f32.mrf.mxu0 }
 0x663   : > { %vm3820_vm15 = vcmp.ge.f32.partialorder %v3726_v62, 0.0  ;;  %v3852_v63 = vmul.f32 0.01, %v3726_v62 }
 0x664   : > { %v3759_v0 = vpop.f32.mrf.mxu1 }
 0x665   : > { %v3884_v1 = vsel %vm3820_vm15, %v3726_v62, %v3852_v63  ;;  %vm3831_vm9 = vcmp.ge.f32.partialorder %v3759_v0, 0.0  ;;  %v3863_v2 = vmul.f32 0.01, %v3759_v0 }
 0x666   : > { %3962 = vst.msk [vmem:[#allocation3 + $0x21] sm:$0xff] %vm250_vm0, %v3884_v1 }
 0x667   : > { %v3895_v3 = vsel %vm3831_vm9, %v3759_v0, %v3863_v2 }
 0x668   : > { %3973 = vst.msk [vmem:[#allocation3 + $0xa9] sm:$0xff] %vm250_vm0, %v3895_v3 }
 0x66a   : > { %v3729_v6 = vpop.f32.mrf.mxu0 }
 0x66b   : > { %vm3821_vm13 = vcmp.ge.f32.partialorder %v3729_v6, 0.0  ;;  %v3853_v7 = vmul.f32 0.01, %v3729_v6 }
 0x66d   : > { %v3885_v8 = vsel %vm3821_vm13, %v3729_v6, %v3853_v7  ;;  %v4060_v9 = vld [vmem:[#allocation3 + $0x21] sm:$0xff] }
 0x66e   : > { %v8316_v10 = vld [vmem:[#allocation3 + $0x20] sm:$0xff]  ;;  %3963 = vst.msk [vmem:[#allocation3 + $0x31] sm:$0xff] %vm250_vm0, %v3885_v8  ;;  %4127 = vrot.lane.b32.xlu1 %v4060_v9, %s6357_s21  ;;  %v3994_v6 = vld [vmem:[#allocation3 + $0x8] sm:$0xff]  ;;  %v4124_v8 = vpop.permute.xlu2 %4123 }
 0x66f   : > { %4028 = vst.msk [vmem:[#allocation4 + $0x18] sm:$0xff] %vm250_vm0, %v8316_v10  ;;  %v8322_v11 = vld [vmem:[#allocation3 + $0xa8] sm:$0xff] }
 0x670   : > { %4039 = vst.msk [vmem:[#allocation4 + $0x70] sm:$0xff] %vm250_vm0, %v8322_v11 }
 0x671   : > { %4026 = vst.msk [vmem:[#allocation4 + $0x8] sm:$0xff] %vm250_vm0, %v3994_v6 }
 0x672   : > { %v3732_v12 = vpop.f32.mrf.mxu0  ;;  %4218 = vst.msk [vmem:[#allocation4 + $0x8] sm:$0xff] %vm443_vm1, %v4124_v8 }
 0x673   : > { %vm3822_vm12 = vcmp.ge.f32.partialorder %v3732_v12, 0.0  ;;  %v3854_v53 = vmul.f32 0.01, %v3732_v12 }
 0x675   : > { %v3886_v13 = vsel %vm3822_vm12, %v3732_v12, %v3854_v53  ;;  %v4061_v15 = vld [vmem:[#allocation3 + $0x31] sm:$0xff] }
 0x676   : > { %v8326_v16 = vld [vmem:[#allocation3 + $0x30] sm:$0xff]  ;;  %3964 = vst.msk [vmem:[#allocation3 + $0x39] sm:$0xff] %vm250_vm0, %v3886_v13  ;;  %4129 = vrot.lane.b32.xlu2 %v4061_v15, %s6357_s21 }
 0x677   : > { %4029 = vst.msk [vmem:[#allocation4 + $0x20] sm:$0xff] %vm250_vm0, %v8326_v16 }
 0x67a   : > { %v3735_v17 = vpop.f32.mrf.mxu0 }
 0x67b   : > { %vm3823_vm14 = vcmp.ge.f32.partialorder %v3735_v17, 0.0  ;;  %v3855_v60 = vmul.f32 0.01, %v3735_v17 }
 0x67d   : > { %v3887_v19 = vsel %vm3823_vm14, %v3735_v17, %v3855_v60  ;;  %v4062_v20 = vld [vmem:[#allocation3 + $0x39] sm:$0xff] }
 0x67e   : > { %v8332_v21 = vld [vmem:[#allocation3 + $0x38] sm:$0xff]  ;;  %3965 = vst.msk [vmem:[#allocation3 + $0x49] sm:$0xff] %vm250_vm0, %v3887_v19  ;;  %4131 = vrot.lane.b32.xlu0 %v4062_v20, %s6357_s21 }
 0x67f   : > { %4030 = vst.msk [vmem:[#allocation4 + $0x28] sm:$0xff] %vm250_vm0, %v8332_v21 }
 0x682   : > { %v3738_v22 = vpop.f32.mrf.mxu0  ;;  %v3762_v5 = vpop.f32.mrf.mxu1 }
 0x683   : > { %vm3824_vm15 = vcmp.ge.f32.partialorder %v3738_v22, 0.0  ;;  %v3856_v25 = vmul.f32 0.01, %v3738_v22  ;;  %vm3832_vm9 = vcmp.ge.f32.partialorder %v3762_v5, 0.0  ;;  %v3864_v26 = vmul.f32 0.01, %v3762_v5 }
 0x685   : > { %v3888_v28 = vsel %vm3824_vm15, %v3738_v22, %v3856_v25  ;;  %v3896_v14 = vsel %vm3832_vm9, %v3762_v5, %v3864_v26  ;;  %v4063_v29 = vld [vmem:[#allocation3 + $0x49] sm:$0xff]  ;;  %v3502_v5 = vpop.permute.xlu0 %3501 }
 0x686   : > { %v8338_v30 = vld [vmem:[#allocation3 + $0x48] sm:$0xff]  ;;  %3966 = vst.msk [vmem:[#allocation3 + $0x51] sm:$0xff] %vm250_vm0, %v3888_v28  ;;  %4133 = vrot.lane.b32.xlu1 %v4063_v29, %s6357_s21 }
 0x687   : > { %3974 = vst.msk [vmem:[#allocation3 + $0xb1] sm:$0xff] %vm250_vm0, %v3896_v14 }
 0x688   : > { %4031 = vst.msk [vmem:[#allocation4 + $0x30] sm:$0xff] %vm250_vm0, %v8338_v30 }
 0x689   : > { %3567 = vst.msk [vmem:[#allocation2 + $0xf8] sm:$0xff] %vm3535_vm10, %v3502_v5 }
 0x68a   : > { %v3741_v23 = vpop.f32.mrf.mxu0  ;;  %v3765_v31 = vpop.f32.mrf.mxu1 }
 0x68b   : > { %vm3825_vm13 = vcmp.ge.f32.partialorder %v3741_v23, 0.0  ;;  %v3857_v24 = vmul.f32 0.01, %v3741_v23  ;;  %vm3833_vm12 = vcmp.ge.f32.partialorder %v3765_v31, 0.0  ;;  %v3865_v18 = vmul.f32 0.01, %v3765_v31 }
 0x68d   : > { %v3889_v32 = vsel %vm3825_vm13, %v3741_v23, %v3857_v24  ;;  %v3897_v33 = vsel %vm3833_vm12, %v3765_v31, %v3865_v18  ;;  %v4064_v27 = vld [vmem:[#allocation3 + $0x51] sm:$0xff] }
 0x68e   : > { %v8345_v41 = vld [vmem:[#allocation3 + $0x50] sm:$0xff]  ;;  %3967 = vst.msk [vmem:[#allocation3 + $0x61] sm:$0xff] %vm250_vm0, %v3889_v32  ;;  %4135 = vrot.lane.b32.xlu2 %v4064_v27, %s6357_s21 }
 0x68f   : > { %3975 = vst.msk [vmem:[#allocation3 + $0xc1] sm:$0xff] %vm250_vm0, %v3897_v33  ;;  %v8350_v42 = vld [vmem:[#allocation3 + $0xb0] sm:$0xff] }
 0x690   : > { %4032 = vst.msk [vmem:[#allocation4 + $0x38] sm:$0xff] %vm250_vm0, %v8345_v41 }
 0x691   : > { %4040 = vst.msk [vmem:[#allocation4 + $0x78] sm:$0xff] %vm250_vm0, %v8350_v42 }
 0x692   : > { %v3744_v34 = vpop.f32.mrf.mxu0  ;;  %v3768_v49 = vpop.f32.mrf.mxu1 }
 0x693   : > { %vm3826_vm14 = vcmp.ge.f32.partialorder %v3744_v34, 0.0  ;;  %v3858_v36 = vmul.f32 0.01, %v3744_v34  ;;  %vm3834_vm15 = vcmp.ge.f32.partialorder %v3768_v49, 0.0  ;;  %v3866_v35 = vmul.f32 0.01, %v3768_v49 }
 0x695   : > { %v3890_v50 = vsel %vm3826_vm14, %v3744_v34, %v3858_v36  ;;  %v3898_v37 = vsel %vm3834_vm15, %v3768_v49, %v3866_v35  ;;  %v4065_v38 = vld [vmem:[#allocation3 + $0x61] sm:$0xff]  ;;  %v8417_v34 = vld [vmem:[#allocation3 + $0xa9] sm:$0xff] }
 0x696   : > { %v8356_v39 = vld [vmem:[#allocation3 + $0x60] sm:$0xff]  ;;  %3968 = vst.msk [vmem:[#allocation3 + $0x69] sm:$0xff] %vm250_vm0, %v3890_v50  ;;  %4137 = vrot.lane.b32.xlu0 %v4065_v38, %s6357_s21  ;;  %v4122_v38 = vpop.permute.xlu1 %4121 }
 0x697   : > { %v8360_v58 = vld [vmem:[#allocation3 + $0xc0] sm:$0xff]  ;;  %3976 = vst.msk [vmem:[#allocation3 + $0xc9] sm:$0xff] %vm250_vm0, %v3898_v37 }
 0x698   : > { %4033 = vst.msk [vmem:[#allocation4 + $0x40] sm:$0xff] %vm250_vm0, %v8356_v39  ;;  %v3993_v35 = vld [vmem:[#allocation3] sm:$0xff] }
 0x699   : > { %4041 = vst.msk [vmem:[#allocation4 + $0x80] sm:$0xff] %vm250_vm0, %v8360_v58 }
 0x69a   : > { %v3747_v40 = vpop.f32.mrf.mxu0  ;;  %v3771_v43 = vpop.f32.mrf.mxu1  ;;  %4025 = vst.msk [vmem:[#allocation4] sm:$0xff] %vm250_vm0, %v3993_v35 }
 0x69b   : > { %vm3827_vm9 = vcmp.ge.f32.partialorder %v3747_v40, 0.0  ;;  %v3859_v44 = vmul.f32 0.01, %v3747_v40  ;;  %vm3835_vm13 = vcmp.ge.f32.partialorder %v3771_v43, 0.0  ;;  %v3867_v45 = vmul.f32 0.01, %v3771_v43 }
 0x69c   : > { %4217 = vst.msk [vmem:[#allocation4] sm:$0xff] %vm443_vm1, %v4122_v38 }
 0x69d   : > { %v3891_v46 = vsel %vm3827_vm9, %v3747_v40, %v3859_v44  ;;  %v3899_v47 = vsel %vm3835_vm13, %v3771_v43, %v3867_v45  ;;  %v4066_v48 = vld [vmem:[#allocation3 + $0x69] sm:$0xff] }
 0x69e   : > { %3969 = vst.msk [vmem:[#allocation3 + $0x79] sm:$0xff] %vm250_vm0, %v3891_v46  ;;  %4139 = vrot.lane.b32.xlu1 %v4066_v48, %s6357_s21  ;;  %v8369_v51 = vld [vmem:[#allocation3 + $0x68] sm:$0xff] }
 0x69f   : > { %3977 = vst.msk [vmem:[#allocation3 + $0xd9] sm:$0xff] %vm250_vm0, %v3899_v47  ;;  %v8372_v52 = vld [vmem:[#allocation3 + $0xc8] sm:$0xff] }
 0x6a0   : > { %4034 = vst.msk [vmem:[#allocation4 + $0x48] sm:$0xff] %vm250_vm0, %v8369_v51  ;;  %v8442_v48 = vld [vmem:[#allocation3 + $0xc9] sm:$0xff] }
 0x6a1   : > { %v3789_v54 = vpop.f32.mrf.mxu3  ;;  %4042 = vst.msk [vmem:[#allocation4 + $0x88] sm:$0xff] %vm250_vm0, %v8372_v52 }
 0x6a2   : > { %vm3841_vm12 = vcmp.ge.f32.partialorder %v3789_v54, 0.0  ;;  %v3873_v56 = vmul.f32 0.01, %v3789_v54  ;;  %v3750_v57 = vpop.f32.mrf.mxu0  ;;  %v3774_v59 = vpop.f32.mrf.mxu1 }
 0x6a3   : > { %vm3828_vm14 = vcmp.ge.f32.partialorder %v3750_v57, 0.0  ;;  %v3860_v61 = vmul.f32 0.01, %v3750_v57  ;;  %vm3836_vm15 = vcmp.ge.f32.partialorder %v3774_v59, 0.0  ;;  %v3868_v62 = vmul.f32 0.01, %v3774_v59 }
 0x6a4   : > { %v3905_v63 = vsel %vm3841_vm12, %v3789_v54, %v3873_v56  ;;  %v8444_v54 = vld [vmem:[#allocation3 + $0xb1] sm:$0xff] }
 0x6a5   : > { %3983 = vst.msk [vmem:[#allocation3 + $0x121] sm:$0xff] %vm250_vm0, %v3905_v63  ;;  %v3892_v0 = vsel %vm3828_vm14, %v3750_v57, %v3860_v61  ;;  %v3900_v1 = vsel %vm3836_vm15, %v3774_v59, %v3868_v62  ;;  %v8380_v2 = vld [vmem:[#allocation3 + $0x79] sm:$0xff] }
 0x6a6   : > { %3970 = vst.msk [vmem:[#allocation3 + $0x81] sm:$0xff] %vm250_vm0, %v3892_v0  ;;  %4141 = vrot.lane.b32.xlu2 %v8380_v2, %s6357_s21  ;;  %v8385_v3 = vld [vmem:[#allocation3 + $0x78] sm:$0xff] }
 0x6a7   : > { %3978 = vst.msk [vmem:[#allocation3 + $0xe1] sm:$0xff] %vm250_vm0, %v3900_v1  ;;  %v8391_v9 = vld [vmem:[#allocation3 + $0xd8] sm:$0xff] }
 0x6a8   : > { %4035 = vst.msk [vmem:[#allocation4 + $0x50] sm:$0xff] %vm250_vm0, %v8385_v3 }
 0x6a9   : > { %v3792_v7 = vpop.f32.mrf.mxu3  ;;  %4043 = vst.msk [vmem:[#allocation4 + $0x90] sm:$0xff] %vm250_vm0, %v8391_v9 }
 0x6aa   : > { %vm3842_vm9 = vcmp.ge.f32.partialorder %v3792_v7, 0.0  ;;  %v3874_v12 = vmul.f32 0.01, %v3792_v7  ;;  %v3753_v53 = vpop.f32.mrf.mxu0  ;;  %v3777_v13 = vpop.f32.mrf.mxu1 }
 0x6ab   : > { %vm3829_vm13 = vcmp.ge.f32.partialorder %v3753_v53, 0.0  ;;  %v3861_v15 = vmul.f32 0.01, %v3753_v53  ;;  %vm3837_vm12 = vcmp.ge.f32.partialorder %v3777_v13, 0.0  ;;  %v3869_v17 = vmul.f32 0.01, %v3777_v13 }
 0x6ac   : > { %v3906_v60 = vsel %vm3842_vm9, %v3792_v7, %v3874_v12  ;;  %v8410_v14 = vld [vmem:[#allocation3 + $0x120] sm:$0xff] }
 0x6ad   : > { %3984 = vst.msk [vmem:[#allocation3 + $0x129] sm:$0xff] %vm250_vm0, %v3906_v60  ;;  %v3893_v19 = vsel %vm3829_vm13, %v3753_v53, %v3861_v15  ;;  %v3901_v20 = vsel %vm3837_vm12, %v3777_v13, %v3869_v17  ;;  %v8397_v22 = vld [vmem:[#allocation3 + $0x81] sm:$0xff]  ;;  %v8468_v7 = vld [vmem:[#allocation3 + $0xd9] sm:$0xff] }
 0x6ae   : > { %3971 = vst.msk [vmem:[#allocation3 + $0x91] sm:$0xff] %vm250_vm0, %v3893_v19  ;;  %4143 = vrot.lane.b32.xlu0 %v8397_v22, %s6357_s21  ;;  %v8403_v25 = vld [vmem:[#allocation3 + $0x80] sm:$0xff] }
 0x6af   : > { %3979 = vst.msk [vmem:[#allocation3 + $0xf1] sm:$0xff] %vm250_vm0, %v3901_v20  ;;  %v8405_v26 = vld [vmem:[#allocation3 + $0xe0] sm:$0xff] }
 0x6b0   : > { %4036 = vst.msk [vmem:[#allocation4 + $0x58] sm:$0xff] %vm250_vm0, %v8403_v25  ;;  %v8482_v15 = vld [vmem:[#allocation3 + $0xc1] sm:$0xff] }
 0x6b1   : > { %v3795_v28 = vpop.f32.mrf.mxu3  ;;  %4044 = vst.msk [vmem:[#allocation4 + $0x98] sm:$0xff] %vm250_vm0, %v8405_v26  ;;  %v8516_v35 = vld [vmem:[#allocation3 + $0x121] sm:$0xff] }
 0x6b2   : > { %vm3843_vm14 = vcmp.ge.f32.partialorder %v3795_v28, 0.0  ;;  %v3875_v29 = vmul.f32 0.01, %v3795_v28  ;;  %v3756_v23 = vpop.f32.mrf.mxu0  ;;  %v3780_v31 = vpop.f32.mrf.mxu1  ;;  %4049 = vst.msk [vmem:[#allocation4 + $0xc0] sm:$0xff] %vm250_vm0, %v8410_v14 }
 0x6b3   : > { %vm3830_vm15 = vcmp.ge.f32.partialorder %v3756_v23, 0.0  ;;  %v3862_v24 = vmul.f32 0.01, %v3756_v23  ;;  %vm3838_vm9 = vcmp.ge.f32.partialorder %v3780_v31, 0.0  ;;  %v3870_v18 = vmul.f32 0.01, %v3780_v31 }
 0x6b4   : > { %v3907_v32 = vsel %vm3843_vm14, %v3795_v28, %v3875_v29  ;;  %v8434_v40 = vld [vmem:[#allocation3 + $0x128] sm:$0xff] }
 0x6b5   : > { %3985 = vst.msk [vmem:[#allocation3 + $0x139] sm:$0xff] %vm250_vm0, %v3907_v32  ;;  %v3894_v33 = vsel %vm3830_vm15, %v3756_v23, %v3862_v24  ;;  %v3902_v27 = vsel %vm3838_vm9, %v3780_v31, %v3870_v18  ;;  %v8419_v49 = vld [vmem:[#allocation3 + $0x91] sm:$0xff]  ;;  %v8501_v29 = vld [vmem:[#allocation3 + $0xe1] sm:$0xff] }
 0x6b6   : > { %3972 = vst.msk [vmem:[#allocation3 + $0x99] sm:$0xff] %vm250_vm0, %v3894_v33  ;;  %4149 = vrot.lane.b32.xlu0 %v8417_v34, %s6357_s21  ;;  %4145 = vrot.lane.b32.xlu1 %v8419_v49, %s6357_s21  ;;  %v8426_v36 = vld [vmem:[#allocation3 + $0x90] sm:$0xff] }
 0x6b7   : > { %3980 = vst.msk [vmem:[#allocation3 + $0xf9] sm:$0xff] %vm250_vm0, %v3902_v27  ;;  %v8430_v50 = vld [vmem:[#allocation3 + $0xf0] sm:$0xff] }
 0x6b8   : > { %4037 = vst.msk [vmem:[#allocation4 + $0x60] sm:$0xff] %vm250_vm0, %v8426_v36  ;;  %v8471_v12 = vld [vmem:[#allocation3 + $0xf1] sm:$0xff] }
 0x6b9   : > { %v3798_v37 = vpop.f32.mrf.mxu3  ;;  %4045 = vst.msk [vmem:[#allocation4 + $0xa0] sm:$0xff] %vm250_vm0, %v8430_v50  ;;  %v3598_v18 = vld [vmem:[#allocation2 + $0xf0] sm:$0xff] }
 0x6ba   : > { %vm3844_vm10 = vcmp.ge.f32.partialorder %v3798_v37, 0.0  ;;  %v3876_v43 = vmul.f32 0.01, %v3798_v37  ;;  %v3783_v44 = vpop.f32.mrf.mxu1  ;;  %4050 = vst.msk [vmem:[#allocation4 + $0xc8] sm:$0xff] %vm250_vm0, %v8434_v40  ;;  %6265 = vmatmul.msk.f32.gmra.mxu3 %vm3609_vm11, %v3598_v18 }
 0x6bb   : > { %vm3839_vm13 = vcmp.ge.f32.partialorder %v3783_v44, 0.0  ;;  %v3871_v45 = vmul.f32 0.01, %v3783_v44 }
 0x6bc   : > { %v3908_v46 = vsel %vm3844_vm10, %v3798_v37, %v3876_v43  ;;  %v8455_v57 = vld [vmem:[#allocation3 + $0x138] sm:$0xff] }
 0x6bd   : > { %3986 = vst.msk [vmem:[#allocation3 + $0x141] sm:$0xff] %vm250_vm0, %v3908_v46  ;;  %v3903_v47 = vsel %vm3839_vm13, %v3783_v44, %v3871_v45  ;;  %v8446_v55 = vld [vmem:[#allocation3 + $0x99] sm:$0xff] }
 0x6be   : > { %3981 = vst.msk [vmem:[#allocation3 + $0x109] sm:$0xff] %vm250_vm0, %v3903_v47  ;;  %4155 = vrot.lane.b32.xlu0 %v8442_v48, %s6357_s21  ;;  %4151 = vrot.lane.b32.xlu1 %v8444_v54, %s6357_s21  ;;  %v8453_v56 = vld [vmem:[#allocation3 + $0x98] sm:$0xff] }
 0x6bf   : > { %4147 = vrot.lane.b32.xlu2 %v8446_v55, %s6357_s21  ;;  %4038 = vst.msk [vmem:[#allocation4 + $0x68] sm:$0xff] %vm250_vm0, %v8453_v56  ;;  %v8461_v59 = vld [vmem:[#allocation3 + $0xf8] sm:$0xff] }
 0x6c0   : > { %4046 = vst.msk [vmem:[#allocation4 + $0xa8] sm:$0xff] %vm250_vm0, %v8461_v59  ;;  %v8495_v28 = vld [vmem:[#allocation3 + $0xf9] sm:$0xff] }
 0x6c1   : > { %v3801_v61 = vpop.f32.mrf.mxu3  ;;  %4051 = vst.msk [vmem:[#allocation4 + $0xd0] sm:$0xff] %vm250_vm0, %v8455_v57  ;;  %v8514_v27 = vld [vmem:[#allocation3 + $0x139] sm:$0xff] }
 0x6c2   : > { %vm3845_vm12 = vcmp.ge.f32.partialorder %v3801_v61, 0.0  ;;  %v3877_v62 = vmul.f32 0.01, %v3801_v61  ;;  %v3786_v63 = vpop.f32.mrf.mxu1  ;;  %v4126_v0 = vpop.permute.xlu0 %4125  ;;  %v3599_v44 = vld [vmem:[#allocation2 + $0xf8] sm:$0xff] }
 0x6c3   : > { %vm3840_vm14 = vcmp.ge.f32.partialorder %v3786_v63, 0.0  ;;  %v3872_v1 = vmul.f32 0.01, %v3786_v63  ;;  %4219 = vst.msk [vmem:[#allocation4 + $0x10] sm:$0xff] %vm443_vm1, %v4126_v0  ;;  %6266 = vmatmul.msk.f32.gmra.mxu3 %vm3609_vm11, %v3599_v44 }
 0x6c4   : > { %v3909_v6 = vsel %vm3845_vm12, %v3801_v61, %v3877_v62  ;;  %v8475_v13 = vld [vmem:[#allocation3 + $0x140] sm:$0xff] }
 0x6c5   : > { %3987 = vst.msk [vmem:[#allocation3 + $0x151] sm:$0xff] %vm250_vm0, %v3909_v6  ;;  %v3904_v8 = vsel %vm3840_vm14, %v3786_v63, %v3872_v1  ;;  %v8473_v53 = vld [vmem:[#allocation3 + $0x108] sm:$0xff] }
 0x6c6   : > { %3982 = vst.msk [vmem:[#allocation3 + $0x111] sm:$0xff] %vm250_vm0, %v3904_v8  ;;  %4161 = vrot.lane.b32.xlu0 %v8471_v12, %s6357_s21  ;;  %4157 = vrot.lane.b32.xlu1 %v8468_v7, %s6357_s21  ;;  %v8524_v38 = vld [vmem:[#allocation3 + $0x109] sm:$0xff]  ;;  %v8536_v62 = vld [vmem:[#allocation3 + $0x141] sm:$0xff] }
 0x6c7   : > { %4153 = vrot.lane.b32.xlu2 %v8482_v15, %s6357_s21  ;;  %4047 = vst.msk [vmem:[#allocation4 + $0xb0] sm:$0xff] %vm250_vm0, %v8473_v53  ;;  %v8542_v63 = vld [vmem:[#allocation3 + $0x129] sm:$0xff] }
 0x6c8   : > { %4052 = vst.msk [vmem:[#allocation4 + $0xd8] sm:$0xff] %vm250_vm0, %v8475_v13  ;;  %v4249_v1 = vld [vmem:[#allocation3 + $0x2] sm:$0xff] }
 0x6c9   : > { %v3804_v17 = vpop.f32.mrf.mxu3 }
 0x6ca   : > { %vm3846_vm15 = vcmp.ge.f32.partialorder %v3804_v17, 0.0  ;;  %v3878_v60 = vmul.f32 0.01, %v3804_v17 }
 0x6cc   : > { %v3910_v19 = vsel %vm3846_vm15, %v3804_v17, %v3878_v60  ;;  %v8490_v20 = vld [vmem:[#allocation3 + $0x150] sm:$0xff] }
 0x6cd   : > { %3988 = vst.msk [vmem:[#allocation3 + $0x159] sm:$0xff] %vm250_vm0, %v3910_v19  ;;  %v8493_v5 = vld [vmem:[#allocation3 + $0x111] sm:$0xff] }
 0x6ce   : > { %4167 = vrot.lane.b32.xlu0 %v8493_v5, %s6357_s21  ;;  %4163 = vrot.lane.b32.xlu1 %v8495_v28, %s6357_s21  ;;  %v8503_v23 = vld [vmem:[#allocation3 + $0x110] sm:$0xff]  ;;  %4053 = vst.msk [vmem:[#allocation4 + $0xe0] sm:$0xff] %vm250_vm0, %v8490_v20 }
 0x6cf   : > { %4159 = vrot.lane.b32.xlu2 %v8501_v29, %s6357_s21  ;;  %4048 = vst.msk [vmem:[#allocation4 + $0xb8] sm:$0xff] %vm250_vm0, %v8503_v23  ;;  %v8558_v17 = vld [vmem:[#allocation3 + $0x151] sm:$0xff] }
 0x6d0   : > { %v4130_v31 = vpop.permute.xlu2 %4129  ;;  %v4250_v19 = vld [vmem:[#allocation3 + $0xa] sm:$0xff] }
 0x6d1   : > { %v3807_v24 = vpop.f32.mrf.mxu3  ;;  %4221 = vst.msk [vmem:[#allocation4 + $0x20] sm:$0xff] %vm443_vm1, %v4130_v31 }
 0x6d2   : > { %vm3847_vm9 = vcmp.ge.f32.partialorder %v3807_v24, 0.0  ;;  %v3879_v32 = vmul.f32 0.01, %v3807_v24 }
 0x6d4   : > { %v3911_v33 = vsel %vm3847_vm9, %v3807_v24, %v3879_v32  ;;  %v8518_v37 = vld [vmem:[#allocation3 + $0x158] sm:$0xff]  ;;  %v8565_v24 = vld [vmem:[#allocation3 + $0x22] sm:$0xff]  ;;  %v8573_v32 = vld [vmem:[#allocation3 + $0x4a] sm:$0xff] }
 0x6d5   : > { %3989 = vst.msk [vmem:[#allocation3 + $0x169] sm:$0xff] %vm250_vm0, %v3911_v33  ;;  %v8534_v61 = vld [vmem:[#allocation3 + $0x159] sm:$0xff] }
 0x6d6   : > { %4173 = vrot.lane.b32.xlu0 %v8514_v27, %s6357_s21  ;;  %4169 = vrot.lane.b32.xlu1 %v8516_v35, %s6357_s21  ;;  %4054 = vst.msk [vmem:[#allocation4 + $0xe8] sm:$0xff] %vm250_vm0, %v8518_v37  ;;  %v8575_v33 = vld [vmem:[#allocation3 + $0x32] sm:$0xff] }
 0x6d7   : > { %4165 = vrot.lane.b32.xlu2 %v8524_v38, %s6357_s21  ;;  %9316 = vst [vmem:[#allocation5_spill] sm:$0xff] %v8575_v33 }
 0x6d9   : > { %v3810_v43 = vpop.f32.mrf.mxu3 }
 0x6da   : > { %vm3848_vm10 = vcmp.ge.f32.partialorder %v3810_v43, 0.0  ;;  %v3880_v45 = vmul.f32 0.01, %v3810_v43 }
 0x6dc   : > { %v3912_v46 = vsel %vm3848_vm10, %v3810_v43, %v3880_v45  ;;  %v8531_v47 = vld [vmem:[#allocation3 + $0x168] sm:$0xff]  ;;  %v8581_v43 = vld [vmem:[#allocation3 + $0x1a] sm:$0xff] }
 0x6dd   : > { %3990 = vst.msk [vmem:[#allocation3 + $0x171] sm:$0xff] %vm250_vm0, %v3912_v46  ;;  %v8551_v8 = vld [vmem:[#allocation3 + $0x169] sm:$0xff]  ;;  %v8588_v46 = vld [vmem:[#allocation3 + $0x52] sm:$0xff] }
 0x6de   : > { %4179 = vrot.lane.b32.xlu0 %v8534_v61, %s6357_s21  ;;  %4175 = vrot.lane.b32.xlu1 %v8536_v62, %s6357_s21  ;;  %4055 = vst.msk [vmem:[#allocation4 + $0xf0] sm:$0xff] %vm250_vm0, %v8531_v47  ;;  %v8586_v45 = vld [vmem:[#allocation3 + $0x6a] sm:$0xff] }
 0x6df   : > { %4171 = vrot.lane.b32.xlu2 %v8542_v63, %s6357_s21  ;;  %9317 = vst [vmem:[#allocation6_spill] sm:$0xff] %v8586_v45 }
 0x6e0   : > { %v4128_v0 = vpop.permute.xlu1 %4127  ;;  %9318 = vst [vmem:[#allocation7_spill] sm:$0xff] %v8588_v46 }
 0x6e1   : > { %4220 = vst.msk [vmem:[#allocation4 + $0x18] sm:$0xff] %vm443_vm1, %v4128_v0  ;;  %v8594_v0 = vld [vmem:[#allocation3 + $0x3a] sm:$0xff] }
 0x6e4   : > { %v8549_v6 = vld [vmem:[#allocation3 + $0x170] sm:$0xff] }
 0x6e5   : > { %4056 = vst.msk [vmem:[#allocation4 + $0xf8] sm:$0xff] %vm250_vm0, %v8549_v6  ;;  %v8563_v31 = vld [vmem:[#allocation3 + $0x171] sm:$0xff] }
 0x6e6   : > { %4313 = vrot.lane.b32.xlu0 %v4249_v1, %s6358_s25  ;;  %4181 = vrot.lane.b32.xlu1 %v8551_v8, %s6357_s21 }
 0x6e7   : > { %4177 = vrot.lane.b32.xlu2 %v8558_v17, %s6357_s21 }
 0x6e8   : > { %v4136_v60 = vpop.permute.xlu2 %4135 }
 0x6e9   : > { %4224 = vst.msk [vmem:[#allocation4 + $0x38] sm:$0xff] %vm443_vm1, %v4136_v60  ;;  %v8599_v60 = vld [vmem:[#allocation3 + $0x7a] sm:$0xff] }
 0x6ea   : > { %9319 = vst [vmem:[#allocation8_spill] sm:$0xff] %v8599_v60 }
 0x6ee   : > { %4319 = vrot.lane.b32.xlu0 %v8565_v24, %s6358_s25  ;;  %4315 = vrot.lane.b32.xlu1 %v4250_v19, %s6358_s25  ;;  %v8601_v19 = vld [vmem:[#allocation3 + $0x92] sm:$0xff] }
 0x6ef   : > { %4183 = vrot.lane.b32.xlu2 %v8563_v31, %s6357_s21  ;;  %9320 = vst [vmem:[#allocation9_spill] sm:$0xff] %v8601_v19 }
 0x6f0   : > { %v4132_v18 = vpop.permute.xlu0 %4131 }
 0x6f1   : > { %4222 = vst.msk [vmem:[#allocation4 + $0x28] sm:$0xff] %vm443_vm1, %v4132_v18  ;;  %v8607_v18 = vld [vmem:[#allocation3 + $0x62] sm:$0xff] }
 0x6f6   : > { %4325 = vrot.lane.b32.xlu0 %v8573_v32, %s6358_s25  ;;  %4321 = vrot.lane.b32.xlu1 %v8575_v33, %s6358_s25  ;;  %v8654_v33 = vld [vmem:[#allocation3 + $0x122] sm:$0xff] }
 0x6f7   : > { %4317 = vrot.lane.b32.xlu2 %v8581_v43, %s6358_s25  ;;  %9331 = vst [vmem:[#allocation20_spill] sm:$0xff] %v8654_v33 }
 0x6f8   : > { %v4134_v44 = vpop.permute.xlu1 %4133 }
 0x6f9   : > { %4223 = vst.msk [vmem:[#allocation4 + $0x30] sm:$0xff] %vm443_vm1, %v4134_v44 }
 0x6fe   : > { %4331 = vrot.lane.b32.xlu0 %v8586_v45, %s6358_s25  ;;  %4327 = vrot.lane.b32.xlu1 %v8588_v46, %s6358_s25  ;;  %v8612_v46 = vld [vmem:[#allocation3 + $0x9a] sm:$0xff]  ;;  %v8625_v45 = vld [vmem:[#allocation3 + $0xc2] sm:$0xff] }
 0x6ff   : > { %4323 = vrot.lane.b32.xlu2 %v8594_v0, %s6358_s25  ;;  %9321 = vst [vmem:[#allocation10_spill] sm:$0xff] %v8612_v46 }
 0x700   : > { %v4142_v1 = vpop.permute.xlu2 %4141  ;;  %9324 = vst [vmem:[#allocation13_spill] sm:$0xff] %v8625_v45 }
 0x701   : > { %4227 = vst.msk [vmem:[#allocation4 + $0x50] sm:$0xff] %vm443_vm1, %v4142_v1  ;;  %v8614_v1 = vld [vmem:[#allocation3 + $0xb2] sm:$0xff] }
 0x702   : > { %9322 = vst [vmem:[#allocation11_spill] sm:$0xff] %v8614_v1 }
 0x706   : > { %4333 = vrot.lane.b32.xlu1 %v8599_v60, %s6358_s25  ;;  %4337 = vrot.lane.b32.xlu0 %v8601_v19, %s6358_s25  ;;  %v8620_v60 = vld [vmem:[#allocation3 + $0x82] sm:$0xff] }
 0x707   : > { %4329 = vrot.lane.b32.xlu2 %v8607_v18, %s6358_s25  ;;  %9323 = vst [vmem:[#allocation12_spill] sm:$0xff] %v8620_v60 }
 0x708   : > { %v4138_v44 = vpop.permute.xlu0 %4137 }
 0x709   : > { %4225 = vst.msk [vmem:[#allocation4 + $0x40] sm:$0xff] %vm443_vm1, %v4138_v44  ;;  %v8627_v44 = vld [vmem:[#allocation3 + $0xda] sm:$0xff] }
 0x70a   : > { %9325 = vst [vmem:[#allocation14_spill] sm:$0xff] %v8627_v44 }
 0x70e   : > { %4339 = vrot.lane.b32.xlu1 %v8612_v46, %s6358_s25  ;;  %4343 = vrot.lane.b32.xlu0 %v8614_v1, %s6358_s25  ;;  %v8633_v46 = vld [vmem:[#allocation3 + $0xaa] sm:$0xff] }
 0x70f   : > { %4335 = vrot.lane.b32.xlu2 %v8620_v60, %s6358_s25  ;;  %9326 = vst [vmem:[#allocation15_spill] sm:$0xff] %v8633_v46  ;;  %v8638_v60 = vld [vmem:[#allocation3 + $0xe2] sm:$0xff] }
 0x710   : > { %v4140_v19 = vpop.permute.xlu1 %4139  ;;  %9327 = vst [vmem:[#allocation16_spill] sm:$0xff] %v8638_v60 }
 0x711   : > { %4226 = vst.msk [vmem:[#allocation4 + $0x48] sm:$0xff] %vm443_vm1, %v4140_v19  ;;  %v8640_v19 = vld [vmem:[#allocation3 + $0xfa] sm:$0xff] }
 0x712   : > { %9328 = vst [vmem:[#allocation17_spill] sm:$0xff] %v8640_v19 }
 0x716   : > { %4345 = vrot.lane.b32.xlu1 %v8625_v45, %s6358_s25  ;;  %4349 = vrot.lane.b32.xlu0 %v8627_v44, %s6358_s25  ;;  %v8646_v45 = vld [vmem:[#allocation3 + $0xca] sm:$0xff] }
 0x717   : > { %4341 = vrot.lane.b32.xlu2 %v8633_v46, %s6358_s25  ;;  %9329 = vst [vmem:[#allocation18_spill] sm:$0xff] %v8646_v45 }
 0x719   : > { %v4148_v1 = vpop.permute.xlu2 %4147 }
 0x71a   : > { %4230 = vst.msk [vmem:[#allocation4 + $0x68] sm:$0xff] %vm443_vm1, %v4148_v1  ;;  %v8652_v1 = vld [vmem:[#allocation3 + $0x10a] sm:$0xff] }
 0x71b   : > { %9330 = vst [vmem:[#allocation19_spill] sm:$0xff] %v8652_v1 }
 0x71e   : > { %4351 = vrot.lane.b32.xlu1 %v8638_v60, %s6358_s25  ;;  %4355 = vrot.lane.b32.xlu0 %v8640_v19, %s6358_s25  ;;  %v8660_v60 = vld [vmem:[#allocation3 + $0xf2] sm:$0xff] }
 0x71f   : > { %4347 = vrot.lane.b32.xlu2 %v8646_v45, %s6358_s25  ;;  %9332 = vst [vmem:[#allocation21_spill] sm:$0xff] %v8660_v60  ;;  %v8667_v45 = vld [vmem:[#allocation3 + $0x12a] sm:$0xff] }
 0x720   : > { %v4144_v44 = vpop.permute.xlu0 %4143  ;;  %9333 = vst [vmem:[#allocation22_spill] sm:$0xff] %v8667_v45 }
 0x721   : > { %4228 = vst.msk [vmem:[#allocation4 + $0x58] sm:$0xff] %vm443_vm1, %v4144_v44  ;;  %v4154_v46 = vpop.permute.xlu2 %4153 }
 0x722   : > { %4233 = vst.msk [vmem:[#allocation4 + $0x80] sm:$0xff] %vm443_vm1, %v4154_v46 }
 0x726   : > { %4357 = vrot.lane.b32.xlu1 %v8652_v1, %s6358_s25  ;;  %4361 = vrot.lane.b32.xlu0 %v8654_v33, %s6358_s25  ;;  %v8669_v1 = vld [vmem:[#allocation3 + $0x142] sm:$0xff]  ;;  %v8675_v33 = vld [vmem:[#allocation3 + $0x112] sm:$0xff] }
 0x727   : > { %4353 = vrot.lane.b32.xlu2 %v8660_v60, %s6358_s25  ;;  %9334 = vst [vmem:[#allocation23_spill] sm:$0xff] %v8669_v1 }
 0x728   : > { %v4150_v19 = vpop.permute.xlu0 %4149  ;;  %v4146_v44 = vpop.permute.xlu1 %4145  ;;  %9335 = vst [vmem:[#allocation24_spill] sm:$0xff] %v8675_v33 }
 0x729   : > { %4231 = vst.msk [vmem:[#allocation4 + $0x70] sm:$0xff] %vm443_vm1, %v4150_v19  ;;  %v4160_v46 = vpop.permute.xlu2 %4159 }
 0x72a   : > { %4229 = vst.msk [vmem:[#allocation4 + $0x60] sm:$0xff] %vm443_vm1, %v4146_v44 }
 0x72b   : > { %4236 = vst.msk [vmem:[#allocation4 + $0x98] sm:$0xff] %vm443_vm1, %v4160_v46  ;;  %v8682_v46 = vld [vmem:[#allocation3 + $0x152] sm:$0xff] }
 0x72c   : > { %9336 = vst [vmem:[#allocation25_spill] sm:$0xff] %v8682_v46 }
 0x72e   : > { %4363 = vrot.lane.b32.xlu1 %v8667_v45, %s6358_s25  ;;  %4367 = vrot.lane.b32.xlu0 %v8669_v1, %s6358_s25  ;;  %v8684_v45 = vld [vmem:[#allocation3 + $0x16a] sm:$0xff]  ;;  %v8690_v1 = vld [vmem:[#allocation3 + $0x13a] sm:$0xff] }
 0x72f   : > { %4359 = vrot.lane.b32.xlu2 %v8675_v33, %s6358_s25  ;;  %9337 = vst [vmem:[#allocation26_spill] sm:$0xff] %v8684_v45 }
 0x730   : > { %v4156_v19 = vpop.permute.xlu0 %4155  ;;  %v4152_v60 = vpop.permute.xlu1 %4151 }
 0x731   : > { %4234 = vst.msk [vmem:[#allocation4 + $0x88] sm:$0xff] %vm443_vm1, %v4156_v19  ;;  %v4166_v44 = vpop.permute.xlu2 %4165 }
 0x732   : > { %4232 = vst.msk [vmem:[#allocation4 + $0x78] sm:$0xff] %vm443_vm1, %v4152_v60 }
 0x733   : > { %4239 = vst.msk [vmem:[#allocation4 + $0xb0] sm:$0xff] %vm443_vm1, %v4166_v44  ;;  %v8697_v44 = vld [vmem:[#allocation3 + $0x172] sm:$0xff] }
 0x734   : > { %9338 = vst [vmem:[#allocation27_spill] sm:$0xff] %v8697_v44 }
 0x736   : > { %4369 = vrot.lane.b32.xlu1 %v8682_v46, %s6358_s25  ;;  %4373 = vrot.lane.b32.xlu0 %v8684_v45, %s6358_s25  ;;  %v8703_v46 = vld [vmem:[#allocation3 + $0x15a] sm:$0xff] }
 0x737   : > { %4365 = vrot.lane.b32.xlu2 %v8690_v1, %s6358_s25 }
 0x738   : > { %v4162_v19 = vpop.permute.xlu0 %4161  ;;  %v4158_v33 = vpop.permute.xlu1 %4157 }
 0x739   : > { %4237 = vst.msk [vmem:[#allocation4 + $0xa0] sm:$0xff] %vm443_vm1, %v4162_v19  ;;  %v4172_v60 = vpop.permute.xlu2 %4171 }
 0x73a   : > { %4235 = vst.msk [vmem:[#allocation4 + $0x90] sm:$0xff] %vm443_vm1, %v4158_v33 }
 0x73b   : > { %4242 = vst.msk [vmem:[#allocation4 + $0xc8] sm:$0xff] %vm443_vm1, %v4172_v60 }
 0x73e   : > { %4375 = vrot.lane.b32.xlu1 %v8697_v44, %s6358_s25  ;;  %4507 = vrot.lane.b32.xlu0 %v8316_v10, %s6359_s26 }
 0x73f   : > { %4371 = vrot.lane.b32.xlu2 %v8703_v46, %s6358_s25  ;;  %s6303_s25 = sshll.u32 %s9363_s16, 4 }
 0x740   : > { %v4168_v45 = vpop.permute.xlu0 %4167  ;;  %v4164_v19 = vpop.permute.xlu1 %4163 }
 0x741   : > { %4240 = vst.msk [vmem:[#allocation4 + $0xb8] sm:$0xff] %vm443_vm1, %v4168_v45  ;;  %v4178_v33 = vpop.permute.xlu2 %4177 }
 0x742   : > { %4238 = vst.msk [vmem:[#allocation4 + $0xa8] sm:$0xff] %vm443_vm1, %v4164_v19 }
 0x743   : > { %4245 = vst.msk [vmem:[#allocation4 + $0xe0] sm:$0xff] %vm443_vm1, %v4178_v33 }
 0x746   : > { %4509 = vrot.lane.b32.xlu1 %v8326_v16, %s6359_s26  ;;  %4513 = vrot.lane.b32.xlu0 %v8338_v30, %s6359_s26 }
 0x747   : > { %4505 = vrot.lane.b32.xlu2 %v8309_v4, %s6359_s26 }
 0x748   : > { %v4174_v10 = vpop.permute.xlu0 %4173  ;;  %v4170_v60 = vpop.permute.xlu1 %4169 }
 0x749   : > { %4243 = vst.msk [vmem:[#allocation4 + $0xd0] sm:$0xff] %vm443_vm1, %v4174_v10  ;;  %v4184_v44 = vpop.permute.xlu2 %4183 }
 0x74a   : > { %4241 = vst.msk [vmem:[#allocation4 + $0xc0] sm:$0xff] %vm443_vm1, %v4170_v60 }
 0x74b   : > { %4248 = vst.msk [vmem:[#allocation4 + $0xf8] sm:$0xff] %vm443_vm1, %v4184_v44 }
 0x74e   : > { %4515 = vrot.lane.b32.xlu1 %v8345_v41, %s6359_s26  ;;  %4519 = vrot.lane.b32.xlu0 %v8369_v51, %s6359_s26  ;;  %v3813_v41 = vpop.f32.mrf.mxu3 }
 0x74f   : > { %4511 = vrot.lane.b32.xlu2 %v8332_v21, %s6359_s26  ;;  %vm3849_vm11 = vcmp.ge.f32.partialorder %v3813_v41, 0.0  ;;  %v3881_v45 = vmul.f32 0.01, %v3813_v41 }
 0x750   : > { %v4180_v16 = vpop.permute.xlu0 %4179  ;;  %v4176_v4 = vpop.permute.xlu1 %4175 }
 0x751   : > { %4246 = vst.msk [vmem:[#allocation4 + $0xe8] sm:$0xff] %vm443_vm1, %v4180_v16  ;;  %v4318_v30 = vpop.permute.xlu2 %4317  ;;  %v3913_v19 = vsel %vm3849_vm11, %v3813_v41, %v3881_v45 }
 0x752   : > { %4244 = vst.msk [vmem:[#allocation4 + $0xd8] sm:$0xff] %vm443_vm1, %v4176_v4 }
 0x753   : > { %4411 = vst.msk [vmem:[#allocation4 + $0x10] sm:$0xff] %vm636_vm2, %v4318_v30 }
 0x754   : > { %3991 = vst.msk [vmem:[#allocation3 + $0x181] sm:$0xff] %vm250_vm0, %v3913_v19  ;;  %v4635_v19 = vld [vmem:[#allocation3 + $0x31] sm:$0xff] }
 0x756   : > { %4521 = vrot.lane.b32.xlu1 %v8385_v3, %s6359_s26  ;;  %4525 = vrot.lane.b32.xlu0 %v8426_v36, %s6359_s26 }
 0x757   : > { %4517 = vrot.lane.b32.xlu2 %v8356_v39, %s6359_s26  ;;  %v3816_v39 = vpop.f32.mrf.mxu3 }
 0x758   : > { %v4314_v21 = vpop.permute.xlu0 %4313  ;;  %v4182_v51 = vpop.permute.xlu1 %4181  ;;  %vm3850_vm13 = vcmp.ge.f32.partialorder %v3816_v39, 0.0  ;;  %v3882_v10 = vmul.f32 0.01, %v3816_v39 }
 0x759   : > { %4409 = vst.msk [vmem:[#allocation4] sm:$0xff] %vm636_vm2, %v4314_v21  ;;  %v4324_v44 = vpop.permute.xlu2 %4323 }
 0x75a   : > { %4247 = vst.msk [vmem:[#allocation4 + $0xf0] sm:$0xff] %vm443_vm1, %v4182_v51  ;;  %v3914_v16 = vsel %vm3850_vm13, %v3816_v39, %v3882_v10  ;;  %v4638_v10 = vld [vmem:[#allocation3 + $0x51] sm:$0xff] }
 0x75b   : > { %4414 = vst.msk [vmem:[#allocation4 + $0x28] sm:$0xff] %vm636_vm2, %v4324_v44  ;;  %v4633_v44 = vld [vmem:[#allocation3 + $0x19] sm:$0xff] }
 0x75c   : > { %3992 = vst.msk [vmem:[#allocation3 + $0x189] sm:$0xff] %vm250_vm0, %v3914_v16  ;;  %vm5627_vm0 = vcmask 293888  }
 0x75e   : > { %4527 = vrot.lane.b32.xlu1 %v8453_v56, %s6359_s26  ;;  %4531 = vrot.lane.b32.xlu0 %v8350_v42, %s6359_s26 }
 0x75f   : > { %4523 = vrot.lane.b32.xlu2 %v8403_v25, %s6359_s26 }
 0x760   : > { %v4320_v3 = vpop.permute.xlu0 %4319  ;;  %v4316_v33 = vpop.permute.xlu1 %4315 }
 0x761   : > { %4412 = vst.msk [vmem:[#allocation4 + $0x18] sm:$0xff] %vm636_vm2, %v4320_v3  ;;  %v4330_v60 = vpop.permute.xlu2 %4329 }
 0x762   : > { %4410 = vst.msk [vmem:[#allocation4 + $0x8] sm:$0xff] %vm636_vm2, %v4316_v33  ;;  %v4636_v33 = vld [vmem:[#allocation3 + $0x39] sm:$0xff] }
 0x763   : > { %4417 = vst.msk [vmem:[#allocation4 + $0x40] sm:$0xff] %vm636_vm2, %v4330_v60  ;;  %v8793_v51 = vld [vmem:[#allocation3 + $0x188] sm:$0xff] }
 0x764   : > { %v4634_v60 = vld [vmem:[#allocation3 + $0x21] sm:$0xff] }
 0x766   : > { %4533 = vrot.lane.b32.xlu1 %v8360_v58, %s6359_s26  ;;  %4537 = vrot.lane.b32.xlu0 %v8391_v9, %s6359_s26 }
 0x767   : > { %4529 = vrot.lane.b32.xlu2 %v8322_v11, %s6359_s26 }
 0x768   : > { %v4326_v56 = vpop.permute.xlu0 %4325  ;;  %v4322_v4 = vpop.permute.xlu1 %4321 }
 0x769   : > { %4415 = vst.msk [vmem:[#allocation4 + $0x30] sm:$0xff] %vm636_vm2, %v4326_v56  ;;  %v4336_v30 = vpop.permute.xlu2 %4335 }
 0x76a   : > { %4413 = vst.msk [vmem:[#allocation4 + $0x20] sm:$0xff] %vm636_vm2, %v4322_v4 }
 0x76b   : > { %4420 = vst.msk [vmem:[#allocation4 + $0x58] sm:$0xff] %vm636_vm2, %v4336_v30  ;;  %v4639_v30 = vld [vmem:[#allocation3 + $0x61] sm:$0xff] }
 0x76e   : > { %4539 = vrot.lane.b32.xlu1 %v8405_v26, %s6359_s26  ;;  %4543 = vrot.lane.b32.xlu0 %v8461_v59, %s6359_s26 }
 0x76f   : > { %4535 = vrot.lane.b32.xlu2 %v8372_v52, %s6359_s26 }
 0x770   : > { %v4332_v58 = vpop.permute.xlu0 %4331  ;;  %v4328_v9 = vpop.permute.xlu1 %4327 }
 0x771   : > { %4418 = vst.msk [vmem:[#allocation4 + $0x48] sm:$0xff] %vm636_vm2, %v4332_v58  ;;  %v4342_v41 = vpop.permute.xlu2 %4341  ;;  %v4637_v58 = vld [vmem:[#allocation3 + $0x49] sm:$0xff] }
 0x772   : > { %4416 = vst.msk [vmem:[#allocation4 + $0x38] sm:$0xff] %vm636_vm2, %v4328_v9 }
 0x773   : > { %4423 = vst.msk [vmem:[#allocation4 + $0x70] sm:$0xff] %vm636_vm2, %v4342_v41 }
 0x776   : > { %4545 = vrot.lane.b32.xlu1 %v8473_v53, %s6359_s26  ;;  %4549 = vrot.lane.b32.xlu0 %v8410_v14, %s6359_s26 }
 0x777   : > { %4541 = vrot.lane.b32.xlu2 %v8430_v50, %s6359_s26 }
 0x778   : > { %v4334_v26 = vpop.permute.xlu1 %4333  ;;  %v4338_v59 = vpop.permute.xlu0 %4337 }
 0x779   : > { %4419 = vst.msk [vmem:[#allocation4 + $0x50] sm:$0xff] %vm636_vm2, %v4334_v26  ;;  %v4348_v21 = vpop.permute.xlu2 %4347 }
 0x77a   : > { %4421 = vst.msk [vmem:[#allocation4 + $0x60] sm:$0xff] %vm636_vm2, %v4338_v59  ;;  %v4640_v59 = vld [vmem:[#allocation3 + $0x69] sm:$0xff] }
 0x77b   : > { %4426 = vst.msk [vmem:[#allocation4 + $0x88] sm:$0xff] %vm636_vm2, %v4348_v21 }
 0x77e   : > { %4551 = vrot.lane.b32.xlu1 %v8434_v40, %s6359_s26  ;;  %4555 = vrot.lane.b32.xlu0 %v8475_v13, %s6359_s26 }
 0x77f   : > { %4547 = vrot.lane.b32.xlu2 %v8503_v23, %s6359_s26 }
 0x780   : > { %v4340_v14 = vpop.permute.xlu1 %4339  ;;  %v4344_v50 = vpop.permute.xlu0 %4343 }
 0x781   : > { %4422 = vst.msk [vmem:[#allocation4 + $0x68] sm:$0xff] %vm636_vm2, %v4340_v14  ;;  %v4354_v53 = vpop.permute.xlu2 %4353 }
 0x782   : > { %4424 = vst.msk [vmem:[#allocation4 + $0x78] sm:$0xff] %vm636_vm2, %v4344_v50 }
 0x783   : > { %4429 = vst.msk [vmem:[#allocation4 + $0xa0] sm:$0xff] %vm636_vm2, %v4354_v53  ;;  %v8888_v53 = vld [vmem:[#allocation3 + $0x181] sm:$0xff] }
 0x786   : > { %4557 = vrot.lane.b32.xlu1 %v8490_v20, %s6359_s26  ;;  %4561 = vrot.lane.b32.xlu0 %v8531_v47, %s6359_s26 }
 0x787   : > { %4553 = vrot.lane.b32.xlu2 %v8455_v57, %s6359_s26 }
 0x788   : > { %v4346_v40 = vpop.permute.xlu1 %4345  ;;  %v4350_v13 = vpop.permute.xlu0 %4349 }
 0x789   : > { %4425 = vst.msk [vmem:[#allocation4 + $0x80] sm:$0xff] %vm636_vm2, %v4346_v40  ;;  %v4360_v23 = vpop.permute.xlu2 %4359  ;;  %v8903_v40 = vld [vmem:[#allocation3 + $0x189] sm:$0xff] }
 0x78a   : > { %4427 = vst.msk [vmem:[#allocation4 + $0x90] sm:$0xff] %vm636_vm2, %v4350_v13 }
 0x78b   : > { %4432 = vst.msk [vmem:[#allocation4 + $0xb8] sm:$0xff] %vm636_vm2, %v4360_v23 }
 0x78e   : > { %4563 = vrot.lane.b32.xlu1 %v8549_v6, %s6359_s26  ;;  %4567 = vrot.lane.b32.xlu0 %v8793_v51, %s6359_s26  ;;  %v8806_v6 = vld [vmem:[#allocation3 + $0x180] sm:$0xff] }
 0x78f   : > { %4559 = vrot.lane.b32.xlu2 %v8518_v37, %s6359_s26 }
 0x790   : > { %v4352_v57 = vpop.permute.xlu1 %4351  ;;  %v4356_v20 = vpop.permute.xlu0 %4355 }
 0x791   : > { %4428 = vst.msk [vmem:[#allocation4 + $0x98] sm:$0xff] %vm636_vm2, %v4352_v57  ;;  %v4366_v45 = vpop.permute.xlu2 %4365 }
 0x792   : > { %4430 = vst.msk [vmem:[#allocation4 + $0xa8] sm:$0xff] %vm636_vm2, %v4356_v20  ;;  %v9340_v20 = vld [vmem:[#allocation6_spill] sm:$0xff] }
 0x793   : > { %4435 = vst.msk [vmem:[#allocation4 + $0xd0] sm:$0xff] %vm636_vm2, %v4366_v45 }
 0x796   : > { %4697 = vrot.lane.b32.xlu1 %v4633_v44, %s6360_s27  ;;  %4701 = vrot.lane.b32.xlu0 %v4635_v19, %s6360_s27 }
 0x797   : > { %4565 = vrot.lane.b32.xlu2 %v8806_v6, %s6359_s26 }
 0x798   : > { %v4358_v37 = vpop.permute.xlu1 %4357  ;;  %v4362_v39 = vpop.permute.xlu0 %4361 }
 0x799   : > { %4431 = vst.msk [vmem:[#allocation4 + $0xb0] sm:$0xff] %vm636_vm2, %v4358_v37  ;;  %v4372_v3 = vpop.permute.xlu2 %4371  ;;  %v9343_v37 = vld [vmem:[#allocation9_spill] sm:$0xff] }
 0x79a   : > { %4433 = vst.msk [vmem:[#allocation4 + $0xc0] sm:$0xff] %vm636_vm2, %v4362_v39  ;;  %v9344_v39 = vld [vmem:[#allocation15_spill] sm:$0xff] }
 0x79b   : > { %4438 = vst.msk [vmem:[#allocation4 + $0xe8] sm:$0xff] %vm636_vm2, %v4372_v3  ;;  %v9345_v3 = vld [vmem:[#allocation8_spill] sm:$0xff] }
 0x79e   : > { %4703 = vrot.lane.b32.xlu1 %v4636_v33, %s6360_s27  ;;  %4707 = vrot.lane.b32.xlu0 %v4638_v10, %s6360_s27 }
 0x79f   : > { %4699 = vrot.lane.b32.xlu2 %v4634_v60, %s6360_s27 }
 0x7a0   : > { %v4364_v16 = vpop.permute.xlu1 %4363  ;;  %v4368_v56 = vpop.permute.xlu0 %4367 }
 0x7a1   : > { %4434 = vst.msk [vmem:[#allocation4 + $0xc8] sm:$0xff] %vm636_vm2, %v4364_v16  ;;  %v4506_v4 = vpop.permute.xlu2 %4505  ;;  %v9346_v16 = vld [vmem:[#allocation11_spill] sm:$0xff] }
 0x7a2   : > { %4436 = vst.msk [vmem:[#allocation4 + $0xd8] sm:$0xff] %vm636_vm2, %v4368_v56  ;;  %v9347_v56 = vld [vmem:[#allocation18_spill] sm:$0xff] }
 0x7a3   : > { %4601 = vst.msk [vmem:[#allocation4] sm:$0xff] %vm829_vm3, %v4506_v4  ;;  %v9348_v4 = vld [vmem:[#allocation10_spill] sm:$0xff] }
 0x7a6   : > { %4709 = vrot.lane.b32.xlu1 %v4639_v30, %s6360_s27  ;;  %4713 = vrot.lane.b32.xlu0 %v8380_v2, %s6360_s27 }
 0x7a7   : > { %4705 = vrot.lane.b32.xlu2 %v4637_v58, %s6360_s27 }
 0x7a8   : > { %v4370_v9 = vpop.permute.xlu1 %4369  ;;  %v4374_v41 = vpop.permute.xlu0 %4373 }
 0x7a9   : > { %4437 = vst.msk [vmem:[#allocation4 + $0xe0] sm:$0xff] %vm636_vm2, %v4370_v9  ;;  %v4512_v26 = vpop.permute.xlu2 %4511 }
 0x7aa   : > { %4439 = vst.msk [vmem:[#allocation4 + $0xf0] sm:$0xff] %vm636_vm2, %v4374_v41  ;;  %v9349_v41 = vld [vmem:[#allocation14_spill] sm:$0xff] }
 0x7ab   : > { %4604 = vst.msk [vmem:[#allocation4 + $0x18] sm:$0xff] %vm829_vm3, %v4512_v26  ;;  %v9350_v26 = vld [vmem:[#allocation21_spill] sm:$0xff] }
 0x7ae   : > { %4715 = vrot.lane.b32.xlu1 %v8397_v22, %s6360_s27  ;;  %4719 = vrot.lane.b32.xlu0 %v8446_v55, %s6360_s27 }
 0x7af   : > { %4711 = vrot.lane.b32.xlu2 %v4640_v59, %s6360_s27  ;;  %v9351_v59 = vld [vmem:[#allocation13_spill] sm:$0xff] }
 0x7b0   : > { %v4376_v2 = vpop.permute.xlu1 %4375  ;;  %v4508_v21 = vpop.permute.xlu0 %4507 }
 0x7b1   : > { %4440 = vst.msk [vmem:[#allocation4 + $0xf8] sm:$0xff] %vm636_vm2, %v4376_v2  ;;  %v4518_v14 = vpop.permute.xlu2 %4517 }
 0x7b2   : > { %4602 = vst.msk [vmem:[#allocation4 + $0x8] sm:$0xff] %vm829_vm3, %v4508_v21 }
 0x7b3   : > { %4607 = vst.msk [vmem:[#allocation4 + $0x30] sm:$0xff] %vm829_vm3, %v4518_v14 }
 0x7b6   : > { %4721 = vrot.lane.b32.xlu1 %v8417_v34, %s6360_s27  ;;  %4725 = vrot.lane.b32.xlu0 %v8482_v15, %s6360_s27 }
 0x7b7   : > { %4717 = vrot.lane.b32.xlu2 %v8419_v49, %s6360_s27 }
 0x7b8   : > { %v4510_v22 = vpop.permute.xlu1 %4509  ;;  %v4514_v55 = vpop.permute.xlu0 %4513 }
 0x7b9   : > { %4603 = vst.msk [vmem:[#allocation4 + $0x10] sm:$0xff] %vm829_vm3, %v4510_v22  ;;  %v4524_v50 = vpop.permute.xlu2 %4523  ;;  %v9352_v22 = vld [vmem:[#allocation17_spill] sm:$0xff] }
 0x7ba   : > { %4605 = vst.msk [vmem:[#allocation4 + $0x20] sm:$0xff] %vm829_vm3, %v4514_v55  ;;  %v9353_v55 = vld [vmem:[#allocation24_spill] sm:$0xff] }
 0x7bb   : > { %4610 = vst.msk [vmem:[#allocation4 + $0x48] sm:$0xff] %vm829_vm3, %v4524_v50  ;;  %v9354_v50 = vld [vmem:[#allocation16_spill] sm:$0xff] }
 0x7be   : > { %4727 = vrot.lane.b32.xlu1 %v8442_v48, %s6360_s27  ;;  %4731 = vrot.lane.b32.xlu0 %v8501_v29, %s6360_s27 }
 0x7bf   : > { %4723 = vrot.lane.b32.xlu2 %v8444_v54, %s6360_s27 }
 0x7c0   : > { %v4516_v34 = vpop.permute.xlu1 %4515  ;;  %v4520_v49 = vpop.permute.xlu0 %4519 }
 0x7c1   : > { %4606 = vst.msk [vmem:[#allocation4 + $0x28] sm:$0xff] %vm829_vm3, %v4516_v34  ;;  %v4530_v15 = vpop.permute.xlu2 %4529 }
 0x7c2   : > { %4608 = vst.msk [vmem:[#allocation4 + $0x38] sm:$0xff] %vm829_vm3, %v4520_v49 }
 0x7c3   : > { %4613 = vst.msk [vmem:[#allocation4 + $0x60] sm:$0xff] %vm829_vm3, %v4530_v15 }
 0x7c6   : > { %4733 = vrot.lane.b32.xlu1 %v8471_v12, %s6360_s27  ;;  %4737 = vrot.lane.b32.xlu0 %v8524_v38, %s6360_s27 }
 0x7c7   : > { %4729 = vrot.lane.b32.xlu2 %v8468_v7, %s6360_s27 }
 0x7c8   : > { %v4522_v48 = vpop.permute.xlu1 %4521  ;;  %v4526_v54 = vpop.permute.xlu0 %4525 }
 0x7c9   : > { %4609 = vst.msk [vmem:[#allocation4 + $0x40] sm:$0xff] %vm829_vm3, %v4522_v48  ;;  %v4536_v29 = vpop.permute.xlu2 %4535  ;;  %v9355_v48 = vld [vmem:[#allocation20_spill] sm:$0xff] }
 0x7ca   : > { %4611 = vst.msk [vmem:[#allocation4 + $0x50] sm:$0xff] %vm829_vm3, %v4526_v54  ;;  %v9356_v54 = vld [vmem:[#allocation19_spill] sm:$0xff] }
 0x7cb   : > { %4616 = vst.msk [vmem:[#allocation4 + $0x78] sm:$0xff] %vm829_vm3, %v4536_v29 }
 0x7ce   : > { %4739 = vrot.lane.b32.xlu1 %v8493_v5, %s6360_s27  ;;  %4743 = vrot.lane.b32.xlu0 %v8542_v63, %s6360_s27 }
 0x7cf   : > { %4735 = vrot.lane.b32.xlu2 %v8495_v28, %s6360_s27 }
 0x7d0   : > { %v4528_v12 = vpop.permute.xlu1 %4527  ;;  %v4532_v7 = vpop.permute.xlu0 %4531 }
 0x7d1   : > { %4612 = vst.msk [vmem:[#allocation4 + $0x58] sm:$0xff] %vm829_vm3, %v4528_v12  ;;  %v4542_v38 = vpop.permute.xlu2 %4541 }
 0x7d2   : > { %4614 = vst.msk [vmem:[#allocation4 + $0x68] sm:$0xff] %vm829_vm3, %v4532_v7 }
 0x7d3   : > { %4619 = vst.msk [vmem:[#allocation4 + $0x90] sm:$0xff] %vm829_vm3, %v4542_v38  ;;  %v9357_v38 = vld [vmem:[#allocation23_spill] sm:$0xff] }
 0x7d6   : > { %4745 = vrot.lane.b32.xlu1 %v8514_v27, %s6360_s27  ;;  %4749 = vrot.lane.b32.xlu0 %v8558_v17, %s6360_s27 }
 0x7d7   : > { %4741 = vrot.lane.b32.xlu2 %v8516_v35, %s6360_s27 }
 0x7d8   : > { %v4534_v5 = vpop.permute.xlu1 %4533  ;;  %v4538_v28 = vpop.permute.xlu0 %4537 }
 0x7d9   : > { %4615 = vst.msk [vmem:[#allocation4 + $0x70] sm:$0xff] %vm829_vm3, %v4534_v5  ;;  %v4548_v63 = vpop.permute.xlu2 %4547 }
 0x7da   : > { %4617 = vst.msk [vmem:[#allocation4 + $0x80] sm:$0xff] %vm829_vm3, %v4538_v28 }
 0x7db   : > { %4622 = vst.msk [vmem:[#allocation4 + $0xa8] sm:$0xff] %vm829_vm3, %v4548_v63 }
 0x7de   : > { %4751 = vrot.lane.b32.xlu1 %v8534_v61, %s6360_s27  ;;  %4755 = vrot.lane.b32.xlu0 %v8563_v31, %s6360_s27 }
 0x7df   : > { %4747 = vrot.lane.b32.xlu2 %v8536_v62, %s6360_s27 }
 0x7e0   : > { %v4540_v27 = vpop.permute.xlu1 %4539  ;;  %v4544_v35 = vpop.permute.xlu0 %4543 }
 0x7e1   : > { %4618 = vst.msk [vmem:[#allocation4 + $0x88] sm:$0xff] %vm829_vm3, %v4540_v27  ;;  %v4554_v17 = vpop.permute.xlu2 %4553  ;;  %v8982_v27 = vld [vmem:[#allocation3 + $0x182] sm:$0xff] }
 0x7e2   : > { %4620 = vst.msk [vmem:[#allocation4 + $0x98] sm:$0xff] %vm829_vm3, %v4544_v35  ;;  %v9359_v35 = vld [vmem:[#allocation26_spill] sm:$0xff] }
 0x7e3   : > { %4625 = vst.msk [vmem:[#allocation4 + $0xc0] sm:$0xff] %vm829_vm3, %v4554_v17 }
 0x7e6   : > { %4757 = vrot.lane.b32.xlu1 %v8888_v53, %s6360_s27  ;;  %4889 = vrot.lane.b32.xlu0 %v8581_v43, %s6361_s28 }
 0x7e7   : > { %4753 = vrot.lane.b32.xlu2 %v8551_v8, %s6360_s27 }
 0x7e8   : > { %v4546_v61 = vpop.permute.xlu1 %4545  ;;  %v4550_v62 = vpop.permute.xlu0 %4549 }
 0x7e9   : > { %4621 = vst.msk [vmem:[#allocation4 + $0xa0] sm:$0xff] %vm829_vm3, %v4546_v61  ;;  %v4560_v31 = vpop.permute.xlu2 %4559 }
 0x7ea   : > { %4623 = vst.msk [vmem:[#allocation4 + $0xb0] sm:$0xff] %vm829_vm3, %v4550_v62 }
 0x7eb   : > { %4628 = vst.msk [vmem:[#allocation4 + $0xd8] sm:$0xff] %vm829_vm3, %v4560_v31  ;;  %v8993_v31 = vld [vmem:[#allocation3 + $0x18a] sm:$0xff] }
 0x7ee   : > { %4891 = vrot.lane.b32.xlu1 %v8565_v24, %s6361_s28  ;;  %4895 = vrot.lane.b32.xlu0 %v8594_v0, %s6361_s28  ;;  %v9339_v24 = vld [vmem:[#allocation5_spill] sm:$0xff] }
 0x7ef   : > { %4759 = vrot.lane.b32.xlu2 %v8903_v40, %s6360_s27 }
 0x7f0   : > { %v4552_v8 = vpop.permute.xlu1 %4551  ;;  %v4556_v43 = vpop.permute.xlu0 %4555 }
 0x7f1   : > { %4624 = vst.msk [vmem:[#allocation4 + $0xb8] sm:$0xff] %vm829_vm3, %v4552_v8  ;;  %v4566_v13 = vpop.permute.xlu2 %4565  ;;  %v5019_v8 = vld [vmem:[#allocation3 + $0x38] sm:$0xff] }
 0x7f2   : > { %4626 = vst.msk [vmem:[#allocation4 + $0xc8] sm:$0xff] %vm829_vm3, %v4556_v43  ;;  %v9361_v43 = vld [vmem:[#allocation27_spill] sm:$0xff] }
 0x7f3   : > { %4631 = vst.msk [vmem:[#allocation4 + $0xf0] sm:$0xff] %vm829_vm3, %v4566_v13 }
 0x7f6   : > { %4897 = vrot.lane.b32.xlu1 %v8573_v32, %s6361_s28  ;;  %4901 = vrot.lane.b32.xlu0 %v8607_v18, %s6361_s28  ;;  %v9341_v32 = vld [vmem:[#allocation12_spill] sm:$0xff]  ;;  %v9342_v18 = vld [vmem:[#allocation7_spill] sm:$0xff] }
 0x7f7   : > { %4893 = vrot.lane.b32.xlu2 %v9339_v24, %s6361_s28 }
 0x7f8   : > { %v4558_v0 = vpop.permute.xlu1 %4557  ;;  %v4562_v23 = vpop.permute.xlu0 %4561 }
 0x7f9   : > { %4627 = vst.msk [vmem:[#allocation4 + $0xd0] sm:$0xff] %vm829_vm3, %v4558_v0  ;;  %v4700_v57 = vpop.permute.xlu2 %4699 }
 0x7fa   : > { %4629 = vst.msk [vmem:[#allocation4 + $0xe0] sm:$0xff] %vm829_vm3, %v4562_v23  ;;  %v5020_v23 = vld [vmem:[#allocation3 + $0x48] sm:$0xff] }
 0x7fb   : > { %4794 = vst.msk [vmem:[#allocation4 + $0x8] sm:$0xff] %vm1022_vm4, %v4700_v57  ;;  %v5022_v57 = vld [vmem:[#allocation3 + $0x60] sm:$0xff] }
 0x7fe   : > { %4903 = vrot.lane.b32.xlu1 %v9340_v20, %s6361_s28  ;;  %4907 = vrot.lane.b32.xlu0 %v9341_v32, %s6361_s28  ;;  %v5018_v20 = vld [vmem:[#allocation3 + $0x30] sm:$0xff] }
 0x7ff   : > { %4899 = vrot.lane.b32.xlu2 %v9342_v18, %s6361_s28 }
 0x800   : > { %v4564_v45 = vpop.permute.xlu1 %4563  ;;  %v4568_v44 = vpop.permute.xlu0 %4567 }
 0x801   : > { %4630 = vst.msk [vmem:[#allocation4 + $0xe8] sm:$0xff] %vm829_vm3, %v4564_v45  ;;  %v4706_v19 = vpop.permute.xlu2 %4705 }
 0x802   : > { %4632 = vst.msk [vmem:[#allocation4 + $0xf8] sm:$0xff] %vm829_vm3, %v4568_v44  ;;  %v5023_v44 = vld [vmem:[#allocation3 + $0x68] sm:$0xff] }
 0x803   : > { %4797 = vst.msk [vmem:[#allocation4 + $0x20] sm:$0xff] %vm1022_vm4, %v4706_v19  ;;  %v5021_v19 = vld [vmem:[#allocation3 + $0x50] sm:$0xff] }
 0x806   : > { %4909 = vrot.lane.b32.xlu1 %v9343_v37, %s6361_s28  ;;  %4913 = vrot.lane.b32.xlu0 %v9344_v39, %s6361_s28 }
 0x807   : > { %4905 = vrot.lane.b32.xlu2 %v9345_v3, %s6361_s28 }
 0x808   : > { %v4698_v33 = vpop.permute.xlu1 %4697  ;;  %v4702_v10 = vpop.permute.xlu0 %4701 }
 0x809   : > { %4793 = vst.msk [vmem:[#allocation4] sm:$0xff] %vm1022_vm4, %v4698_v33  ;;  %v4712_v60 = vpop.permute.xlu2 %4711  ;;  %v5024_v33 = vld [vmem:[#allocation3 + $0x78] sm:$0xff] }
 0x80a   : > { %4795 = vst.msk [vmem:[#allocation4 + $0x10] sm:$0xff] %vm1022_vm4, %v4702_v10 }
 0x80b   : > { %4800 = vst.msk [vmem:[#allocation4 + $0x38] sm:$0xff] %vm1022_vm4, %v4712_v60 }
 0x80e   : > { %4915 = vrot.lane.b32.xlu1 %v9346_v16, %s6361_s28  ;;  %4919 = vrot.lane.b32.xlu0 %v9347_v56, %s6361_s28 }
 0x80f   : > { %4911 = vrot.lane.b32.xlu2 %v9348_v4, %s6361_s28  ;;  %v5049_v4 = vld [vmem:[#allocation3 + $0x1a0] sm:$0xff] }
 0x810   : > { %v4704_v30 = vpop.permute.xlu1 %4703  ;;  %v4708_v58 = vpop.permute.xlu0 %4707 }
 0x811   : > { %4796 = vst.msk [vmem:[#allocation4 + $0x18] sm:$0xff] %vm1022_vm4, %v4704_v30  ;;  %v4718_v9 = vpop.permute.xlu2 %4717  ;;  %v5433_v30 = vld [vmem:[#allocation3 + $0x1a2] sm:$0xff] }
 0x812   : > { %4798 = vst.msk [vmem:[#allocation4 + $0x28] sm:$0xff] %vm1022_vm4, %v4708_v58 }
 0x813   : > { %4803 = vst.msk [vmem:[#allocation4 + $0x50] sm:$0xff] %vm1022_vm4, %v4718_v9 }
 0x816   : > { %4921 = vrot.lane.b32.xlu1 %v9349_v41, %s6361_s28  ;;  %4925 = vrot.lane.b32.xlu0 %v9350_v26, %s6361_s28  ;;  %v5048_v41 = vld [vmem:[#allocation3 + $0x198] sm:$0xff]  ;;  %v5241_v26 = vld [vmem:[#allocation3 + $0x1a1] sm:$0xff] }
 0x817   : > { %4917 = vrot.lane.b32.xlu2 %v9351_v59, %s6361_s28  ;;  %v5033_v59 = vld [vmem:[#allocation3 + $0xe0] sm:$0xff] }
 0x818   : > { %v4710_v2 = vpop.permute.xlu1 %4709  ;;  %v4714_v21 = vpop.permute.xlu0 %4713 }
 0x819   : > { %4799 = vst.msk [vmem:[#allocation4 + $0x30] sm:$0xff] %vm1022_vm4, %v4710_v2  ;;  %v4724_v14 = vpop.permute.xlu2 %4723 }
 0x81a   : > { %4801 = vst.msk [vmem:[#allocation4 + $0x40] sm:$0xff] %vm1022_vm4, %v4714_v21 }
 0x81b   : > { %4806 = vst.msk [vmem:[#allocation4 + $0x68] sm:$0xff] %vm1022_vm4, %v4724_v14 }
 0x81e   : > { %4927 = vrot.lane.b32.xlu1 %v9352_v22, %s6361_s28  ;;  %4931 = vrot.lane.b32.xlu0 %v9353_v55, %s6361_s28  ;;  %v5432_v22 = vld [vmem:[#allocation3 + $0x19a] sm:$0xff] }
 0x81f   : > { %4923 = vrot.lane.b32.xlu2 %v9354_v50, %s6361_s28  ;;  %v5240_v55 = vld [vmem:[#allocation3 + $0x199] sm:$0xff] }
 0x820   : > { %v4716_v34 = vpop.permute.xlu1 %4715  ;;  %v4720_v49 = vpop.permute.xlu0 %4719 }
 0x821   : > { %4802 = vst.msk [vmem:[#allocation4 + $0x48] sm:$0xff] %vm1022_vm4, %v4716_v34  ;;  %v4730_v15 = vpop.permute.xlu2 %4729 }
 0x822   : > { %4804 = vst.msk [vmem:[#allocation4 + $0x58] sm:$0xff] %vm1022_vm4, %v4720_v49 }
 0x823   : > { %4809 = vst.msk [vmem:[#allocation4 + $0x80] sm:$0xff] %vm1022_vm4, %v4730_v15  ;;  %v5417_v15 = vld [vmem:[#allocation3 + $0xe2] sm:$0xff] }
 0x826   : > { %4933 = vrot.lane.b32.xlu1 %v9355_v48, %s6361_s28  ;;  %4937 = vrot.lane.b32.xlu0 %v8690_v1, %s6361_s28  ;;  %v9358_v1 = vld [vmem:[#allocation22_spill] sm:$0xff] }
 0x827   : > { %4929 = vrot.lane.b32.xlu2 %v9356_v54, %s6361_s28  ;;  %v5032_v48 = vld [vmem:[#allocation3 + $0xd8] sm:$0xff]  ;;  %v5225_v54 = vld [vmem:[#allocation3 + $0xe1] sm:$0xff] }
 0x828   : > { %v4722_v29 = vpop.permute.xlu1 %4721  ;;  %v4726_v12 = vpop.permute.xlu0 %4725 }
 0x829   : > { %4805 = vst.msk [vmem:[#allocation4 + $0x60] sm:$0xff] %vm1022_vm4, %v4722_v29  ;;  %v4736_v7 = vpop.permute.xlu2 %4735 }
 0x82a   : > { %4807 = vst.msk [vmem:[#allocation4 + $0x70] sm:$0xff] %vm1022_vm4, %v4726_v12 }
 0x82b   : > { %4812 = vst.msk [vmem:[#allocation4 + $0x98] sm:$0xff] %vm1022_vm4, %v4736_v7 }
 0x82e   : > { %4939 = vrot.lane.b32.xlu1 %v9357_v38, %s6361_s28  ;;  %4943 = vrot.lane.b32.xlu0 %v8703_v46, %s6361_s28  ;;  %v9360_v46 = vld [vmem:[#allocation25_spill] sm:$0xff] }
 0x82f   : > { %4935 = vrot.lane.b32.xlu2 %v9358_v1, %s6361_s28 }
 0x830   : > { %v4728_v5 = vpop.permute.xlu1 %4727  ;;  %v4732_v28 = vpop.permute.xlu0 %4731 }
 0x831   : > { %4808 = vst.msk [vmem:[#allocation4 + $0x78] sm:$0xff] %vm1022_vm4, %v4728_v5  ;;  %v4742_v63 = vpop.permute.xlu2 %4741  ;;  %v5416_v5 = vld [vmem:[#allocation3 + $0xda] sm:$0xff] }
 0x832   : > { %4810 = vst.msk [vmem:[#allocation4 + $0x88] sm:$0xff] %vm1022_vm4, %v4732_v28  ;;  %v5224_v28 = vld [vmem:[#allocation3 + $0xd9] sm:$0xff] }
 0x833   : > { %4815 = vst.msk [vmem:[#allocation4 + $0xb0] sm:$0xff] %vm1022_vm4, %v4742_v63 }
 0x836   : > { %4945 = vrot.lane.b32.xlu1 %v9359_v35, %s6361_s28  ;;  %4949 = vrot.lane.b32.xlu0 %v8982_v27, %s6361_s28  ;;  %v5223_v35 = vld [vmem:[#allocation3 + $0xc9] sm:$0xff] }
 0x837   : > { %4941 = vrot.lane.b32.xlu2 %v9360_v46, %s6361_s28  ;;  %v5415_v46 = vld [vmem:[#allocation3 + $0xca] sm:$0xff] }
 0x838   : > { %v4734_v17 = vpop.permute.xlu1 %4733  ;;  %v4738_v61 = vpop.permute.xlu0 %4737 }
 0x839   : > { %4811 = vst.msk [vmem:[#allocation4 + $0x90] sm:$0xff] %vm1022_vm4, %v4734_v17  ;;  %v4748_v62 = vpop.permute.xlu2 %4747 }
 0x83a   : > { %4813 = vst.msk [vmem:[#allocation4 + $0xa0] sm:$0xff] %vm1022_vm4, %v4738_v61 }
 0x83b   : > { %4818 = vst.msk [vmem:[#allocation4 + $0xc8] sm:$0xff] %vm1022_vm4, %v4748_v62  ;;  %v5237_v62 = vld [vmem:[#allocation3 + $0x171] sm:$0xff] }
 0x83e   : > { %4951 = vrot.lane.b32.xlu1 %v8993_v31, %s6361_s28  ;;  %5084 = vrot.lane.b32.xlu0 %v5019_v8, %s6362_s29  ;;  %v5045_v8 = vld [vmem:[#allocation3 + $0x170] sm:$0xff] }
 0x83f   : > { %4947 = vrot.lane.b32.xlu2 %v9361_v43, %s6361_s28  ;;  %s217_s28 = scalar_lea.vmem %s9292_s4, %s6303_s25 }
 0x840   : > { %v4740_v13 = vpop.permute.xlu1 %4739  ;;  %v4744_v24 = vpop.permute.xlu0 %4743 }
 0x841   : > { %4814 = vst.msk [vmem:[#allocation4 + $0xa8] sm:$0xff] %vm1022_vm4, %v4740_v13  ;;  %v4754_v0 = vpop.permute.xlu2 %4753 }
 0x842   : > { %4816 = vst.msk [vmem:[#allocation4 + $0xb8] sm:$0xff] %vm1022_vm4, %v4744_v24  ;;  %v5236_v24 = vld [vmem:[#allocation3 + $0x169] sm:$0xff] }
 0x843   : > { %4821 = vst.msk [vmem:[#allocation4 + $0xe0] sm:$0xff] %vm1022_vm4, %v4754_v0  ;;  %v5429_v0 = vld [vmem:[#allocation3 + $0x172] sm:$0xff] }
 0x846   : > { %5086 = vrot.lane.b32.xlu1 %v5020_v23, %s6362_s29  ;;  %5090 = vrot.lane.b32.xlu0 %v5022_v57, %s6362_s29 }
 0x847   : > { %5082 = vrot.lane.b32.xlu2 %v5018_v20, %s6362_s29 }
 0x848   : > { %v4746_v32 = vpop.permute.xlu1 %4745  ;;  %v4750_v18 = vpop.permute.xlu0 %4749 }
 0x849   : > { %4817 = vst.msk [vmem:[#allocation4 + $0xc0] sm:$0xff] %vm1022_vm4, %v4746_v32  ;;  %v4760_v45 = vpop.permute.xlu2 %4759  ;;  %v5428_v32 = vld [vmem:[#allocation3 + $0x16a] sm:$0xff] }
 0x84a   : > { %4819 = vst.msk [vmem:[#allocation4 + $0xd0] sm:$0xff] %vm1022_vm4, %v4750_v18  ;;  %v5043_v18 = vld [vmem:[#allocation3 + $0x158] sm:$0xff] }
 0x84b   : > { %4824 = vst.msk [vmem:[#allocation4 + $0xf8] sm:$0xff] %vm1022_vm4, %v4760_v45 }
 0x84e   : > { %5092 = vrot.lane.b32.xlu1 %v5023_v44, %s6362_s29  ;;  %5096 = vrot.lane.b32.xlu0 %v8403_v25, %s6362_s29 }
 0x84f   : > { %5088 = vrot.lane.b32.xlu2 %v5021_v19, %s6362_s29 }
 0x850   : > { %v4752_v37 = vpop.permute.xlu1 %4751  ;;  %v4756_v39 = vpop.permute.xlu0 %4755 }
 0x851   : > { %4820 = vst.msk [vmem:[#allocation4 + $0xd8] sm:$0xff] %vm1022_vm4, %v4752_v37  ;;  %v4894_v3 = vpop.permute.xlu2 %4893  ;;  %v5413_v37 = vld [vmem:[#allocation3 + $0xb2] sm:$0xff] }
 0x852   : > { %4822 = vst.msk [vmem:[#allocation4 + $0xe8] sm:$0xff] %vm1022_vm4, %v4756_v39  ;;  %v5427_v39 = vld [vmem:[#allocation3 + $0x15a] sm:$0xff] }
 0x853   : > { %4987 = vst.msk [vmem:[#allocation4 + $0x10] sm:$0xff] %vm1215_vm5, %v4894_v3  ;;  %v5221_v3 = vld [vmem:[#allocation3 + $0xb1] sm:$0xff] }
 0x856   : > { %5098 = vrot.lane.b32.xlu1 %v8426_v36, %s6362_s29  ;;  %5102 = vrot.lane.b32.xlu0 %v8322_v11, %s6362_s29  ;;  %v5027_v36 = vld [vmem:[#allocation3 + $0x98] sm:$0xff] }
 0x857   : > { %5094 = vrot.lane.b32.xlu2 %v5024_v33, %s6362_s29 }
 0x858   : > { %v4758_v25 = vpop.permute.xlu1 %4757  ;;  %v4890_v10 = vpop.permute.xlu0 %4889 }
 0x859   : > { %4823 = vst.msk [vmem:[#allocation4 + $0xf0] sm:$0xff] %vm1022_vm4, %v4758_v25  ;;  %v4900_v60 = vpop.permute.xlu2 %4899 }
 0x85a   : > { %4985 = vst.msk [vmem:[#allocation4] sm:$0xff] %vm1215_vm5, %v4890_v10 }
 0x85b   : > { %4990 = vst.msk [vmem:[#allocation4 + $0x28] sm:$0xff] %vm1215_vm5, %v4900_v60  ;;  %v5220_v60 = vld [vmem:[#allocation3 + $0xa9] sm:$0xff] }
 0x85e   : > { %5104 = vrot.lane.b32.xlu1 %v8350_v42, %s6362_s29  ;;  %5108 = vrot.lane.b32.xlu0 %v8372_v52, %s6362_s29  ;;  %v5030_v42 = vld [vmem:[#allocation3 + $0xc0] sm:$0xff] }
 0x85f   : > { %5100 = vrot.lane.b32.xlu2 %v5027_v36, %s6362_s29  ;;  %v5412_v36 = vld [vmem:[#allocation3 + $0xaa] sm:$0xff] }
 0x860   : > { %v4892_v11 = vpop.permute.xlu1 %4891  ;;  %v4896_v16 = vpop.permute.xlu0 %4895 }
 0x861   : > { %4986 = vst.msk [vmem:[#allocation4 + $0x8] sm:$0xff] %vm1215_vm5, %v4892_v11  ;;  %v4906_v56 = vpop.permute.xlu2 %4905  ;;  %v5235_v11 = vld [vmem:[#allocation3 + $0x159] sm:$0xff] }
 0x862   : > { %4988 = vst.msk [vmem:[#allocation4 + $0x18] sm:$0xff] %vm1215_vm5, %v4896_v16 }
 0x863   : > { %4993 = vst.msk [vmem:[#allocation4 + $0x40] sm:$0xff] %vm1215_vm5, %v4906_v56 }
 0x866   : > { %5144 = vrot.lane.b32.xlu1 %v5049_v4, %s6362_s29  ;;  %5528 = vrot.lane.b32.xlu0 %v5433_v30, %s6364_s5  ;;  %v5234_v30 = vld [vmem:[#allocation3 + $0x151] sm:$0xff] }
 0x867   : > { %5106 = vrot.lane.b32.xlu2 %v5030_v42, %s6362_s29  ;;  %v5219_v42 = vld [vmem:[#allocation3 + $0x99] sm:$0xff] }
 0x868   : > { %v4898_v52 = vpop.permute.xlu1 %4897  ;;  %v4902_v58 = vpop.permute.xlu0 %4901 }
 0x869   : > { %4989 = vst.msk [vmem:[#allocation4 + $0x20] sm:$0xff] %vm1215_vm5, %v4898_v52  ;;  %v4912_v9 = vpop.permute.xlu2 %4911  ;;  %v5042_v52 = vld [vmem:[#allocation3 + $0x150] sm:$0xff] }
 0x86a   : > { %4991 = vst.msk [vmem:[#allocation4 + $0x30] sm:$0xff] %vm1215_vm5, %v4902_v58 }
 0x86b   : > { %4996 = vst.msk [vmem:[#allocation4 + $0x58] sm:$0xff] %vm1215_vm5, %v4912_v9 }
 0x86e   : > { %5142 = vrot.lane.b32.xlu1 %v5048_v41, %s6362_s29  ;;  %5112 = vrot.lane.b32.xlu0 %v5033_v59, %s6362_s29  ;;  %v5233_v59 = vld [vmem:[#allocation3 + $0x141] sm:$0xff] }
 0x86f   : > { %5336 = vrot.lane.b32.xlu2 %v5241_v26, %s6363_s30  ;;  %v5041_v26 = vld [vmem:[#allocation3 + $0x140] sm:$0xff] }
 0x870   : > { %v4904_v2 = vpop.permute.xlu1 %4903  ;;  %v4908_v21 = vpop.permute.xlu0 %4907 }
 0x871   : > { %4992 = vst.msk [vmem:[#allocation4 + $0x38] sm:$0xff] %vm1215_vm5, %v4904_v2  ;;  %v4918_v14 = vpop.permute.xlu2 %4917  ;;  %v5426_v2 = vld [vmem:[#allocation3 + $0x152] sm:$0xff] }
 0x872   : > { %4994 = vst.msk [vmem:[#allocation4 + $0x48] sm:$0xff] %vm1215_vm5, %v4908_v21 }
 0x873   : > { %4999 = vst.msk [vmem:[#allocation4 + $0x70] sm:$0xff] %vm1215_vm5, %v4918_v14 }
 0x876   : > { %5526 = vrot.lane.b32.xlu1 %v5432_v22, %s6364_s5  ;;  %5140 = vrot.lane.b32.xlu0 %v8793_v51, %s6362_s29 }
 0x877   : > { %5334 = vrot.lane.b32.xlu2 %v5240_v55, %s6363_s30  ;;  %v5425_v55 = vld [vmem:[#allocation3 + $0x142] sm:$0xff] }
 0x878   : > { %v4910_v50 = vpop.permute.xlu1 %4909  ;;  %v4914_v34 = vpop.permute.xlu0 %4913 }
 0x879   : > { %4995 = vst.msk [vmem:[#allocation4 + $0x50] sm:$0xff] %vm1215_vm5, %v4910_v50  ;;  %v4924_v49 = vpop.permute.xlu2 %4923  ;;  %v5040_v50 = vld [vmem:[#allocation3 + $0x138] sm:$0xff] }
 0x87a   : > { %4997 = vst.msk [vmem:[#allocation4 + $0x60] sm:$0xff] %vm1215_vm5, %v4914_v34  ;;  %v5411_v34 = vld [vmem:[#allocation3 + $0x9a] sm:$0xff] }
 0x87b   : > { %5002 = vst.msk [vmem:[#allocation4 + $0x88] sm:$0xff] %vm1215_vm5, %v4924_v49 }
 0x87e   : > { %5496 = vrot.lane.b32.xlu1 %v5417_v15, %s6364_s5  ;;  %5110 = vrot.lane.b32.xlu0 %v5032_v48, %s6362_s29 }
 0x87f   : > { %5304 = vrot.lane.b32.xlu2 %v5225_v54, %s6363_s30  ;;  %v5410_v54 = vld [vmem:[#allocation3 + $0x92] sm:$0xff] }
 0x880   : > { %v4916_v51 = vpop.permute.xlu1 %4915  ;;  %v4920_v29 = vpop.permute.xlu0 %4919 }
 0x881   : > { %4998 = vst.msk [vmem:[#allocation4 + $0x68] sm:$0xff] %vm1215_vm5, %v4916_v51  ;;  %v4930_v12 = vpop.permute.xlu2 %4929  ;;  %v5424_v51 = vld [vmem:[#allocation3 + $0x13a] sm:$0xff] }
 0x882   : > { %5000 = vst.msk [vmem:[#allocation4 + $0x78] sm:$0xff] %vm1215_vm5, %v4920_v29  ;;  %v5218_v29 = vld [vmem:[#allocation3 + $0x91] sm:$0xff] }
 0x883   : > { %5005 = vst.msk [vmem:[#allocation4 + $0xa0] sm:$0xff] %vm1215_vm5, %v4930_v12 }
 0x886   : > { %5524 = vrot.lane.b32.xlu1 %v8993_v31, %s6364_s5  ;;  %5138 = vrot.lane.b32.xlu0 %v8806_v6, %s6362_s29  ;;  %v5222_v31 = vld [vmem:[#allocation3 + $0xc1] sm:$0xff] }
 0x887   : > { %5332 = vrot.lane.b32.xlu2 %v8903_v40, %s6363_s30 }
 0x888   : > { %v4922_v7 = vpop.permute.xlu1 %4921  ;;  %v4926_v38 = vpop.permute.xlu0 %4925 }
 0x889   : > { %5001 = vst.msk [vmem:[#allocation4 + $0x80] sm:$0xff] %vm1215_vm5, %v4922_v7  ;;  %v4936_v1 = vpop.permute.xlu2 %4935 }
 0x88a   : > { %5003 = vst.msk [vmem:[#allocation4 + $0x90] sm:$0xff] %vm1215_vm5, %v4926_v38 }
 0x88b   : > { %5008 = vst.msk [vmem:[#allocation4 + $0xb8] sm:$0xff] %vm1215_vm5, %v4936_v1 }
 0x88e   : > { %5494 = vrot.lane.b32.xlu1 %v5416_v5, %s6364_s5  ;;  %5522 = vrot.lane.b32.xlu0 %v8982_v27, %s6364_s5  ;;  %v5217_v5 = vld [vmem:[#allocation3 + $0x81] sm:$0xff] }
 0x88f   : > { %5302 = vrot.lane.b32.xlu2 %v5224_v28, %s6363_s30  ;;  %v5409_v28 = vld [vmem:[#allocation3 + $0x82] sm:$0xff] }
 0x890   : > { %v4928_v6 = vpop.permute.xlu1 %4927  ;;  %v4932_v40 = vpop.permute.xlu0 %4931 }
 0x891   : > { %5004 = vst.msk [vmem:[#allocation4 + $0x98] sm:$0xff] %vm1215_vm5, %v4928_v6  ;;  %v4942_v63 = vpop.permute.xlu2 %4941  ;;  %v5232_v6 = vld [vmem:[#allocation3 + $0x139] sm:$0xff] }
 0x892   : > { %5006 = vst.msk [vmem:[#allocation4 + $0xa8] sm:$0xff] %vm1215_vm5, %v4932_v40 }
 0x893   : > { %5011 = vst.msk [vmem:[#allocation4 + $0xd0] sm:$0xff] %vm1215_vm5, %v4942_v63 }
 0x896   : > { %5300 = vrot.lane.b32.xlu1 %v5223_v35, %s6363_s30  ;;  %5492 = vrot.lane.b32.xlu0 %v5415_v46, %s6364_s5  ;;  %v5231_v46 = vld [vmem:[#allocation3 + $0x129] sm:$0xff] }
 0x897   : > { %5330 = vrot.lane.b32.xlu2 %v8888_v53, %s6363_s30 }
 0x898   : > { %v4934_v27 = vpop.permute.xlu1 %4933  ;;  %v4938_v17 = vpop.permute.xlu0 %4937 }
 0x899   : > { %5007 = vst.msk [vmem:[#allocation4 + $0xb0] sm:$0xff] %vm1215_vm5, %v4934_v27  ;;  %v4948_v61 = vpop.permute.xlu2 %4947  ;;  %v5216_v27 = vld [vmem:[#allocation3 + $0x79] sm:$0xff] }
 0x89a   : > { %5009 = vst.msk [vmem:[#allocation4 + $0xc0] sm:$0xff] %vm1215_vm5, %v4938_v17  ;;  %v5039_v17 = vld [vmem:[#allocation3 + $0x128] sm:$0xff] }
 0x89b   : > { %5014 = vst.msk [vmem:[#allocation4 + $0xe8] sm:$0xff] %vm1215_vm5, %v4948_v61 }
 0x89e   : > { %5328 = vrot.lane.b32.xlu1 %v5237_v62, %s6363_s30  ;;  %5298 = vrot.lane.b32.xlu0 %v5222_v31, %s6363_s30 }
 0x89f   : > { %5136 = vrot.lane.b32.xlu2 %v5045_v8, %s6362_s29 }
 0x8a0   : > { %v4940_v43 = vpop.permute.xlu1 %4939  ;;  %v4944_v53 = vpop.permute.xlu0 %4943 }
 0x8a1   : > { %5010 = vst.msk [vmem:[#allocation4 + $0xc8] sm:$0xff] %vm1215_vm5, %v4940_v43  ;;  %v5083_v13 = vpop.permute.xlu2 %5082  ;;  %v5038_v43 = vld [vmem:[#allocation3 + $0x120] sm:$0xff] }
 0x8a2   : > { %5012 = vst.msk [vmem:[#allocation4 + $0xd8] sm:$0xff] %vm1215_vm5, %v4944_v53  ;;  %v5230_v53 = vld [vmem:[#allocation3 + $0x121] sm:$0xff] }
 0x8a3   : > { %5178 = vst.msk [vmem:[#allocation4] sm:$0xff] %vm1409_vm6, %v5083_v13  ;;  %v5423_v13 = vld [vmem:[#allocation3 + $0x12a] sm:$0xff] }
 0x8a6   : > { %5134 = vrot.lane.b32.xlu1 %v8531_v47, %s6362_s29  ;;  %5326 = vrot.lane.b32.xlu0 %v5236_v24, %s6363_s30  ;;  %v5414_v47 = vld [vmem:[#allocation3 + $0xc2] sm:$0xff] }
 0x8a7   : > { %5520 = vrot.lane.b32.xlu2 %v5429_v0, %s6364_s5 }
 0x8a8   : > { %v4946_v23 = vpop.permute.xlu1 %4945  ;;  %v4950_v57 = vpop.permute.xlu0 %4949 }
 0x8a9   : > { %5013 = vst.msk [vmem:[#allocation4 + $0xe0] sm:$0xff] %vm1215_vm5, %v4946_v23  ;;  %v5089_v20 = vpop.permute.xlu2 %5088 }
 0x8aa   : > { %5015 = vst.msk [vmem:[#allocation4 + $0xf0] sm:$0xff] %vm1215_vm5, %v4950_v57 }
 0x8ab   : > { %5181 = vst.msk [vmem:[#allocation4 + $0x18] sm:$0xff] %vm1409_vm6, %v5089_v20  ;;  %v5422_v20 = vld [vmem:[#allocation3 + $0x122] sm:$0xff] }
 0x8ae   : > { %5518 = vrot.lane.b32.xlu1 %v5428_v32, %s6364_s5  ;;  %5132 = vrot.lane.b32.xlu0 %v5043_v18, %s6362_s29  ;;  %v5037_v32 = vld [vmem:[#allocation3 + $0x110] sm:$0xff]  ;;  %v5408_v18 = vld [vmem:[#allocation3 + $0x7a] sm:$0xff] }
 0x8af   : > { %5490 = vrot.lane.b32.xlu2 %v5414_v47, %s6364_s5 }
 0x8b0   : > { %v4952_v45 = vpop.permute.xlu1 %4951  ;;  %v5085_v44 = vpop.permute.xlu0 %5084 }
 0x8b1   : > { %5016 = vst.msk [vmem:[#allocation4 + $0xf8] sm:$0xff] %vm1215_vm5, %v4952_v45  ;;  %v5095_v19 = vpop.permute.xlu2 %5094 }
 0x8b2   : > { %5179 = vst.msk [vmem:[#allocation4 + $0x8] sm:$0xff] %vm1409_vm6, %v5085_v44 }
 0x8b3   : > { %5184 = vst.msk [vmem:[#allocation4 + $0x30] sm:$0xff] %vm1409_vm6, %v5095_v19 }
 0x8b6   : > { %5488 = vrot.lane.b32.xlu1 %v5413_v37, %s6364_s5  ;;  %5516 = vrot.lane.b32.xlu0 %v5427_v39, %s6364_s5  ;;  %v5407_v37 = vld [vmem:[#allocation3 + $0x6a] sm:$0xff]  ;;  %v5421_v39 = vld [vmem:[#allocation3 + $0x112] sm:$0xff] }
 0x8b7   : > { %5296 = vrot.lane.b32.xlu2 %v5221_v3, %s6363_s30  ;;  %v5215_v3 = vld [vmem:[#allocation3 + $0x69] sm:$0xff] }
 0x8b8   : > { %v5087_v33 = vpop.permute.xlu1 %5086  ;;  %v5091_v25 = vpop.permute.xlu0 %5090 }
 0x8b9   : > { %5180 = vst.msk [vmem:[#allocation4 + $0x10] sm:$0xff] %vm1409_vm6, %v5087_v33  ;;  %v5101_v10 = vpop.permute.xlu2 %5100 }
 0x8ba   : > { %5182 = vst.msk [vmem:[#allocation4 + $0x20] sm:$0xff] %vm1409_vm6, %v5091_v25 }
 0x8bb   : > { %5187 = vst.msk [vmem:[#allocation4 + $0x48] sm:$0xff] %vm1409_vm6, %v5101_v10 }
 0x8be   : > { %5294 = vrot.lane.b32.xlu1 %v5220_v60, %s6363_s30  ;;  %5486 = vrot.lane.b32.xlu0 %v5412_v36, %s6364_s5 }
 0x8bf   : > { %5324 = vrot.lane.b32.xlu2 %v5235_v11, %s6363_s30  ;;  %v5214_v11 = vld [vmem:[#allocation3 + $0x61] sm:$0xff] }
 0x8c0   : > { %v5093_v16 = vpop.permute.xlu1 %5092  ;;  %v5097_v56 = vpop.permute.xlu0 %5096 }
 0x8c1   : > { %5183 = vst.msk [vmem:[#allocation4 + $0x28] sm:$0xff] %vm1409_vm6, %v5093_v16  ;;  %v5107_v4 = vpop.permute.xlu2 %5106  ;;  %v5406_v16 = vld [vmem:[#allocation3 + $0x62] sm:$0xff] }
 0x8c2   : > { %5185 = vst.msk [vmem:[#allocation4 + $0x38] sm:$0xff] %vm1409_vm6, %v5097_v56  ;;  %v5229_v56 = vld [vmem:[#allocation3 + $0x111] sm:$0xff] }
 0x8c3   : > { %5190 = vst.msk [vmem:[#allocation4 + $0x60] sm:$0xff] %vm1409_vm6, %v5107_v4 }
 0x8c6   : > { %5322 = vrot.lane.b32.xlu1 %v5234_v30, %s6363_s30  ;;  %5292 = vrot.lane.b32.xlu0 %v5219_v42, %s6363_s30 }
 0x8c7   : > { %5130 = vrot.lane.b32.xlu2 %v5042_v52, %s6362_s29 }
 0x8c8   : > { %v5099_v58 = vpop.permute.xlu1 %5098  ;;  %v5103_v9 = vpop.permute.xlu0 %5102 }
 0x8c9   : > { %5186 = vst.msk [vmem:[#allocation4 + $0x40] sm:$0xff] %vm1409_vm6, %v5099_v58  ;;  %v5337_v41 = vpop.permute.xlu2 %5336  ;;  %v5228_v58 = vld [vmem:[#allocation3 + $0x109] sm:$0xff] }
 0x8ca   : > { %5188 = vst.msk [vmem:[#allocation4 + $0x50] sm:$0xff] %vm1409_vm6, %v5103_v9  ;;  %v5213_v9 = vld [vmem:[#allocation3 + $0x51] sm:$0xff] }
 0x8ce   : > { %5128 = vrot.lane.b32.xlu1 %v5041_v26, %s6362_s29  ;;  %5320 = vrot.lane.b32.xlu0 %v5233_v59, %s6363_s30 }
 0x8cf   : > { %5514 = vrot.lane.b32.xlu2 %v5426_v2, %s6364_s5 }
 0x8d0   : > { %v5105_v21 = vpop.permute.xlu1 %5104  ;;  %v5109_v14 = vpop.permute.xlu0 %5108 }
 0x8d1   : > { %5189 = vst.msk [vmem:[#allocation4 + $0x58] sm:$0xff] %vm1409_vm6, %v5105_v21  ;;  %v5335_v22 = vpop.permute.xlu2 %5334 }
 0x8d2   : > { %5191 = vst.msk [vmem:[#allocation4 + $0x68] sm:$0xff] %vm1409_vm6, %v5109_v14 }
 0x8d6   : > { %5512 = vrot.lane.b32.xlu1 %v5425_v55, %s6364_s5  ;;  %5126 = vrot.lane.b32.xlu0 %v5040_v50, %s6362_s29  ;;  %v5227_v55 = vld [vmem:[#allocation3 + $0xf9] sm:$0xff]  ;;  %v5420_v50 = vld [vmem:[#allocation3 + $0x10a] sm:$0xff] }
 0x8d7   : > { %5484 = vrot.lane.b32.xlu2 %v5411_v34, %s6364_s5 }
 0x8d8   : > { %v5145_v49 = vpop.permute.xlu1 %5144  ;;  %v5529_v15 = vpop.permute.xlu0 %5528 }
 0x8d9   : > { %5209 = vst.msk [vmem:[#allocation4 + $0xf8] sm:$0xff] %vm1409_vm6, %v5145_v49  ;;  %v5305_v48 = vpop.permute.xlu2 %5304 }
 0x8da   : > { %5401 = vst.msk [vmem:[#allocation4 + $0xf8] sm:$0xff] %vm1603_vm7, %v5337_v41  ;;  %v5036_v41 = vld [vmem:[#allocation3 + $0x108] sm:$0xff] }
 0x8db   : > { %5593 = vst.msk [vmem:[#allocation4 + $0xf8] sm:$0xff] %vm1796_vm8, %v5529_v15 }
 0x8de   : > { %5482 = vrot.lane.b32.xlu1 %v5410_v54, %s6364_s5  ;;  %5510 = vrot.lane.b32.xlu0 %v5424_v51, %s6364_s5  ;;  %v5034_v54 = vld [vmem:[#allocation3 + $0xf0] sm:$0xff] }
 0x8df   : > { %5290 = vrot.lane.b32.xlu2 %v5218_v29, %s6363_s30  ;;  %v5405_v51 = vld [vmem:[#allocation3 + $0x52] sm:$0xff] }
 0x8e0   : > { %v5143_v12 = vpop.permute.xlu1 %5142  ;;  %v5113_v7 = vpop.permute.xlu0 %5112 }
 0x8e1   : > { %5208 = vst.msk [vmem:[#allocation4 + $0xf0] sm:$0xff] %vm1409_vm6, %v5143_v12  ;;  %v5333_v38 = vpop.permute.xlu2 %5332 }
 0x8e2   : > { %5400 = vst.msk [vmem:[#allocation4 + $0xf0] sm:$0xff] %vm1603_vm7, %v5335_v22  ;;  %v5626_v1 = vld [vmem:[#allocation4 + $0xf8] sm:$0xff]  ;;  %v5035_v22 = vld [vmem:[#allocation3 + $0xf8] sm:$0xff] }
 0x8e3   : > { %5193 = vst.msk [vmem:[#allocation4 + $0x78] sm:$0xff] %vm1409_vm6, %v5113_v7  ;;  %6284 = vmatpush.xpose.msk.msra.mxu2 %vm5627_vm0, %v5626_v1  ;;  %v5404_v1 = vld [vmem:[#allocation3 + $0x4a] sm:$0xff] }
 0x8e4   : > { %5385 = vst.msk [vmem:[#allocation4 + $0x78] sm:$0xff] %vm1603_vm7, %v5305_v48  ;;  %v5419_v48 = vld [vmem:[#allocation3 + $0xfa] sm:$0xff] }
 0x8e6   : > { %5288 = vrot.lane.b32.xlu1 %v5217_v5, %s6363_s30  ;;  %5480 = vrot.lane.b32.xlu0 %v5409_v28, %s6364_s5  ;;  %v5418_v5 = vld [vmem:[#allocation3 + $0xf2] sm:$0xff]  ;;  %v5212_v28 = vld [vmem:[#allocation3 + $0x49] sm:$0xff] }
 0x8e7   : > { %5318 = vrot.lane.b32.xlu2 %v5232_v6, %s6363_s30 }
 0x8e8   : > { %v5527_v40 = vpop.permute.xlu1 %5526  ;;  %v5141_v63 = vpop.permute.xlu0 %5140 }
 0x8e9   : > { %5592 = vst.msk [vmem:[#allocation4 + $0xf0] sm:$0xff] %vm1796_vm8, %v5527_v40  ;;  %v5303_v35 = vpop.permute.xlu2 %5302 }
 0x8ea   : > { %5207 = vst.msk [vmem:[#allocation4 + $0xe8] sm:$0xff] %vm1409_vm6, %v5141_v63 }
 0x8eb   : > { %5399 = vst.msk [vmem:[#allocation4 + $0xe8] sm:$0xff] %vm1603_vm7, %v5333_v38 }
 0x8ee   : > { %5316 = vrot.lane.b32.xlu1 %v5231_v46, %s6363_s30  ;;  %5286 = vrot.lane.b32.xlu0 %v5216_v27, %s6363_s30  ;;  %v5211_v27 = vld [vmem:[#allocation3 + $0x39] sm:$0xff] }
 0x8ef   : > { %5124 = vrot.lane.b32.xlu2 %v5039_v17, %s6362_s29  ;;  %v5210_v17 = vld [vmem:[#allocation3 + $0x31] sm:$0xff] }
 0x8f0   : > { %v5497_v61 = vpop.permute.xlu1 %5496  ;;  %v5111_v62 = vpop.permute.xlu0 %5110  ;;  %v5625_v31 = vld [vmem:[#allocation4 + $0xf0] sm:$0xff] }
 0x8f1   : > { %5577 = vst.msk [vmem:[#allocation4 + $0x78] sm:$0xff] %vm1796_vm8, %v5497_v61  ;;  %v5331_v8 = vpop.permute.xlu2 %5330  ;;  %6285 = vmatpush.xpose.msk.msra.mxu2 %vm5627_vm0, %v5625_v31  ;;  %v5226_v61 = vld [vmem:[#allocation3 + $0xf1] sm:$0xff] }
 0x8f2   : > { %5192 = vst.msk [vmem:[#allocation4 + $0x70] sm:$0xff] %vm1409_vm6, %v5111_v62 }
 0x8f3   : > { %5384 = vst.msk [vmem:[#allocation4 + $0x70] sm:$0xff] %vm1603_vm7, %v5303_v35 }
 0x8f6   : > { %5122 = vrot.lane.b32.xlu1 %v5038_v43, %s6362_s29  ;;  %5314 = vrot.lane.b32.xlu0 %v5230_v53, %s6363_s30  ;;  %v5402_v53 = vld [vmem:[#allocation3 + $0x32] sm:$0xff] }
 0x8f7   : > { %5508 = vrot.lane.b32.xlu2 %v5423_v13, %s6364_s5  ;;  %v5403_v13 = vld [vmem:[#allocation3 + $0x3a] sm:$0xff] }
 0x8f8   : > { %v5525_v24 = vpop.permute.xlu1 %5524  ;;  %v5139_v0 = vpop.permute.xlu0 %5138  ;;  %v5610_v23 = vld [vmem:[#allocation4 + $0x78] sm:$0xff] }
 0x8f9   : > { %5591 = vst.msk [vmem:[#allocation4 + $0xe8] sm:$0xff] %vm1796_vm8, %v5525_v24  ;;  %v5137_v57 = vpop.permute.xlu2 %5136  ;;  %6267 = vmatpush.xpose.msk.msrb.mxu1 %vm5627_vm0, %v5610_v23 }
 0x8fa   : > { %5206 = vst.msk [vmem:[#allocation4 + $0xe0] sm:$0xff] %vm1409_vm6, %v5139_v0 }
 0x8fb   : > { %5398 = vst.msk [vmem:[#allocation4 + $0xe0] sm:$0xff] %vm1603_vm7, %v5331_v8 }
 0x8fc   : > { %5205 = vst.msk [vmem:[#allocation4 + $0xd8] sm:$0xff] %vm1409_vm6, %v5137_v57 }
 0x8fe   : > { %5506 = vrot.lane.b32.xlu1 %v5422_v20, %s6364_s5  ;;  %5120 = vrot.lane.b32.xlu0 %v5037_v32, %s6362_s29 }
 0x8ff   : > { %5478 = vrot.lane.b32.xlu2 %v5408_v18, %s6364_s5 }
 0x900   : > { %v5495_v47 = vpop.permute.xlu1 %5494  ;;  %v5523_v45 = vpop.permute.xlu0 %5522  ;;  %v5624_v44 = vld [vmem:[#allocation4 + $0xe8] sm:$0xff] }
 0x901   : > { %5576 = vst.msk [vmem:[#allocation4 + $0x70] sm:$0xff] %vm1796_vm8, %v5495_v47  ;;  %v5521_v19 = vpop.permute.xlu2 %5520  ;;  %6286 = vmatpush.xpose.msk.msra.mxu2 %vm5627_vm0, %v5624_v44 }
 0x902   : > { %5590 = vst.msk [vmem:[#allocation4 + $0xe0] sm:$0xff] %vm1796_vm8, %v5523_v45 }
 0x906   : > { %5476 = vrot.lane.b32.xlu1 %v5407_v37, %s6364_s5  ;;  %5504 = vrot.lane.b32.xlu0 %v5421_v39, %s6364_s5 }
 0x907   : > { %5284 = vrot.lane.b32.xlu2 %v5215_v3, %s6363_s30 }
 0x908   : > { %v5301_v33 = vpop.permute.xlu1 %5300  ;;  %v5493_v25 = vpop.permute.xlu0 %5492  ;;  %v5609_v10 = vld [vmem:[#allocation4 + $0x70] sm:$0xff] }
 0x909   : > { %5383 = vst.msk [vmem:[#allocation4 + $0x68] sm:$0xff] %vm1603_vm7, %v5301_v33  ;;  %v5491_v60 = vpop.permute.xlu2 %5490  ;;  %6268 = vmatpush.xpose.msk.msrb.mxu1 %vm5627_vm0, %v5609_v10  ;;  %v5623_v36 = vld [vmem:[#allocation4 + $0xe0] sm:$0xff] }
 0x90a   : > { %5575 = vst.msk [vmem:[#allocation4 + $0x68] sm:$0xff] %vm1796_vm8, %v5493_v25  ;;  %6287 = vmatpush.xpose.msk.msra.mxu2 %vm5627_vm0, %v5623_v36 }
 0x90e   : > { %5282 = vrot.lane.b32.xlu1 %v5214_v11, %s6363_s30  ;;  %5474 = vrot.lane.b32.xlu0 %v5406_v16, %s6364_s5 }
 0x90f   : > { %5312 = vrot.lane.b32.xlu2 %v5229_v56, %s6363_s30 }
 0x910   : > { %v5329_v4 = vpop.permute.xlu1 %5328  ;;  %v5299_v30 = vpop.permute.xlu0 %5298 }
 0x911   : > { %5397 = vst.msk [vmem:[#allocation4 + $0xd8] sm:$0xff] %vm1603_vm7, %v5329_v4  ;;  %v5297_v42 = vpop.permute.xlu2 %5296  ;;  %v5608_v52 = vld [vmem:[#allocation4 + $0x68] sm:$0xff] }
 0x912   : > { %5589 = vst.msk [vmem:[#allocation4 + $0xd8] sm:$0xff] %vm1796_vm8, %v5521_v19  ;;  %6269 = vmatpush.xpose.msk.msrb.mxu1 %vm5627_vm0, %v5608_v52 }
 0x913   : > { %5382 = vst.msk [vmem:[#allocation4 + $0x60] sm:$0xff] %vm1603_vm7, %v5299_v30 }
 0x914   : > { %5574 = vst.msk [vmem:[#allocation4 + $0x60] sm:$0xff] %vm1796_vm8, %v5491_v60 }
 0x915   : > { %5381 = vst.msk [vmem:[#allocation4 + $0x58] sm:$0xff] %vm1603_vm7, %v5297_v42 }
 0x916   : > { %5310 = vrot.lane.b32.xlu1 %v5228_v58, %s6363_s30  ;;  %5280 = vrot.lane.b32.xlu0 %v5213_v9, %s6363_s30 }
 0x917   : > { %5118 = vrot.lane.b32.xlu2 %v5036_v41, %s6362_s29 }
 0x918   : > { %v5135_v26 = vpop.permute.xlu1 %5134  ;;  %v5327_v59 = vpop.permute.xlu0 %5326 }
 0x919   : > { %5204 = vst.msk [vmem:[#allocation4 + $0xd0] sm:$0xff] %vm1409_vm6, %v5135_v26  ;;  %v5325_v2 = vpop.permute.xlu2 %5324  ;;  %v5622_v21 = vld [vmem:[#allocation4 + $0xd8] sm:$0xff] }
 0x91a   : > { %5396 = vst.msk [vmem:[#allocation4 + $0xd0] sm:$0xff] %vm1603_vm7, %v5327_v59  ;;  %6288 = vmatpush.xpose.msk.msra.mxu2 %vm5627_vm0, %v5622_v21 }
 0x91b   : > { %v5607_v14 = vld [vmem:[#allocation4 + $0x60] sm:$0xff] }
 0x91c   : > { %6270 = vmatpush.xpose.msk.msrb.mxu1 %vm5627_vm0, %v5607_v14 }
 0x91e   : > { %5116 = vrot.lane.b32.xlu1 %v5035_v22, %s6362_s29  ;;  %5308 = vrot.lane.b32.xlu0 %v5227_v55, %s6363_s30 }
 0x91f   : > { %5502 = vrot.lane.b32.xlu2 %v5420_v50, %s6364_s5 }
 0x920   : > { %v5519_v34 = vpop.permute.xlu1 %5518  ;;  %v5133_v49 = vpop.permute.xlu0 %5132 }
 0x921   : > { %5588 = vst.msk [vmem:[#allocation4 + $0xd0] sm:$0xff] %vm1796_vm8, %v5519_v34  ;;  %v5131_v15 = vpop.permute.xlu2 %5130 }
 0x922   : > { %5203 = vst.msk [vmem:[#allocation4 + $0xc8] sm:$0xff] %vm1409_vm6, %v5133_v49 }
 0x923   : > { %5395 = vst.msk [vmem:[#allocation4 + $0xc8] sm:$0xff] %vm1603_vm7, %v5325_v2 }
 0x924   : > { %5202 = vst.msk [vmem:[#allocation4 + $0xc0] sm:$0xff] %vm1409_vm6, %v5131_v15 }
 0x926   : > { %5500 = vrot.lane.b32.xlu1 %v5419_v48, %s6364_s5  ;;  %5114 = vrot.lane.b32.xlu0 %v5034_v54, %s6362_s29 }
 0x927   : > { %5472 = vrot.lane.b32.xlu2 %v5405_v51, %s6364_s5 }
 0x928   : > { %v5489_v29 = vpop.permute.xlu1 %5488  ;;  %v5517_v12 = vpop.permute.xlu0 %5516  ;;  %v5621_v7 = vld [vmem:[#allocation4 + $0xd0] sm:$0xff] }
 0x929   : > { %5573 = vst.msk [vmem:[#allocation4 + $0x58] sm:$0xff] %vm1796_vm8, %v5489_v29  ;;  %v5515_v38 = vpop.permute.xlu2 %5514  ;;  %6289 = vmatpush.xpose.msk.msra.mxu2 %vm5627_vm0, %v5621_v7 }
 0x92a   : > { %5587 = vst.msk [vmem:[#allocation4 + $0xc8] sm:$0xff] %vm1796_vm8, %v5517_v12 }
 0x92e   : > { %5470 = vrot.lane.b32.xlu1 %v5404_v1, %s6364_s5  ;;  %5498 = vrot.lane.b32.xlu0 %v5418_v5, %s6364_s5 }
 0x92f   : > { %5278 = vrot.lane.b32.xlu2 %v5212_v28, %s6363_s30 }
 0x930   : > { %v5295_v6 = vpop.permute.xlu1 %5294  ;;  %v5487_v40 = vpop.permute.xlu0 %5486  ;;  %v5606_v63 = vld [vmem:[#allocation4 + $0x58] sm:$0xff] }
 0x931   : > { %5380 = vst.msk [vmem:[#allocation4 + $0x50] sm:$0xff] %vm1603_vm7, %v5295_v6  ;;  %v5485_v35 = vpop.permute.xlu2 %5484  ;;  %6271 = vmatpush.xpose.msk.msrb.mxu1 %vm5627_vm0, %v5606_v63  ;;  %v5620_v46 = vld [vmem:[#allocation4 + $0xc8] sm:$0xff] }
 0x932   : > { %5572 = vst.msk [vmem:[#allocation4 + $0x50] sm:$0xff] %vm1796_vm8, %v5487_v40  ;;  %6290 = vmatpush.xpose.msk.msra.mxu2 %vm5627_vm0, %v5620_v46 }
 0x936   : > { %5276 = vrot.lane.b32.xlu1 %v5211_v27, %s6363_s30  ;;  %5274 = vrot.lane.b32.xlu0 %v5210_v17, %s6363_s30 }
 0x937   : > { %5306 = vrot.lane.b32.xlu2 %v5226_v61, %s6363_s30  ;;  %v5594_v61 = vld [vmem:[%s9291_s3] sm:$0xff] }
 0x938   : > { %v5323_v62 = vpop.permute.xlu1 %5322  ;;  %v5293_v31 = vpop.permute.xlu0 %5292 }
 0x939   : > { %5394 = vst.msk [vmem:[#allocation4 + $0xc0] sm:$0xff] %vm1603_vm7, %v5323_v62  ;;  %v5291_v8 = vpop.permute.xlu2 %5290  ;;  %v5605_v43 = vld [vmem:[#allocation4 + $0x50] sm:$0xff] }
 0x93a   : > { %5586 = vst.msk [vmem:[#allocation4 + $0xc0] sm:$0xff] %vm1796_vm8, %v5515_v38  ;;  %6272 = vmatpush.xpose.msk.msrb.mxu1 %vm5627_vm0, %v5605_v43 }
 0x93b   : > { %5379 = vst.msk [vmem:[#allocation4 + $0x48] sm:$0xff] %vm1603_vm7, %v5293_v31 }
 0x93c   : > { %5571 = vst.msk [vmem:[#allocation4 + $0x48] sm:$0xff] %vm1796_vm8, %v5485_v35 }
 0x93d   : > { %5378 = vst.msk [vmem:[#allocation4 + $0x40] sm:$0xff] %vm1603_vm7, %v5291_v8 }
 0x93e   : > { %5466 = vrot.lane.b32.xlu1 %v5402_v53, %s6364_s5 }
 0x93f   : > { %5468 = vrot.lane.b32.xlu2 %v5403_v13, %s6364_s5 }
 0x940   : > { %v5129_v24 = vpop.permute.xlu1 %5128  ;;  %v5321_v0 = vpop.permute.xlu0 %5320 }
 0x941   : > { %5201 = vst.msk [vmem:[#allocation4 + $0xb8] sm:$0xff] %vm1409_vm6, %v5129_v24  ;;  %v5319_v23 = vpop.permute.xlu2 %5318  ;;  %v5619_v57 = vld [vmem:[#allocation4 + $0xc0] sm:$0xff] }
 0x942   : > { %5393 = vst.msk [vmem:[#allocation4 + $0xb8] sm:$0xff] %vm1603_vm7, %v5321_v0  ;;  %6291 = vmatpush.xpose.msk.msra.mxu2 %vm5627_vm0, %v5619_v57 }
 0x943   : > { %v5604_v20 = vld [vmem:[#allocation4 + $0x48] sm:$0xff] }
 0x944   : > { %6273 = vmatpush.xpose.msk.msrb.mxu1 %vm5627_vm0, %v5604_v20 }
 0x948   : > { %v5513_v32 = vpop.permute.xlu1 %5512  ;;  %v5127_v18 = vpop.permute.xlu0 %5126 }
 0x949   : > { %5585 = vst.msk [vmem:[#allocation4 + $0xb8] sm:$0xff] %vm1796_vm8, %v5513_v32  ;;  %v5125_v47 = vpop.permute.xlu2 %5124 }
 0x94a   : > { %5200 = vst.msk [vmem:[#allocation4 + $0xb0] sm:$0xff] %vm1409_vm6, %v5127_v18 }
 0x94b   : > { %5392 = vst.msk [vmem:[#allocation4 + $0xb0] sm:$0xff] %vm1603_vm7, %v5319_v23 }
 0x94c   : > { %5199 = vst.msk [vmem:[#allocation4 + $0xa8] sm:$0xff] %vm1409_vm6, %v5125_v47 }
 0x950   : > { %v5483_v45 = vpop.permute.xlu1 %5482  ;;  %v5511_v44 = vpop.permute.xlu0 %5510  ;;  %v5618_v19 = vld [vmem:[#allocation4 + $0xb8] sm:$0xff] }
 0x951   : > { %5570 = vst.msk [vmem:[#allocation4 + $0x40] sm:$0xff] %vm1796_vm8, %v5483_v45  ;;  %v5509_v37 = vpop.permute.xlu2 %5508  ;;  %6292 = vmatpush.xpose.msk.msra.mxu2 %vm5627_vm0, %v5618_v19 }
 0x952   : > { %5584 = vst.msk [vmem:[#allocation4 + $0xb0] sm:$0xff] %vm1796_vm8, %v5511_v44 }
 0x958   : > { %v5289_v39 = vpop.permute.xlu1 %5288  ;;  %v5481_v3 = vpop.permute.xlu0 %5480  ;;  %v5603_v33 = vld [vmem:[#allocation4 + $0x40] sm:$0xff] }
 0x959   : > { %5377 = vst.msk [vmem:[#allocation4 + $0x38] sm:$0xff] %vm1603_vm7, %v5289_v39  ;;  %v5479_v25 = vpop.permute.xlu2 %5478  ;;  %6274 = vmatpush.xpose.msk.msrb.mxu1 %vm5627_vm0, %v5603_v33  ;;  %v5617_v10 = vld [vmem:[#allocation4 + $0xb0] sm:$0xff] }
 0x95a   : > { %5569 = vst.msk [vmem:[#allocation4 + $0x38] sm:$0xff] %vm1796_vm8, %v5481_v3  ;;  %6293 = vmatpush.xpose.msk.msra.mxu2 %vm5627_vm0, %v5617_v10 }
 0x960   : > { %v5317_v60 = vpop.permute.xlu1 %5316  ;;  %v5287_v36 = vpop.permute.xlu0 %5286 }
 0x961   : > { %5391 = vst.msk [vmem:[#allocation4 + $0xa8] sm:$0xff] %vm1603_vm7, %v5317_v60  ;;  %v5285_v11 = vpop.permute.xlu2 %5284  ;;  %v5602_v16 = vld [vmem:[#allocation4 + $0x38] sm:$0xff] }
 0x962   : > { %5583 = vst.msk [vmem:[#allocation4 + $0xa8] sm:$0xff] %vm1796_vm8, %v5509_v37  ;;  %6275 = vmatpush.xpose.msk.msrb.mxu1 %vm5627_vm0, %v5602_v16 }
 0x963   : > { %5376 = vst.msk [vmem:[#allocation4 + $0x30] sm:$0xff] %vm1603_vm7, %v5287_v36 }
 0x964   : > { %5568 = vst.msk [vmem:[#allocation4 + $0x30] sm:$0xff] %vm1796_vm8, %v5479_v25 }
 0x965   : > { %5375 = vst.msk [vmem:[#allocation4 + $0x28] sm:$0xff] %vm1603_vm7, %v5285_v11 }
 0x968   : > { %v5123_v56 = vpop.permute.xlu1 %5122  ;;  %v5315_v4 = vpop.permute.xlu0 %5314 }
 0x969   : > { %5198 = vst.msk [vmem:[#allocation4 + $0xa0] sm:$0xff] %vm1409_vm6, %v5123_v56  ;;  %v5313_v30 = vpop.permute.xlu2 %5312  ;;  %v5616_v42 = vld [vmem:[#allocation4 + $0xa8] sm:$0xff] }
 0x96a   : > { %5390 = vst.msk [vmem:[#allocation4 + $0xa0] sm:$0xff] %vm1603_vm7, %v5315_v4  ;;  %6294 = vmatpush.xpose.msk.msra.mxu2 %vm5627_vm0, %v5616_v42 }
 0x96b   : > { %v5601_v52 = vld [vmem:[#allocation4 + $0x30] sm:$0xff] }
 0x96c   : > { %6276 = vmatpush.xpose.msk.msrb.mxu1 %vm5627_vm0, %v5601_v52 }
 0x970   : > { %v5507_v58 = vpop.permute.xlu1 %5506  ;;  %v5121_v9 = vpop.permute.xlu0 %5120 }
 0x971   : > { %5582 = vst.msk [vmem:[#allocation4 + $0xa0] sm:$0xff] %vm1796_vm8, %v5507_v58  ;;  %v5119_v41 = vpop.permute.xlu2 %5118 }
 0x972   : > { %5197 = vst.msk [vmem:[#allocation4 + $0x98] sm:$0xff] %vm1409_vm6, %v5121_v9 }
 0x973   : > { %5389 = vst.msk [vmem:[#allocation4 + $0x98] sm:$0xff] %vm1603_vm7, %v5313_v30 }
 0x974   : > { %5196 = vst.msk [vmem:[#allocation4 + $0x90] sm:$0xff] %vm1409_vm6, %v5119_v41 }
 0x978   : > { %v5477_v26 = vpop.permute.xlu1 %5476  ;;  %v5505_v59 = vpop.permute.xlu0 %5504  ;;  %v5615_v2 = vld [vmem:[#allocation4 + $0xa0] sm:$0xff] }
 0x979   : > { %5567 = vst.msk [vmem:[#allocation4 + $0x28] sm:$0xff] %vm1796_vm8, %v5477_v26  ;;  %v5503_v21 = vpop.permute.xlu2 %5502  ;;  %6295 = vmatpush.xpose.msk.msra.mxu2 %vm5627_vm0, %v5615_v2 }
 0x97a   : > { %5581 = vst.msk [vmem:[#allocation4 + $0x98] sm:$0xff] %vm1796_vm8, %v5505_v59 }
 0x980   : > { %v5283_v14 = vpop.permute.xlu1 %5282  ;;  %v5475_v22 = vpop.permute.xlu0 %5474  ;;  %v5600_v55 = vld [vmem:[#allocation4 + $0x28] sm:$0xff] }
 0x981   : > { %5374 = vst.msk [vmem:[#allocation4 + $0x20] sm:$0xff] %vm1603_vm7, %v5283_v14  ;;  %v5473_v50 = vpop.permute.xlu2 %5472  ;;  %6277 = vmatpush.xpose.msk.msrb.mxu1 %vm5627_vm0, %v5600_v55  ;;  %v5614_v34 = vld [vmem:[#allocation4 + $0x98] sm:$0xff] }
 0x982   : > { %5566 = vst.msk [vmem:[#allocation4 + $0x20] sm:$0xff] %vm1796_vm8, %v5475_v22  ;;  %6296 = vmatpush.xpose.msk.msra.mxu2 %vm5627_vm0, %v5614_v34 }
 0x988   : > { %v5311_v49 = vpop.permute.xlu1 %5310  ;;  %v5281_v15 = vpop.permute.xlu0 %5280 }
 0x989   : > { %5388 = vst.msk [vmem:[#allocation4 + $0x90] sm:$0xff] %vm1603_vm7, %v5311_v49  ;;  %v5599_v48 = vld [vmem:[#allocation4 + $0x20] sm:$0xff]  ;;  %v5279_v54 = vpop.permute.xlu2 %5278 }
 0x98a   : > { %5580 = vst.msk [vmem:[#allocation4 + $0x90] sm:$0xff] %vm1796_vm8, %v5503_v21  ;;  %6278 = vmatpush.xpose.msk.msrb.mxu1 %vm5627_vm0, %v5599_v48 }
 0x98b   : > { %5373 = vst.msk [vmem:[#allocation4 + $0x18] sm:$0xff] %vm1603_vm7, %v5281_v15 }
 0x98c   : > { %5565 = vst.msk [vmem:[#allocation4 + $0x18] sm:$0xff] %vm1796_vm8, %v5473_v50 }
 0x98d   : > { %5372 = vst.msk [vmem:[#allocation4 + $0x10] sm:$0xff] %vm1603_vm7, %v5279_v54 }
 0x990   : > { %v5117_v51 = vpop.permute.xlu1 %5116  ;;  %v5309_v29 = vpop.permute.xlu0 %5308 }
 0x991   : > { %5195 = vst.msk [vmem:[#allocation4 + $0x88] sm:$0xff] %vm1409_vm6, %v5117_v51  ;;  %v5613_v12 = vld [vmem:[#allocation4 + $0x90] sm:$0xff]  ;;  %v5307_v5 = vpop.permute.xlu2 %5306 }
 0x992   : > { %5387 = vst.msk [vmem:[#allocation4 + $0x88] sm:$0xff] %vm1603_vm7, %v5309_v29  ;;  %6297 = vmatpush.xpose.msk.msra.mxu2 %vm5627_vm0, %v5613_v12 }
 0x993   : > { %v5598_v7 = vld [vmem:[#allocation4 + $0x18] sm:$0xff] }
 0x994   : > { %6279 = vmatpush.xpose.msk.msrb.mxu1 %vm5627_vm0, %v5598_v7 }
 0x998   : > { %v5501_v38 = vpop.permute.xlu1 %5500  ;;  %v5115_v1 = vpop.permute.xlu0 %5114 }
 0x999   : > { %5579 = vst.msk [vmem:[#allocation4 + $0x88] sm:$0xff] %vm1796_vm8, %v5501_v38  ;;  %v5469_v27 = vpop.permute.xlu2 %5468 }
 0x99a   : > { %5194 = vst.msk [vmem:[#allocation4 + $0x80] sm:$0xff] %vm1409_vm6, %v5115_v1 }
 0x99b   : > { %5386 = vst.msk [vmem:[#allocation4 + $0x80] sm:$0xff] %vm1603_vm7, %v5307_v5 }
 0x9a0   : > { %v5471_v28 = vpop.permute.xlu1 %5470  ;;  %v5499_v6 = vpop.permute.xlu0 %5498  ;;  %v5612_v40 = vld [vmem:[#allocation4 + $0x88] sm:$0xff] }
 0x9a1   : > { %5564 = vst.msk [vmem:[#allocation4 + $0x10] sm:$0xff] %vm1796_vm8, %v5471_v28  ;;  %6298 = vmatpush.xpose.msk.msra.mxu2 %vm5627_vm0, %v5612_v40 }
 0x9a2   : > { %5578 = vst.msk [vmem:[#allocation4 + $0x80] sm:$0xff] %vm1796_vm8, %v5499_v6 }
 0x9a8   : > { %v5277_v63 = vpop.permute.xlu1 %5276  ;;  %v5275_v35 = vpop.permute.xlu0 %5274  ;;  %v5597_v46 = vld [vmem:[#allocation4 + $0x10] sm:$0xff] }
 0x9a9   : > { %5371 = vst.msk [vmem:[#allocation4 + $0x8] sm:$0xff] %vm1603_vm7, %v5277_v63  ;;  %6280 = vmatpush.xpose.msk.msrb.mxu1 %vm5627_vm0, %v5597_v46  ;;  %v5611_v17 = vld [vmem:[#allocation4 + $0x80] sm:$0xff] }
 0x9aa   : > { %5563 = vst.msk [vmem:[#allocation4 + $0x8] sm:$0xff] %vm1796_vm8, %v5469_v27  ;;  %6299 = vmatpush.xpose.msk.msra.mxu2 %vm5627_vm0, %v5611_v17 }
 0x9ab   : > { %5370 = vst.msk [vmem:[#allocation4] sm:$0xff] %vm1603_vm7, %v5275_v35 }
 0x9ad   : > { %6300 = vmatmul.msk.f32.vlgmr.msra.gmra.mxu2 %vm5627_vm0, %v5594_v61 }
 0x9b0   : > { %v5467_v62 = vpop.permute.xlu1 %5466 }
 0x9b1   : > { %5562 = vst.msk [vmem:[#allocation4] sm:$0xff] %vm1796_vm8, %v5467_v62  ;;  %v5596_v31 = vld [vmem:[#allocation4 + $0x8] sm:$0xff] }
 0x9b2   : > { %6281 = vmatpush.xpose.msk.msrb.mxu1 %vm5627_vm0, %v5596_v31 }
 0x9b8   : > { %v5595_v8 = vld [vmem:[#allocation4] sm:$0xff] }
 0x9b9   : > { %6282 = vmatpush.xpose.msk.msrb.mxu1 %vm5627_vm0, %v5595_v8 }
 0x9bc   : > { %6283 = vmatmul.msk.f32.vlgmr.msrb.gmra.mxu1 %vm5627_vm0, %v5594_v61 }
 0xa30   : > { %v5764_v43 = vpop.f32.mrf.mxu2 }
 0xa31   : > { %vm5768_vm1 = vcmp.ge.f32.partialorder %v5764_v43, 0.0  ;;  %v5770_v53 = vmul.f32 0.01, %v5764_v43 }
 0xa33   : > { %v5772_v13 = vsel %vm5768_vm1, %v5764_v43, %v5770_v53 }
 0xa34   : > { %5774 = vst [vmem:[%s217_s28 + $0x8] sm:$0xff] %v5772_v13 }
 0xa39   : > { %v5744_v24 = vpop.f32.mrf.mxu1 }
 0xa3a   : > { %vm5767_vm2 = vcmp.ge.f32.partialorder %v5744_v24, 0.0  ;;  %v5769_v0 = vmul.f32 0.01, %v5744_v24 }
 0xa3c   : > { %v5771_v23 = vsel %vm5767_vm2, %v5744_v24, %v5769_v0 }
 0xa3d   : > { %5773 = vst [vmem:[%s217_s28] sm:$0xff] %v5771_v23 }
 0xa3e PF: > { %s14_s15 = sadd.s32 1, %s6355_s15  }
 0xa3f   : > { %p11_p4 = scmp.ge.s32.totalorder %s14_s15, 4  }
 0xa41   :  { %13 = sbr.rel (!%p11_p4) target bundleno = 1 (0x1), region = 76 }

</bundles_post_ra>
